<compile_context>
chip_gen: v6e
topology: v6e:2x2x1
jax: 0.10.0
libtpu: 0.0.40
codegen_flags: <defaults>
</compile_context>

<pallas_src>
import functools
import math

import jax
import jax.numpy as jnp
from jax.experimental import pallas as pl
from jax.experimental.pallas import tpu as pltpu

_VMEM_LIMIT = 48 * 1024 * 1024   # headroom under v7x's 64 MiB physical VMEM
_LN_EPS = 1e-12


def _pick_tile(dim, prefs):
    """Largest preferred tile that divides `dim`; else the full extent (always legal)."""
    for t in prefs:
        if dim % t == 0:
            return t
    return dim


# ----------------------------------------------------------------------------
# Pallas kernels
# ----------------------------------------------------------------------------
def _linear_kernel(x_ref, w_ref, b_ref, o_ref, *, act):
    """Tiled bf16 matmul, f32 accumulation directly in the output block.
    Grid = (M_tiles, N_tiles, K_tiles); epilogue adds bias + optional activation."""
    k = pl.program_id(2)

    @pl.when(k == 0)
    def _():
        o_ref[...] = jnp.zeros_like(o_ref)

    o_ref[...] += jnp.dot(x_ref[...], w_ref[...], preferred_element_type=jnp.float32)

    @pl.when(k == pl.num_programs(2) - 1)
    def _():
        y = o_ref[...] + b_ref[...]
        if act == "tanh":
            y = jnp.tanh(y)
        elif act == "gelu":
            # TODO(synk): HF BERT uses exact erf-GELU; tanh-approx keeps the
            # activation on the EUP inside the matmul epilogue (tiny numeric delta).
            c = math.sqrt(2.0 / math.pi)
            y = 0.5 * y * (1.0 + jnp.tanh(c * (y + 0.044715 * y * y * y)))
        o_ref[...] = y


def pallas_linear(x, w, b, act="none"):
    """y = act(x @ w + b); x:(M,K) w:(K,N) b:(N,) -> (M,N) float32. MXU in bf16."""
    M, K = x.shape
    N = w.shape[1]
    tm = _pick_tile(M, (256, 128, 64, 32, 16, 8))
    tn = _pick_tile(N, (512, 384, 256, 128))
    tk = _pick_tile(K, (768, 512, 256, 128))
    kernel = functools.partial(_linear_kernel, act=act)
    return pl.pallas_call(
        kernel,
        out_shape=jax.ShapeDtypeStruct((M, N), jnp.float32),
        grid_spec=pltpu.PrefetchScalarGridSpec(
            num_scalar_prefetch=0,
            grid=(M // tm, N // tn, K // tk),
            in_specs=[
                pl.BlockSpec((tm, tk), lambda i, j, k: (i, k)),
                pl.BlockSpec((tk, tn), lambda i, j, k: (k, j)),
                pl.BlockSpec((1, tn), lambda i, j, k: (0, j)),
            ],
            out_specs=pl.BlockSpec((tm, tn), lambda i, j, k: (i, j)),
        ),
        compiler_params=pltpu.CompilerParams(
            dimension_semantics=("parallel", "parallel", "arbitrary"),
            vmem_limit_bytes=_VMEM_LIMIT,
        ),
    )(x.astype(jnp.bfloat16), w.astype(jnp.bfloat16), b.reshape(1, N).astype(jnp.float32))


def _linear_residual_ln_kernel(x_ref, w_ref, b_ref, r_ref, g_ref, bb_ref, o_ref, *, eps):
    """LayerNorm(x @ w + b + residual) fused into the matmul epilogue.
    Full hidden row (N) resident; grid = (M_tiles, K_tiles)."""
    k = pl.program_id(1)

    @pl.when(k == 0)
    def _():
        o_ref[...] = jnp.zeros_like(o_ref)

    o_ref[...] += jnp.dot(x_ref[...], w_ref[...], preferred_element_type=jnp.float32)

    @pl.when(k == pl.num_programs(1) - 1)
    def _():
        y = o_ref[...] + b_ref[...] + r_ref[...]
        mu = jnp.mean(y, axis=-1, keepdims=True)
        var = jnp.mean(jnp.square(y - mu), axis=-1, keepdims=True)
        inv = jax.lax.rsqrt(var + eps)
        o_ref[...] = (y - mu) * inv * g_ref[...] + bb_ref[...]


def pallas_linear_residual_ln(x, w, b, residual, gamma, beta, eps=_LN_EPS):
    """LayerNorm(x @ w + b + residual); bias/residual/LN computed in-kernel (f32)."""
    M, K = x.shape
    N = w.shape[1]
    tm = _pick_tile(M, (256, 128, 64, 32, 16, 8))
    tk = _pick_tile(K, (768, 512, 256, 128))
    kernel = functools.partial(_linear_residual_ln_kernel, eps=eps)
    return pl.pallas_call(
        kernel,
        out_shape=jax.ShapeDtypeStruct((M, N), jnp.float32),
        grid_spec=pltpu.PrefetchScalarGridSpec(
            num_scalar_prefetch=0,
            grid=(M // tm, K // tk),
            in_specs=[
                pl.BlockSpec((tm, tk), lambda i, k: (i, k)),
                pl.BlockSpec((tk, N), lambda i, k: (k, 0)),
                pl.BlockSpec((1, N), lambda i, k: (0, 0)),
                pl.BlockSpec((tm, N), lambda i, k: (i, 0)),
                pl.BlockSpec((1, N), lambda i, k: (0, 0)),
                pl.BlockSpec((1, N), lambda i, k: (0, 0)),
            ],
            out_specs=pl.BlockSpec((tm, N), lambda i, k: (i, 0)),
        ),
        compiler_params=pltpu.CompilerParams(
            dimension_semantics=("parallel", "arbitrary"),
            vmem_limit_bytes=_VMEM_LIMIT,
        ),
    )(
        x.astype(jnp.bfloat16),
        w.astype(jnp.bfloat16),
        b.reshape(1, N).astype(jnp.float32),
        residual.astype(jnp.float32),
        gamma.reshape(1, N).astype(jnp.float32),
        beta.reshape(1, N).astype(jnp.float32),
    )


def _layernorm_kernel(x_ref, g_ref, b_ref, o_ref, *, eps):
    x = x_ref[...]
    mu = jnp.mean(x, axis=-1, keepdims=True)
    var = jnp.mean(jnp.square(x - mu), axis=-1, keepdims=True)
    inv = jax.lax.rsqrt(var + eps)
    o_ref[...] = (x - mu) * inv * g_ref[...] + b_ref[...]


def pallas_layernorm(x, gamma, beta, eps=_LN_EPS):
    """Row-tiled LayerNorm over the hidden axis (no residual; used for embeddings)."""
    M, H = x.shape
    tm = _pick_tile(M, (512, 256, 128, 64, 32, 16, 8))
    kernel = functools.partial(_layernorm_kernel, eps=eps)
    return pl.pallas_call(
        kernel,
        out_shape=jax.ShapeDtypeStruct((M, H), jnp.float32),
        grid_spec=pltpu.PrefetchScalarGridSpec(
            num_scalar_prefetch=0,
            grid=(M // tm,),
            in_specs=[
                pl.BlockSpec((tm, H), lambda i: (i, 0)),
                pl.BlockSpec((1, H), lambda i: (0, 0)),
                pl.BlockSpec((1, H), lambda i: (0, 0)),
            ],
            out_specs=pl.BlockSpec((tm, H), lambda i: (i, 0)),
        ),
        compiler_params=pltpu.CompilerParams(
            dimension_semantics=("parallel",),
            vmem_limit_bytes=_VMEM_LIMIT,
        ),
    )(x.astype(jnp.float32), gamma.reshape(1, H), beta.reshape(1, H))


def _attention_kernel(qkv_ref, m_ref, o_ref, *, num_heads, head_dim, scale):
    """One batch per grid step: loop over heads inside the kernel, softmax in f32,
    MXU matmuls in bf16, single lane-dense (S, H) output store."""
    qkv = qkv_ref[0]          # (S, 3H) f32
    mask = m_ref[0]           # (1, S) additive mask, broadcast over query rows
    H = num_heads * head_dim
    ctxs = []
    for h in range(num_heads):
        q = qkv[:, h * head_dim:(h + 1) * head_dim].astype(jnp.bfloat16)
        k = qkv[:, H + h * head_dim:H + (h + 1) * head_dim].astype(jnp.bfloat16)
        v = qkv[:, 2 * H + h * head_dim:2 * H + (h + 1) * head_dim].astype(jnp.bfloat16)
        s = jax.lax.dot_general(
            q, k, (((1,), (1,)), ((), ())), preferred_element_type=jnp.float32
        )                      # (S, S)
        s = s * scale + mask
        s = s - jnp.max(s, axis=-1, keepdims=True)
        p = jnp.exp(s)
        p = p * pl.reciprocal(jnp.sum(p, axis=-1, keepdims=True), approx=False)
        ctxs.append(
            jnp.dot(p.astype(jnp.bfloat16), v, preferred_element_type=jnp.float32)
        )
    o_ref[0] = jnp.concatenate(ctxs, axis=-1)   # (S, H) lane-dense


def pallas_attention(qkv, mask_add, num_heads, head_dim, scale):
    """qkv: (B, S, 3H) fused projections; mask_add: (B, 1, S). Returns (B, S, H) f32."""
    B, S, threeH = qkv.shape
    H = num_heads * head_dim
    kernel = functools.partial(
        _attention_kernel, num_heads=num_heads, head_dim=head_dim, scale=scale
    )
    return pl.pallas_call(
        kernel,
        out_shape=jax.ShapeDtypeStruct((B, S, H), jnp.float32),
        grid_spec=pltpu.PrefetchScalarGridSpec(
            num_scalar_prefetch=0,
            grid=(B,),
            in_specs=[
                pl.BlockSpec((1, S, threeH), lambda b: (b, 0, 0)),
                pl.BlockSpec((1, 1, S), lambda b: (b, 0, 0)),
            ],
            out_specs=pl.BlockSpec((1, S, H), lambda b: (b, 0, 0)),
        ),
        compiler_params=pltpu.CompilerParams(
            dimension_semantics=("parallel",),
            vmem_limit_bytes=_VMEM_LIMIT,
        ),
    )(qkv, mask_add)


# ----------------------------------------------------------------------------
# Parameters (deterministic synthetic init)
# ----------------------------------------------------------------------------
def init_params(key, cfg):
    H, I = cfg["hidden"], cfg["intermediate"]
    keys = iter(jax.random.split(key, 128))

    def nrm(shape):
        return jax.random.normal(next(keys), shape, jnp.float32) * 0.02

    def dense(fi, fo):
        return {"w": nrm((fi, fo)), "b": jnp.zeros((fo,), jnp.float32)}

    params = {
        "word_emb": nrm((cfg["vocab"], H)),
        "pos_emb": nrm((cfg["max_pos"], H)),
        "type_emb": nrm((cfg["type_vocab"], H)),
        "emb_ln_g": jnp.ones((H,), jnp.float32),
        "emb_ln_b": jnp.zeros((H,), jnp.float32),
        "layers": [],
        "pooler": dense(H, H),
        "fc": dense(H, 128),
        "out": dense(128, 1),
    }
    for _ in range(cfg["layers"]):
        params["layers"].append(
            {
                "qkv": dense(H, 3 * H),     # fused Wq|Wk|Wv
                "ao": dense(H, H),
                "ln1_g": jnp.ones((H,), jnp.float32),
                "ln1_b": jnp.zeros((H,), jnp.float32),
                "inter": dense(H, I),
                "ffo": dense(I, H),
                "ln2_g": jnp.ones((H,), jnp.float32),
                "ln2_b": jnp.zeros((H,), jnp.float32),
            }
        )
    return params


# ----------------------------------------------------------------------------
# Forward pass (BertModel -> pooled output -> dropout -> fc -> out)
# ----------------------------------------------------------------------------
def bert_forward(params, ids, mask, token_type_ids, *, cfg):
    B, S = ids.shape
    H = cfg["hidden"]
    nh = cfg["heads"]
    dh = H // nh
    scale = 1.0 / math.sqrt(dh)

    # --- embeddings (gathers are glue; LayerNorm runs in a Pallas kernel) ---
    emb = (
        jnp.take(params["word_emb"], ids, axis=0)
        + params["pos_emb"][:S][None, :, :]
        + jnp.take(params["type_emb"], token_type_ids, axis=0)
    )
    x = pallas_layernorm(emb.reshape(B * S, H), params["emb_ln_g"], params["emb_ln_b"])
    # embedding dropout (p=0.1): identity at inference

    # additive attention mask: (1 - mask) * -10000, broadcast over heads & queries
    mask_add = ((1.0 - mask.astype(jnp.float32)) * -10000.0).reshape(B, 1, S)

    for layer in params["layers"]:
        # fused QKV projection: one (M,H)x(H,3H) matmul, activations streamed once
        qkv = pallas_linear(x, layer["qkv"]["w"], layer["qkv"]["b"])      # (B*S, 3H)
        ctx = pallas_attention(qkv.reshape(B, S, 3 * H), mask_add, nh, dh, scale)
        ctx = ctx.reshape(B * S, H)
        # attention-output dropout: identity at inference
        # attention output projection with fused bias + residual + LayerNorm
        x = pallas_linear_residual_ln(
            ctx, layer["ao"]["w"], layer["ao"]["b"], x, layer["ln1_g"], layer["ln1_b"]
        )

        # feed-forward: GELU fused into the matmul epilogue
        inter = pallas_linear(x, layer["inter"]["w"], layer["inter"]["b"], act="gelu")
        # ffn-output dropout: identity at inference
        x = pallas_linear_residual_ln(
            inter, layer["ffo"]["w"], layer["ffo"]["b"], x, layer["ln2_g"], layer["ln2_b"]
        )

    # --- pooler: dense + tanh on the [CLS] token ---
    cls = x.reshape(B, S, H)[:, 0, :]                                      # (B, H)
    pooled = pallas_linear(cls, params["pooler"]["w"], params["pooler"]["b"], act="tanh")

    # --- classification head ---
    # nn.Dropout(0.3): identity at inference
    h = pallas_linear(pooled, params["fc"]["w"], params["fc"]["b"])        # (B, 128)
    # final (128 -> 1) projection stays in plain JAX: a 1-wide lane output would
    # waste 127/128 MXU lanes and a kernel launch for negligible FLOPs.
    out = h @ params["out"]["w"] + params["out"]["b"]                      # (B, 1)
    return out


# ----------------------------------------------------------------------------
# Demo
# ----------------------------------------------------------------------------
if __name__ == "__main__":
    cfg = dict(
        vocab=512,          # small synthetic vocab
        hidden=768,         # must stay 768 to match fc(768, 128)
        heads=12,
        layers=2,           # reduced from 12 for a small demo
        intermediate=3072,
        max_pos=64,
        type_vocab=2,
    )
    B, S = 2, 8

    key = jax.random.PRNGKey(0)
    k_ids, k_params = jax.random.split(key)

    ids = jax.random.randint(k_ids, (B, S), 0, cfg["vocab"], dtype=jnp.int32)
    mask = jnp.ones((B, S), jnp.int32).at[1, 6:].set(0)   # second example padded
    token_type_ids = jnp.concatenate(
        [jnp.zeros((B, S // 2), jnp.int32), jnp.ones((B, S // 2), jnp.int32)], axis=1
    )

    params = init_params(k_params, cfg)

    fwd = jax.jit(functools.partial(bert_forward, cfg=cfg))
    out = fwd(params, ids, mask, token_type_ids)
    jax.block_until_ready(out)

    assert out.shape == (B, 1) and out.dtype == jnp.float32
    print("KERNEL_OK")
</pallas_src>

<mosaic_0001>
module attributes {stable_mosaic.version = 11 : i64} {
  func.func @_layernorm_kernel(%arg0: i32, %arg1: memref<16x768xf32, #tpu.memory_space<vmem>>, %arg2: memref<1x768xf32, #tpu.memory_space<vmem>>, %arg3: memref<1x768xf32, #tpu.memory_space<vmem>>, %arg4: memref<16x768xf32, #tpu.memory_space<vmem>>) attributes {dimension_semantics = [#tpu.dimension_semantics<parallel>], iteration_bounds = array<i64: 1>, scalar_prefetch = 0 : i64, scratch_operands = 0 : i64, tpu.core_type = #tpu.core_type<tc>, window_params = [{transform_indices = @transform_0, window_bounds = array<i64: 16, 768>}, {pipeline_mode = #tpu.pipeline_mode<synchronous>, transform_indices = @transform_1, window_bounds = array<i64: 1, 768>}, {pipeline_mode = #tpu.pipeline_mode<synchronous>, transform_indices = @transform_2, window_bounds = array<i64: 1, 768>}, {transform_indices = @transform_3, window_bounds = array<i64: 16, 768>}]} {
    %c0 = arith.constant 0 : index
    %c0_0 = arith.constant 0 : index
    %0 = vector.load %arg1[%c0, %c0_0] : memref<16x768xf32, #tpu.memory_space<vmem>>, vector<16x768xf32>
    %cst = arith.constant dense<0.000000e+00> : vector<16xf32>
    %1 = vector.multi_reduction <add>, %0, %cst [1] : vector<16x768xf32> to vector<16xf32>
    %2 = vector.shape_cast %1 : vector<16xf32> to vector<16x1xf32>
    %cst_1 = arith.constant 7.680000e+02 : f32
    %3 = vector.broadcast %cst_1 : f32 to vector<16x1xf32>
    %4 = arith.divf %2, %3 : vector<16x1xf32>
    %5 = vector.broadcast %4 : vector<16x1xf32> to vector<16x768xf32>
    %6 = arith.subf %0, %5 : vector<16x768xf32>
    %7 = arith.mulf %6, %6 : vector<16x768xf32>
    %cst_2 = arith.constant dense<0.000000e+00> : vector<16xf32>
    %8 = vector.multi_reduction <add>, %7, %cst_2 [1] : vector<16x768xf32> to vector<16xf32>
    %9 = vector.shape_cast %8 : vector<16xf32> to vector<16x1xf32>
    %cst_3 = arith.constant 7.680000e+02 : f32
    %10 = vector.broadcast %cst_3 : f32 to vector<16x1xf32>
    %11 = arith.divf %9, %10 : vector<16x1xf32>
    %cst_4 = arith.constant 9.99999996E-13 : f32
    %12 = vector.broadcast %cst_4 : f32 to vector<16x1xf32>
    %13 = arith.addf %11, %12 : vector<16x1xf32>
    %14 = math.rsqrt %13 : vector<16x1xf32>
    %15 = vector.broadcast %4 : vector<16x1xf32> to vector<16x768xf32>
    %16 = arith.subf %0, %15 : vector<16x768xf32>
    %17 = vector.broadcast %14 : vector<16x1xf32> to vector<16x768xf32>
    %18 = arith.mulf %16, %17 : vector<16x768xf32>
    %c0_5 = arith.constant 0 : index
    %c0_6 = arith.constant 0 : index
    %19 = vector.load %arg2[%c0_5, %c0_6] : memref<1x768xf32, #tpu.memory_space<vmem>>, vector<1x768xf32>
    %20 = vector.broadcast %19 : vector<1x768xf32> to vector<16x768xf32>
    %21 = arith.mulf %18, %20 : vector<16x768xf32>
    %c0_7 = arith.constant 0 : index
    %c0_8 = arith.constant 0 : index
    %22 = vector.load %arg3[%c0_7, %c0_8] : memref<1x768xf32, #tpu.memory_space<vmem>>, vector<1x768xf32>
    %23 = vector.broadcast %22 : vector<1x768xf32> to vector<16x768xf32>
    %24 = arith.addf %21, %23 : vector<16x768xf32>
    %c0_9 = arith.constant 0 : index
    %c0_10 = arith.constant 0 : index
    %25 = vector.load %arg4[%c0_9, %c0_10] : memref<16x768xf32, #tpu.memory_space<vmem>>, vector<16x768xf32>
    tpu.vector_store %arg4[%c0_9, %c0_10], %24 {strides = array<i32>} : memref<16x768xf32, #tpu.memory_space<vmem>>, vector<16x768xf32>,
    return
  }
  func.func @transform_0(%arg0: i32) -> (i32, i32) {
    %c0_i32 = arith.constant 0 : i32
    %c0_i32_0 = arith.constant 0 : i32
    return %arg0, %c0_i32 : i32, i32
  }
  func.func @transform_1(%arg0: i32) -> (i32, i32) {
    %c0_i32 = arith.constant 0 : i32
    %c0_i32_0 = arith.constant 0 : i32
    %c0_i32_1 = arith.constant 0 : i32
    return %c0_i32, %c0_i32_0 : i32, i32
  }
  func.func @transform_2(%arg0: i32) -> (i32, i32) {
    %c0_i32 = arith.constant 0 : i32
    %c0_i32_0 = arith.constant 0 : i32
    %c0_i32_1 = arith.constant 0 : i32
    return %c0_i32, %c0_i32_0 : i32, i32
  }
  func.func @transform_3(%arg0: i32) -> (i32, i32) {
    %c0_i32 = arith.constant 0 : i32
    %c0_i32_0 = arith.constant 0 : i32
    return %arg0, %c0_i32 : i32, i32
  }
}

module attributes {stable_mosaic.version = 11 : i64} {
  func.func @_linear_kernel(%arg0: i32, %arg1: i32, %arg2: i32, %arg3: memref<16x768xbf16, #tpu.memory_space<vmem>>, %arg4: memref<768x384xbf16, #tpu.memory_space<vmem>>, %arg5: memref<1x384xf32, #tpu.memory_space<vmem>>, %arg6: memref<16x384xf32, #tpu.memory_space<vmem>>) attributes {dimension_semantics = [#tpu.dimension_semantics<parallel>, #tpu.dimension_semantics<parallel>, #tpu.dimension_semantics<arbitrary>], iteration_bounds = array<i64: 1, 6, 1>, scalar_prefetch = 0 : i64, scratch_operands = 0 : i64, tpu.core_type = #tpu.core_type<tc>, window_params = [{transform_indices = @transform_0, window_bounds = array<i64: 16, 768>}, {transform_indices = @transform_1, window_bounds = array<i64: 768, 384>}, {transform_indices = @transform_2, window_bounds = array<i64: 1, 384>}, {transform_indices = @transform_3, window_bounds = array<i64: 16, 384>}]} {
    %c0_i32 = arith.constant 0 : i32
    %0 = arith.cmpi eq, %arg2, %c0_i32 : i32
    %1 = arith.extui %0 : i1 to i32
    %c0_i32_0 = arith.constant 0 : i32
    %2 = arith.cmpi ne, %1, %c0_i32_0 : i32
    scf.if %2 {
      %cst_10 = arith.constant 0.000000e+00 : f32
      %12 = vector.broadcast %cst_10 : f32 to vector<16x384xf32>
      %c0_11 = arith.constant 0 : index
      %c0_12 = arith.constant 0 : index
      %13 = vector.load %arg6[%c0_11, %c0_12] : memref<16x384xf32, #tpu.memory_space<vmem>>, vector<16x384xf32>
      tpu.vector_store %arg6[%c0_11, %c0_12], %12 {strides = array<i32>} : memref<16x384xf32, #tpu.memory_space<vmem>>, vector<16x384xf32>,
    } else {
    }
    %c0 = arith.constant 0 : index
    %c0_1 = arith.constant 0 : index
    %3 = vector.load %arg6[%c0, %c0_1] : memref<16x384xf32, #tpu.memory_space<vmem>>, vector<16x384xf32>
    %c0_2 = arith.constant 0 : index
    %c0_3 = arith.constant 0 : index
    %4 = vector.load %arg3[%c0_2, %c0_3] : memref<16x768xbf16, #tpu.memory_space<vmem>>, vector<16x768xbf16>
    %c0_4 = arith.constant 0 : index
    %c0_5 = arith.constant 0 : index
    %5 = vector.load %arg4[%c0_4, %c0_5] : memref<768x384xbf16, #tpu.memory_space<vmem>>, vector<768x384xbf16>
    %cst = arith.constant dense<0.000000e+00> : vector<16x384xf32>
    %6 = tpu.matmul %4, %5, %cst {dimension_numbers = #tpu.dot_dimension_numbers<[1], [0], [0], [1], [0, 0, 1, 1], [], []>} : vector<16x768xbf16>, vector<768x384xbf16>, vector<16x384xf32> -> vector<16x384xf32>
    %7 = arith.addf %3, %6 : vector<16x384xf32>
    %c0_6 = arith.constant 0 : index
    %c0_7 = arith.constant 0 : index
    %8 = vector.load %arg6[%c0_6, %c0_7] : memref<16x384xf32, #tpu.memory_space<vmem>>, vector<16x384xf32>
    tpu.vector_store %arg6[%c0_6, %c0_7], %7 {strides = array<i32>} : memref<16x384xf32, #tpu.memory_space<vmem>>, vector<16x384xf32>,
    %c0_i32_8 = arith.constant 0 : i32
    %9 = arith.cmpi eq, %arg2, %c0_i32_8 : i32
    %10 = arith.extui %9 : i1 to i32
    %c0_i32_9 = arith.constant 0 : i32
    %11 = arith.cmpi ne, %10, %c0_i32_9 : i32
    scf.if %11 {
      %c0_10 = arith.constant 0 : index
      %c0_11 = arith.constant 0 : index
      %12 = vector.load %arg6[%c0_10, %c0_11] : memref<16x384xf32, #tpu.memory_space<vmem>>, vector<16x384xf32>
      %c0_12 = arith.constant 0 : index
      %c0_13 = arith.constant 0 : index
      %13 = vector.load %arg5[%c0_12, %c0_13] : memref<1x384xf32, #tpu.memory_space<vmem>>, vector<1x384xf32>
      %14 = vector.broadcast %13 : vector<1x384xf32> to vector<16x384xf32>
      %15 = arith.addf %12, %14 : vector<16x384xf32>
      %c0_14 = arith.constant 0 : index
      %c0_15 = arith.constant 0 : index
      %16 = vector.load %arg6[%c0_14, %c0_15] : memref<16x384xf32, #tpu.memory_space<vmem>>, vector<16x384xf32>
      tpu.vector_store %arg6[%c0_14, %c0_15], %15 {strides = array<i32>} : memref<16x384xf32, #tpu.memory_space<vmem>>, vector<16x384xf32>,
    } else {
    }
    return
  }
  func.func @transform_0(%arg0: i32, %arg1: i32, %arg2: i32) -> (i32, i32) {
    %c0_i32 = arith.constant 0 : i32
    return %arg0, %arg2 : i32, i32
  }
  func.func @transform_1(%arg0: i32, %arg1: i32, %arg2: i32) -> (i32, i32) {
    %c0_i32 = arith.constant 0 : i32
    return %arg2, %arg1 : i32, i32
  }
  func.func @transform_2(%arg0: i32, %arg1: i32, %arg2: i32) -> (i32, i32) {
    %c0_i32 = arith.constant 0 : i32
    %c0_i32_0 = arith.constant 0 : i32
    return %c0_i32, %arg1 : i32, i32
  }
  func.func @transform_3(%arg0: i32, %arg1: i32, %arg2: i32) -> (i32, i32) {
    %c0_i32 = arith.constant 0 : i32
    return %arg0, %arg1 : i32, i32
  }
}

module attributes {stable_mosaic.version = 11 : i64} {
  func.func @_attention_kernel(%arg0: i32, %arg1: memref<1x8x2304xf32, #tpu.memory_space<vmem>>, %arg2: memref<1x1x8xf32, #tpu.memory_space<vmem>>, %arg3: memref<1x8x768xf32, #tpu.memory_space<vmem>>) attributes {dimension_semantics = [#tpu.dimension_semantics<parallel>], iteration_bounds = array<i64: 2>, scalar_prefetch = 0 : i64, scratch_operands = 0 : i64, tpu.core_type = #tpu.core_type<tc>, window_params = [{transform_indices = @transform_0, window_bounds = array<i64: 1, 8, 2304>}, {transform_indices = @transform_1, window_bounds = array<i64: 1, 1, 8>}, {transform_indices = @transform_2, window_bounds = array<i64: 1, 8, 768>}]} {
    %c0 = arith.constant 0 : index
    %c0_0 = arith.constant 0 : index
    %c0_1 = arith.constant 0 : index
    %0 = vector.load %arg1[%c0, %c0_0, %c0_1] : memref<1x8x2304xf32, #tpu.memory_space<vmem>>, vector<1x8x2304xf32>
    %1 = vector.shape_cast %0 : vector<1x8x2304xf32> to vector<8x2304xf32>
    %c0_2 = arith.constant 0 : index
    %c0_3 = arith.constant 0 : index
    %c0_4 = arith.constant 0 : index
    %2 = vector.load %arg2[%c0_2, %c0_3, %c0_4] : memref<1x1x8xf32, #tpu.memory_space<vmem>>, vector<1x1x8xf32>
    %3 = vector.shape_cast %2 : vector<1x1x8xf32> to vector<1x8xf32>
    %4 = vector.extract_strided_slice %1 {offsets = [0, 0], sizes = [8, 64], strides = [1, 1]} : vector<8x2304xf32> to vector<8x64xf32>
    %5 = arith.truncf %4 : vector<8x64xf32> to vector<8x64xbf16>
    %6 = vector.extract_strided_slice %1 {offsets = [0, 768], sizes = [8, 64], strides = [1, 1]} : vector<8x2304xf32> to vector<8x64xf32>
    %7 = arith.truncf %6 : vector<8x64xf32> to vector<8x64xbf16>
    %8 = vector.extract_strided_slice %1 {offsets = [0, 1536], sizes = [8, 64], strides = [1, 1]} : vector<8x2304xf32> to vector<8x64xf32>
    %9 = arith.truncf %8 : vector<8x64xf32> to vector<8x64xbf16>
    %cst = arith.constant dense<0.000000e+00> : vector<8x8xf32>
    %10 = tpu.matmul %5, %7, %cst {dimension_numbers = #tpu.dot_dimension_numbers<[1], [1], [0], [0], [0, 0, 1, 0], [], []>} : vector<8x64xbf16>, vector<8x64xbf16>, vector<8x8xf32> -> vector<8x8xf32>
    %cst_5 = arith.constant 1.250000e-01 : f32
    %11 = vector.broadcast %cst_5 : f32 to vector<8x8xf32>
    %12 = arith.mulf %10, %11 : vector<8x8xf32>
    %13 = vector.broadcast %3 : vector<1x8xf32> to vector<8x8xf32>
    %14 = arith.addf %12, %13 : vector<8x8xf32>
    %cst_6 = arith.constant dense<0xFF800000> : vector<8xf32>
    %15 = vector.multi_reduction <maximumf>, %14, %cst_6 [1] : vector<8x8xf32> to vector<8xf32>
    %16 = vector.shape_cast %15 : vector<8xf32> to vector<8x1xf32>
    %17 = vector.broadcast %16 : vector<8x1xf32> to vector<8x8xf32>
    %18 = arith.subf %14, %17 : vector<8x8xf32>
    %19 = math.exp %18 : vector<8x8xf32>
    %cst_7 = arith.constant dense<0.000000e+00> : vector<8xf32>
    %20 = vector.multi_reduction <add>, %19, %cst_7 [1] : vector<8x8xf32> to vector<8xf32>
    %21 = vector.shape_cast %20 : vector<8xf32> to vector<8x1xf32>
    %22 = tpu.reciprocal %21 : vector<8x1xf32> -> vector<8x1xf32>
    %23 = vector.broadcast %22 : vector<8x1xf32> to vector<8x8xf32>
    %24 = arith.mulf %19, %23 : vector<8x8xf32>
    %25 = arith.truncf %24 : vector<8x8xf32> to vector<8x8xbf16>
    %cst_8 = arith.constant dense<0.000000e+00> : vector<8x64xf32>
    %26 = tpu.matmul %25, %9, %cst_8 {dimension_numbers = #tpu.dot_dimension_numbers<[1], [0], [0], [1], [0, 0, 1, 1], [], []>} : vector<8x8xbf16>, vector<8x64xbf16>, vector<8x64xf32> -> vector<8x64xf32>
    %27 = vector.extract_strided_slice %1 {offsets = [0, 64], sizes = [8, 64], strides = [1, 1]} : vector<8x2304xf32> to vector<8x64xf32>
    %28 = arith.truncf %27 : vector<8x64xf32> to vector<8x64xbf16>
    %29 = vector.extract_strided_slice %1 {offsets = [0, 832], sizes = [8, 64], strides = [1, 1]} : vector<8x2304xf32> to vector<8x64xf32>
    %30 = arith.truncf %29 : vector<8x64xf32> to vector<8x64xbf16>
    %31 = vector.extract_strided_slice %1 {offsets = [0, 1600], sizes = [8, 64], strides = [1, 1]} : vector<8x2304xf32> to vector<8x64xf32>
    %32 = arith.truncf %31 : vector<8x64xf32> to vector<8x64xbf16>
    %cst_9 = arith.constant dense<0.000000e+00> : vector<8x8xf32>
    %33 = tpu.matmul %28, %30, %cst_9 {dimension_numbers = #tpu.dot_dimension_numbers<[1], [1], [0], [0], [0, 0, 1, 0], [], []>} : vector<8x64xbf16>, vector<8x64xbf16>, vector<8x8xf32> -> vector<8x8xf32>
    %cst_10 = arith.constant 1.250000e-01 : f32
    %34 = vector.broadcast %cst_10 : f32 to vector<8x8xf32>
    %35 = arith.mulf %33, %34 : vector<8x8xf32>
    %36 = vector.broadcast %3 : vector<1x8xf32> to vector<8x8xf32>
    %37 = arith.addf %35, %36 : vector<8x8xf32>
    %cst_11 = arith.constant dense<0xFF800000> : vector<8xf32>
    %38 = vector.multi_reduction <maximumf>, %37, %cst_11 [1] : vector<8x8xf32> to vector<8xf32>
    %39 = vector.shape_cast %38 : vector<8xf32> to vector<8x1xf32>
    %40 = vector.broadcast %39 : vector<8x1xf32> to vector<8x8xf32>
    %41 = arith.subf %37, %40 : vector<8x8xf32>
    %42 = math.exp %41 : vector<8x8xf32>
    %cst_12 = arith.constant dense<0.000000e+00> : vector<8xf32>
    %43 = vector.multi_reduction <add>, %42, %cst_12 [1] : vector<8x8xf32> to vector<8xf32>
    %44 = vector.shape_cast %43 : vector<8xf32> to vector<8x1xf32>
    %45 = tpu.reciprocal %44 : vector<8x1xf32> -> vector<8x1xf32>
    %46 = vector.broadcast %45 : vector<8x1xf32> to vector<8x8xf32>
    %47 = arith.mulf %42, %46 : vector<8x8xf32>
    %48 = arith.truncf %47 : vector<8x8xf32> to vector<8x8xbf16>
    %cst_13 = arith.constant dense<0.000000e+00> : vector<8x64xf32>
    %49 = tpu.matmul %48, %32, %cst_13 {dimension_numbers = #tpu.dot_dimension_numbers<[1], [0], [0], [1], [0, 0, 1, 1], [], []>} : vector<8x8xbf16>, vector<8x64xbf16>, vector<8x64xf32> -> vector<8x64xf32>
    %50 = vector.extract_strided_slice %1 {offsets = [0, 128], sizes = [8, 64], strides = [1, 1]} : vector<8x2304xf32> to vector<8x64xf32>
    %51 = arith.truncf %50 : vector<8x64xf32> to vector<8x64xbf16>
    %52 = vector.extract_strided_slice %1 {offsets = [0, 896], sizes = [8, 64], strides = [1, 1]} : vector<8x2304xf32> to vector<8x64xf32>
    %53 = arith.truncf %52 : vector<8x64xf32> to vector<8x64xbf16>
    %54 = vector.extract_strided_slice %1 {offsets = [0, 1664], sizes = [8, 64], strides = [1, 1]} : vector<8x2304xf32> to vector<8x64xf32>
    %55 = arith.truncf %54 : vector<8x64xf32> to vector<8x64xbf16>
    %cst_14 = arith.constant dense<0.000000e+00> : vector<8x8xf32>
    %56 = tpu.matmul %51, %53, %cst_14 {dimension_numbers = #tpu.dot_dimension_numbers<[1], [1], [0], [0], [0, 0, 1, 0], [], []>} : vector<8x64xbf16>, vector<8x64xbf16>, vector<8x8xf32> -> vector<8x8xf32>
    %cst_15 = arith.constant 1.250000e-01 : f32
    %57 = vector.broadcast %cst_15 : f32 to vector<8x8xf32>
    %58 = arith.mulf %56, %57 : vector<8x8xf32>
    %59 = vector.broadcast %3 : vector<1x8xf32> to vector<8x8xf32>
    %60 = arith.addf %58, %59 : vector<8x8xf32>
    %cst_16 = arith.constant dense<0xFF800000> : vector<8xf32>
    %61 = vector.multi_reduction <maximumf>, %60, %cst_16 [1] : vector<8x8xf32> to vector<8xf32>
    %62 = vector.shape_cast %61 : vector<8xf32> to vector<8x1xf32>
    %63 = vector.broadcast %62 : vector<8x1xf32> to vector<8x8xf32>
    %64 = arith.subf %60, %63 : vector<8x8xf32>
    %65 = math.exp %64 : vector<8x8xf32>
    %cst_17 = arith.constant dense<0.000000e+00> : vector<8xf32>
    %66 = vector.multi_reduction <add>, %65, %cst_17 [1] : vector<8x8xf32> to vector<8xf32>
    %67 = vector.shape_cast %66 : vector<8xf32> to vector<8x1xf32>
    %68 = tpu.reciprocal %67 : vector<8x1xf32> -> vector<8x1xf32>
    %69 = vector.broadcast %68 : vector<8x1xf32> to vector<8x8xf32>
    %70 = arith.mulf %65, %69 : vector<8x8xf32>
    %71 = arith.truncf %70 : vector<8x8xf32> to vector<8x8xbf16>
    %cst_18 = arith.constant dense<0.000000e+00> : vector<8x64xf32>
    %72 = tpu.matmul %71, %55, %cst_18 {dimension_numbers = #tpu.dot_dimension_numbers<[1], [0], [0], [1], [0, 0, 1, 1], [], []>} : vector<8x8xbf16>, vector<8x64xbf16>, vector<8x64xf32> -> vector<8x64xf32>
    %73 = vector.extract_strided_slice %1 {offsets = [0, 192], sizes = [8, 64], strides = [1, 1]} : vector<8x2304xf32> to vector<8x64xf32>
    %74 = arith.truncf %73 : vector<8x64xf32> to vector<8x64xbf16>
    %75 = vector.extract_strided_slice %1 {offsets = [0, 960], sizes = [8, 64], strides = [1, 1]} : vector<8x2304xf32> to vector<8x64xf32>
    %76 = arith.truncf %75 : vector<8x64xf32> to vector<8x64xbf16>
    %77 = vector.extract_strided_slice %1 {offsets = [0, 1728], sizes = [8, 64], strides = [1, 1]} : vector<8x2304xf32> to vector<8x64xf32>
    %78 = arith.truncf %77 : vector<8x64xf32> to vector<8x64xbf16>
    %cst_19 = arith.constant dense<0.000000e+00> : vector<8x8xf32>
    %79 = tpu.matmul %74, %76, %cst_19 {dimension_numbers = #tpu.dot_dimension_numbers<[1], [1], [0], [0], [0, 0, 1, 0], [], []>} : vector<8x64xbf16>, vector<8x64xbf16>, vector<8x8xf32> -> vector<8x8xf32>
    %cst_20 = arith.constant 1.250000e-01 : f32
    %80 = vector.broadcast %cst_20 : f32 to vector<8x8xf32>
    %81 = arith.mulf %79, %80 : vector<8x8xf32>
    %82 = vector.broadcast %3 : vector<1x8xf32> to vector<8x8xf32>
    %83 = arith.addf %81, %82 : vector<8x8xf32>
    %cst_21 = arith.constant dense<0xFF800000> : vector<8xf32>
    %84 = vector.multi_reduction <maximumf>, %83, %cst_21 [1] : vector<8x8xf32> to vector<8xf32>
    %85 = vector.shape_cast %84 : vector<8xf32> to vector<8x1xf32>
    %86 = vector.broadcast %85 : vector<8x1xf32> to vector<8x8xf32>
    %87 = arith.subf %83, %86 : vector<8x8xf32>
    %88 = math.exp %87 : vector<8x8xf32>
    %cst_22 = arith.constant dense<0.000000e+00> : vector<8xf32>
    %89 = vector.multi_reduction <add>, %88, %cst_22 [1] : vector<8x8xf32> to vector<8xf32>
    %90 = vector.shape_cast %89 : vector<8xf32> to vector<8x1xf32>
    %91 = tpu.reciprocal %90 : vector<8x1xf32> -> vector<8x1xf32>
    %92 = vector.broadcast %91 : vector<8x1xf32> to vector<8x8xf32>
    %93 = arith.mulf %88, %92 : vector<8x8xf32>
    %94 = arith.truncf %93 : vector<8x8xf32> to vector<8x8xbf16>
    %cst_23 = arith.constant dense<0.000000e+00> : vector<8x64xf32>
    %95 = tpu.matmul %94, %78, %cst_23 {dimension_numbers = #tpu.dot_dimension_numbers<[1], [0], [0], [1], [0, 0, 1, 1], [], []>} : vector<8x8xbf16>, vector<8x64xbf16>, vector<8x64xf32> -> vector<8x64xf32>
    %96 = vector.extract_strided_slice %1 {offsets = [0, 256], sizes = [8, 64], strides = [1, 1]} : vector<8x2304xf32> to vector<8x64xf32>
    %97 = arith.truncf %96 : vector<8x64xf32> to vector<8x64xbf16>
    %98 = vector.extract_strided_slice %1 {offsets = [0, 1024], sizes = [8, 64], strides = [1, 1]} : vector<8x2304xf32> to vector<8x64xf32>
    %99 = arith.truncf %98 : vector<8x64xf32> to vector<8x64xbf16>
    %100 = vector.extract_strided_slice %1 {offsets = [0, 1792], sizes = [8, 64], strides = [1, 1]} : vector<8x2304xf32> to vector<8x64xf32>
    %101 = arith.truncf %100 : vector<8x64xf32> to vector<8x64xbf16>
    %cst_24 = arith.constant dense<0.000000e+00> : vector<8x8xf32>
    %102 = tpu.matmul %97, %99, %cst_24 {dimension_numbers = #tpu.dot_dimension_numbers<[1], [1], [0], [0], [0, 0, 1, 0], [], []>} : vector<8x64xbf16>, vector<8x64xbf16>, vector<8x8xf32> -> vector<8x8xf32>
    %cst_25 = arith.constant 1.250000e-01 : f32
    %103 = vector.broadcast %cst_25 : f32 to vector<8x8xf32>
    %104 = arith.mulf %102, %103 : vector<8x8xf32>
    %105 = vector.broadcast %3 : vector<1x8xf32> to vector<8x8xf32>
    %106 = arith.addf %104, %105 : vector<8x8xf32>
    %cst_26 = arith.constant dense<0xFF800000> : vector<8xf32>
    %107 = vector.multi_reduction <maximumf>, %106, %cst_26 [1] : vector<8x8xf32> to vector<8xf32>
    %108 = vector.shape_cast %107 : vector<8xf32> to vector<8x1xf32>
    %109 = vector.broadcast %108 : vector<8x1xf32> to vector<8x8xf32>
    %110 = arith.subf %106, %109 : vector<8x8xf32>
    %111 = math.exp %110 : vector<8x8xf32>
    %cst_27 = arith.constant dense<0.000000e+00> : vector<8xf32>
    %112 = vector.multi_reduction <add>, %111, %cst_27 [1] : vector<8x8xf32> to vector<8xf32>
    %113 = vector.shape_cast %112 : vector<8xf32> to vector<8x1xf32>
    %114 = tpu.reciprocal %113 : vector<8x1xf32> -> vector<8x1xf32>
    %115 = vector.broadcast %114 : vector<8x1xf32> to vector<8x8xf32>
    %116 = arith.mulf %111, %115 : vector<8x8xf32>
    %117 = arith.truncf %116 : vector<8x8xf32> to vector<8x8xbf16>
    %cst_28 = arith.constant dense<0.000000e+00> : vector<8x64xf32>
    %118 = tpu.matmul %117, %101, %cst_28 {dimension_numbers = #tpu.dot_dimension_numbers<[1], [0], [0], [1], [0, 0, 1, 1], [], []>} : vector<8x8xbf16>, vector<8x64xbf16>, vector<8x64xf32> -> vector<8x64xf32>
    %119 = vector.extract_strided_slice %1 {offsets = [0, 320], sizes = [8, 64], strides = [1, 1]} : vector<8x2304xf32> to vector<8x64xf32>
    %120 = arith.truncf %119 : vector<8x64xf32> to vector<8x64xbf16>
    %121 = vector.extract_strided_slice %1 {offsets = [0, 1088], sizes = [8, 64], strides = [1, 1]} : vector<8x2304xf32> to vector<8x64xf32>
    %122 = arith.truncf %121 : vector<8x64xf32> to vector<8x64xbf16>
    %123 = vector.extract_strided_slice %1 {offsets = [0, 1856], sizes = [8, 64], strides = [1, 1]} : vector<8x2304xf32> to vector<8x64xf32>
    %124 = arith.truncf %123 : vector<8x64xf32> to vector<8x64xbf16>
    %cst_29 = arith.constant dense<0.000000e+00> : vector<8x8xf32>
    %125 = tpu.matmul %120, %122, %cst_29 {dimension_numbers = #tpu.dot_dimension_numbers<[1], [1], [0], [0], [0, 0, 1, 0], [], []>} : vector<8x64xbf16>, vector<8x64xbf16>, vector<8x8xf32> -> vector<8x8xf32>
    %cst_30 = arith.constant 1.250000e-01 : f32
    %126 = vector.broadcast %cst_30 : f32 to vector<8x8xf32>
    %127 = arith.mulf %125, %126 : vector<8x8xf32>
    %128 = vector.broadcast %3 : vector<1x8xf32> to vector<8x8xf32>
    %129 = arith.addf %127, %128 : vector<8x8xf32>
    %cst_31 = arith.constant dense<0xFF800000> : vector<8xf32>
    %130 = vector.multi_reduction <maximumf>, %129, %cst_31 [1] : vector<8x8xf32> to vector<8xf32>
    %131 = vector.shape_cast %130 : vector<8xf32> to vector<8x1xf32>
    %132 = vector.broadcast %131 : vector<8x1xf32> to vector<8x8xf32>
    %133 = arith.subf %129, %132 : vector<8x8xf32>
    %134 = math.exp %133 : vector<8x8xf32>
    %cst_32 = arith.constant dense<0.000000e+00> : vector<8xf32>
    %135 = vector.multi_reduction <add>, %134, %cst_32 [1] : vector<8x8xf32> to vector<8xf32>
    %136 = vector.shape_cast %135 : vector<8xf32> to vector<8x1xf32>
    %137 = tpu.reciprocal %136 : vector<8x1xf32> -> vector<8x1xf32>
    %138 = vector.broadcast %137 : vector<8x1xf32> to vector<8x8xf32>
    %139 = arith.mulf %134, %138 : vector<8x8xf32>
    %140 = arith.truncf %139 : vector<8x8xf32> to vector<8x8xbf16>
    %cst_33 = arith.constant dense<0.000000e+00> : vector<8x64xf32>
    %141 = tpu.matmul %140, %124, %cst_33 {dimension_numbers = #tpu.dot_dimension_numbers<[1], [0], [0], [1], [0, 0, 1, 1], [], []>} : vector<8x8xbf16>, vector<8x64xbf16>, vector<8x64xf32> -> vector<8x64xf32>
    %142 = vector.extract_strided_slice %1 {offsets = [0, 384], sizes = [8, 64], strides = [1, 1]} : vector<8x2304xf32> to vector<8x64xf32>
    %143 = arith.truncf %142 : vector<8x64xf32> to vector<8x64xbf16>
    %144 = vector.extract_strided_slice %1 {offsets = [0, 1152], sizes = [8, 64], strides = [1, 1]} : vector<8x2304xf32> to vector<8x64xf32>
    %145 = arith.truncf %144 : vector<8x64xf32> to vector<8x64xbf16>
    %146 = vector.extract_strided_slice %1 {offsets = [0, 1920], sizes = [8, 64], strides = [1, 1]} : vector<8x2304xf32> to vector<8x64xf32>
    %147 = arith.truncf %146 : vector<8x64xf32> to vector<8x64xbf16>
    %cst_34 = arith.constant dense<0.000000e+00> : vector<8x8xf32>
    %148 = tpu.matmul %143, %145, %cst_34 {dimension_numbers = #tpu.dot_dimension_numbers<[1], [1], [0], [0], [0, 0, 1, 0], [], []>} : vector<8x64xbf16>, vector<8x64xbf16>, vector<8x8xf32> -> vector<8x8xf32>
    %cst_35 = arith.constant 1.250000e-01 : f32
    %149 = vector.broadcast %cst_35 : f32 to vector<8x8xf32>
    %150 = arith.mulf %148, %149 : vector<8x8xf32>
    %151 = vector.broadcast %3 : vector<1x8xf32> to vector<8x8xf32>
    %152 = arith.addf %150, %151 : vector<8x8xf32>
    %cst_36 = arith.constant dense<0xFF800000> : vector<8xf32>
    %153 = vector.multi_reduction <maximumf>, %152, %cst_36 [1] : vector<8x8xf32> to vector<8xf32>
    %154 = vector.shape_cast %153 : vector<8xf32> to vector<8x1xf32>
    %155 = vector.broadcast %154 : vector<8x1xf32> to vector<8x8xf32>
    %156 = arith.subf %152, %155 : vector<8x8xf32>
    %157 = math.exp %156 : vector<8x8xf32>
    %cst_37 = arith.constant dense<0.000000e+00> : vector<8xf32>
    %158 = vector.multi_reduction <add>, %157, %cst_37 [1] : vector<8x8xf32> to vector<8xf32>
    %159 = vector.shape_cast %158 : vector<8xf32> to vector<8x1xf32>
    %160 = tpu.reciprocal %159 : vector<8x1xf32> -> vector<8x1xf32>
    %161 = vector.broadcast %160 : vector<8x1xf32> to vector<8x8xf32>
    %162 = arith.mulf %157, %161 : vector<8x8xf32>
    %163 = arith.truncf %162 : vector<8x8xf32> to vector<8x8xbf16>
    %cst_38 = arith.constant dense<0.000000e+00> : vector<8x64xf32>
    %164 = tpu.matmul %163, %147, %cst_38 {dimension_numbers = #tpu.dot_dimension_numbers<[1], [0], [0], [1], [0, 0, 1, 1], [], []>} : vector<8x8xbf16>, vector<8x64xbf16>, vector<8x64xf32> -> vector<8x64xf32>
    %165 = vector.extract_strided_slice %1 {offsets = [0, 448], sizes = [8, 64], strides = [1, 1]} : vector<8x2304xf32> to vector<8x64xf32>
    %166 = arith.truncf %165 : vector<8x64xf32> to vector<8x64xbf16>
    %167 = vector.extract_strided_slice %1 {offsets = [0, 1216], sizes = [8, 64], strides = [1, 1]} : vector<8x2304xf32> to vector<8x64xf32>
    %168 = arith.truncf %167 : vector<8x64xf32> to vector<8x64xbf16>
    %169 = vector.extract_strided_slice %1 {offsets = [0, 1984], sizes = [8, 64], strides = [1, 1]} : vector<8x2304xf32> to vector<8x64xf32>
    %170 = arith.truncf %169 : vector<8x64xf32> to vector<8x64xbf16>
    %cst_39 = arith.constant dense<0.000000e+00> : vector<8x8xf32>
    %171 = tpu.matmul %166, %168, %cst_39 {dimension_numbers = #tpu.dot_dimension_numbers<[1], [1], [0], [0], [0, 0, 1, 0], [], []>} : vector<8x64xbf16>, vector<8x64xbf16>, vector<8x8xf32> -> vector<8x8xf32>
    %cst_40 = arith.constant 1.250000e-01 : f32
    %172 = vector.broadcast %cst_40 : f32 to vector<8x8xf32>
    %173 = arith.mulf %171, %172 : vector<8x8xf32>
    %174 = vector.broadcast %3 : vector<1x8xf32> to vector<8x8xf32>
    %175 = arith.addf %173, %174 : vector<8x8xf32>
    %cst_41 = arith.constant dense<0xFF800000> : vector<8xf32>
    %176 = vector.multi_reduction <maximumf>, %175, %cst_41 [1] : vector<8x8xf32> to vector<8xf32>
    %177 = vector.shape_cast %176 : vector<8xf32> to vector<8x1xf32>
    %178 = vector.broadcast %177 : vector<8x1xf32> to vector<8x8xf32>
    %179 = arith.subf %175, %178 : vector<8x8xf32>
    %180 = math.exp %179 : vector<8x8xf32>
    %cst_42 = arith.constant dense<0.000000e+00> : vector<8xf32>
    %181 = vector.multi_reduction <add>, %180, %cst_42 [1] : vector<8x8xf32> to vector<8xf32>
    %182 = vector.shape_cast %181 : vector<8xf32> to vector<8x1xf32>
    %183 = tpu.reciprocal %182 : vector<8x1xf32> -> vector<8x1xf32>
    %184 = vector.broadcast %183 : vector<8x1xf32> to vector<8x8xf32>
    %185 = arith.mulf %180, %184 : vector<8x8xf32>
    %186 = arith.truncf %185 : vector<8x8xf32> to vector<8x8xbf16>
    %cst_43 = arith.constant dense<0.000000e+00> : vector<8x64xf32>
    %187 = tpu.matmul %186, %170, %cst_43 {dimension_numbers = #tpu.dot_dimension_numbers<[1], [0], [0], [1], [0, 0, 1, 1], [], []>} : vector<8x8xbf16>, vector<8x64xbf16>, vector<8x64xf32> -> vector<8x64xf32>
    %188 = vector.extract_strided_slice %1 {offsets = [0, 512], sizes = [8, 64], strides = [1, 1]} : vector<8x2304xf32> to vector<8x64xf32>
    %189 = arith.truncf %188 : vector<8x64xf32> to vector<8x64xbf16>
    %190 = vector.extract_strided_slice %1 {offsets = [0, 1280], sizes = [8, 64], strides = [1, 1]} : vector<8x2304xf32> to vector<8x64xf32>
    %191 = arith.truncf %190 : vector<8x64xf32> to vector<8x64xbf16>
    %192 = vector.extract_strided_slice %1 {offsets = [0, 2048], sizes = [8, 64], strides = [1, 1]} : vector<8x2304xf32> to vector<8x64xf32>
    %193 = arith.truncf %192 : vector<8x64xf32> to vector<8x64xbf16>
    %cst_44 = arith.constant dense<0.000000e+00> : vector<8x8xf32>
    %194 = tpu.matmul %189, %191, %cst_44 {dimension_numbers = #tpu.dot_dimension_numbers<[1], [1], [0], [0], [0, 0, 1, 0], [], []>} : vector<8x64xbf16>, vector<8x64xbf16>, vector<8x8xf32> -> vector<8x8xf32>
    %cst_45 = arith.constant 1.250000e-01 : f32
    %195 = vector.broadcast %cst_45 : f32 to vector<8x8xf32>
    %196 = arith.mulf %194, %195 : vector<8x8xf32>
    %197 = vector.broadcast %3 : vector<1x8xf32> to vector<8x8xf32>
    %198 = arith.addf %196, %197 : vector<8x8xf32>
    %cst_46 = arith.constant dense<0xFF800000> : vector<8xf32>
    %199 = vector.multi_reduction <maximumf>, %198, %cst_46 [1] : vector<8x8xf32> to vector<8xf32>
    %200 = vector.shape_cast %199 : vector<8xf32> to vector<8x1xf32>
    %201 = vector.broadcast %200 : vector<8x1xf32> to vector<8x8xf32>
    %202 = arith.subf %198, %201 : vector<8x8xf32>
    %203 = math.exp %202 : vector<8x8xf32>
    %cst_47 = arith.constant dense<0.000000e+00> : vector<8xf32>
    %204 = vector.multi_reduction <add>, %203, %cst_47 [1] : vector<8x8xf32> to vector<8xf32>
    %205 = vector.shape_cast %204 : vector<8xf32> to vector<8x1xf32>
    %206 = tpu.reciprocal %205 : vector<8x1xf32> -> vector<8x1xf32>
    %207 = vector.broadcast %206 : vector<8x1xf32> to vector<8x8xf32>
    %208 = arith.mulf %203, %207 : vector<8x8xf32>
    %209 = arith.truncf %208 : vector<8x8xf32> to vector<8x8xbf16>
    %cst_48 = arith.constant dense<0.000000e+00> : vector<8x64xf32>
    %210 = tpu.matmul %209, %193, %cst_48 {dimension_numbers = #tpu.dot_dimension_numbers<[1], [0], [0], [1], [0, 0, 1, 1], [], []>} : vector<8x8xbf16>, vector<8x64xbf16>, vector<8x64xf32> -> vector<8x64xf32>
    %211 = vector.extract_strided_slice %1 {offsets = [0, 576], sizes = [8, 64], strides = [1, 1]} : vector<8x2304xf32> to vector<8x64xf32>
    %212 = arith.truncf %211 : vector<8x64xf32> to vector<8x64xbf16>
    %213 = vector.extract_strided_slice %1 {offsets = [0, 1344], sizes = [8, 64], strides = [1, 1]} : vector<8x2304xf32> to vector<8x64xf32>
    %214 = arith.truncf %213 : vector<8x64xf32> to vector<8x64xbf16>
    %215 = vector.extract_strided_slice %1 {offsets = [0, 2112], sizes = [8, 64], strides = [1, 1]} : vector<8x2304xf32> to vector<8x64xf32>
    %216 = arith.truncf %215 : vector<8x64xf32> to vector<8x64xbf16>
    %cst_49 = arith.constant dense<0.000000e+00> : vector<8x8xf32>
    %217 = tpu.matmul %212, %214, %cst_49 {dimension_numbers = #tpu.dot_dimension_numbers<[1], [1], [0], [0], [0, 0, 1, 0], [], []>} : vector<8x64xbf16>, vector<8x64xbf16>, vector<8x8xf32> -> vector<8x8xf32>
    %cst_50 = arith.constant 1.250000e-01 : f32
    %218 = vector.broadcast %cst_50 : f32 to vector<8x8xf32>
    %219 = arith.mulf %217, %218 : vector<8x8xf32>
    %220 = vector.broadcast %3 : vector<1x8xf32> to vector<8x8xf32>
    %221 = arith.addf %219, %220 : vector<8x8xf32>
    %cst_51 = arith.constant dense<0xFF800000> : vector<8xf32>
    %222 = vector.multi_reduction <maximumf>, %221, %cst_51 [1] : vector<8x8xf32> to vector<8xf32>
    %223 = vector.shape_cast %222 : vector<8xf32> to vector<8x1xf32>
    %224 = vector.broadcast %223 : vector<8x1xf32> to vector<8x8xf32>
    %225 = arith.subf %221, %224 : vector<8x8xf32>
    %226 = math.exp %225 : vector<8x8xf32>
    %cst_52 = arith.constant dense<0.000000e+00> : vector<8xf32>
    %227 = vector.multi_reduction <add>, %226, %cst_52 [1] : vector<8x8xf32> to vector<8xf32>
    %228 = vector.shape_cast %227 : vector<8xf32> to vector<8x1xf32>
    %229 = tpu.reciprocal %228 : vector<8x1xf32> -> vector<8x1xf32>
    %230 = vector.broadcast %229 : vector<8x1xf32> to vector<8x8xf32>
    %231 = arith.mulf %226, %230 : vector<8x8xf32>
    %232 = arith.truncf %231 : vector<8x8xf32> to vector<8x8xbf16>
    %cst_53 = arith.constant dense<0.000000e+00> : vector<8x64xf32>
    %233 = tpu.matmul %232, %216, %cst_53 {dimension_numbers = #tpu.dot_dimension_numbers<[1], [0], [0], [1], [0, 0, 1, 1], [], []>} : vector<8x8xbf16>, vector<8x64xbf16>, vector<8x64xf32> -> vector<8x64xf32>
    %234 = vector.extract_strided_slice %1 {offsets = [0, 640], sizes = [8, 64], strides = [1, 1]} : vector<8x2304xf32> to vector<8x64xf32>
    %235 = arith.truncf %234 : vector<8x64xf32> to vector<8x64xbf16>
    %236 = vector.extract_strided_slice %1 {offsets = [0, 1408], sizes = [8, 64], strides = [1, 1]} : vector<8x2304xf32> to vector<8x64xf32>
    %237 = arith.truncf %236 : vector<8x64xf32> to vector<8x64xbf16>
    %238 = vector.extract_strided_slice %1 {offsets = [0, 2176], sizes = [8, 64], strides = [1, 1]} : vector<8x2304xf32> to vector<8x64xf32>
    %239 = arith.truncf %238 : vector<8x64xf32> to vector<8x64xbf16>
    %cst_54 = arith.constant dense<0.000000e+00> : vector<8x8xf32>
    %240 = tpu.matmul %235, %237, %cst_54 {dimension_numbers = #tpu.dot_dimension_numbers<[1], [1], [0], [0], [0, 0, 1, 0], [], []>} : vector<8x64xbf16>, vector<8x64xbf16>, vector<8x8xf32> -> vector<8x8xf32>
    %cst_55 = arith.constant 1.250000e-01 : f32
    %241 = vector.broadcast %cst_55 : f32 to vector<8x8xf32>
    %242 = arith.mulf %240, %241 : vector<8x8xf32>
    %243 = vector.broadcast %3 : vector<1x8xf32> to vector<8x8xf32>
    %244 = arith.addf %242, %243 : vector<8x8xf32>
    %cst_56 = arith.constant dense<0xFF800000> : vector<8xf32>
    %245 = vector.multi_reduction <maximumf>, %244, %cst_56 [1] : vector<8x8xf32> to vector<8xf32>
    %246 = vector.shape_cast %245 : vector<8xf32> to vector<8x1xf32>
    %247 = vector.broadcast %246 : vector<8x1xf32> to vector<8x8xf32>
    %248 = arith.subf %244, %247 : vector<8x8xf32>
    %249 = math.exp %248 : vector<8x8xf32>
    %cst_57 = arith.constant dense<0.000000e+00> : vector<8xf32>
    %250 = vector.multi_reduction <add>, %249, %cst_57 [1] : vector<8x8xf32> to vector<8xf32>
    %251 = vector.shape_cast %250 : vector<8xf32> to vector<8x1xf32>
    %252 = tpu.reciprocal %251 : vector<8x1xf32> -> vector<8x1xf32>
    %253 = vector.broadcast %252 : vector<8x1xf32> to vector<8x8xf32>
    %254 = arith.mulf %249, %253 : vector<8x8xf32>
    %255 = arith.truncf %254 : vector<8x8xf32> to vector<8x8xbf16>
    %cst_58 = arith.constant dense<0.000000e+00> : vector<8x64xf32>
    %256 = tpu.matmul %255, %239, %cst_58 {dimension_numbers = #tpu.dot_dimension_numbers<[1], [0], [0], [1], [0, 0, 1, 1], [], []>} : vector<8x8xbf16>, vector<8x64xbf16>, vector<8x64xf32> -> vector<8x64xf32>
    %257 = vector.extract_strided_slice %1 {offsets = [0, 704], sizes = [8, 64], strides = [1, 1]} : vector<8x2304xf32> to vector<8x64xf32>
    %258 = arith.truncf %257 : vector<8x64xf32> to vector<8x64xbf16>
    %259 = vector.extract_strided_slice %1 {offsets = [0, 1472], sizes = [8, 64], strides = [1, 1]} : vector<8x2304xf32> to vector<8x64xf32>
    %260 = arith.truncf %259 : vector<8x64xf32> to vector<8x64xbf16>
    %261 = vector.extract_strided_slice %1 {offsets = [0, 2240], sizes = [8, 64], strides = [1, 1]} : vector<8x2304xf32> to vector<8x64xf32>
    %262 = arith.truncf %261 : vector<8x64xf32> to vector<8x64xbf16>
    %cst_59 = arith.constant dense<0.000000e+00> : vector<8x8xf32>
    %263 = tpu.matmul %258, %260, %cst_59 {dimension_numbers = #tpu.dot_dimension_numbers<[1], [1], [0], [0], [0, 0, 1, 0], [], []>} : vector<8x64xbf16>, vector<8x64xbf16>, vector<8x8xf32> -> vector<8x8xf32>
    %cst_60 = arith.constant 1.250000e-01 : f32
    %264 = vector.broadcast %cst_60 : f32 to vector<8x8xf32>
    %265 = arith.mulf %263, %264 : vector<8x8xf32>
    %266 = vector.broadcast %3 : vector<1x8xf32> to vector<8x8xf32>
    %267 = arith.addf %265, %266 : vector<8x8xf32>
    %cst_61 = arith.constant dense<0xFF800000> : vector<8xf32>
    %268 = vector.multi_reduction <maximumf>, %267, %cst_61 [1] : vector<8x8xf32> to vector<8xf32>
    %269 = vector.shape_cast %268 : vector<8xf32> to vector<8x1xf32>
    %270 = vector.broadcast %269 : vector<8x1xf32> to vector<8x8xf32>
    %271 = arith.subf %267, %270 : vector<8x8xf32>
    %272 = math.exp %271 : vector<8x8xf32>
    %cst_62 = arith.constant dense<0.000000e+00> : vector<8xf32>
    %273 = vector.multi_reduction <add>, %272, %cst_62 [1] : vector<8x8xf32> to vector<8xf32>
    %274 = vector.shape_cast %273 : vector<8xf32> to vector<8x1xf32>
    %275 = tpu.reciprocal %274 : vector<8x1xf32> -> vector<8x1xf32>
    %276 = vector.broadcast %275 : vector<8x1xf32> to vector<8x8xf32>
    %277 = arith.mulf %272, %276 : vector<8x8xf32>
    %278 = arith.truncf %277 : vector<8x8xf32> to vector<8x8xbf16>
    %cst_63 = arith.constant dense<0.000000e+00> : vector<8x64xf32>
    %279 = tpu.matmul %278, %262, %cst_63 {dimension_numbers = #tpu.dot_dimension_numbers<[1], [0], [0], [1], [0, 0, 1, 1], [], []>} : vector<8x8xbf16>, vector<8x64xbf16>, vector<8x64xf32> -> vector<8x64xf32>
    %280 = tpu.concatenate %26, %49, %72, %95, %118, %141, %164, %187, %210, %233, %256, %279 in 1 : vector<8x64xf32>, vector<8x64xf32>, vector<8x64xf32>, vector<8x64xf32>, vector<8x64xf32>, vector<8x64xf32>, vector<8x64xf32>, vector<8x64xf32>, vector<8x64xf32>, vector<8x64xf32>, vector<8x64xf32>, vector<8x64xf32> -> vector<8x768xf32>
    %c0_64 = arith.constant 0 : index
    %c0_65 = arith.constant 0 : index
    %c0_66 = arith.constant 0 : index
    %281 = vector.load %arg3[%c0_64, %c0_65, %c0_66] : memref<1x8x768xf32, #tpu.memory_space<vmem>>, vector<1x8x768xf32>
    %282 = vector.shape_cast %281 : vector<1x8x768xf32> to vector<8x768xf32>
    %283 = vector.shape_cast %280 : vector<8x768xf32> to vector<1x8x768xf32>
    tpu.vector_store %arg3[%c0_64, %c0_65, %c0_66], %283 {strides = array<i32>} : memref<1x8x768xf32, #tpu.memory_space<vmem>>, vector<1x8x768xf32>,
    return
  }
  func.func @transform_0(%arg0: i32) -> (i32, i32, i32) {
    %c0_i32 = arith.constant 0 : i32
    %c0_i32_0 = arith.constant 0 : i32
    %c0_i32_1 = arith.constant 0 : i32
    return %arg0, %c0_i32, %c0_i32_0 : i32, i32, i32
  }
  func.func @transform_1(%arg0: i32) -> (i32, i32, i32) {
    %c0_i32 = arith.constant 0 : i32
    %c0_i32_0 = arith.constant 0 : i32
    %c0_i32_1 = arith.constant 0 : i32
    return %arg0, %c0_i32, %c0_i32_0 : i32, i32, i32
  }
  func.func @transform_2(%arg0: i32) -> (i32, i32, i32) {
    %c0_i32 = arith.constant 0 : i32
    %c0_i32_0 = arith.constant 0 : i32
    %c0_i32_1 = arith.constant 0 : i32
    return %arg0, %c0_i32, %c0_i32_0 : i32, i32, i32
  }
}

module attributes {stable_mosaic.version = 11 : i64} {
  func.func @_linear_residual_ln_kernel(%arg0: i32, %arg1: i32, %arg2: memref<16x768xbf16, #tpu.memory_space<vmem>>, %arg3: memref<768x768xbf16, #tpu.memory_space<vmem>>, %arg4: memref<1x768xf32, #tpu.memory_space<vmem>>, %arg5: memref<16x768xf32, #tpu.memory_space<vmem>>, %arg6: memref<1x768xf32, #tpu.memory_space<vmem>>, %arg7: memref<1x768xf32, #tpu.memory_space<vmem>>, %arg8: memref<16x768xf32, #tpu.memory_space<vmem>>) attributes {dimension_semantics = [#tpu.dimension_semantics<parallel>, #tpu.dimension_semantics<arbitrary>], iteration_bounds = array<i64: 1, 1>, scalar_prefetch = 0 : i64, scratch_operands = 0 : i64, tpu.core_type = #tpu.core_type<tc>, window_params = [{transform_indices = @transform_0, window_bounds = array<i64: 16, 768>}, {transform_indices = @transform_1, window_bounds = array<i64: 768, 768>}, {pipeline_mode = #tpu.pipeline_mode<synchronous>, transform_indices = @transform_2, window_bounds = array<i64: 1, 768>}, {transform_indices = @transform_3, window_bounds = array<i64: 16, 768>}, {pipeline_mode = #tpu.pipeline_mode<synchronous>, transform_indices = @transform_4, window_bounds = array<i64: 1, 768>}, {pipeline_mode = #tpu.pipeline_mode<synchronous>, transform_indices = @transform_5, window_bounds = array<i64: 1, 768>}, {transform_indices = @transform_6, window_bounds = array<i64: 16, 768>}]} {
    %c0_i32 = arith.constant 0 : i32
    %0 = arith.cmpi eq, %arg1, %c0_i32 : i32
    %1 = arith.extui %0 : i1 to i32
    %c0_i32_0 = arith.constant 0 : i32
    %2 = arith.cmpi ne, %1, %c0_i32_0 : i32
    scf.if %2 {
      %cst_10 = arith.constant 0.000000e+00 : f32
      %12 = vector.broadcast %cst_10 : f32 to vector<16x768xf32>
      %c0_11 = arith.constant 0 : index
      %c0_12 = arith.constant 0 : index
      %13 = vector.load %arg8[%c0_11, %c0_12] : memref<16x768xf32, #tpu.memory_space<vmem>>, vector<16x768xf32>
      tpu.vector_store %arg8[%c0_11, %c0_12], %12 {strides = array<i32>} : memref<16x768xf32, #tpu.memory_space<vmem>>, vector<16x768xf32>,
    } else {
    }
    %c0 = arith.constant 0 : index
    %c0_1 = arith.constant 0 : index
    %3 = vector.load %arg8[%c0, %c0_1] : memref<16x768xf32, #tpu.memory_space<vmem>>, vector<16x768xf32>
    %c0_2 = arith.constant 0 : index
    %c0_3 = arith.constant 0 : index
    %4 = vector.load %arg2[%c0_2, %c0_3] : memref<16x768xbf16, #tpu.memory_space<vmem>>, vector<16x768xbf16>
    %c0_4 = arith.constant 0 : index
    %c0_5 = arith.constant 0 : index
    %5 = vector.load %arg3[%c0_4, %c0_5] : memref<768x768xbf16, #tpu.memory_space<vmem>>, vector<768x768xbf16>
    %cst = arith.constant dense<0.000000e+00> : vector<16x768xf32>
    %6 = tpu.matmul %4, %5, %cst {dimension_numbers = #tpu.dot_dimension_numbers<[1], [0], [0], [1], [0, 0, 1, 1], [], []>} : vector<16x768xbf16>, vector<768x768xbf16>, vector<16x768xf32> -> vector<16x768xf32>
    %7 = arith.addf %3, %6 : vector<16x768xf32>
    %c0_6 = arith.constant 0 : index
    %c0_7 = arith.constant 0 : index
    %8 = vector.load %arg8[%c0_6, %c0_7] : memref<16x768xf32, #tpu.memory_space<vmem>>, vector<16x768xf32>
    tpu.vector_store %arg8[%c0_6, %c0_7], %7 {strides = array<i32>} : memref<16x768xf32, #tpu.memory_space<vmem>>, vector<16x768xf32>,
    %c0_i32_8 = arith.constant 0 : i32
    %9 = arith.cmpi eq, %arg1, %c0_i32_8 : i32
    %10 = arith.extui %9 : i1 to i32
    %c0_i32_9 = arith.constant 0 : i32
    %11 = arith.cmpi ne, %10, %c0_i32_9 : i32
    scf.if %11 {
      %c0_10 = arith.constant 0 : index
      %c0_11 = arith.constant 0 : index
      %12 = vector.load %arg8[%c0_10, %c0_11] : memref<16x768xf32, #tpu.memory_space<vmem>>, vector<16x768xf32>
      %c0_12 = arith.constant 0 : index
      %c0_13 = arith.constant 0 : index
      %13 = vector.load %arg4[%c0_12, %c0_13] : memref<1x768xf32, #tpu.memory_space<vmem>>, vector<1x768xf32>
      %14 = vector.broadcast %13 : vector<1x768xf32> to vector<16x768xf32>
      %15 = arith.addf %12, %14 : vector<16x768xf32>
      %c0_14 = arith.constant 0 : index
      %c0_15 = arith.constant 0 : index
      %16 = vector.load %arg5[%c0_14, %c0_15] : memref<16x768xf32, #tpu.memory_space<vmem>>, vector<16x768xf32>
      %17 = arith.addf %15, %16 : vector<16x768xf32>
      %cst_16 = arith.constant dense<0.000000e+00> : vector<16xf32>
      %18 = vector.multi_reduction <add>, %17, %cst_16 [1] : vector<16x768xf32> to vector<16xf32>
      %19 = vector.shape_cast %18 : vector<16xf32> to vector<16x1xf32>
      %cst_17 = arith.constant 7.680000e+02 : f32
      %20 = vector.broadcast %cst_17 : f32 to vector<16x1xf32>
      %21 = arith.divf %19, %20 : vector<16x1xf32>
      %22 = vector.broadcast %21 : vector<16x1xf32> to vector<16x768xf32>
      %23 = arith.subf %17, %22 : vector<16x768xf32>
      %24 = arith.mulf %23, %23 : vector<16x768xf32>
      %cst_18 = arith.constant dense<0.000000e+00> : vector<16xf32>
      %25 = vector.multi_reduction <add>, %24, %cst_18 [1] : vector<16x768xf32> to vector<16xf32>
      %26 = vector.shape_cast %25 : vector<16xf32> to vector<16x1xf32>
      %cst_19 = arith.constant 7.680000e+02 : f32
      %27 = vector.broadcast %cst_19 : f32 to vector<16x1xf32>
      %28 = arith.divf %26, %27 : vector<16x1xf32>
      %cst_20 = arith.constant 9.99999996E-13 : f32
      %29 = vector.broadcast %cst_20 : f32 to vector<16x1xf32>
      %30 = arith.addf %28, %29 : vector<16x1xf32>
      %31 = math.rsqrt %30 : vector<16x1xf32>
      %32 = vector.broadcast %21 : vector<16x1xf32> to vector<16x768xf32>
      %33 = arith.subf %17, %32 : vector<16x768xf32>
      %34 = vector.broadcast %31 : vector<16x1xf32> to vector<16x768xf32>
      %35 = arith.mulf %33, %34 : vector<16x768xf32>
      %c0_21 = arith.constant 0 : index
      %c0_22 = arith.constant 0 : index
      %36 = vector.load %arg6[%c0_21, %c0_22] : memref<1x768xf32, #tpu.memory_space<vmem>>, vector<1x768xf32>
      %37 = vector.broadcast %36 : vector<1x768xf32> to vector<16x768xf32>
      %38 = arith.mulf %35, %37 : vector<16x768xf32>
      %c0_23 = arith.constant 0 : index
      %c0_24 = arith.constant 0 : index
      %39 = vector.load %arg7[%c0_23, %c0_24] : memref<1x768xf32, #tpu.memory_space<vmem>>, vector<1x768xf32>
      %40 = vector.broadcast %39 : vector<1x768xf32> to vector<16x768xf32>
      %41 = arith.addf %38, %40 : vector<16x768xf32>
      %c0_25 = arith.constant 0 : index
      %c0_26 = arith.constant 0 : index
      %42 = vector.load %arg8[%c0_25, %c0_26] : memref<16x768xf32, #tpu.memory_space<vmem>>, vector<16x768xf32>
      tpu.vector_store %arg8[%c0_25, %c0_26], %41 {strides = array<i32>} : memref<16x768xf32, #tpu.memory_space<vmem>>, vector<16x768xf32>,
    } else {
    }
    return
  }
  func.func @transform_0(%arg0: i32, %arg1: i32) -> (i32, i32) {
    %c0_i32 = arith.constant 0 : i32
    return %arg0, %arg1 : i32, i32
  }
  func.func @transform_1(%arg0: i32, %arg1: i32) -> (i32, i32) {
    %c0_i32 = arith.constant 0 : i32
    %c0_i32_0 = arith.constant 0 : i32
    return %arg1, %c0_i32 : i32, i32
  }
  func.func @transform_2(%arg0: i32, %arg1: i32) -> (i32, i32) {
    %c0_i32 = arith.constant 0 : i32
    %c0_i32_0 = arith.constant 0 : i32
    %c0_i32_1 = arith.constant 0 : i32
    return %c0_i32, %c0_i32_0 : i32, i32
  }
  func.func @transform_3(%arg0: i32, %arg1: i32) -> (i32, i32) {
    %c0_i32 = arith.constant 0 : i32
    %c0_i32_0 = arith.constant 0 : i32
    return %arg0, %c0_i32 : i32, i32
  }
  func.func @transform_4(%arg0: i32, %arg1: i32) -> (i32, i32) {
    %c0_i32 = arith.constant 0 : i32
    %c0_i32_0 = arith.constant 0 : i32
    %c0_i32_1 = arith.constant 0 : i32
    return %c0_i32, %c0_i32_0 : i32, i32
  }
  func.func @transform_5(%arg0: i32, %arg1: i32) -> (i32, i32) {
    %c0_i32 = arith.constant 0 : i32
    %c0_i32_0 = arith.constant 0 : i32
    %c0_i32_1 = arith.constant 0 : i32
    return %c0_i32, %c0_i32_0 : i32, i32
  }
  func.func @transform_6(%arg0: i32, %arg1: i32) -> (i32, i32) {
    %c0_i32 = arith.constant 0 : i32
    %c0_i32_0 = arith.constant 0 : i32
    return %arg0, %c0_i32 : i32, i32
  }
}

module attributes {stable_mosaic.version = 11 : i64} {
  func.func @_linear_kernel(%arg0: i32, %arg1: i32, %arg2: i32, %arg3: memref<16x768xbf16, #tpu.memory_space<vmem>>, %arg4: memref<768x512xbf16, #tpu.memory_space<vmem>>, %arg5: memref<1x512xf32, #tpu.memory_space<vmem>>, %arg6: memref<16x512xf32, #tpu.memory_space<vmem>>) attributes {dimension_semantics = [#tpu.dimension_semantics<parallel>, #tpu.dimension_semantics<parallel>, #tpu.dimension_semantics<arbitrary>], iteration_bounds = array<i64: 1, 6, 1>, scalar_prefetch = 0 : i64, scratch_operands = 0 : i64, tpu.core_type = #tpu.core_type<tc>, window_params = [{transform_indices = @transform_0, window_bounds = array<i64: 16, 768>}, {transform_indices = @transform_1, window_bounds = array<i64: 768, 512>}, {transform_indices = @transform_2, window_bounds = array<i64: 1, 512>}, {transform_indices = @transform_3, window_bounds = array<i64: 16, 512>}]} {
    %c0_i32 = arith.constant 0 : i32
    %0 = arith.cmpi eq, %arg2, %c0_i32 : i32
    %1 = arith.extui %0 : i1 to i32
    %c0_i32_0 = arith.constant 0 : i32
    %2 = arith.cmpi ne, %1, %c0_i32_0 : i32
    scf.if %2 {
      %cst_10 = arith.constant 0.000000e+00 : f32
      %12 = vector.broadcast %cst_10 : f32 to vector<16x512xf32>
      %c0_11 = arith.constant 0 : index
      %c0_12 = arith.constant 0 : index
      %13 = vector.load %arg6[%c0_11, %c0_12] : memref<16x512xf32, #tpu.memory_space<vmem>>, vector<16x512xf32>
      tpu.vector_store %arg6[%c0_11, %c0_12], %12 {strides = array<i32>} : memref<16x512xf32, #tpu.memory_space<vmem>>, vector<16x512xf32>,
    } else {
    }
    %c0 = arith.constant 0 : index
    %c0_1 = arith.constant 0 : index
    %3 = vector.load %arg6[%c0, %c0_1] : memref<16x512xf32, #tpu.memory_space<vmem>>, vector<16x512xf32>
    %c0_2 = arith.constant 0 : index
    %c0_3 = arith.constant 0 : index
    %4 = vector.load %arg3[%c0_2, %c0_3] : memref<16x768xbf16, #tpu.memory_space<vmem>>, vector<16x768xbf16>
    %c0_4 = arith.constant 0 : index
    %c0_5 = arith.constant 0 : index
    %5 = vector.load %arg4[%c0_4, %c0_5] : memref<768x512xbf16, #tpu.memory_space<vmem>>, vector<768x512xbf16>
    %cst = arith.constant dense<0.000000e+00> : vector<16x512xf32>
    %6 = tpu.matmul %4, %5, %cst {dimension_numbers = #tpu.dot_dimension_numbers<[1], [0], [0], [1], [0, 0, 1, 1], [], []>} : vector<16x768xbf16>, vector<768x512xbf16>, vector<16x512xf32> -> vector<16x512xf32>
    %7 = arith.addf %3, %6 : vector<16x512xf32>
    %c0_6 = arith.constant 0 : index
    %c0_7 = arith.constant 0 : index
    %8 = vector.load %arg6[%c0_6, %c0_7] : memref<16x512xf32, #tpu.memory_space<vmem>>, vector<16x512xf32>
    tpu.vector_store %arg6[%c0_6, %c0_7], %7 {strides = array<i32>} : memref<16x512xf32, #tpu.memory_space<vmem>>, vector<16x512xf32>,
    %c0_i32_8 = arith.constant 0 : i32
    %9 = arith.cmpi eq, %arg2, %c0_i32_8 : i32
    %10 = arith.extui %9 : i1 to i32
    %c0_i32_9 = arith.constant 0 : i32
    %11 = arith.cmpi ne, %10, %c0_i32_9 : i32
    scf.if %11 {
      %c0_10 = arith.constant 0 : index
      %c0_11 = arith.constant 0 : index
      %12 = vector.load %arg6[%c0_10, %c0_11] : memref<16x512xf32, #tpu.memory_space<vmem>>, vector<16x512xf32>
      %c0_12 = arith.constant 0 : index
      %c0_13 = arith.constant 0 : index
      %13 = vector.load %arg5[%c0_12, %c0_13] : memref<1x512xf32, #tpu.memory_space<vmem>>, vector<1x512xf32>
      %14 = vector.broadcast %13 : vector<1x512xf32> to vector<16x512xf32>
      %15 = arith.addf %12, %14 : vector<16x512xf32>
      %cst_14 = arith.constant 5.000000e-01 : f32
      %16 = vector.broadcast %cst_14 : f32 to vector<16x512xf32>
      %17 = arith.mulf %16, %15 : vector<16x512xf32>
      %cst_15 = arith.constant 4.471500e-02 : f32
      %18 = vector.broadcast %cst_15 : f32 to vector<16x512xf32>
      %19 = arith.mulf %18, %15 : vector<16x512xf32>
      %20 = arith.mulf %19, %15 : vector<16x512xf32>
      %21 = arith.mulf %20, %15 : vector<16x512xf32>
      %22 = arith.addf %15, %21 : vector<16x512xf32>
      %cst_16 = arith.constant 0.797884583 : f32
      %23 = vector.broadcast %cst_16 : f32 to vector<16x512xf32>
      %24 = arith.mulf %23, %22 : vector<16x512xf32>
      %25 = math.tanh %24 : vector<16x512xf32>
      %cst_17 = arith.constant 1.000000e+00 : f32
      %26 = vector.broadcast %cst_17 : f32 to vector<16x512xf32>
      %27 = arith.addf %26, %25 : vector<16x512xf32>
      %28 = arith.mulf %17, %27 : vector<16x512xf32>
      %c0_18 = arith.constant 0 : index
      %c0_19 = arith.constant 0 : index
      %29 = vector.load %arg6[%c0_18, %c0_19] : memref<16x512xf32, #tpu.memory_space<vmem>>, vector<16x512xf32>
      tpu.vector_store %arg6[%c0_18, %c0_19], %28 {strides = array<i32>} : memref<16x512xf32, #tpu.memory_space<vmem>>, vector<16x512xf32>,
    } else {
    }
    return
  }
  func.func @transform_0(%arg0: i32, %arg1: i32, %arg2: i32) -> (i32, i32) {
    %c0_i32 = arith.constant 0 : i32
    return %arg0, %arg2 : i32, i32
  }
  func.func @transform_1(%arg0: i32, %arg1: i32, %arg2: i32) -> (i32, i32) {
    %c0_i32 = arith.constant 0 : i32
    return %arg2, %arg1 : i32, i32
  }
  func.func @transform_2(%arg0: i32, %arg1: i32, %arg2: i32) -> (i32, i32) {
    %c0_i32 = arith.constant 0 : i32
    %c0_i32_0 = arith.constant 0 : i32
    return %c0_i32, %arg1 : i32, i32
  }
  func.func @transform_3(%arg0: i32, %arg1: i32, %arg2: i32) -> (i32, i32) {
    %c0_i32 = arith.constant 0 : i32
    return %arg0, %arg1 : i32, i32
  }
}

module attributes {stable_mosaic.version = 11 : i64} {
  func.func @_linear_residual_ln_kernel(%arg0: i32, %arg1: i32, %arg2: memref<16x768xbf16, #tpu.memory_space<vmem>>, %arg3: memref<768x768xbf16, #tpu.memory_space<vmem>>, %arg4: memref<1x768xf32, #tpu.memory_space<vmem>>, %arg5: memref<16x768xf32, #tpu.memory_space<vmem>>, %arg6: memref<1x768xf32, #tpu.memory_space<vmem>>, %arg7: memref<1x768xf32, #tpu.memory_space<vmem>>, %arg8: memref<16x768xf32, #tpu.memory_space<vmem>>) attributes {dimension_semantics = [#tpu.dimension_semantics<parallel>, #tpu.dimension_semantics<arbitrary>], iteration_bounds = array<i64: 1, 4>, scalar_prefetch = 0 : i64, scratch_operands = 0 : i64, tpu.core_type = #tpu.core_type<tc>, window_params = [{transform_indices = @transform_0, window_bounds = array<i64: 16, 768>}, {transform_indices = @transform_1, window_bounds = array<i64: 768, 768>}, {pipeline_mode = #tpu.pipeline_mode<synchronous>, transform_indices = @transform_2, window_bounds = array<i64: 1, 768>}, {transform_indices = @transform_3, window_bounds = array<i64: 16, 768>}, {pipeline_mode = #tpu.pipeline_mode<synchronous>, transform_indices = @transform_4, window_bounds = array<i64: 1, 768>}, {pipeline_mode = #tpu.pipeline_mode<synchronous>, transform_indices = @transform_5, window_bounds = array<i64: 1, 768>}, {transform_indices = @transform_6, window_bounds = array<i64: 16, 768>}]} {
    %c0_i32 = arith.constant 0 : i32
    %0 = arith.cmpi eq, %arg1, %c0_i32 : i32
    %1 = arith.extui %0 : i1 to i32
    %c0_i32_0 = arith.constant 0 : i32
    %2 = arith.cmpi ne, %1, %c0_i32_0 : i32
    scf.if %2 {
      %cst_9 = arith.constant 0.000000e+00 : f32
      %12 = vector.broadcast %cst_9 : f32 to vector<16x768xf32>
      %c0_10 = arith.constant 0 : index
      %c0_11 = arith.constant 0 : index
      %13 = vector.load %arg8[%c0_10, %c0_11] : memref<16x768xf32, #tpu.memory_space<vmem>>, vector<16x768xf32>
      tpu.vector_store %arg8[%c0_10, %c0_11], %12 {strides = array<i32>} : memref<16x768xf32, #tpu.memory_space<vmem>>, vector<16x768xf32>,
    } else {
    }
    %c0 = arith.constant 0 : index
    %c0_1 = arith.constant 0 : index
    %3 = vector.load %arg8[%c0, %c0_1] : memref<16x768xf32, #tpu.memory_space<vmem>>, vector<16x768xf32>
    %c0_2 = arith.constant 0 : index
    %c0_3 = arith.constant 0 : index
    %4 = vector.load %arg2[%c0_2, %c0_3] : memref<16x768xbf16, #tpu.memory_space<vmem>>, vector<16x768xbf16>
    %c0_4 = arith.constant 0 : index
    %c0_5 = arith.constant 0 : index
    %5 = vector.load %arg3[%c0_4, %c0_5] : memref<768x768xbf16, #tpu.memory_space<vmem>>, vector<768x768xbf16>
    %cst = arith.constant dense<0.000000e+00> : vector<16x768xf32>
    %6 = tpu.matmul %4, %5, %cst {dimension_numbers = #tpu.dot_dimension_numbers<[1], [0], [0], [1], [0, 0, 1, 1], [], []>} : vector<16x768xbf16>, vector<768x768xbf16>, vector<16x768xf32> -> vector<16x768xf32>
    %7 = arith.addf %3, %6 : vector<16x768xf32>
    %c0_6 = arith.constant 0 : index
    %c0_7 = arith.constant 0 : index
    %8 = vector.load %arg8[%c0_6, %c0_7] : memref<16x768xf32, #tpu.memory_space<vmem>>, vector<16x768xf32>
    tpu.vector_store %arg8[%c0_6, %c0_7], %7 {strides = array<i32>} : memref<16x768xf32, #tpu.memory_space<vmem>>, vector<16x768xf32>,
    %c3_i32 = arith.constant 3 : i32
    %9 = arith.cmpi eq, %arg1, %c3_i32 : i32
    %10 = arith.extui %9 : i1 to i32
    %c0_i32_8 = arith.constant 0 : i32
    %11 = arith.cmpi ne, %10, %c0_i32_8 : i32
    scf.if %11 {
      %c0_9 = arith.constant 0 : index
      %c0_10 = arith.constant 0 : index
      %12 = vector.load %arg8[%c0_9, %c0_10] : memref<16x768xf32, #tpu.memory_space<vmem>>, vector<16x768xf32>
      %c0_11 = arith.constant 0 : index
      %c0_12 = arith.constant 0 : index
      %13 = vector.load %arg4[%c0_11, %c0_12] : memref<1x768xf32, #tpu.memory_space<vmem>>, vector<1x768xf32>
      %14 = vector.broadcast %13 : vector<1x768xf32> to vector<16x768xf32>
      %15 = arith.addf %12, %14 : vector<16x768xf32>
      %c0_13 = arith.constant 0 : index
      %c0_14 = arith.constant 0 : index
      %16 = vector.load %arg5[%c0_13, %c0_14] : memref<16x768xf32, #tpu.memory_space<vmem>>, vector<16x768xf32>
      %17 = arith.addf %15, %16 : vector<16x768xf32>
      %cst_15 = arith.constant dense<0.000000e+00> : vector<16xf32>
      %18 = vector.multi_reduction <add>, %17, %cst_15 [1] : vector<16x768xf32> to vector<16xf32>
      %19 = vector.shape_cast %18 : vector<16xf32> to vector<16x1xf32>
      %cst_16 = arith.constant 7.680000e+02 : f32
      %20 = vector.broadcast %cst_16 : f32 to vector<16x1xf32>
      %21 = arith.divf %19, %20 : vector<16x1xf32>
      %22 = vector.broadcast %21 : vector<16x1xf32> to vector<16x768xf32>
      %23 = arith.subf %17, %22 : vector<16x768xf32>
      %24 = arith.mulf %23, %23 : vector<16x768xf32>
      %cst_17 = arith.constant dense<0.000000e+00> : vector<16xf32>
      %25 = vector.multi_reduction <add>, %24, %cst_17 [1] : vector<16x768xf32> to vector<16xf32>
      %26 = vector.shape_cast %25 : vector<16xf32> to vector<16x1xf32>
      %cst_18 = arith.constant 7.680000e+02 : f32
      %27 = vector.broadcast %cst_18 : f32 to vector<16x1xf32>
      %28 = arith.divf %26, %27 : vector<16x1xf32>
      %cst_19 = arith.constant 9.99999996E-13 : f32
      %29 = vector.broadcast %cst_19 : f32 to vector<16x1xf32>
      %30 = arith.addf %28, %29 : vector<16x1xf32>
      %31 = math.rsqrt %30 : vector<16x1xf32>
      %32 = vector.broadcast %21 : vector<16x1xf32> to vector<16x768xf32>
      %33 = arith.subf %17, %32 : vector<16x768xf32>
      %34 = vector.broadcast %31 : vector<16x1xf32> to vector<16x768xf32>
      %35 = arith.mulf %33, %34 : vector<16x768xf32>
      %c0_20 = arith.constant 0 : index
      %c0_21 = arith.constant 0 : index
      %36 = vector.load %arg6[%c0_20, %c0_21] : memref<1x768xf32, #tpu.memory_space<vmem>>, vector<1x768xf32>
      %37 = vector.broadcast %36 : vector<1x768xf32> to vector<16x768xf32>
      %38 = arith.mulf %35, %37 : vector<16x768xf32>
      %c0_22 = arith.constant 0 : index
      %c0_23 = arith.constant 0 : index
      %39 = vector.load %arg7[%c0_22, %c0_23] : memref<1x768xf32, #tpu.memory_space<vmem>>, vector<1x768xf32>
      %40 = vector.broadcast %39 : vector<1x768xf32> to vector<16x768xf32>
      %41 = arith.addf %38, %40 : vector<16x768xf32>
      %c0_24 = arith.constant 0 : index
      %c0_25 = arith.constant 0 : index
      %42 = vector.load %arg8[%c0_24, %c0_25] : memref<16x768xf32, #tpu.memory_space<vmem>>, vector<16x768xf32>
      tpu.vector_store %arg8[%c0_24, %c0_25], %41 {strides = array<i32>} : memref<16x768xf32, #tpu.memory_space<vmem>>, vector<16x768xf32>,
    } else {
    }
    return
  }
  func.func @transform_0(%arg0: i32, %arg1: i32) -> (i32, i32) {
    %c0_i32 = arith.constant 0 : i32
    return %arg0, %arg1 : i32, i32
  }
  func.func @transform_1(%arg0: i32, %arg1: i32) -> (i32, i32) {
    %c0_i32 = arith.constant 0 : i32
    %c0_i32_0 = arith.constant 0 : i32
    return %arg1, %c0_i32 : i32, i32
  }
  func.func @transform_2(%arg0: i32, %arg1: i32) -> (i32, i32) {
    %c0_i32 = arith.constant 0 : i32
    %c0_i32_0 = arith.constant 0 : i32
    %c0_i32_1 = arith.constant 0 : i32
    return %c0_i32, %c0_i32_0 : i32, i32
  }
  func.func @transform_3(%arg0: i32, %arg1: i32) -> (i32, i32) {
    %c0_i32 = arith.constant 0 : i32
    %c0_i32_0 = arith.constant 0 : i32
    return %arg0, %c0_i32 : i32, i32
  }
  func.func @transform_4(%arg0: i32, %arg1: i32) -> (i32, i32) {
    %c0_i32 = arith.constant 0 : i32
    %c0_i32_0 = arith.constant 0 : i32
    %c0_i32_1 = arith.constant 0 : i32
    return %c0_i32, %c0_i32_0 : i32, i32
  }
  func.func @transform_5(%arg0: i32, %arg1: i32) -> (i32, i32) {
    %c0_i32 = arith.constant 0 : i32
    %c0_i32_0 = arith.constant 0 : i32
    %c0_i32_1 = arith.constant 0 : i32
    return %c0_i32, %c0_i32_0 : i32, i32
  }
  func.func @transform_6(%arg0: i32, %arg1: i32) -> (i32, i32) {
    %c0_i32 = arith.constant 0 : i32
    %c0_i32_0 = arith.constant 0 : i32
    return %arg0, %c0_i32 : i32, i32
  }
}

module attributes {stable_mosaic.version = 11 : i64} {
  func.func @_linear_kernel(%arg0: i32, %arg1: i32, %arg2: i32, %arg3: memref<2x768xbf16, #tpu.memory_space<vmem>>, %arg4: memref<768x384xbf16, #tpu.memory_space<vmem>>, %arg5: memref<1x384xf32, #tpu.memory_space<vmem>>, %arg6: memref<2x384xf32, #tpu.memory_space<vmem>>) attributes {dimension_semantics = [#tpu.dimension_semantics<parallel>, #tpu.dimension_semantics<parallel>, #tpu.dimension_semantics<arbitrary>], iteration_bounds = array<i64: 1, 2, 1>, scalar_prefetch = 0 : i64, scratch_operands = 0 : i64, tpu.core_type = #tpu.core_type<tc>, window_params = [{transform_indices = @transform_0, window_bounds = array<i64: 2, 768>}, {transform_indices = @transform_1, window_bounds = array<i64: 768, 384>}, {transform_indices = @transform_2, window_bounds = array<i64: 1, 384>}, {transform_indices = @transform_3, window_bounds = array<i64: 2, 384>}]} {
    %c0_i32 = arith.constant 0 : i32
    %0 = arith.cmpi eq, %arg2, %c0_i32 : i32
    %1 = arith.extui %0 : i1 to i32
    %c0_i32_0 = arith.constant 0 : i32
    %2 = arith.cmpi ne, %1, %c0_i32_0 : i32
    scf.if %2 {
      %cst_10 = arith.constant 0.000000e+00 : f32
      %12 = vector.broadcast %cst_10 : f32 to vector<2x384xf32>
      %c0_11 = arith.constant 0 : index
      %c0_12 = arith.constant 0 : index
      %13 = vector.load %arg6[%c0_11, %c0_12] : memref<2x384xf32, #tpu.memory_space<vmem>>, vector<2x384xf32>
      tpu.vector_store %arg6[%c0_11, %c0_12], %12 {strides = array<i32>} : memref<2x384xf32, #tpu.memory_space<vmem>>, vector<2x384xf32>,
    } else {
    }
    %c0 = arith.constant 0 : index
    %c0_1 = arith.constant 0 : index
    %3 = vector.load %arg6[%c0, %c0_1] : memref<2x384xf32, #tpu.memory_space<vmem>>, vector<2x384xf32>
    %c0_2 = arith.constant 0 : index
    %c0_3 = arith.constant 0 : index
    %4 = vector.load %arg3[%c0_2, %c0_3] : memref<2x768xbf16, #tpu.memory_space<vmem>>, vector<2x768xbf16>
    %c0_4 = arith.constant 0 : index
    %c0_5 = arith.constant 0 : index
    %5 = vector.load %arg4[%c0_4, %c0_5] : memref<768x384xbf16, #tpu.memory_space<vmem>>, vector<768x384xbf16>
    %cst = arith.constant dense<0.000000e+00> : vector<2x384xf32>
    %6 = tpu.matmul %4, %5, %cst {dimension_numbers = #tpu.dot_dimension_numbers<[1], [0], [0], [1], [0, 0, 1, 1], [], []>} : vector<2x768xbf16>, vector<768x384xbf16>, vector<2x384xf32> -> vector<2x384xf32>
    %7 = arith.addf %3, %6 : vector<2x384xf32>
    %c0_6 = arith.constant 0 : index
    %c0_7 = arith.constant 0 : index
    %8 = vector.load %arg6[%c0_6, %c0_7] : memref<2x384xf32, #tpu.memory_space<vmem>>, vector<2x384xf32>
    tpu.vector_store %arg6[%c0_6, %c0_7], %7 {strides = array<i32>} : memref<2x384xf32, #tpu.memory_space<vmem>>, vector<2x384xf32>,
    %c0_i32_8 = arith.constant 0 : i32
    %9 = arith.cmpi eq, %arg2, %c0_i32_8 : i32
    %10 = arith.extui %9 : i1 to i32
    %c0_i32_9 = arith.constant 0 : i32
    %11 = arith.cmpi ne, %10, %c0_i32_9 : i32
    scf.if %11 {
      %c0_10 = arith.constant 0 : index
      %c0_11 = arith.constant 0 : index
      %12 = vector.load %arg6[%c0_10, %c0_11] : memref<2x384xf32, #tpu.memory_space<vmem>>, vector<2x384xf32>
      %c0_12 = arith.constant 0 : index
      %c0_13 = arith.constant 0 : index
      %13 = vector.load %arg5[%c0_12, %c0_13] : memref<1x384xf32, #tpu.memory_space<vmem>>, vector<1x384xf32>
      %14 = vector.broadcast %13 : vector<1x384xf32> to vector<2x384xf32>
      %15 = arith.addf %12, %14 : vector<2x384xf32>
      %16 = math.tanh %15 : vector<2x384xf32>
      %c0_14 = arith.constant 0 : index
      %c0_15 = arith.constant 0 : index
      %17 = vector.load %arg6[%c0_14, %c0_15] : memref<2x384xf32, #tpu.memory_space<vmem>>, vector<2x384xf32>
      tpu.vector_store %arg6[%c0_14, %c0_15], %16 {strides = array<i32>} : memref<2x384xf32, #tpu.memory_space<vmem>>, vector<2x384xf32>,
    } else {
    }
    return
  }
  func.func @transform_0(%arg0: i32, %arg1: i32, %arg2: i32) -> (i32, i32) {
    %c0_i32 = arith.constant 0 : i32
    return %arg0, %arg2 : i32, i32
  }
  func.func @transform_1(%arg0: i32, %arg1: i32, %arg2: i32) -> (i32, i32) {
    %c0_i32 = arith.constant 0 : i32
    return %arg2, %arg1 : i32, i32
  }
  func.func @transform_2(%arg0: i32, %arg1: i32, %arg2: i32) -> (i32, i32) {
    %c0_i32 = arith.constant 0 : i32
    %c0_i32_0 = arith.constant 0 : i32
    return %c0_i32, %arg1 : i32, i32
  }
  func.func @transform_3(%arg0: i32, %arg1: i32, %arg2: i32) -> (i32, i32) {
    %c0_i32 = arith.constant 0 : i32
    return %arg0, %arg1 : i32, i32
  }
}

module attributes {stable_mosaic.version = 11 : i64} {
  func.func @_linear_kernel(%arg0: i32, %arg1: i32, %arg2: i32, %arg3: memref<2x768xbf16, #tpu.memory_space<vmem>>, %arg4: memref<768x128xbf16, #tpu.memory_space<vmem>>, %arg5: memref<1x128xf32, #tpu.memory_space<vmem>>, %arg6: memref<2x128xf32, #tpu.memory_space<vmem>>) attributes {dimension_semantics = [#tpu.dimension_semantics<parallel>, #tpu.dimension_semantics<parallel>, #tpu.dimension_semantics<arbitrary>], iteration_bounds = array<i64: 1, 1, 1>, scalar_prefetch = 0 : i64, scratch_operands = 0 : i64, tpu.core_type = #tpu.core_type<tc>, window_params = [{transform_indices = @transform_0, window_bounds = array<i64: 2, 768>}, {transform_indices = @transform_1, window_bounds = array<i64: 768, 128>}, {transform_indices = @transform_2, window_bounds = array<i64: 1, 128>}, {transform_indices = @transform_3, window_bounds = array<i64: 2, 128>}]} {
    %c0_i32 = arith.constant 0 : i32
    %0 = arith.cmpi eq, %arg2, %c0_i32 : i32
    %1 = arith.extui %0 : i1 to i32
    %c0_i32_0 = arith.constant 0 : i32
    %2 = arith.cmpi ne, %1, %c0_i32_0 : i32
    scf.if %2 {
      %cst_10 = arith.constant 0.000000e+00 : f32
      %12 = vector.broadcast %cst_10 : f32 to vector<2x128xf32>
      %c0_11 = arith.constant 0 : index
      %c0_12 = arith.constant 0 : index
      %13 = vector.load %arg6[%c0_11, %c0_12] : memref<2x128xf32, #tpu.memory_space<vmem>>, vector<2x128xf32>
      tpu.vector_store %arg6[%c0_11, %c0_12], %12 {strides = array<i32>} : memref<2x128xf32, #tpu.memory_space<vmem>>, vector<2x128xf32>,
    } else {
    }
    %c0 = arith.constant 0 : index
    %c0_1 = arith.constant 0 : index
    %3 = vector.load %arg6[%c0, %c0_1] : memref<2x128xf32, #tpu.memory_space<vmem>>, vector<2x128xf32>
    %c0_2 = arith.constant 0 : index
    %c0_3 = arith.constant 0 : index
    %4 = vector.load %arg3[%c0_2, %c0_3] : memref<2x768xbf16, #tpu.memory_space<vmem>>, vector<2x768xbf16>
    %c0_4 = arith.constant 0 : index
    %c0_5 = arith.constant 0 : index
    %5 = vector.load %arg4[%c0_4, %c0_5] : memref<768x128xbf16, #tpu.memory_space<vmem>>, vector<768x128xbf16>
    %cst = arith.constant dense<0.000000e+00> : vector<2x128xf32>
    %6 = tpu.matmul %4, %5, %cst {dimension_numbers = #tpu.dot_dimension_numbers<[1], [0], [0], [1], [0, 0, 1, 1], [], []>} : vector<2x768xbf16>, vector<768x128xbf16>, vector<2x128xf32> -> vector<2x128xf32>
    %7 = arith.addf %3, %6 : vector<2x128xf32>
    %c0_6 = arith.constant 0 : index
    %c0_7 = arith.constant 0 : index
    %8 = vector.load %arg6[%c0_6, %c0_7] : memref<2x128xf32, #tpu.memory_space<vmem>>, vector<2x128xf32>
    tpu.vector_store %arg6[%c0_6, %c0_7], %7 {strides = array<i32>} : memref<2x128xf32, #tpu.memory_space<vmem>>, vector<2x128xf32>,
    %c0_i32_8 = arith.constant 0 : i32
    %9 = arith.cmpi eq, %arg2, %c0_i32_8 : i32
    %10 = arith.extui %9 : i1 to i32
    %c0_i32_9 = arith.constant 0 : i32
    %11 = arith.cmpi ne, %10, %c0_i32_9 : i32
    scf.if %11 {
      %c0_10 = arith.constant 0 : index
      %c0_11 = arith.constant 0 : index
      %12 = vector.load %arg6[%c0_10, %c0_11] : memref<2x128xf32, #tpu.memory_space<vmem>>, vector<2x128xf32>
      %c0_12 = arith.constant 0 : index
      %c0_13 = arith.constant 0 : index
      %13 = vector.load %arg5[%c0_12, %c0_13] : memref<1x128xf32, #tpu.memory_space<vmem>>, vector<1x128xf32>
      %14 = vector.broadcast %13 : vector<1x128xf32> to vector<2x128xf32>
      %15 = arith.addf %12, %14 : vector<2x128xf32>
      %c0_14 = arith.constant 0 : index
      %c0_15 = arith.constant 0 : index
      %16 = vector.load %arg6[%c0_14, %c0_15] : memref<2x128xf32, #tpu.memory_space<vmem>>, vector<2x128xf32>
      tpu.vector_store %arg6[%c0_14, %c0_15], %15 {strides = array<i32>} : memref<2x128xf32, #tpu.memory_space<vmem>>, vector<2x128xf32>,
    } else {
    }
    return
  }
  func.func @transform_0(%arg0: i32, %arg1: i32, %arg2: i32) -> (i32, i32) {
    %c0_i32 = arith.constant 0 : i32
    return %arg0, %arg2 : i32, i32
  }
  func.func @transform_1(%arg0: i32, %arg1: i32, %arg2: i32) -> (i32, i32) {
    %c0_i32 = arith.constant 0 : i32
    return %arg2, %arg1 : i32, i32
  }
  func.func @transform_2(%arg0: i32, %arg1: i32, %arg2: i32) -> (i32, i32) {
    %c0_i32 = arith.constant 0 : i32
    %c0_i32_0 = arith.constant 0 : i32
    return %c0_i32, %arg1 : i32, i32
  }
  func.func @transform_3(%arg0: i32, %arg1: i32, %arg2: i32) -> (i32, i32) {
    %c0_i32 = arith.constant 0 : i32
    return %arg0, %arg1 : i32, i32
  }
}

</mosaic_0001>

<bundles_post_ra>
// kernel: bert_forward.13
= control target key start
LH: loop header
LB: loop body
LE: loop exit
PB: predicated region body
PF: predicated region fallthrough
CT: control target
= control target key end

     0   :  { %v101_v63 = vlaneseq  ;;  %s360_s0 = inlined_call_operand.vmem [shape: f32[16,768], index: 0, kind: input, shape index: {}]   ;;  %s361_s1 = inlined_call_operand.vmem [shape: f32[1,768], index: 1, kind: input, shape index: {}]   ;;  %s362_s2 = inlined_call_operand.vmem [shape: f32[1,768], index: 2, kind: input, shape index: {}]   ;;  %s363_s3 = inlined_call_operand.vmem [shape: f32[16,768], index: 3, kind: output, shape index: {}]  }
   0x1   :  { %v14_v0 = vld [vmem:[%s360_s0] sm:$0xff]  ;;  %v15_v1 = vld [vmem:[%s360_s0 + $0x8] sm:$0xff]  ;;  %v16_v2 = vld [vmem:[%s360_s0 + $0x10] sm:$0xff] }
   0x2   :  { %v17_v3 = vld [vmem:[%s360_s0 + $0x18] sm:$0xff]  ;;  %v26_v4 = vadd.f32 %v15_v1, %v14_v0  ;;  %v20_v5 = vld [vmem:[%s360_s0 + $0x30] sm:$0xff]  ;;  %v22_v7 = vld [vmem:[%s360_s0 + $0x40] sm:$0xff] }
   0x3   :  { %v21_v6 = vld [vmem:[%s360_s0 + $0x38] sm:$0xff]  ;;  %v18_v10 = vld [vmem:[%s360_s0 + $0x20] sm:$0xff]  ;;  %v23_v11 = vld [vmem:[%s360_s0 + $0x48] sm:$0xff] }
   0x4   :  { %v27_v8 = vadd.f32 %v26_v4, %v16_v2  ;;  %v33_v9 = vadd.f32 %v21_v6, %v20_v5  ;;  %v19_v14 = vld [vmem:[%s360_s0 + $0x28] sm:$0xff]  ;;  %v24_v15 = vld [vmem:[%s360_s0 + $0x50] sm:$0xff]  ;;  %v25_v18 = vld [vmem:[%s360_s0 + $0x58] sm:$0xff] }
   0x6   :  { %v28_v12 = vadd.f32 %v27_v8, %v17_v3  ;;  %v34_v13 = vadd.f32 %v33_v9, %v22_v7 }
   0x8   :  { %v29_v16 = vadd.f32 %v28_v12, %v18_v10  ;;  %v35_v17 = vadd.f32 %v34_v13, %v23_v11 }
   0xa   :  { %v30_v19 = vadd.f32 %v29_v16, %v19_v14  ;;  %v36_v20 = vadd.f32 %v35_v17, %v24_v15 }
   0xc   :  { %31 = vadd.xlane.f32.xlu0 %v30_v19  ;;  %v37_v21 = vadd.f32 %v36_v20, %v25_v18 }
  0x10   :  { %38 = vadd.xlane.f32.xlu0 %v37_v21 }
  0x95   :  { %v32_v22 = vpop.xlane.xlu0 %31 }
  0x96   :  { %v41_v23 = vmul.f32 0.0013020834, %v32_v22 }
  0x98   :  { %v263_v24 = vsub.f32 %v14_v0, %v41_v23  ;;  %v265_v25 = vsub.f32 %v15_v1, %v41_v23  ;;  %v267_v26 = vsub.f32 %v16_v2, %v41_v23  ;;  %v269_v28 = vsub.f32 %v17_v3, %v41_v23 }
  0x99   :  { %v39_v27 = vpop.xlane.xlu0 %38  ;;  %v275_v32 = vsub.f32 %v18_v10, %v41_v23  ;;  %v48_v38 = vsub.f32 %v19_v14, %v41_v23  ;;  %v102_v3 = vshrl.u32 %v101_v63, 7 }
  0x9a   :  { %v42_v29 = vmul.f32 0.0013020834, %v39_v27  ;;  %v55_v30 = vmul.f32 %v263_v24, %v263_v24  ;;  %v56_v31 = vmul.f32 %v265_v25, %v265_v25  ;;  %v57_v33 = vmul.f32 %v267_v26, %v267_v26 }
  0x9b   :  { %v58_v39 = vmul.f32 %v269_v28, %v269_v28  ;;  %v59_v44 = vmul.f32 %v275_v32, %v275_v32  ;;  %v60_v49 = vmul.f32 %v48_v38, %v48_v38  ;;  %v103_v4 = vsub.s32 0, %v102_v3 }
  0x9c   :  { %v67_v34 = vadd.f32 %v56_v31, %v55_v30  ;;  %v279_v35 = vsub.f32 %v20_v5, %v42_v29  ;;  %v281_v36 = vsub.f32 %v21_v6, %v42_v29  ;;  %v283_v37 = vsub.f32 %v22_v7, %v42_v29  ;;  %v99_v6 = vld [vmem:[%s361_s1] sm:$0x3f] }
  0x9d   :  { %v287_v41 = vsub.f32 %v23_v11, %v42_v29  ;;  %v295_v46 = vsub.f32 %v24_v15, %v42_v29  ;;  %v299_v51 = vsub.f32 %v25_v18, %v42_v29  ;;  %v107_v5 = vsub.s32 1, %v102_v3  ;;  %v143_v11 = vld [vmem:[%s362_s2] sm:$0x3f] }
  0x9e   :  { %v68_v40 = vadd.f32 %v67_v34, %v57_v33  ;;  %v61_v42 = vmul.f32 %v279_v35, %v279_v35  ;;  %v62_v43 = vmul.f32 %v281_v36, %v281_v36  ;;  %v63_v47 = vmul.f32 %v283_v37, %v283_v37 }
  0x9f   :  { %v64_v52 = vmul.f32 %v287_v41, %v287_v41  ;;  %v65_v55 = vmul.f32 %v295_v46, %v295_v46  ;;  %v66_v57 = vmul.f32 %v299_v51, %v299_v51  ;;  %v111_v7 = vsub.s32 2, %v102_v3 }
  0xa0   :  { %v69_v45 = vadd.f32 %v68_v40, %v58_v39  ;;  %v74_v48 = vadd.f32 %v62_v43, %v61_v42  ;;  %v115_v8 = vsub.s32 3, %v102_v3  ;;  %v119_v9 = vsub.s32 4, %v102_v3 }
  0xa1   :  { %v123_v10 = vsub.s32 5, %v102_v3  ;;  %v104_v12 = vrot.slane %v99_v6, %v103_v4  ;;  %v108_v13 = vrot.slane %v99_v6, %v107_v5  ;;  %v112_v14 = vrot.slane %v99_v6, %v111_v7 }
  0xa2   :  { %v70_v50 = vadd.f32 %v69_v45, %v59_v44  ;;  %v75_v53 = vadd.f32 %v74_v48, %v63_v47  ;;  %v116_v15 = vrot.slane %v99_v6, %v115_v8  ;;  %v120_v16 = vrot.slane %v99_v6, %v119_v9 }
  0xa3   :  { %v124_v17 = vrot.slane %v99_v6, %v123_v10  ;;  %v148_v19 = vrot.slane %v143_v11, %v103_v4  ;;  %v152_v20 = vrot.slane %v143_v11, %v107_v5  ;;  %v156_v21 = vrot.slane %v143_v11, %v111_v7 }
  0xa4   :  { %v71_v54 = vadd.f32 %v70_v50, %v60_v49  ;;  %v76_v56 = vadd.f32 %v75_v53, %v64_v52  ;;  %v160_v22 = vrot.slane %v143_v11, %v115_v8  ;;  %v164_v31 = vrot.slane %v143_v11, %v119_v9 }
  0xa5   :  { %v168_v33 = vrot.slane %v143_v11, %v123_v10 }
  0xa6   :  { %72 = vadd.xlane.f32.xlu1 %v71_v54  ;;  %v77_v58 = vadd.f32 %v76_v56, %v65_v55 }
  0xa8   :  { %v78_v59 = vadd.f32 %v77_v58, %v66_v57 }
  0xaa   :  { %79 = vadd.xlane.f32.xlu1 %v78_v59 }
 0x12f   :  { %v73_v60 = vpop.xlane.xlu1 %72 }
 0x130   :  { %v81_v61 = vmul.f32 0.0013020834, %v73_v60 }
 0x132   :  { %v83_v62 = vadd.f32 1e-12, %v81_v61 }
 0x133   :  { %v80_v0 = vpop.xlane.xlu1 %79 }
 0x134   :  { %203 = vrsqrt.f32 %v83_v62  ;;  %v82_v1 = vmul.f32 0.0013020834, %v80_v0 }
 0x136   :  { %v84_v2 = vadd.f32 1e-12, %v82_v1 }
 0x138   :  { %205 = vrsqrt.f32 %v84_v2 }
 0x141   :  { %v204_v18 = vpop.eup %203 }
 0x142   :  { %v87_v23 = vmul.f32 %v204_v18, %v263_v24  ;;  %v88_v27 = vmul.f32 %v204_v18, %v265_v25  ;;  %v89_v29 = vmul.f32 %v204_v18, %v267_v26  ;;  %v90_v30 = vmul.f32 %v204_v18, %v269_v28 }
 0x143   :  { %v91_v34 = vmul.f32 %v204_v18, %v275_v32  ;;  %v92_v39 = vmul.f32 %v204_v18, %v48_v38 }
 0x144   :  { %v131_v40 = vmul.f32 %v104_v12, %v87_v23  ;;  %v132_v42 = vmul.f32 %v108_v13, %v88_v27  ;;  %v133_v43 = vmul.f32 %v112_v14, %v89_v29  ;;  %v134_v44 = vmul.f32 %v116_v15, %v90_v30 }
 0x145   :  { %v206_v45 = vpop.eup %205  ;;  %v135_v47 = vmul.f32 %v120_v16, %v91_v34  ;;  %v136_v48 = vmul.f32 %v124_v17, %v92_v39 }
 0x146   :  { %v175_v49 = vadd.f32 %v148_v19, %v131_v40  ;;  %v176_v24 = vadd.f32 %v152_v20, %v132_v42  ;;  %v177_v50 = vadd.f32 %v156_v21, %v133_v43  ;;  %v178_v25 = vadd.f32 %v160_v22, %v134_v44 }
 0x147   :  { %v179_v52 = vadd.f32 %v164_v31, %v135_v47  ;;  %v180_v26 = vadd.f32 %v168_v33, %v136_v48  ;;  %v93_v28 = vmul.f32 %v206_v45, %v279_v35  ;;  %v94_v53 = vmul.f32 %v206_v45, %v281_v36 }
 0x148   :  { %187 = vst [vmem:[%s363_s3] sm:$0xff] %v175_v49  ;;  %188 = vst [vmem:[%s363_s3 + $0x8] sm:$0xff] %v176_v24  ;;  %v95_v32 = vmul.f32 %v206_v45, %v283_v37  ;;  %v96_v35 = vmul.f32 %v206_v45, %v287_v41  ;;  %v97_v36 = vmul.f32 %v206_v45, %v295_v46 }
 0x149   :  { %189 = vst [vmem:[%s363_s3 + $0x10] sm:$0xff] %v177_v50  ;;  %190 = vst [vmem:[%s363_s3 + $0x18] sm:$0xff] %v178_v25  ;;  %v98_v38 = vmul.f32 %v206_v45, %v299_v51  ;;  %v137_v54 = vmul.f32 %v104_v12, %v93_v28  ;;  %v138_v55 = vmul.f32 %v108_v13, %v94_v53 }
 0x14a   :  { %191 = vst [vmem:[%s363_s3 + $0x20] sm:$0xff] %v179_v52  ;;  %192 = vst [vmem:[%s363_s3 + $0x28] sm:$0xff] %v180_v26  ;;  %v139_v56 = vmul.f32 %v112_v14, %v95_v32  ;;  %v140_v57 = vmul.f32 %v116_v15, %v96_v35  ;;  %v141_v58 = vmul.f32 %v120_v16, %v97_v36 }
 0x14b   :  { %v142_v37 = vmul.f32 %v124_v17, %v98_v38  ;;  %v181_v59 = vadd.f32 %v148_v19, %v137_v54  ;;  %v182_v41 = vadd.f32 %v152_v20, %v138_v55 }
 0x14c   :  { %v183_v60 = vadd.f32 %v156_v21, %v139_v56  ;;  %v184_v46 = vadd.f32 %v160_v22, %v140_v57  ;;  %v185_v61 = vadd.f32 %v164_v31, %v141_v58 }
 0x14d   :  { %v186_v51 = vadd.f32 %v168_v33, %v142_v37  ;;  %193 = vst [vmem:[%s363_s3 + $0x30] sm:$0xff] %v181_v59  ;;  %194 = vst [vmem:[%s363_s3 + $0x38] sm:$0xff] %v182_v41 }
 0x14e   :  { %195 = vst [vmem:[%s363_s3 + $0x40] sm:$0xff] %v183_v60  ;;  %196 = vst [vmem:[%s363_s3 + $0x48] sm:$0xff] %v184_v46 }
 0x14f   :  { %197 = vst [vmem:[%s363_s3 + $0x50] sm:$0xff] %v185_v61  ;;  %198 = vst [vmem:[%s363_s3 + $0x58] sm:$0xff] %v186_v51 }

// kernel: bert_forward.14
= control target key start
LH: loop header
LB: loop body
LE: loop exit
PB: predicated region body
PF: predicated region fallthrough
CT: control target
= control target key end

     0   :  { %s2855_s12 = smov 0   ;;  %s2857_s13 = smov 0   ;;  %s3521_s0 = inlined_call_operand.vmem [shape: bf16[16,768], index: 0, kind: input, shape index: {}]   ;;  %s3522_s1 = inlined_call_operand.vmem [shape: bf16[768,2304], index: 1, kind: input, shape index: {}]   ;;  %s3523_s2 = inlined_call_operand.vmem [shape: f32[1,2304], index: 2, kind: input, shape index: {}]   ;;  %s3524_s3 = inlined_call_operand.vmem [shape: f32[16,2304], index: 3, kind: output, shape index: {}]  }
   0x1   :  { %s2859_s14 = smov 0   ;;  %s2861_s15 = smov 0  }
   0x2   :  { %s2863_s16 = smov 0  }
   0x3 LB: > { %s28_s17 = sadd.s32 1, %s2829_s15  ;;  %s2130_s18 = sadd.s32 4294967295, %s2833_s16   ;;  %s2833_s16 = sphi %s2863_s16, %s13_s16   ;;  %s2829_s15 = sphi %s2861_s15, %s3529_s15   ;;  %s2825_s14 = sphi %s2859_s14, %s3528_s14   ;;  %s2821_s13 = sphi %s2857_s13, %s3527_s13   ;;  %s2817_s12 = sphi %s2855_s12, %s3526_s12  }
   0x4   : > { %p30_p0 = scmp.ge.s32.totalorder %s28_s17, 6  ;;  %p76_p1 = scmp.ne.s32.totalorder %s2821_s13, %s2817_s12 }
   0x5   : > { %p77_p2 = scmp.eq.s32.totalorder %s2833_s16, 0  ;;  %p134_p4 = scmp.eq.s32.totalorder %s2130_s18, 5 }
   0x6   : > { %s3531_s17 = smov (%p30_p0, %s28_s17), 0  ;;  %s69_s20 = sadd.s32 1, %s2821_s13 }
   0x7   : > { %p78_p3 = por %p77_p2, %p76_p1  ;;  %s65_s19 = ssub.s32 %s2829_s15, %s3531_s17 }
   0x8   : > { %p67_p5 = scmp.eq.s32.totalorder %s65_s19, 0  ;;  %p2890_p6 = por %p134_p4, %p76_p1 }
   0x9   : > { %p2134_p7 = scmp.ge.s32.totalorder %s2833_s16, 6 }
   0xa   : > { %s2895_s22 = scalar_select %p67_p5, %s2821_s13, %s69_s20  }
   0xb   : > { %171 = sbr.rel (%p2134_p7) target bundleno = 133 (0x85), region = 20 }
  0x10   : > { %174 = sbr.rel (!%p78_p3) target bundleno = 133 (0x85), region = 24  ;;  %s176_s23 = sand.u32 (%p78_p3), 1, %s2821_s13  }
  0x11   : > { %s2482_s24 = smul.u32 (%p78_p3), 12, %s2829_s15 }
  0x12   : > { %s2550_s25 = smul.u32 (%p78_p3), 1152, %s176_s23 }
  0x13   : > { %s2903_s28 = scalar_lea.vmem (%p78_p3), %s3522_s1, %s2482_s24 }
  0x14   : > { %v199_v0 = vld [vmem:[%s2903_s28] sm:$0xff] (%p78_p3)  ;;  %v201_v1 = vld [vmem:[%s2903_s28 + $0x48] sm:$0xff] (%p78_p3)  ;;  %v203_v2 = vld [vmem:[%s2903_s28 + $0x90] sm:$0xff] (%p78_p3)  ;;  %s2908_s29 = scalar_lea.vmem (%p78_p3), [#allocation2], %s2550_s25 }
  0x15   : > { %200 = vst [vmem:[%s2908_s29] sm:$0xff] %v199_v0  ;;  %202 = vst [vmem:[%s2908_s29 + $0xc] sm:$0xff] %v201_v1  ;;  %v205_v3 = vld [vmem:[%s2903_s28 + $0xd8] sm:$0xff]  ;;  %v207_v4 = vld [vmem:[%s2903_s28 + $0x120] sm:$0xff] }
  0x16   : > { %204 = vst [vmem:[%s2908_s29 + $0x18] sm:$0xff] %v203_v2  ;;  %v209_v5 = vld [vmem:[%s2903_s28 + $0x168] sm:$0xff]  ;;  %206 = vst [vmem:[%s2908_s29 + $0x24] sm:$0xff] %v205_v3  ;;  %v211_v6 = vld [vmem:[%s2903_s28 + $0x1b0] sm:$0xff] }
  0x17   : > { %208 = vst [vmem:[%s2908_s29 + $0x30] sm:$0xff] %v207_v4  ;;  %210 = vst [vmem:[%s2908_s29 + $0x3c] sm:$0xff] %v209_v5  ;;  %v213_v7 = vld [vmem:[%s2903_s28 + $0x1f8] sm:$0xff]  ;;  %v215_v8 = vld [vmem:[%s2903_s28 + $0x240] sm:$0xff] }
  0x18   : > { %212 = vst [vmem:[%s2908_s29 + $0x48] sm:$0xff] %v211_v6  ;;  %214 = vst [vmem:[%s2908_s29 + $0x54] sm:$0xff] %v213_v7  ;;  %v217_v9 = vld [vmem:[%s2903_s28 + $0x288] sm:$0xff]  ;;  %v219_v10 = vld [vmem:[%s2903_s28 + $0x2d0] sm:$0xff] }
  0x19   : > { %216 = vst [vmem:[%s2908_s29 + $0x60] sm:$0xff] %v215_v8  ;;  %v221_v11 = vld [vmem:[%s2903_s28 + $0x318] sm:$0xff]  ;;  %218 = vst [vmem:[%s2908_s29 + $0x6c] sm:$0xff] %v217_v9  ;;  %v223_v12 = vld [vmem:[%s2903_s28 + $0x360] sm:$0xff] }
  0x1a   : > { %220 = vst [vmem:[%s2908_s29 + $0x78] sm:$0xff] %v219_v10  ;;  %222 = vst [vmem:[%s2908_s29 + $0x84] sm:$0xff] %v221_v11  ;;  %v225_v13 = vld [vmem:[%s2903_s28 + $0x3a8] sm:$0xff]  ;;  %v227_v14 = vld [vmem:[%s2903_s28 + $0x3f0] sm:$0xff] }
  0x1b   : > { %224 = vst [vmem:[%s2908_s29 + $0x90] sm:$0xff] %v223_v12  ;;  %226 = vst [vmem:[%s2908_s29 + $0x9c] sm:$0xff] %v225_v13  ;;  %v229_v15 = vld [vmem:[%s2903_s28 + $0x438] sm:$0xff]  ;;  %v231_v16 = vld [vmem:[%s2903_s28 + $0x480] sm:$0xff] }
  0x1c   : > { %228 = vst [vmem:[%s2908_s29 + $0xa8] sm:$0xff] %v227_v14  ;;  %v233_v17 = vld [vmem:[%s2903_s28 + $0x4c8] sm:$0xff]  ;;  %230 = vst [vmem:[%s2908_s29 + $0xb4] sm:$0xff] %v229_v15  ;;  %v235_v18 = vld [vmem:[%s2903_s28 + $0x510] sm:$0xff] }
  0x1d   : > { %232 = vst [vmem:[%s2908_s29 + $0xc0] sm:$0xff] %v231_v16  ;;  %234 = vst [vmem:[%s2908_s29 + $0xcc] sm:$0xff] %v233_v17  ;;  %v237_v19 = vld [vmem:[%s2903_s28 + $0x558] sm:$0xff]  ;;  %v239_v20 = vld [vmem:[%s2903_s28 + $0x5a0] sm:$0xff] }
  0x1e   : > { %236 = vst [vmem:[%s2908_s29 + $0xd8] sm:$0xff] %v235_v18  ;;  %238 = vst [vmem:[%s2908_s29 + $0xe4] sm:$0xff] %v237_v19  ;;  %v241_v21 = vld [vmem:[%s2903_s28 + $0x5e8] sm:$0xff]  ;;  %v243_v22 = vld [vmem:[%s2903_s28 + $0x630] sm:$0xff] }
  0x1f   : > { %240 = vst [vmem:[%s2908_s29 + $0xf0] sm:$0xff] %v239_v20  ;;  %v245_v23 = vld [vmem:[%s2903_s28 + $0x678] sm:$0xff]  ;;  %242 = vst [vmem:[%s2908_s29 + $0xfc] sm:$0xff] %v241_v21  ;;  %v247_v24 = vld [vmem:[%s2903_s28 + $0x6c0] sm:$0xff] }
  0x20   : > { %244 = vst [vmem:[%s2908_s29 + $0x108] sm:$0xff] %v243_v22  ;;  %246 = vst [vmem:[%s2908_s29 + $0x114] sm:$0xff] %v245_v23  ;;  %v249_v25 = vld [vmem:[%s2903_s28 + $0x708] sm:$0xff]  ;;  %v251_v26 = vld [vmem:[%s2903_s28 + $0x750] sm:$0xff] }
  0x21   : > { %248 = vst [vmem:[%s2908_s29 + $0x120] sm:$0xff] %v247_v24  ;;  %250 = vst [vmem:[%s2908_s29 + $0x12c] sm:$0xff] %v249_v25  ;;  %v253_v27 = vld [vmem:[%s2903_s28 + $0x798] sm:$0xff]  ;;  %v255_v28 = vld [vmem:[%s2903_s28 + $0x7e0] sm:$0xff] }
  0x22   : > { %252 = vst [vmem:[%s2908_s29 + $0x138] sm:$0xff] %v251_v26  ;;  %v257_v29 = vld [vmem:[%s2903_s28 + $0x828] sm:$0xff]  ;;  %254 = vst [vmem:[%s2908_s29 + $0x144] sm:$0xff] %v253_v27  ;;  %v259_v30 = vld [vmem:[%s2903_s28 + $0x870] sm:$0xff] }
  0x23   : > { %256 = vst [vmem:[%s2908_s29 + $0x150] sm:$0xff] %v255_v28  ;;  %258 = vst [vmem:[%s2908_s29 + $0x15c] sm:$0xff] %v257_v29  ;;  %v261_v31 = vld [vmem:[%s2903_s28 + $0x8b8] sm:$0xff]  ;;  %v263_v32 = vld [vmem:[%s2903_s28 + $0x900] sm:$0xff] }
  0x24   : > { %260 = vst [vmem:[%s2908_s29 + $0x168] sm:$0xff] %v259_v30  ;;  %262 = vst [vmem:[%s2908_s29 + $0x174] sm:$0xff] %v261_v31  ;;  %v265_v33 = vld [vmem:[%s2903_s28 + $0x948] sm:$0xff]  ;;  %v267_v34 = vld [vmem:[%s2903_s28 + $0x990] sm:$0xff] }
  0x25   : > { %264 = vst [vmem:[%s2908_s29 + $0x180] sm:$0xff] %v263_v32  ;;  %v269_v35 = vld [vmem:[%s2903_s28 + $0x9d8] sm:$0xff]  ;;  %266 = vst [vmem:[%s2908_s29 + $0x18c] sm:$0xff] %v265_v33  ;;  %v271_v36 = vld [vmem:[%s2903_s28 + $0xa20] sm:$0xff] }
  0x26   : > { %268 = vst [vmem:[%s2908_s29 + $0x198] sm:$0xff] %v267_v34  ;;  %270 = vst [vmem:[%s2908_s29 + $0x1a4] sm:$0xff] %v269_v35  ;;  %v273_v37 = vld [vmem:[%s2903_s28 + $0xa68] sm:$0xff]  ;;  %v275_v38 = vld [vmem:[%s2903_s28 + $0xab0] sm:$0xff] }
  0x27   : > { %272 = vst [vmem:[%s2908_s29 + $0x1b0] sm:$0xff] %v271_v36  ;;  %274 = vst [vmem:[%s2908_s29 + $0x1bc] sm:$0xff] %v273_v37  ;;  %v277_v39 = vld [vmem:[%s2903_s28 + $0xaf8] sm:$0xff]  ;;  %v279_v40 = vld [vmem:[%s2903_s28 + $0xb40] sm:$0xff] }
  0x28   : > { %276 = vst [vmem:[%s2908_s29 + $0x1c8] sm:$0xff] %v275_v38  ;;  %v281_v41 = vld [vmem:[%s2903_s28 + $0xb88] sm:$0xff]  ;;  %278 = vst [vmem:[%s2908_s29 + $0x1d4] sm:$0xff] %v277_v39  ;;  %v283_v42 = vld [vmem:[%s2903_s28 + $0xbd0] sm:$0xff] }
  0x29   : > { %280 = vst [vmem:[%s2908_s29 + $0x1e0] sm:$0xff] %v279_v40  ;;  %282 = vst [vmem:[%s2908_s29 + $0x1ec] sm:$0xff] %v281_v41  ;;  %v285_v43 = vld [vmem:[%s2903_s28 + $0xc18] sm:$0xff]  ;;  %v287_v44 = vld [vmem:[%s2903_s28 + $0xc60] sm:$0xff] }
  0x2a   : > { %284 = vst [vmem:[%s2908_s29 + $0x1f8] sm:$0xff] %v283_v42  ;;  %286 = vst [vmem:[%s2908_s29 + $0x204] sm:$0xff] %v285_v43  ;;  %v289_v45 = vld [vmem:[%s2903_s28 + $0xca8] sm:$0xff]  ;;  %v291_v46 = vld [vmem:[%s2903_s28 + $0xcf0] sm:$0xff] }
  0x2b   : > { %288 = vst [vmem:[%s2908_s29 + $0x210] sm:$0xff] %v287_v44  ;;  %v293_v47 = vld [vmem:[%s2903_s28 + $0xd38] sm:$0xff]  ;;  %290 = vst [vmem:[%s2908_s29 + $0x21c] sm:$0xff] %v289_v45  ;;  %v295_v48 = vld [vmem:[%s2903_s28 + $0xd80] sm:$0xff] }
  0x2c   : > { %292 = vst [vmem:[%s2908_s29 + $0x228] sm:$0xff] %v291_v46  ;;  %294 = vst [vmem:[%s2908_s29 + $0x234] sm:$0xff] %v293_v47  ;;  %v297_v49 = vld [vmem:[%s2903_s28 + $0xdc8] sm:$0xff]  ;;  %v299_v50 = vld [vmem:[%s2903_s28 + $0xe10] sm:$0xff] }
  0x2d   : > { %296 = vst [vmem:[%s2908_s29 + $0x240] sm:$0xff] %v295_v48  ;;  %298 = vst [vmem:[%s2908_s29 + $0x24c] sm:$0xff] %v297_v49  ;;  %v301_v51 = vld [vmem:[%s2903_s28 + $0xe58] sm:$0xff]  ;;  %v303_v52 = vld [vmem:[%s2903_s28 + $0xea0] sm:$0xff] }
  0x2e   : > { %300 = vst [vmem:[%s2908_s29 + $0x258] sm:$0xff] %v299_v50  ;;  %v305_v53 = vld [vmem:[%s2903_s28 + $0xee8] sm:$0xff]  ;;  %302 = vst [vmem:[%s2908_s29 + $0x264] sm:$0xff] %v301_v51  ;;  %v307_v54 = vld [vmem:[%s2903_s28 + $0xf30] sm:$0xff] }
  0x2f   : > { %304 = vst [vmem:[%s2908_s29 + $0x270] sm:$0xff] %v303_v52  ;;  %306 = vst [vmem:[%s2908_s29 + $0x27c] sm:$0xff] %v305_v53  ;;  %v309_v55 = vld [vmem:[%s2903_s28 + $0xf78] sm:$0xff]  ;;  %v311_v56 = vld [vmem:[%s2903_s28 + $0xfc0] sm:$0xff] }
  0x30   : > { %308 = vst [vmem:[%s2908_s29 + $0x288] sm:$0xff] %v307_v54  ;;  %310 = vst [vmem:[%s2908_s29 + $0x294] sm:$0xff] %v309_v55  ;;  %v313_v57 = vld [vmem:[%s2903_s28 + $0x1008] sm:$0xff]  ;;  %v315_v58 = vld [vmem:[%s2903_s28 + $0x1050] sm:$0xff] }
  0x31   : > { %312 = vst [vmem:[%s2908_s29 + $0x2a0] sm:$0xff] %v311_v56  ;;  %v317_v59 = vld [vmem:[%s2903_s28 + $0x1098] sm:$0xff]  ;;  %314 = vst [vmem:[%s2908_s29 + $0x2ac] sm:$0xff] %v313_v57  ;;  %v319_v60 = vld [vmem:[%s2903_s28 + $0x10e0] sm:$0xff] }
  0x32   : > { %316 = vst [vmem:[%s2908_s29 + $0x2b8] sm:$0xff] %v315_v58  ;;  %318 = vst [vmem:[%s2908_s29 + $0x2c4] sm:$0xff] %v317_v59  ;;  %v321_v61 = vld [vmem:[%s2903_s28 + $0x1128] sm:$0xff]  ;;  %v323_v62 = vld [vmem:[%s2903_s28 + $0x1170] sm:$0xff] }
  0x33   : > { %320 = vst [vmem:[%s2908_s29 + $0x2d0] sm:$0xff] %v319_v60  ;;  %322 = vst [vmem:[%s2908_s29 + $0x2dc] sm:$0xff] %v321_v61  ;;  %v325_v63 = vld [vmem:[%s2903_s28 + $0x11b8] sm:$0xff]  ;;  %v327_v0 = vld [vmem:[%s2903_s28 + $0x1200] sm:$0xff] }
  0x34   : > { %324 = vst [vmem:[%s2908_s29 + $0x2e8] sm:$0xff] %v323_v62  ;;  %v329_v1 = vld [vmem:[%s2903_s28 + $0x1248] sm:$0xff]  ;;  %326 = vst [vmem:[%s2908_s29 + $0x2f4] sm:$0xff] %v325_v63  ;;  %v331_v2 = vld [vmem:[%s2903_s28 + $0x1290] sm:$0xff] }
  0x35   : > { %328 = vst [vmem:[%s2908_s29 + $0x300] sm:$0xff] %v327_v0  ;;  %330 = vst [vmem:[%s2908_s29 + $0x30c] sm:$0xff] %v329_v1  ;;  %v333_v3 = vld [vmem:[%s2903_s28 + $0x12d8] sm:$0xff]  ;;  %v335_v4 = vld [vmem:[%s2903_s28 + $0x1320] sm:$0xff] }
  0x36   : > { %332 = vst [vmem:[%s2908_s29 + $0x318] sm:$0xff] %v331_v2  ;;  %334 = vst [vmem:[%s2908_s29 + $0x324] sm:$0xff] %v333_v3  ;;  %v337_v5 = vld [vmem:[%s2903_s28 + $0x1368] sm:$0xff]  ;;  %v339_v6 = vld [vmem:[%s2903_s28 + $0x13b0] sm:$0xff] }
  0x37   : > { %336 = vst [vmem:[%s2908_s29 + $0x330] sm:$0xff] %v335_v4  ;;  %v341_v7 = vld [vmem:[%s2903_s28 + $0x13f8] sm:$0xff]  ;;  %338 = vst [vmem:[%s2908_s29 + $0x33c] sm:$0xff] %v337_v5  ;;  %v343_v8 = vld [vmem:[%s2903_s28 + $0x1440] sm:$0xff] }
  0x38   : > { %340 = vst [vmem:[%s2908_s29 + $0x348] sm:$0xff] %v339_v6  ;;  %342 = vst [vmem:[%s2908_s29 + $0x354] sm:$0xff] %v341_v7  ;;  %v345_v9 = vld [vmem:[%s2903_s28 + $0x1488] sm:$0xff]  ;;  %v347_v10 = vld [vmem:[%s2903_s28 + $0x14d0] sm:$0xff] }
  0x39   : > { %344 = vst [vmem:[%s2908_s29 + $0x360] sm:$0xff] %v343_v8  ;;  %346 = vst [vmem:[%s2908_s29 + $0x36c] sm:$0xff] %v345_v9  ;;  %v349_v11 = vld [vmem:[%s2903_s28 + $0x1518] sm:$0xff]  ;;  %v351_v12 = vld [vmem:[%s2903_s28 + $0x1560] sm:$0xff] }
  0x3a   : > { %348 = vst [vmem:[%s2908_s29 + $0x378] sm:$0xff] %v347_v10  ;;  %v353_v13 = vld [vmem:[%s2903_s28 + $0x15a8] sm:$0xff]  ;;  %350 = vst [vmem:[%s2908_s29 + $0x384] sm:$0xff] %v349_v11  ;;  %v355_v14 = vld [vmem:[%s2903_s28 + $0x15f0] sm:$0xff] }
  0x3b   : > { %352 = vst [vmem:[%s2908_s29 + $0x390] sm:$0xff] %v351_v12  ;;  %354 = vst [vmem:[%s2908_s29 + $0x39c] sm:$0xff] %v353_v13  ;;  %v357_v15 = vld [vmem:[%s2903_s28 + $0x1638] sm:$0xff]  ;;  %v359_v16 = vld [vmem:[%s2903_s28 + $0x1680] sm:$0xff] }
  0x3c   : > { %356 = vst [vmem:[%s2908_s29 + $0x3a8] sm:$0xff] %v355_v14  ;;  %358 = vst [vmem:[%s2908_s29 + $0x3b4] sm:$0xff] %v357_v15  ;;  %v361_v17 = vld [vmem:[%s2903_s28 + $0x16c8] sm:$0xff]  ;;  %v363_v18 = vld [vmem:[%s2903_s28 + $0x1710] sm:$0xff] }
  0x3d   : > { %360 = vst [vmem:[%s2908_s29 + $0x3c0] sm:$0xff] %v359_v16  ;;  %v365_v19 = vld [vmem:[%s2903_s28 + $0x1758] sm:$0xff]  ;;  %362 = vst [vmem:[%s2908_s29 + $0x3cc] sm:$0xff] %v361_v17  ;;  %v367_v20 = vld [vmem:[%s2903_s28 + $0x17a0] sm:$0xff] }
  0x3e   : > { %364 = vst [vmem:[%s2908_s29 + $0x3d8] sm:$0xff] %v363_v18  ;;  %366 = vst [vmem:[%s2908_s29 + $0x3e4] sm:$0xff] %v365_v19  ;;  %v369_v21 = vld [vmem:[%s2903_s28 + $0x17e8] sm:$0xff]  ;;  %v371_v22 = vld [vmem:[%s2903_s28 + $0x1830] sm:$0xff] }
  0x3f   : > { %368 = vst [vmem:[%s2908_s29 + $0x3f0] sm:$0xff] %v367_v20  ;;  %370 = vst [vmem:[%s2908_s29 + $0x3fc] sm:$0xff] %v369_v21  ;;  %v373_v23 = vld [vmem:[%s2903_s28 + $0x1878] sm:$0xff]  ;;  %v375_v24 = vld [vmem:[%s2903_s28 + $0x18c0] sm:$0xff] }
  0x40   : > { %372 = vst [vmem:[%s2908_s29 + $0x408] sm:$0xff] %v371_v22  ;;  %v377_v25 = vld [vmem:[%s2903_s28 + $0x1908] sm:$0xff]  ;;  %374 = vst [vmem:[%s2908_s29 + $0x414] sm:$0xff] %v373_v23  ;;  %v379_v26 = vld [vmem:[%s2903_s28 + $0x1950] sm:$0xff] }
  0x41   : > { %376 = vst [vmem:[%s2908_s29 + $0x420] sm:$0xff] %v375_v24  ;;  %378 = vst [vmem:[%s2908_s29 + $0x42c] sm:$0xff] %v377_v25  ;;  %v381_v27 = vld [vmem:[%s2903_s28 + $0x1998] sm:$0xff]  ;;  %v383_v28 = vld [vmem:[%s2903_s28 + $0x19e0] sm:$0xff] }
  0x42   : > { %380 = vst [vmem:[%s2908_s29 + $0x438] sm:$0xff] %v379_v26  ;;  %382 = vst [vmem:[%s2908_s29 + $0x444] sm:$0xff] %v381_v27  ;;  %v385_v29 = vld [vmem:[%s2903_s28 + $0x1a28] sm:$0xff]  ;;  %v387_v30 = vld [vmem:[%s2903_s28 + $0x1a70] sm:$0xff] }
  0x43   : > { %384 = vst [vmem:[%s2908_s29 + $0x450] sm:$0xff] %v383_v28  ;;  %v389_v31 = vld [vmem:[%s2903_s28 + $0x1ab8] sm:$0xff]  ;;  %386 = vst [vmem:[%s2908_s29 + $0x45c] sm:$0xff] %v385_v29  ;;  %v2136_v32 = vld [vmem:[%s2903_s28 + $0x8] sm:$0xf] }
  0x44   : > { %388 = vst [vmem:[%s2908_s29 + $0x468] sm:$0xff] %v387_v30  ;;  %390 = vst [vmem:[%s2908_s29 + $0x474] sm:$0xff] %v389_v31  ;;  %v2138_v33 = vld [vmem:[%s2903_s28 + $0x50] sm:$0xf]  ;;  %v2140_v34 = vld [vmem:[%s2903_s28 + $0x98] sm:$0xf] }
  0x45   : > { %2137 = vst [vmem:[%s2908_s29 + $0x8] sm:$0xf] %v2136_v32  ;;  %2139 = vst [vmem:[%s2908_s29 + $0x14] sm:$0xf] %v2138_v33  ;;  %v2142_v35 = vld [vmem:[%s2903_s28 + $0xe0] sm:$0xf] }
  0x46   : > { %2141 = vst [vmem:[%s2908_s29 + $0x20] sm:$0xf] %v2140_v34  ;;  %v2144_v36 = vld [vmem:[%s2903_s28 + $0x128] sm:$0xf]  ;;  %v2146_v37 = vld [vmem:[%s2903_s28 + $0x170] sm:$0xf] }
  0x47   : > { %2143 = vst [vmem:[%s2908_s29 + $0x2c] sm:$0xf] %v2142_v35  ;;  %2145 = vst [vmem:[%s2908_s29 + $0x38] sm:$0xf] %v2144_v36  ;;  %v2148_v38 = vld [vmem:[%s2903_s28 + $0x1b8] sm:$0xf] }
  0x48   : > { %2147 = vst [vmem:[%s2908_s29 + $0x44] sm:$0xf] %v2146_v37  ;;  %v2150_v39 = vld [vmem:[%s2903_s28 + $0x200] sm:$0xf]  ;;  %v2152_v40 = vld [vmem:[%s2903_s28 + $0x248] sm:$0xf] }
  0x49   : > { %2149 = vst [vmem:[%s2908_s29 + $0x50] sm:$0xf] %v2148_v38  ;;  %2151 = vst [vmem:[%s2908_s29 + $0x5c] sm:$0xf] %v2150_v39  ;;  %v2154_v41 = vld [vmem:[%s2903_s28 + $0x290] sm:$0xf] }
  0x4a   : > { %2153 = vst [vmem:[%s2908_s29 + $0x68] sm:$0xf] %v2152_v40  ;;  %v2156_v42 = vld [vmem:[%s2903_s28 + $0x2d8] sm:$0xf]  ;;  %v2158_v43 = vld [vmem:[%s2903_s28 + $0x320] sm:$0xf] }
  0x4b   : > { %2155 = vst [vmem:[%s2908_s29 + $0x74] sm:$0xf] %v2154_v41  ;;  %2157 = vst [vmem:[%s2908_s29 + $0x80] sm:$0xf] %v2156_v42  ;;  %v2160_v44 = vld [vmem:[%s2903_s28 + $0x368] sm:$0xf] }
  0x4c   : > { %2159 = vst [vmem:[%s2908_s29 + $0x8c] sm:$0xf] %v2158_v43  ;;  %v2162_v45 = vld [vmem:[%s2903_s28 + $0x3b0] sm:$0xf]  ;;  %v2164_v46 = vld [vmem:[%s2903_s28 + $0x3f8] sm:$0xf] }
  0x4d   : > { %2161 = vst [vmem:[%s2908_s29 + $0x98] sm:$0xf] %v2160_v44  ;;  %2163 = vst [vmem:[%s2908_s29 + $0xa4] sm:$0xf] %v2162_v45  ;;  %v2166_v47 = vld [vmem:[%s2903_s28 + $0x440] sm:$0xf] }
  0x4e   : > { %2165 = vst [vmem:[%s2908_s29 + $0xb0] sm:$0xf] %v2164_v46  ;;  %v2168_v48 = vld [vmem:[%s2903_s28 + $0x488] sm:$0xf]  ;;  %v2170_v49 = vld [vmem:[%s2903_s28 + $0x4d0] sm:$0xf] }
  0x4f   : > { %2167 = vst [vmem:[%s2908_s29 + $0xbc] sm:$0xf] %v2166_v47  ;;  %2169 = vst [vmem:[%s2908_s29 + $0xc8] sm:$0xf] %v2168_v48  ;;  %v2172_v50 = vld [vmem:[%s2903_s28 + $0x518] sm:$0xf] }
  0x50   : > { %2171 = vst [vmem:[%s2908_s29 + $0xd4] sm:$0xf] %v2170_v49  ;;  %v2174_v51 = vld [vmem:[%s2903_s28 + $0x560] sm:$0xf]  ;;  %v2176_v52 = vld [vmem:[%s2903_s28 + $0x5a8] sm:$0xf] }
  0x51   : > { %2173 = vst [vmem:[%s2908_s29 + $0xe0] sm:$0xf] %v2172_v50  ;;  %2175 = vst [vmem:[%s2908_s29 + $0xec] sm:$0xf] %v2174_v51  ;;  %v2178_v53 = vld [vmem:[%s2903_s28 + $0x5f0] sm:$0xf] }
  0x52   : > { %2177 = vst [vmem:[%s2908_s29 + $0xf8] sm:$0xf] %v2176_v52  ;;  %v2180_v54 = vld [vmem:[%s2903_s28 + $0x638] sm:$0xf]  ;;  %v2182_v55 = vld [vmem:[%s2903_s28 + $0x680] sm:$0xf] }
  0x53   : > { %2179 = vst [vmem:[%s2908_s29 + $0x104] sm:$0xf] %v2178_v53  ;;  %2181 = vst [vmem:[%s2908_s29 + $0x110] sm:$0xf] %v2180_v54  ;;  %v2184_v56 = vld [vmem:[%s2903_s28 + $0x6c8] sm:$0xf] }
  0x54   : > { %2183 = vst [vmem:[%s2908_s29 + $0x11c] sm:$0xf] %v2182_v55  ;;  %v2186_v57 = vld [vmem:[%s2903_s28 + $0x710] sm:$0xf]  ;;  %v2188_v58 = vld [vmem:[%s2903_s28 + $0x758] sm:$0xf] }
  0x55   : > { %2185 = vst [vmem:[%s2908_s29 + $0x128] sm:$0xf] %v2184_v56  ;;  %2187 = vst [vmem:[%s2908_s29 + $0x134] sm:$0xf] %v2186_v57  ;;  %v2190_v59 = vld [vmem:[%s2903_s28 + $0x7a0] sm:$0xf] }
  0x56   : > { %2189 = vst [vmem:[%s2908_s29 + $0x140] sm:$0xf] %v2188_v58  ;;  %v2192_v60 = vld [vmem:[%s2903_s28 + $0x7e8] sm:$0xf]  ;;  %v2194_v61 = vld [vmem:[%s2903_s28 + $0x830] sm:$0xf] }
  0x57   : > { %2191 = vst [vmem:[%s2908_s29 + $0x14c] sm:$0xf] %v2190_v59  ;;  %2193 = vst [vmem:[%s2908_s29 + $0x158] sm:$0xf] %v2192_v60  ;;  %v2196_v62 = vld [vmem:[%s2903_s28 + $0x878] sm:$0xf] }
  0x58   : > { %2195 = vst [vmem:[%s2908_s29 + $0x164] sm:$0xf] %v2194_v61  ;;  %v2198_v63 = vld [vmem:[%s2903_s28 + $0x8c0] sm:$0xf]  ;;  %v2200_v0 = vld [vmem:[%s2903_s28 + $0x908] sm:$0xf] }
  0x59   : > { %2197 = vst [vmem:[%s2908_s29 + $0x170] sm:$0xf] %v2196_v62  ;;  %2199 = vst [vmem:[%s2908_s29 + $0x17c] sm:$0xf] %v2198_v63  ;;  %v2202_v1 = vld [vmem:[%s2903_s28 + $0x950] sm:$0xf] }
  0x5a   : > { %2201 = vst [vmem:[%s2908_s29 + $0x188] sm:$0xf] %v2200_v0  ;;  %v2204_v2 = vld [vmem:[%s2903_s28 + $0x998] sm:$0xf]  ;;  %v2206_v3 = vld [vmem:[%s2903_s28 + $0x9e0] sm:$0xf] }
  0x5b   : > { %2203 = vst [vmem:[%s2908_s29 + $0x194] sm:$0xf] %v2202_v1  ;;  %2205 = vst [vmem:[%s2908_s29 + $0x1a0] sm:$0xf] %v2204_v2  ;;  %v2208_v4 = vld [vmem:[%s2903_s28 + $0xa28] sm:$0xf] }
  0x5c   : > { %2207 = vst [vmem:[%s2908_s29 + $0x1ac] sm:$0xf] %v2206_v3  ;;  %v2210_v5 = vld [vmem:[%s2903_s28 + $0xa70] sm:$0xf]  ;;  %v2212_v6 = vld [vmem:[%s2903_s28 + $0xab8] sm:$0xf] }
  0x5d   : > { %2209 = vst [vmem:[%s2908_s29 + $0x1b8] sm:$0xf] %v2208_v4  ;;  %2211 = vst [vmem:[%s2908_s29 + $0x1c4] sm:$0xf] %v2210_v5  ;;  %v2214_v7 = vld [vmem:[%s2903_s28 + $0xb00] sm:$0xf] }
  0x5e   : > { %2213 = vst [vmem:[%s2908_s29 + $0x1d0] sm:$0xf] %v2212_v6  ;;  %v2216_v8 = vld [vmem:[%s2903_s28 + $0xb48] sm:$0xf]  ;;  %v2218_v9 = vld [vmem:[%s2903_s28 + $0xb90] sm:$0xf] }
  0x5f   : > { %2215 = vst [vmem:[%s2908_s29 + $0x1dc] sm:$0xf] %v2214_v7  ;;  %2217 = vst [vmem:[%s2908_s29 + $0x1e8] sm:$0xf] %v2216_v8  ;;  %v2220_v10 = vld [vmem:[%s2903_s28 + $0xbd8] sm:$0xf] }
  0x60   : > { %2219 = vst [vmem:[%s2908_s29 + $0x1f4] sm:$0xf] %v2218_v9  ;;  %v2222_v11 = vld [vmem:[%s2903_s28 + $0xc20] sm:$0xf]  ;;  %v2224_v12 = vld [vmem:[%s2903_s28 + $0xc68] sm:$0xf] }
  0x61   : > { %2221 = vst [vmem:[%s2908_s29 + $0x200] sm:$0xf] %v2220_v10  ;;  %2223 = vst [vmem:[%s2908_s29 + $0x20c] sm:$0xf] %v2222_v11  ;;  %v2226_v13 = vld [vmem:[%s2903_s28 + $0xcb0] sm:$0xf] }
  0x62   : > { %2225 = vst [vmem:[%s2908_s29 + $0x218] sm:$0xf] %v2224_v12  ;;  %v2228_v14 = vld [vmem:[%s2903_s28 + $0xcf8] sm:$0xf]  ;;  %v2230_v15 = vld [vmem:[%s2903_s28 + $0xd40] sm:$0xf] }
  0x63   : > { %2227 = vst [vmem:[%s2908_s29 + $0x224] sm:$0xf] %v2226_v13  ;;  %2229 = vst [vmem:[%s2908_s29 + $0x230] sm:$0xf] %v2228_v14  ;;  %v2232_v16 = vld [vmem:[%s2903_s28 + $0xd88] sm:$0xf] }
  0x64   : > { %2231 = vst [vmem:[%s2908_s29 + $0x23c] sm:$0xf] %v2230_v15  ;;  %v2234_v17 = vld [vmem:[%s2903_s28 + $0xdd0] sm:$0xf]  ;;  %v2236_v18 = vld [vmem:[%s2903_s28 + $0xe18] sm:$0xf] }
  0x65   : > { %2233 = vst [vmem:[%s2908_s29 + $0x248] sm:$0xf] %v2232_v16  ;;  %2235 = vst [vmem:[%s2908_s29 + $0x254] sm:$0xf] %v2234_v17  ;;  %v2238_v19 = vld [vmem:[%s2903_s28 + $0xe60] sm:$0xf] }
  0x66   : > { %2237 = vst [vmem:[%s2908_s29 + $0x260] sm:$0xf] %v2236_v18  ;;  %v2240_v20 = vld [vmem:[%s2903_s28 + $0xea8] sm:$0xf]  ;;  %v2242_v21 = vld [vmem:[%s2903_s28 + $0xef0] sm:$0xf] }
  0x67   : > { %2239 = vst [vmem:[%s2908_s29 + $0x26c] sm:$0xf] %v2238_v19  ;;  %2241 = vst [vmem:[%s2908_s29 + $0x278] sm:$0xf] %v2240_v20  ;;  %v2244_v22 = vld [vmem:[%s2903_s28 + $0xf38] sm:$0xf] }
  0x68   : > { %2243 = vst [vmem:[%s2908_s29 + $0x284] sm:$0xf] %v2242_v21  ;;  %v2246_v23 = vld [vmem:[%s2903_s28 + $0xf80] sm:$0xf]  ;;  %v2248_v24 = vld [vmem:[%s2903_s28 + $0xfc8] sm:$0xf] }
  0x69   : > { %2245 = vst [vmem:[%s2908_s29 + $0x290] sm:$0xf] %v2244_v22  ;;  %2247 = vst [vmem:[%s2908_s29 + $0x29c] sm:$0xf] %v2246_v23  ;;  %v2250_v25 = vld [vmem:[%s2903_s28 + $0x1010] sm:$0xf] }
  0x6a   : > { %2249 = vst [vmem:[%s2908_s29 + $0x2a8] sm:$0xf] %v2248_v24  ;;  %v2252_v26 = vld [vmem:[%s2903_s28 + $0x1058] sm:$0xf]  ;;  %v2254_v27 = vld [vmem:[%s2903_s28 + $0x10a0] sm:$0xf] }
  0x6b   : > { %2251 = vst [vmem:[%s2908_s29 + $0x2b4] sm:$0xf] %v2250_v25  ;;  %2253 = vst [vmem:[%s2908_s29 + $0x2c0] sm:$0xf] %v2252_v26  ;;  %v2256_v28 = vld [vmem:[%s2903_s28 + $0x10e8] sm:$0xf] }
  0x6c   : > { %2255 = vst [vmem:[%s2908_s29 + $0x2cc] sm:$0xf] %v2254_v27  ;;  %v2258_v29 = vld [vmem:[%s2903_s28 + $0x1130] sm:$0xf]  ;;  %v2260_v30 = vld [vmem:[%s2903_s28 + $0x1178] sm:$0xf] }
  0x6d   : > { %2257 = vst [vmem:[%s2908_s29 + $0x2d8] sm:$0xf] %v2256_v28  ;;  %2259 = vst [vmem:[%s2908_s29 + $0x2e4] sm:$0xf] %v2258_v29  ;;  %v2262_v31 = vld [vmem:[%s2903_s28 + $0x11c0] sm:$0xf] }
  0x6e   : > { %2261 = vst [vmem:[%s2908_s29 + $0x2f0] sm:$0xf] %v2260_v30  ;;  %v2264_v32 = vld [vmem:[%s2903_s28 + $0x1208] sm:$0xf]  ;;  %v2266_v33 = vld [vmem:[%s2903_s28 + $0x1250] sm:$0xf] }
  0x6f   : > { %2263 = vst [vmem:[%s2908_s29 + $0x2fc] sm:$0xf] %v2262_v31  ;;  %2265 = vst [vmem:[%s2908_s29 + $0x308] sm:$0xf] %v2264_v32  ;;  %v2268_v34 = vld [vmem:[%s2903_s28 + $0x1298] sm:$0xf] }
  0x70   : > { %2267 = vst [vmem:[%s2908_s29 + $0x314] sm:$0xf] %v2266_v33  ;;  %v2270_v35 = vld [vmem:[%s2903_s28 + $0x12e0] sm:$0xf]  ;;  %v2272_v36 = vld [vmem:[%s2903_s28 + $0x1328] sm:$0xf] }
  0x71   : > { %2269 = vst [vmem:[%s2908_s29 + $0x320] sm:$0xf] %v2268_v34  ;;  %2271 = vst [vmem:[%s2908_s29 + $0x32c] sm:$0xf] %v2270_v35  ;;  %v2274_v37 = vld [vmem:[%s2903_s28 + $0x1370] sm:$0xf] }
  0x72   : > { %2273 = vst [vmem:[%s2908_s29 + $0x338] sm:$0xf] %v2272_v36  ;;  %v2276_v38 = vld [vmem:[%s2903_s28 + $0x13b8] sm:$0xf]  ;;  %v2278_v39 = vld [vmem:[%s2903_s28 + $0x1400] sm:$0xf] }
  0x73   : > { %2275 = vst [vmem:[%s2908_s29 + $0x344] sm:$0xf] %v2274_v37  ;;  %2277 = vst [vmem:[%s2908_s29 + $0x350] sm:$0xf] %v2276_v38  ;;  %v2280_v40 = vld [vmem:[%s2903_s28 + $0x1448] sm:$0xf] }
  0x74   : > { %2279 = vst [vmem:[%s2908_s29 + $0x35c] sm:$0xf] %v2278_v39  ;;  %v2282_v41 = vld [vmem:[%s2903_s28 + $0x1490] sm:$0xf]  ;;  %v2284_v42 = vld [vmem:[%s2903_s28 + $0x14d8] sm:$0xf] }
  0x75   : > { %2281 = vst [vmem:[%s2908_s29 + $0x368] sm:$0xf] %v2280_v40  ;;  %2283 = vst [vmem:[%s2908_s29 + $0x374] sm:$0xf] %v2282_v41  ;;  %v2286_v43 = vld [vmem:[%s2903_s28 + $0x1520] sm:$0xf] }
  0x76   : > { %2285 = vst [vmem:[%s2908_s29 + $0x380] sm:$0xf] %v2284_v42  ;;  %v2288_v44 = vld [vmem:[%s2903_s28 + $0x1568] sm:$0xf]  ;;  %v2290_v45 = vld [vmem:[%s2903_s28 + $0x15b0] sm:$0xf] }
  0x77   : > { %2287 = vst [vmem:[%s2908_s29 + $0x38c] sm:$0xf] %v2286_v43  ;;  %2289 = vst [vmem:[%s2908_s29 + $0x398] sm:$0xf] %v2288_v44  ;;  %v2292_v46 = vld [vmem:[%s2903_s28 + $0x15f8] sm:$0xf] }
  0x78   : > { %2291 = vst [vmem:[%s2908_s29 + $0x3a4] sm:$0xf] %v2290_v45  ;;  %v2294_v47 = vld [vmem:[%s2903_s28 + $0x1640] sm:$0xf]  ;;  %v2296_v48 = vld [vmem:[%s2903_s28 + $0x1688] sm:$0xf] }
  0x79   : > { %2293 = vst [vmem:[%s2908_s29 + $0x3b0] sm:$0xf] %v2292_v46  ;;  %2295 = vst [vmem:[%s2908_s29 + $0x3bc] sm:$0xf] %v2294_v47  ;;  %v2298_v49 = vld [vmem:[%s2903_s28 + $0x16d0] sm:$0xf] }
  0x7a   : > { %2297 = vst [vmem:[%s2908_s29 + $0x3c8] sm:$0xf] %v2296_v48  ;;  %v2300_v50 = vld [vmem:[%s2903_s28 + $0x1718] sm:$0xf]  ;;  %v2302_v51 = vld [vmem:[%s2903_s28 + $0x1760] sm:$0xf] }
  0x7b   : > { %2299 = vst [vmem:[%s2908_s29 + $0x3d4] sm:$0xf] %v2298_v49  ;;  %2301 = vst [vmem:[%s2908_s29 + $0x3e0] sm:$0xf] %v2300_v50  ;;  %v2304_v52 = vld [vmem:[%s2903_s28 + $0x17a8] sm:$0xf] }
  0x7c   : > { %2303 = vst [vmem:[%s2908_s29 + $0x3ec] sm:$0xf] %v2302_v51  ;;  %v2306_v53 = vld [vmem:[%s2903_s28 + $0x17f0] sm:$0xf]  ;;  %v2308_v54 = vld [vmem:[%s2903_s28 + $0x1838] sm:$0xf] }
  0x7d   : > { %2305 = vst [vmem:[%s2908_s29 + $0x3f8] sm:$0xf] %v2304_v52  ;;  %2307 = vst [vmem:[%s2908_s29 + $0x404] sm:$0xf] %v2306_v53  ;;  %v2310_v55 = vld [vmem:[%s2903_s28 + $0x1880] sm:$0xf] }
  0x7e   : > { %2309 = vst [vmem:[%s2908_s29 + $0x410] sm:$0xf] %v2308_v54  ;;  %v2312_v56 = vld [vmem:[%s2903_s28 + $0x18c8] sm:$0xf]  ;;  %v2314_v57 = vld [vmem:[%s2903_s28 + $0x1910] sm:$0xf] }
  0x7f   : > { %2311 = vst [vmem:[%s2908_s29 + $0x41c] sm:$0xf] %v2310_v55  ;;  %2313 = vst [vmem:[%s2908_s29 + $0x428] sm:$0xf] %v2312_v56  ;;  %v2316_v58 = vld [vmem:[%s2903_s28 + $0x1958] sm:$0xf] }
  0x80   : > { %2315 = vst [vmem:[%s2908_s29 + $0x434] sm:$0xf] %v2314_v57  ;;  %v2318_v59 = vld [vmem:[%s2903_s28 + $0x19a0] sm:$0xf]  ;;  %v2320_v60 = vld [vmem:[%s2903_s28 + $0x19e8] sm:$0xf] }
  0x81   : > { %2317 = vst [vmem:[%s2908_s29 + $0x440] sm:$0xf] %v2316_v58  ;;  %2319 = vst [vmem:[%s2908_s29 + $0x44c] sm:$0xf] %v2318_v59  ;;  %v2322_v61 = vld [vmem:[%s2903_s28 + $0x1a30] sm:$0xf] }
  0x82   : > { %2321 = vst [vmem:[%s2908_s29 + $0x458] sm:$0xf] %v2320_v60  ;;  %v2324_v62 = vld [vmem:[%s2903_s28 + $0x1a78] sm:$0xf]  ;;  %v2326_v63 = vld [vmem:[%s2903_s28 + $0x1ac0] sm:$0xf] }
  0x83   : > { %2323 = vst [vmem:[%s2908_s29 + $0x464] sm:$0xf] %v2322_v61  ;;  %2325 = vst [vmem:[%s2908_s29 + $0x470] sm:$0xf] %v2324_v62 }
  0x84   : > { %2327 = vst [vmem:[%s2908_s29 + $0x47c] sm:$0xf] %v2326_v63 }
  0x85 PF: > { %p2328_p8 = scmp.ge.s32.totalorder %s2833_s16, 1  ;;  %p603_p9 = scmp.lt.s32.totalorder %s2833_s16, 7 }
  0x87   : > { %p604_p10 = pnand %p2328_p8, %p603_p9 }
  0x88   : > { %s610_s30 = sand.u32 (!%p604_p10), 1, %s2817_s12   ;;  %s660_s26 = smul.u32 (!%p604_p10), 3, %s2825_s14 }
  0x89   : > { %607 = sbr.rel (%p604_p10) target bundleno = 517 (0x205), region = 54 }
  0x8a   : > { %s2551_s4 = smul.u32 (!%p604_p10), 1152, %s610_s30  ;;  %p661_p11 = scmp.lt.s32.totalorder (!%p604_p10), %s660_s26, 17 }
  0x8c   : > { %s3307_s9 = scalar_lea.vmem (!%p604_p10), [#allocation2], %s2551_s4  ;;  %s2552_s4 = smul.u32 (!%p604_p10), 48, %s610_s30 }
  0x8e   : > { %v3299_v0 = vld [vmem:[%s3521_s0 + $0x4] ss:$24 sps:$4 sm:$0xff]   ;;  %v2594_v2 = vld [vmem:[%s3307_s9 + $0xac] ss:$12 sps:$4 sm:$0xff]   ;;  %v2598_v4 = vld [vmem:[%s3307_s9 + $0xa8] ss:$12 sps:$4 sm:$0xff]  }
  0x8f   : > { %v3304_v1 = vld [vmem:[%s3521_s0 + $0xc] ss:$24 sps:$4 sm:$0xff]   ;;  %1712 = vmatprep.mubr.bf16.mxu0 %v3299_v0  ;;  %1680 = vmatprep.subr.bf16.mxu0 %v2594_v2  ;;  %v2599_v5 = vld [vmem:[%s3307_s9 + $0x228] ss:$12 sps:$4 sm:$0xff]   ;;  %v2604_v8 = vld [vmem:[%s3307_s9 + $0x90] ss:$12 sps:$4 sm:$0xff]  }
  0x90   : > { %1755 = vmatprep.mubr.bf16.mxu1 %v3304_v1  ;;  %v2596_v3 = vld [vmem:[%s3307_s9 + $0x22c] ss:$12 sps:$4 sm:$0xff]   ;;  %v2600_v6 = vld [vmem:[%s3307_s9 + $0x94] ss:$12 sps:$4 sm:$0xff]   ;;  %1681 = vmatpush1.bf16.msra.mxu0 %v2598_v4  ;;  %v2605_v9 = vld [vmem:[%s3307_s9 + $0x210] ss:$12 sps:$4 sm:$0xff]  }
  0x91   : > { %1723 = vmatprep.subr.bf16.mxu1 %v2596_v3  ;;  %v2602_v7 = vld [vmem:[%s3307_s9 + $0x214] ss:$12 sps:$4 sm:$0xff]   ;;  %1682 = vmatprep.subr.bf16.mxu0 %v2600_v6  ;;  %v2606_v10 = vld [vmem:[%s3307_s9 + $0x7c] ss:$12 sps:$4 sm:$0xff]   ;;  %v2610_v12 = vld [vmem:[%s3307_s9 + $0x78] ss:$12 sps:$4 sm:$0xff]  }
  0x92   : > { %1724 = vmatpush1.bf16.msra.mxu1 %v2599_v5  ;;  %v2608_v11 = vld [vmem:[%s3307_s9 + $0x1fc] ss:$12 sps:$4 sm:$0xff]   ;;  %v2611_v13 = vld [vmem:[%s3307_s9 + $0x1f8] ss:$12 sps:$4 sm:$0xff]   ;;  %v2616_v16 = vld [vmem:[%s3307_s9 + $0x60] ss:$12 sps:$4 sm:$0xff]  }
  0x93   : > { %1725 = vmatprep.subr.bf16.mxu1 %v2602_v7  ;;  %v2612_v14 = vld [vmem:[%s3307_s9 + $0x64] ss:$12 sps:$4 sm:$0xff]   ;;  %v2617_v17 = vld [vmem:[%s3307_s9 + $0x1e0] ss:$12 sps:$4 sm:$0xff]   ;;  %v2622_v20 = vld [vmem:[%s3307_s9 + $0x48] ss:$12 sps:$4 sm:$0xff]  }
  0x94   : > { %1683 = vmatpush1.bf16.msra.mxu0 %v2604_v8  ;;  %v2614_v15 = vld [vmem:[%s3307_s9 + $0x1e4] ss:$12 sps:$4 sm:$0xff]   ;;  %v2618_v18 = vld [vmem:[%s3307_s9 + $0x4c] ss:$12 sps:$4 sm:$0xff]   ;;  %v2623_v21 = vld [vmem:[%s3307_s9 + $0x1c8] ss:$12 sps:$4 sm:$0xff]  }
  0x95   : > { %1684 = vmatprep.subr.bf16.mxu0 %v2606_v10  ;;  %v2620_v19 = vld [vmem:[%s3307_s9 + $0x1cc] ss:$12 sps:$4 sm:$0xff]   ;;  %v2624_v22 = vld [vmem:[%s3307_s9 + $0x34] ss:$12 sps:$4 sm:$0xff]   ;;  %v2628_v24 = vld [vmem:[%s3307_s9 + $0x30] ss:$12 sps:$4 sm:$0xff]  }
  0x96   : > { %1726 = vmatpush1.bf16.msra.mxu1 %v2605_v9  ;;  %v2626_v23 = vld [vmem:[%s3307_s9 + $0x1b4] ss:$12 sps:$4 sm:$0xff]   ;;  %v2629_v25 = vld [vmem:[%s3307_s9 + $0x1b0] ss:$12 sps:$4 sm:$0xff]   ;;  %v2634_v28 = vld [vmem:[%s3307_s9 + $0x18] ss:$12 sps:$4 sm:$0xff]  }
  0x97   : > { %1727 = vmatprep.subr.bf16.mxu1 %v2608_v11  ;;  %v2630_v26 = vld [vmem:[%s3307_s9 + $0x1c] ss:$12 sps:$4 sm:$0xff]   ;;  %v2635_v29 = vld [vmem:[%s3307_s9 + $0x198] ss:$12 sps:$4 sm:$0xff]   ;;  %v2640_v32 = vld [vmem:[%s3307_s9] ss:$12 sps:$4 sm:$0xff]  }
  0x98   : > { %1685 = vmatpush1.bf16.msra.mxu0 %v2610_v12  ;;  %v2632_v27 = vld [vmem:[%s3307_s9 + $0x19c] ss:$12 sps:$4 sm:$0xff]   ;;  %v2636_v30 = vld [vmem:[%s3307_s9 + $0x4] ss:$12 sps:$4 sm:$0xff]   ;;  %v2641_v33 = vld [vmem:[%s3307_s9 + $0x180] ss:$12 sps:$4 sm:$0xff]  }
  0x99   : > { %1686 = vmatprep.subr.bf16.mxu0 %v2612_v14  ;;  %v2638_v31 = vld [vmem:[%s3307_s9 + $0x184] ss:$12 sps:$4 sm:$0xff]   ;;  %v2642_v34 = vld [vmem:[%s3307_s9 + $0x16c] ss:$12 sps:$4 sm:$0xff]   ;;  %v2646_v36 = vld [vmem:[%s3307_s9 + $0x168] ss:$12 sps:$4 sm:$0xff]  }
  0x9a   : > { %1728 = vmatpush1.bf16.msra.mxu1 %v2611_v13  ;;  %v2644_v35 = vld [vmem:[%s3307_s9 + $0x2ec] ss:$12 sps:$4 sm:$0xff]   ;;  %v2647_v37 = vld [vmem:[%s3307_s9 + $0x2e8] ss:$12 sps:$4 sm:$0xff]   ;;  %v2652_v40 = vld [vmem:[%s3307_s9 + $0x150] ss:$12 sps:$4 sm:$0xff]  }
  0x9b   : > { %1729 = vmatprep.subr.bf16.mxu1 %v2614_v15  ;;  %v2648_v38 = vld [vmem:[%s3307_s9 + $0x154] ss:$12 sps:$4 sm:$0xff]   ;;  %v2653_v41 = vld [vmem:[%s3307_s9 + $0x2d0] ss:$12 sps:$4 sm:$0xff]   ;;  %v2658_v44 = vld [vmem:[%s3307_s9 + $0x138] ss:$12 sps:$4 sm:$0xff]  }
  0x9c   : > { %1687 = vmatpush1.bf16.msra.mxu0 %v2616_v16  ;;  %v2650_v39 = vld [vmem:[%s3307_s9 + $0x2d4] ss:$12 sps:$4 sm:$0xff]   ;;  %v2654_v42 = vld [vmem:[%s3307_s9 + $0x13c] ss:$12 sps:$4 sm:$0xff]   ;;  %v2659_v45 = vld [vmem:[%s3307_s9 + $0x2b8] ss:$12 sps:$4 sm:$0xff]  }
  0x9d   : > { %1688 = vmatprep.subr.bf16.mxu0 %v2618_v18  ;;  %v2656_v43 = vld [vmem:[%s3307_s9 + $0x2bc] ss:$12 sps:$4 sm:$0xff]   ;;  %v2660_v46 = vld [vmem:[%s3307_s9 + $0x124] ss:$12 sps:$4 sm:$0xff]   ;;  %v2664_v48 = vld [vmem:[%s3307_s9 + $0x120] ss:$12 sps:$4 sm:$0xff]  }
  0x9e   : > { %1730 = vmatpush1.bf16.msra.mxu1 %v2617_v17  ;;  %v2662_v47 = vld [vmem:[%s3307_s9 + $0x2a4] ss:$12 sps:$4 sm:$0xff]   ;;  %v2665_v49 = vld [vmem:[%s3307_s9 + $0x2a0] ss:$12 sps:$4 sm:$0xff]   ;;  %v2670_v52 = vld [vmem:[%s3307_s9 + $0x108] ss:$12 sps:$4 sm:$0xff]  }
  0x9f   : > { %1731 = vmatprep.subr.bf16.mxu1 %v2620_v19  ;;  %v2666_v50 = vld [vmem:[%s3307_s9 + $0x10c] ss:$12 sps:$4 sm:$0xff]   ;;  %v2671_v53 = vld [vmem:[%s3307_s9 + $0x288] ss:$12 sps:$4 sm:$0xff]   ;;  %v2676_v56 = vld [vmem:[%s3307_s9 + $0xf0] ss:$12 sps:$4 sm:$0xff]  }
  0xa0   : > { %1689 = vmatpush1.bf16.msra.mxu0 %v2622_v20  ;;  %v2668_v51 = vld [vmem:[%s3307_s9 + $0x28c] ss:$12 sps:$4 sm:$0xff]   ;;  %v2672_v54 = vld [vmem:[%s3307_s9 + $0xf4] ss:$12 sps:$4 sm:$0xff]   ;;  %v2677_v57 = vld [vmem:[%s3307_s9 + $0x270] ss:$12 sps:$4 sm:$0xff]  }
  0xa1   : > { %1690 = vmatprep.subr.bf16.mxu0 %v2624_v22  ;;  %v2674_v55 = vld [vmem:[%s3307_s9 + $0x274] ss:$12 sps:$4 sm:$0xff]   ;;  %v2678_v58 = vld [vmem:[%s3307_s9 + $0xdc] ss:$12 sps:$4 sm:$0xff]   ;;  %v2682_v60 = vld [vmem:[%s3307_s9 + $0xd8] ss:$12 sps:$4 sm:$0xff]  }
  0xa2   : > { %1732 = vmatpush1.bf16.msra.mxu1 %v2623_v21  ;;  %v2680_v59 = vld [vmem:[%s3307_s9 + $0x25c] ss:$12 sps:$4 sm:$0xff]   ;;  %v2683_v61 = vld [vmem:[%s3307_s9 + $0x258] ss:$12 sps:$4 sm:$0xff]   ;;  %v2688_v2 = vld [vmem:[%s3307_s9 + $0xc0] ss:$12 sps:$4 sm:$0xff]  }
  0xa3   : > { %1733 = vmatprep.subr.bf16.mxu1 %v2626_v23  ;;  %v2684_v62 = vld [vmem:[%s3307_s9 + $0xc4] ss:$12 sps:$4 sm:$0xff]   ;;  %v2689_v3 = vld [vmem:[%s3307_s9 + $0x240] ss:$12 sps:$4 sm:$0xff]   ;;  %v2696_v8 = vld [vmem:[%s3307_s9 + $0x3a8] ss:$12 sps:$4 sm:$0xff]  }
  0xa4   : > { %1691 = vmatpush1.bf16.msra.mxu0 %v2628_v24  ;;  %v2686_v63 = vld [vmem:[%s3307_s9 + $0x244] ss:$12 sps:$4 sm:$0xff]   ;;  %v2698_v4 = vld [vmem:[%s3307_s9 + $0x3ac] ss:$12 sps:$4 sm:$0xff]   ;;  %v3384_v7 = vld [vmem:[%s3521_s0 + $0x8] ss:$24 sps:$4 sm:$0xff]  }
  0xa5   : > { %1692 = vmatprep.subr.bf16.mxu0 %v2630_v26  ;;  %v3378_v5 = vld [vmem:[%s3521_s0] ss:$24 sps:$4 sm:$0xff]   ;;  %v2699_v6 = vld [vmem:[%s3307_s9 + $0x170] ss:$12 sps:$4 sm:$0xff]   ;;  %v2714_v19 = vld [vmem:[%s3307_s9 + $0x128] ss:$12 sps:$4 sm:$0xff]  }
  0xa6   : > { %1734 = vmatpush1.bf16.msra.mxu1 %v2629_v25  ;;  %v2700_v9 = vld [vmem:[%s3307_s9 + $0xb0] ss:$12 sps:$4 sm:$0xff]   ;;  %v2703_v10 = vld [vmem:[%s3307_s9 + $0x394] ss:$12 sps:$4 sm:$0xff]   ;;  %v2704_v11 = vld [vmem:[%s3307_s9 + $0x158] ss:$12 sps:$4 sm:$0xff]  }
  0xa7   : > { %1735 = vmatprep.subr.bf16.mxu1 %v2632_v27  ;;  %v2701_v12 = vld [vmem:[%s3307_s9 + $0x390] ss:$12 sps:$4 sm:$0xff]   ;;  %v2705_v13 = vld [vmem:[%s3307_s9 + $0x98] ss:$12 sps:$4 sm:$0xff]   ;;  %v2709_v15 = vld [vmem:[%s3307_s9 + $0x140] ss:$12 sps:$4 sm:$0xff]  }
  0xa8   : > { %1693 = vmatpush1.bf16.msra.mxu0 %v2634_v28  ;;  %v2708_v14 = vld [vmem:[%s3307_s9 + $0x37c] ss:$12 sps:$4 sm:$0xff]   ;;  %v2706_v16 = vld [vmem:[%s3307_s9 + $0x378] ss:$12 sps:$4 sm:$0xff]   ;;  %v2710_v17 = vld [vmem:[%s3307_s9 + $0x80] ss:$12 sps:$4 sm:$0xff]  }
  0xa9   : > { %1694 = vmatprep.subr.bf16.mxu0 %v2636_v30  ;;  %v2713_v18 = vld [vmem:[%s3307_s9 + $0x364] ss:$12 sps:$4 sm:$0xff]   ;;  %v2711_v20 = vld [vmem:[%s3307_s9 + $0x360] ss:$12 sps:$4 sm:$0xff]   ;;  %v2715_v21 = vld [vmem:[%s3307_s9 + $0x68] ss:$12 sps:$4 sm:$0xff]  }
  0xaa   : > { %1736 = vmatpush1.bf16.msra.mxu1 %v2635_v29  ;;  %v2719_v22 = vld [vmem:[%s3307_s9 + $0x110] ss:$12 sps:$4 sm:$0xff]   ;;  %v2716_v23 = vld [vmem:[%s3307_s9 + $0x348] ss:$12 sps:$4 sm:$0xff]   ;;  %v2724_v26 = vld [vmem:[%s3307_s9 + $0xf8] ss:$12 sps:$4 sm:$0xff]  }
  0xab   : > { %1737 = vmatprep.subr.bf16.mxu1 %v2638_v31  ;;  %v2720_v24 = vld [vmem:[%s3307_s9 + $0x50] ss:$12 sps:$4 sm:$0xff]   ;;  %v2723_v25 = vld [vmem:[%s3307_s9 + $0x334] ss:$12 sps:$4 sm:$0xff]   ;;  %v2725_v28 = vld [vmem:[%s3307_s9 + $0x38] ss:$12 sps:$4 sm:$0xff]  }
  0xac   : > { %1695 = vmatpush1.bf16.msra.mxu0 %v2640_v32  ;;  %v2721_v27 = vld [vmem:[%s3307_s9 + $0x330] ss:$12 sps:$4 sm:$0xff]   ;;  %v2729_v30 = vld [vmem:[%s3307_s9 + $0xe0] ss:$12 sps:$4 sm:$0xff]   ;;  %v2726_v31 = vld [vmem:[%s3307_s9 + $0x318] ss:$12 sps:$4 sm:$0xff]  }
  0xad   : > { %1696 = vmatprep.subr.bf16.mxu0 %v2642_v34  ;;  %v2728_v29 = vld [vmem:[%s3307_s9 + $0x31c] ss:$12 sps:$4 sm:$0xff]   ;;  %v2730_v32 = vld [vmem:[%s3307_s9 + $0x20] ss:$12 sps:$4 sm:$0xff]   ;;  %s3533_s26 = smov (!%p661_p11, %s660_s26), 17  ;;  %s3486_s5 = scalar_lea.vmem [#allocation3], %s2552_s4 }
  0xae   : > { %1738 = vmatpush1.bf16.msra.mxu1 %v2641_v33  ;;  %v2733_v33 = vld [vmem:[%s3307_s9 + $0x304] ss:$12 sps:$4 sm:$0xff]   ;;  %v2734_v34 = vld [vmem:[%s3307_s9 + $0xc8] ss:$12 sps:$4 sm:$0xff]   ;;  %s663_s29 = scalar_lea.vmem %s3523_s2, %s3533_s26  ;;  %s2483_s12 = smul.u32 (%p2890_p6), 24, %s2825_s14 }
  0xaf   : > { %1739 = vmatprep.subr.bf16.mxu1 %v2644_v35  ;;  %v2731_v35 = vld [vmem:[%s3307_s9 + $0x300] ss:$12 sps:$4 sm:$0xff]  }
  0xb0   : > { %1697 = vmatpush2.bf16.msra.mxu0 %v2646_v36  ;;  %v2735_v36 = vld [vmem:[%s3307_s9 + $0x8] ss:$12 sps:$4 sm:$0xff]   ;;  %s1994_s7 = scalar_lea.vmem (%p2890_p6), %s3524_s3, %s2483_s12 }
  0xb1   : > { %1698 = vmatprep.subr.bf16.mxu0 %v2648_v38  ;;  %v2739_v38 = vld [vmem:[%s3307_s9 + $0x2f0] ss:$12 sps:$4 sm:$0xff]  }
  0xb2   : > { %1740 = vmatpush2.bf16.msra.mxu1 %v2647_v37  ;;  %v2738_v37 = vld [vmem:[%s3307_s9 + $0x46c] ss:$12 sps:$4 sm:$0xff]  }
  0xb3   : > { %1741 = vmatprep.subr.bf16.mxu1 %v2650_v39  ;;  %v2736_v39 = vld [vmem:[%s3307_s9 + $0x468] ss:$12 sps:$4 sm:$0xff]  }
  0xb4   : > { %1699 = vmatpush2.bf16.msra.mxu0 %v2652_v40  ;;  %v2740_v40 = vld [vmem:[%s3307_s9 + $0x230] ss:$12 sps:$4 sm:$0xff]  }
  0xb5   : > { %1700 = vmatprep.subr.bf16.mxu0 %v2654_v42  ;;  %v3427_v42 = vld [vmem:[%s3521_s0 + $0x14] ss:$24 sps:$4 sm:$0xff]  }
  0xb6   : > { %1742 = vmatpush2.bf16.msra.mxu1 %v2653_v41  ;;  %v2743_v41 = vld [vmem:[%s3307_s9 + $0x454] ss:$12 sps:$4 sm:$0xff]  }
  0xb7   : > { %1743 = vmatprep.subr.bf16.mxu1 %v2656_v43  ;;  %v2744_v43 = vld [vmem:[%s3307_s9 + $0x2d8] ss:$12 sps:$4 sm:$0xff]  }
  0xb8   : > { %1701 = vmatpush2.bf16.msra.mxu0 %v2658_v44  ;;  %v2741_v44 = vld [vmem:[%s3307_s9 + $0x450] ss:$12 sps:$4 sm:$0xff]  }
  0xb9   : > { %1702 = vmatprep.subr.bf16.mxu0 %v2660_v46  ;;  %v2748_v46 = vld [vmem:[%s3307_s9 + $0x43c] ss:$12 sps:$4 sm:$0xff]  }
  0xba   : > { %1744 = vmatpush2.bf16.msra.mxu1 %v2659_v45  ;;  %v2745_v45 = vld [vmem:[%s3307_s9 + $0x218] ss:$12 sps:$4 sm:$0xff]  }
  0xbb   : > { %1745 = vmatprep.subr.bf16.mxu1 %v2662_v47  ;;  %v2749_v47 = vld [vmem:[%s3307_s9 + $0x2c0] ss:$12 sps:$4 sm:$0xff]  }
  0xbc   : > { %1703 = vmatpush2.bf16.msra.mxu0 %v2664_v48  ;;  %v2746_v48 = vld [vmem:[%s3307_s9 + $0x438] ss:$12 sps:$4 sm:$0xff]  }
  0xbd   : > { %1704 = vmatprep.subr.bf16.mxu0 %v2666_v50  ;;  %v2753_v50 = vld [vmem:[%s3307_s9 + $0x424] ss:$12 sps:$4 sm:$0xff]  }
  0xbe   : > { %1746 = vmatpush2.bf16.msra.mxu1 %v2665_v49  ;;  %v2750_v49 = vld [vmem:[%s3307_s9 + $0x200] ss:$12 sps:$4 sm:$0xff]  }
  0xbf   : > { %1747 = vmatprep.subr.bf16.mxu1 %v2668_v51  ;;  %v2754_v51 = vld [vmem:[%s3307_s9 + $0x2a8] ss:$12 sps:$4 sm:$0xff]  }
  0xc0   : > { %1705 = vmatpush2.bf16.msra.mxu0 %v2670_v52  ;;  %v2751_v52 = vld [vmem:[%s3307_s9 + $0x420] ss:$12 sps:$4 sm:$0xff]  }
  0xc1   : > { %1706 = vmatprep.subr.bf16.mxu0 %v2672_v54  ;;  %v2758_v54 = vld [vmem:[%s3307_s9 + $0x40c] ss:$12 sps:$4 sm:$0xff]  }
  0xc2   : > { %1748 = vmatpush2.bf16.msra.mxu1 %v2671_v53  ;;  %v2755_v53 = vld [vmem:[%s3307_s9 + $0x1e8] ss:$12 sps:$4 sm:$0xff]  }
  0xc3   : > { %1749 = vmatprep.subr.bf16.mxu1 %v2674_v55  ;;  %v2756_v55 = vld [vmem:[%s3307_s9 + $0x408] ss:$12 sps:$4 sm:$0xff]  }
  0xc4   : > { %1707 = vmatpush2.bf16.msra.mxu0 %v2676_v56  ;;  %v2760_v56 = vld [vmem:[%s3307_s9 + $0x1d0] ss:$12 sps:$4 sm:$0xff]  }
  0xc5   : > { %1708 = vmatprep.subr.bf16.mxu0 %v2678_v58  ;;  %v2764_v58 = vld [vmem:[%s3307_s9 + $0x278] ss:$12 sps:$4 sm:$0xff]  }
  0xc6   : > { %1750 = vmatpush2.bf16.msra.mxu1 %v2677_v57  ;;  %v2763_v57 = vld [vmem:[%s3307_s9 + $0x3f4] ss:$12 sps:$4 sm:$0xff]  }
  0xc7   : > { %1751 = vmatprep.subr.bf16.mxu1 %v2680_v59  ;;  %v2761_v59 = vld [vmem:[%s3307_s9 + $0x3f0] ss:$12 sps:$4 sm:$0xff]  }
  0xc8   : > { %1709 = vmatpush2.bf16.msra.mxu0 %v2682_v60  ;;  %v2765_v60 = vld [vmem:[%s3307_s9 + $0x1b8] ss:$12 sps:$4 sm:$0xff]  }
  0xc9   : > { %1710 = vmatprep.subr.bf16.mxu0 %v2684_v62  ;;  %v2769_v62 = vld [vmem:[%s3307_s9 + $0x260] ss:$12 sps:$4 sm:$0xff]  }
  0xca   : > { %1752 = vmatpush2.bf16.msra.mxu1 %v2683_v61  ;;  %v2768_v61 = vld [vmem:[%s3307_s9 + $0x3dc] ss:$12 sps:$4 sm:$0xff]  }
  0xcb   : > { %1753 = vmatprep.subr.bf16.mxu1 %v2686_v63  ;;  %v2766_v63 = vld [vmem:[%s3307_s9 + $0x3d8] ss:$12 sps:$4 sm:$0xff]  }
  0xcc   : > { %1711 = vmatpush2.bf16.msra.mxu0 %v2688_v2  ;;  %v2770_v2 = vld [vmem:[%s3307_s9 + $0x1a0] ss:$12 sps:$4 sm:$0xff]  }
  0xcd   : > { %1766 = vmatprep.subr.bf16.mxu0 %v2698_v4  ;;  %v2774_v4 = vld [vmem:[%s3307_s9 + $0x248] ss:$12 sps:$4 sm:$0xff]  }
  0xce   : > { %1754 = vmatpush2.bf16.msra.mxu1 %v2689_v3  ;;  %v2773_v3 = vld [vmem:[%s3307_s9 + $0x3c4] ss:$12 sps:$4 sm:$0xff]  }
  0xcf   : > { %2484 = vmatprep.subr.bf16.mxu1 %v2699_v6  ;;  %1713 = vmatmul.mubr.bf16.vlgmr.msra.gmra.mxu0 %v3378_v5  ;;  %v2775_v6 = vld [vmem:[%s3307_s9 + $0x188] ss:$12 sps:$4 sm:$0xff]  }
  0xd0   : > { %1767 = vmatpush1.bf16.msra.mxu0 %v2696_v8  ;;  %1798 = vmatprep.mubr.bf16.mxu0 %v3427_v42  ;;  %v2779_v8 = vld [vmem:[%s3307_s9 + $0x470] ss:$12 sps:$4 sm:$0xff]  }
  0xd1   : > { %1756 = vmatmul.mubr.bf16.vlgmr.msra.gmra.mxu1 %v3384_v7  ;;  %1768 = vmatprep.subr.bf16.mxu0 %v2703_v10  ;;  %v2780_v10 = vld [vmem:[%s3307_s9 + $0x3b0] ss:$12 sps:$4 sm:$0xff]  }
  0xd2   : > { %2485 = vmatpush3.bf16.msra.mxu1 %v2700_v9  ;;  %1841 = vmatprep.mubr.bf16.mxu1 %v3299_v0  ;;  %v2718_v0 = vld [vmem:[%s3307_s9 + $0x34c] ss:$12 sps:$4 sm:$0xff]   ;;  %v2776_v9 = vld [vmem:[%s3521_s0 + $0x10] ss:$24 sps:$4 sm:$0xff]  }
  0xd3   : > { %2486 = vmatprep.subr.bf16.mxu1 %v2704_v11  ;;  %v2781_v11 = vld [vmem:[%s3307_s9 + $0x458] ss:$12 sps:$4 sm:$0xff]  }
  0xd4   : > { %1769 = vmatpush1.bf16.msra.mxu0 %v2701_v12  ;;  %v2782_v12 = vld [vmem:[%s3307_s9 + $0x398] ss:$12 sps:$4 sm:$0xff]  }
  0xd5   : > { %1770 = vmatprep.subr.bf16.mxu0 %v2708_v14  ;;  %v2784_v14 = vld [vmem:[%s3307_s9 + $0x380] ss:$12 sps:$4 sm:$0xff]  }
  0xd6   : > { %2487 = vmatpush3.bf16.msra.mxu1 %v2705_v13  ;;  %v2783_v13 = vld [vmem:[%s3307_s9 + $0x440] ss:$12 sps:$4 sm:$0xff]  }
  0xd7   : > { %2488 = vmatprep.subr.bf16.mxu1 %v2709_v15  ;;  %v2785_v15 = vld [vmem:[%s3307_s9 + $0x428] ss:$12 sps:$4 sm:$0xff]  }
  0xd8   : > { %1771 = vmatpush1.bf16.msra.mxu0 %v2706_v16  ;;  %v2786_v16 = vld [vmem:[%s3307_s9 + $0x368] ss:$12 sps:$4 sm:$0xff]  }
  0xd9   : > { %1772 = vmatprep.subr.bf16.mxu0 %v2713_v18  ;;  %v2789_v18 = vld [vmem:[%s3307_s9 + $0x3f8] ss:$12 sps:$4 sm:$0xff]  }
  0xda   : > { %2489 = vmatpush3.bf16.msra.mxu1 %v2710_v17  ;;  %v2788_v17 = vld [vmem:[%s3307_s9 + $0x350] ss:$12 sps:$4 sm:$0xff]  }
  0xdb   : > { %2490 = vmatprep.subr.bf16.mxu1 %v2714_v19  ;;  %v2790_v19 = vld [vmem:[%s3307_s9 + $0x338] ss:$12 sps:$4 sm:$0xff]  }
  0xdc   : > { %1773 = vmatpush1.bf16.msra.mxu0 %v2711_v20  ;;  %v2791_v20 = vld [vmem:[%s3307_s9 + $0x3e0] ss:$12 sps:$4 sm:$0xff]  }
  0xdd   : > { %1774 = vmatprep.subr.bf16.mxu0 %v2718_v0  ;;  %v2793_v0 = vld [vmem:[%s3307_s9 + $0x3c8] ss:$12 sps:$4 sm:$0xff]  }
  0xde   : > { %2491 = vmatpush3.bf16.msra.mxu1 %v2715_v21  ;;  %v2792_v21 = vld [vmem:[%s3307_s9 + $0x320] ss:$12 sps:$4 sm:$0xff]  }
  0xdf   : > { %2492 = vmatprep.subr.bf16.mxu1 %v2719_v22  ;;  %v2794_v22 = vld [vmem:[%s3307_s9 + $0x308] ss:$12 sps:$4 sm:$0xff]  }
  0xe0   : > { %1775 = vmatpush1.bf16.msra.mxu0 %v2716_v23 }
  0xe1   : > { %1776 = vmatprep.subr.bf16.mxu0 %v2723_v25 }
  0xe2   : > { %2493 = vmatpush3.bf16.msra.mxu1 %v2720_v24  ;;  %v1955_v24 = vlaneseq }
  0xe3   : > { %2494 = vmatprep.subr.bf16.mxu1 %v2724_v26 }
  0xe4   : > { %1777 = vmatpush1.bf16.msra.mxu0 %v2721_v27  ;;  %v1956_v27 = vshrl.u32 %v1955_v24, 7 }
  0xe5   : > { %1778 = vmatprep.subr.bf16.mxu0 %v2728_v29 }
  0xe6   : > { %2495 = vmatpush3.bf16.msra.mxu1 %v2725_v28 }
  0xe7   : > { %2496 = vmatprep.subr.bf16.mxu1 %v2729_v30  ;;  %v1957_v30 = vsub.s32 0, %v1956_v27 }
  0xe8   : > { %1779 = vmatpush1.bf16.msra.mxu0 %v2726_v31 }
  0xe9   : > { %1780 = vmatprep.subr.bf16.mxu0 %v2733_v33  ;;  %v1953_v33 = vld [vmem:[%s663_s29] sm:$0x7] }
  0xea   : > { %2497 = vmatpush3.bf16.msra.mxu1 %v2730_v32 }
  0xeb   : > { %2498 = vmatprep.subr.bf16.mxu1 %v2734_v34 }
  0xec   : > { %1781 = vmatpush1.bf16.msra.mxu0 %v2731_v35  ;;  %v1961_v35 = vsub.s32 1, %v1956_v27 }
  0xed   : > { %1782 = vmatprep.subr.bf16.mxu0 %v2738_v37 }
  0xee   : > { %2499 = vmatpush3.bf16.msra.mxu1 %v2735_v36 }
  0xef   : > { %2506 = vmatprep.subr.bf16.mxu1 %v2739_v38 }
  0xf0   : > { %1783 = vmatpush2.bf16.msra.mxu0 %v2736_v39  ;;  %v1958_v39 = vrot.slane %v1953_v33, %v1957_v30 }
  0xf1   : > { %1842 = vmatmul.mubr.bf16.vlgmr.msra.gmra.mxu1 %v3378_v5  ;;  %1784 = vmatprep.subr.bf16.mxu0 %v2743_v41  ;;  %v2771_v5 = vld [vmem:[%s3307_s9 + $0x3c0] ss:$12 sps:$4 sm:$0xff]  }
  0xf2   : > { %2507 = vmatpush3.bf16.msra.mxu1 %v2740_v40  ;;  %1882 = vmatprep.mubr.bf16.mxu1 %v3304_v1  ;;  %v2759_v1 = vld [vmem:[%s3307_s9 + $0x290] ss:$12 sps:$4 sm:$0xff]  }
  0xf3   : > { %2508 = vmatprep.subr.bf16.mxu1 %v2744_v43 }
  0xf4   : > { %1785 = vmatpush2.bf16.msra.mxu0 %v2741_v44  ;;  %v1962_v44 = vrot.slane %v1953_v33, %v1961_v35 }
  0xf5   : > { %1786 = vmatprep.subr.bf16.mxu0 %v2748_v46 }
  0xf6   : > { %2509 = vmatpush3.bf16.msra.mxu1 %v2745_v45 }
  0xf7   : > { %2510 = vmatprep.subr.bf16.mxu1 %v2749_v47 }
  0xf8   : > { %1787 = vmatpush2.bf16.msra.mxu0 %v2746_v48 }
  0xf9   : > { %1788 = vmatprep.subr.bf16.mxu0 %v2753_v50 }
  0xfa   : > { %2511 = vmatpush3.bf16.msra.mxu1 %v2750_v49 }
  0xfb   : > { %2512 = vmatprep.subr.bf16.mxu1 %v2754_v51 }
  0xfc   : > { %1789 = vmatpush2.bf16.msra.mxu0 %v2751_v52 }
  0xfd   : > { %1790 = vmatprep.subr.bf16.mxu0 %v2758_v54 }
  0xfe   : > { %2513 = vmatpush3.bf16.msra.mxu1 %v2755_v53 }
  0xff   : > { %2514 = vmatprep.subr.bf16.mxu1 %v2759_v1 }
 0x100   : > { %1791 = vmatpush2.bf16.msra.mxu0 %v2756_v55 }
 0x101   : > { %1792 = vmatprep.subr.bf16.mxu0 %v2763_v57 }
 0x102   : > { %2515 = vmatpush3.bf16.msra.mxu1 %v2760_v56 }
 0x103   : > { %2516 = vmatprep.subr.bf16.mxu1 %v2764_v58 }
 0x104   : > { %1793 = vmatpush2.bf16.msra.mxu0 %v2761_v59 }
 0x105   : > { %1794 = vmatprep.subr.bf16.mxu0 %v2768_v61 }
 0x106   : > { %2517 = vmatpush3.bf16.msra.mxu1 %v2765_v60 }
 0x107   : > { %2518 = vmatprep.subr.bf16.mxu1 %v2769_v62 }
 0x108   : > { %1795 = vmatpush2.bf16.msra.mxu0 %v2766_v63 }
 0x109   : > { %1796 = vmatprep.subr.bf16.mxu0 %v2773_v3 }
 0x10a   : > { %2519 = vmatpush3.bf16.msra.mxu1 %v2770_v2  ;;  %v1965_v2 = vsub.s32 2, %v1956_v27 }
 0x10b   : > { %2520 = vmatprep.subr.bf16.mxu1 %v2774_v4 }
 0x10c   : > { %1797 = vmatpush2.bf16.msra.mxu0 %v2771_v5 }
 0x10d   : > { %2528 = vmatprep.subr.bf16.mxu0 %v2779_v8 }
 0x10e   : > { %2521 = vmatpush3.bf16.msra.mxu1 %v2775_v6 }
 0x10f   : > { %1799 = vmatmul.mubr.bf16.vlgmr.msra.gmra.mxu0 %v2776_v9 }
 0x110   : > { %2529 = vmatpush3.bf16.msra.mxu0 %v2780_v10  ;;  %1923 = vmatprep.mubr.bf16.mxu0 %v3427_v42 }
 0x111   : > { %1883 = vmatmul.mubr.bf16.vlgmr.msra.gmra.mxu1 %v3384_v7  ;;  %2530 = vmatprep.subr.bf16.mxu0 %v2781_v11  ;;  %v2787_v7 = vld [vmem:[%s3307_s9 + $0x410] ss:$12 sps:$4 sm:$0xff]   ;;  %v1966_v11 = vrot.slane %v1953_v33, %v1965_v2 }
 0x114   : > { %2531 = vmatpush3.bf16.msra.mxu0 %v2782_v12 }
 0x115   : > { %2532 = vmatprep.subr.bf16.mxu0 %v2783_v13 }
 0x118   : > { %2533 = vmatpush3.bf16.msra.mxu0 %v2784_v14 }
 0x119   : > { %2534 = vmatprep.subr.bf16.mxu0 %v2785_v15 }
 0x11c   : > { %2535 = vmatpush3.bf16.msra.mxu0 %v2786_v16 }
 0x11d   : > { %2536 = vmatprep.subr.bf16.mxu0 %v2787_v7 }
 0x120   : > { %2537 = vmatpush3.bf16.msra.mxu0 %v2788_v17 }
 0x121   : > { %2538 = vmatprep.subr.bf16.mxu0 %v2789_v18 }
 0x124   : > { %2539 = vmatpush3.bf16.msra.mxu0 %v2790_v19 }
 0x125   : > { %2540 = vmatprep.subr.bf16.mxu0 %v2791_v20 }
 0x128   : > { %2541 = vmatpush3.bf16.msra.mxu0 %v2792_v21 }
 0x129   : > { %2542 = vmatprep.subr.bf16.mxu0 %v2793_v0 }
 0x12c   : > { %2543 = vmatpush3.bf16.msra.mxu0 %v2794_v22 }
 0x12f   : > { %1924 = vmatmul.mubr.bf16.vlgmr.msra.gmra.mxu0 %v2776_v9 }
 0x18f   : > { %v1714_v23 = vpop.f32.mrf.mxu0 }
 0x191   : > { %v1757_v25 = vpop.f32.mrf.mxu1  ;;  %v1716_v26 = vpop.f32.mrf.mxu0 }
 0x192   : > { %v1758_v34 = vadd.f32 %v1757_v25, %v1714_v23 }
 0x193   : > { %v1759_v28 = vpop.f32.mrf.mxu1  ;;  %v1718_v29 = vpop.f32.mrf.mxu0 }
 0x194   : > { %v1760_v37 = vadd.f32 %v1759_v28, %v1716_v26 }
 0x195   : > { %v1761_v31 = vpop.f32.mrf.mxu1  ;;  %v1720_v32 = vpop.f32.mrf.mxu0 }
 0x196   : > { %v1762_v42 = vadd.f32 %v1761_v31, %v1718_v29 }
 0x197   : > { %v1763_v40 = vpop.f32.mrf.mxu1 }
 0x198   : > { %v1764_v47 = vadd.f32 %v1763_v40, %v1720_v32 }
 0x1b1   : > { %v2500_v45 = vpop.f32.mrf.mxu1 }
 0x1b3   : > { %v2501_v53 = vpop.f32.mrf.mxu1 }
 0x1b4   : > { %v2502_v63 = vadd.f32 %v2501_v53, %v2500_v45 }
 0x1b5   : > { %v2503_v55 = vpop.f32.mrf.mxu1 }
 0x1b7   : > { %v2504_v56 = vpop.f32.mrf.mxu1 }
 0x1b8   : > { %v2505_v9 = vadd.f32 %v2504_v56, %v2503_v55 }
 0x1cf   : > { %v1800_v36 = vpop.f32.mrf.mxu0 }
 0x1d0   : > { %v1801_v38 = vadd.f32 %v1800_v36, %v1758_v34 }
 0x1d1   : > { %v1802_v41 = vpop.f32.mrf.mxu0  ;;  %v2522_v57 = vpop.f32.mrf.mxu1 }
 0x1d2   : > { %v1803_v43 = vadd.f32 %v1802_v41, %v1760_v37  ;;  %v1970_v48 = vadd.f32 %v1958_v39, %v1801_v38 }
 0x1d3   : > { %v1804_v46 = vpop.f32.mrf.mxu0  ;;  %v2523_v58 = vpop.f32.mrf.mxu1 }
 0x1d4   : > { %v1805_v49 = vadd.f32 %v1804_v46, %v1762_v42  ;;  %1976 = vst [vmem:[%s3486_s5] sm:$0xff] %v1970_v48  ;;  %v1971_v51 = vadd.f32 %v1962_v44, %v1803_v43  ;;  %v2524_v60 = vadd.f32 %v2523_v58, %v2522_v57 }
 0x1d5   : > { %v1806_v50 = vpop.f32.mrf.mxu0  ;;  %v2525_v59 = vpop.f32.mrf.mxu1 }
 0x1d6   : > { %v1807_v52 = vadd.f32 %v1806_v50, %v1764_v47  ;;  %1977 = vst [vmem:[%s3486_s5 + $0x8] sm:$0xff] %v1971_v51  ;;  %v1973_v54 = vadd.f32 %v1958_v39, %v1805_v49  ;;  %v1885_v4 = vadd.f32 %v2524_v60, %v2502_v63 }
 0x1d7   : > { %v2526_v61 = vpop.f32.mrf.mxu1 }
 0x1d8   : > { %1979 = vst [vmem:[%s3486_s5 + $0x18] sm:$0xff] %v1973_v54  ;;  %v1974_v1 = vadd.f32 %v1962_v44, %v1807_v52  ;;  %v2527_v5 = vadd.f32 %v2526_v61, %v2525_v59 }
 0x1da   : > { %1980 = vst [vmem:[%s3486_s5 + $0x20] sm:$0xff] %v1974_v1  ;;  %v1888_v13 = vadd.f32 %v2527_v5, %v2505_v9 }
 0x1db   : > { %v2007_v17 = vld [vmem:[%s3486_s5] sm:$0xff] (%p2890_p6) }
 0x1dc   : > { %2008 = vst [vmem:[%s1994_s7] sm:$0xff] (%p2890_p6), %v2007_v17 }
 0x1dd   : > { %v2009_v18 = vld [vmem:[%s3486_s5 + $0x8] sm:$0xff] (%p2890_p6) }
 0x1de   : > { %2010 = vst [vmem:[%s1994_s7 + $0x8] sm:$0xff] (%p2890_p6), %v2009_v18 }
 0x1df   : > { %v2013_v20 = vld [vmem:[%s3486_s5 + $0x18] sm:$0xff] (%p2890_p6) }
 0x1e0   : > { %2014 = vst [vmem:[%s1994_s7 + $0x90] sm:$0xff] (%p2890_p6), %v2013_v20 }
 0x1e1   : > { %v2015_v21 = vld [vmem:[%s3486_s5 + $0x20] sm:$0xff] (%p2890_p6) }
 0x1e2   : > { %2016 = vst [vmem:[%s1994_s7 + $0x98] sm:$0xff] (%p2890_p6), %v2015_v21 }
 0x1ef   : > { %v2544_v62 = vpop.f32.mrf.mxu0 }
 0x1f1   : > { %v2545_v3 = vpop.f32.mrf.mxu0 }
 0x1f2   : > { %v2546_v6 = vadd.f32 %v2545_v3, %v2544_v62 }
 0x1f3   : > { %v2547_v8 = vpop.f32.mrf.mxu0 }
 0x1f4   : > { %v1926_v10 = vadd.f32 %v2546_v6, %v1885_v4 }
 0x1f5   : > { %v2548_v12 = vpop.f32.mrf.mxu0 }
 0x1f6   : > { %v2549_v14 = vadd.f32 %v2548_v12, %v2547_v8  ;;  %v1972_v15 = vadd.f32 %v1966_v11, %v1926_v10 }
 0x1f8   : > { %v1929_v16 = vadd.f32 %v2549_v14, %v1888_v13  ;;  %1978 = vst [vmem:[%s3486_s5 + $0x10] sm:$0xff] %v1972_v15  ;;  %1988 = sbr.rel (!%p2890_p6) target bundleno = 517 (0x205), region = 70 }
 0x1fa   : > { %v1975_v7 = vadd.f32 %v1966_v11, %v1929_v16 }
 0x1fc   : > { %1981 = vst [vmem:[%s3486_s5 + $0x28] sm:$0xff] %v1975_v7 }
 0x1ff   : > { %v2011_v19 = vld [vmem:[%s3486_s5 + $0x10] sm:$0xff] }
 0x200   : > { %2012 = vst [vmem:[%s1994_s7 + $0x10] sm:$0xff] %v2011_v19 }
 0x203   : > { %v2017_v0 = vld [vmem:[%s3486_s5 + $0x28] sm:$0xff] }
 0x204   : > { %2018 = vst [vmem:[%s1994_s7 + $0xa0] sm:$0xff] %v2017_v0 }
 0x205 PF: > { %s13_s16 = sadd.s32 1, %s2833_s16   ;;  %s3526_s12 = smov %s2821_s13 }
 0x206   : > { %p10_p12 = scmp.ge.s32.totalorder %s13_s16, 8   ;;  %s3527_s13 = smov %s2895_s22 }
 0x207   : > { %s3528_s14 = smov %s2829_s15  ;;  %s3529_s15 = smov %s3531_s17 }
 0x208   :  { %12 = sbr.rel (!%p10_p12) target bundleno = 3 (0x3), region = 136 }

// kernel: bert_forward.15
= control target key start
LH: loop header
LB: loop body
LE: loop exit
PB: predicated region body
PF: predicated region fallthrough
CT: control target
= control target key end

     0   :  { %s1944_s9 = smov 0   ;;  %s2328_s0 = inlined_call_operand.vmem [shape: f32[2,8,2304], index: 0, kind: input, shape index: {}]   ;;  %s2329_s1 = inlined_call_operand.vmem [shape: f32[2,1,8], index: 1, kind: input, shape index: {}]   ;;  %s2330_s2 = inlined_call_operand.vmem [shape: f32[2,8,768], index: 2, kind: output, shape index: {}]  }
   0x1 LB: > { %s1631_s10 = sadd.s32 4294967295, %s1924_s9   ;;  %p1635_p0 = scmp.ge.s32.totalorder %s1924_s9, 1  ;;  %s1924_s9 = sphi %s1944_s9, %s12_s9  }
   0x2   : > { %p120_p1 = scmp.lt.s32.totalorder %s1924_s9, 3 }
   0x4   : > { %p121_p2 = pnand %p1635_p0, %p120_p1 }
   0x5   : > { %p145_p3 = scmp.lt.s32.totalorder (!%p121_p2), %s1631_s10, 1  ;;  %s1928_s18 = smov (!%p121_p2), 64  }
   0x6   : > { %124 = sbr.rel (%p121_p2) target bundleno = 1512 (0x5e8), region = 28 }
   0xb   : > { %v1926_v0 = vmov 0.0   ;;  %vm1927_vm0 = vmmov 0   ;;  %s2332_s10 = smov (!%p145_p3, %s1631_s10), 1  ;;  %vm181_vm1 = vcmask 523264   ;;  %vm236_vm2 = vcmask 64512  }
   0xc   : > { %1713 = vmatprep.subr.bf16.mxu0 %v1926_v0  ;;  %1715 = vmatprep.mubr.msk.bf16.mxu0 %vm1927_vm0, %v1926_v0  ;;  %s1857_s11 = smul.u32 144, %s2332_s10  ;;  %s152_s17 = scalar_lea.vmem %s2329_s1, %s2332_s10  ;;  %vm252_vm3 = vcmask 1043456  }
   0xd   : > { %1719 = vmatprep.subr.bf16.mxu1 %v1926_v0  ;;  %1721 = vmatprep.mubr.msk.bf16.mxu1 %vm1927_vm0, %v1926_v0  ;;  %v1977_v7 = vld [vmem:[%s152_s17] ss:$0 sm:$0xff]  ;;  %s1858_s19 = smul.u32 48, %s2332_s10 }
   0xe   : > { %s1964_s14 = scalar_lea.vmem %s2328_s0, %s1857_s11 }
   0xf   : > { %v165_v1 = vld [vmem:[%s1964_s14 + $0x30] sm:$0xff]  ;;  %v159_v4 = vld [vmem:[%s1964_s14] sm:$0xff]  ;;  %v160_v14 = vld [vmem:[%s1964_s14 + $0x8] sm:$0xff]  ;;  %s2308_s22 = scalar_lea.vmem %s2330_s2, %s1858_s19 }
  0x10   : > { %v179_v2 = vpack.c.bf16 %v165_v1, %v165_v1  ;;  %v178_v5 = vpack.c.bf16 %v159_v4, %v159_v4  ;;  %v167_v15 = vld [vmem:[%s1964_s14 + $0x40] sm:$0xff]  ;;  %v411_v16 = vpack.c.bf16 %v160_v14, %v160_v14  ;;  %v161_v18 = vld [vmem:[%s1964_s14 + $0x10] sm:$0xff]  ;;  %v168_v20 = vld [vmem:[%s1964_s14 + $0x48] sm:$0xff] }
  0x11   : > { %v1986_v17 = vpack.c.bf16 %v167_v15, %v167_v15  ;;  %v1991_v19 = vpack.c.bf16 %v161_v18, %v161_v18  ;;  %v1996_v21 = vpack.c.bf16 %v168_v20, %v168_v20  ;;  %v162_v22 = vld [vmem:[%s1964_s14 + $0x18] sm:$0xff]  ;;  %v169_v24 = vld [vmem:[%s1964_s14 + $0x50] sm:$0xff]  ;;  %v171_v33 = vld [vmem:[%s1964_s14 + $0x60] sm:$0xff] }
  0x12   : > { %v186_v3 = vsel %vm181_vm1, %v179_v2, 0  ;;  %300 = vrot.lane.b32.xlu1 %v179_v2, %s1928_s18  ;;  %v2001_v23 = vpack.c.bf16 %v162_v22, %v162_v22  ;;  %v2006_v25 = vpack.c.bf16 %v169_v24, %v169_v24  ;;  %v170_v26 = vld [vmem:[%s1964_s14 + $0x58] sm:$0xff]  ;;  %v2017_v34 = vpack.c.bf16 %v171_v33, %v171_v33  ;;  %v163_v38 = vld [vmem:[%s1964_s14 + $0x20] sm:$0xff]  ;;  %v164_v40 = vld [vmem:[%s1964_s14 + $0x28] sm:$0xff] }
  0x13   : > { %1714 = vmatpush3.bf16.xpose.msra.mxu0 %v186_v3  ;;  %v2011_v27 = vpack.c.bf16 %v170_v26, %v170_v26  ;;  %v166_v36 = vld [vmem:[%s1964_s14 + $0x38] sm:$0xff]  ;;  %v1083_v39 = vpack.c.bf16 %v163_v38, %v163_v38  ;;  %v2027_v41 = vpack.c.bf16 %v164_v40, %v164_v40  ;;  %v642_v53 = vsel %vm181_vm1, %v1986_v17, 0 }
  0x14   : > { %1731 = vmatprep.subr.bf16.mxu0 %v1926_v0  ;;  %v254_v35 = vsel %vm252_vm3, %v2017_v34, 0  ;;  %v412_v37 = vpack.c.bf16 %v166_v36, %v166_v36  ;;  %v866_v57 = vsel %vm181_vm1, %v1996_v21, 0  ;;  %v1090_v61 = vsel %vm181_vm1, %v2006_v25, 0 }
  0x15   : > { %1720 = vmatpush3.bf16.msra.mxu1 %v254_v35  ;;  %v1314_v2 = vsel %vm181_vm1, %v2011_v27, 0 }
  0x16   : > { %297 = vrot.lane.b32.xlu1 %v178_v5, %s1928_s18  ;;  %1725 = vmatprep.subr.bf16.mxu1 %v1926_v0  ;;  %v418_v49 = vsel %vm181_vm1, %v412_v37, 0 }
  0x1a   : > { %1716 = vmatmul.mubr.msk.bf16.vlgmr.msra.gmra.mxu0 %vm181_vm1, %v178_v5  ;;  %521 = vrot.lane.b32.xlu1 %v411_v16, %s1928_s18 }
  0x1b   : > { %1733 = vmatprep.mubr.msk.bf16.mxu0 %vm1927_vm0, %v1926_v0 }
  0x1e   : > { %748 = vrot.lane.b32.xlu1 %v1986_v17, %s1928_s18 }
  0x22   : > { %745 = vrot.lane.b32.xlu1 %v1991_v19, %s1928_s18 }
  0x26   : > { %972 = vrot.lane.b32.xlu1 %v1996_v21, %s1928_s18 }
  0x2a   : > { %969 = vrot.lane.b32.xlu1 %v2001_v23, %s1928_s18 }
  0x2e   : > { %1196 = vrot.lane.b32.xlu1 %v2006_v25, %s1928_s18 }
  0x32   : > { %1420 = vrot.lane.b32.xlu1 %v2011_v27, %s1928_s18 }
  0x84   : > { %v301_v44 = vpop.permute.xlu1 %300 }
  0x85   : > { %v306_v46 = vsel %vm181_vm1, %v301_v44, 0 }
  0x88   : > { %v298_v48 = vpop.permute.xlu1 %297 }
  0x8c   : > { %v522_v52 = vpop.permute.xlu1 %521 }
  0x90   : > { %v749_v54 = vpop.permute.xlu1 %748 }
  0x91   : > { %v754_v55 = vsel %vm181_vm1, %v749_v54, 0 }
  0x94   : > { %v746_v56 = vpop.permute.xlu1 %745 }
  0x98   : > { %v973_v58 = vpop.permute.xlu1 %972 }
  0x99   : > { %v978_v59 = vsel %vm181_vm1, %v973_v58, 0 }
  0x9c   : > { %v970_v60 = vpop.permute.xlu1 %969 }
  0xa0   : > { %v1197_v62 = vpop.permute.xlu1 %1196 }
  0xa1   : > { %v1202_v63 = vsel %vm181_vm1, %v1197_v62, 0 }
  0xa4   : > { %v1421_v3 = vpop.permute.xlu1 %1420 }
  0xa5   : > { %v1426_v4 = vsel %vm181_vm1, %v1421_v3, 0 }
  0xda   : > { %v222_v6 = vpop.f32.mrf.mxu0 }
  0xdb   : > { %v228_v8 = vmul.f32 0.125, %v222_v6 }
  0xdc   : > { %v1717_v9 = vpop.f32.mrf.mxu0 }
  0xdd   : > { %v235_v10 = vadd.f32 %v1977_v7, %v228_v8 }
  0xde   : > { %v225_v11 = vpop.f32.mrf.mxu0 }
  0xdf   : > { %v237_v12 = vsel %vm236_vm2, %v235_v10, -inf }
  0xe0   : > { %238 = vmax.xlane.f32.xlu0 %v237_v12  ;;  %v1718_v13 = vpop.f32.mrf.mxu0 }
 0x169   : > { %v239_v28 = vpop.xlane.xlu0 %238 }
 0x16a   : > { %v240_v29 = vsub.f32 %v235_v10, %v239_v28 }
 0x16c   : > { %v241_v30 = vmul.f32 1.442695, %v240_v29 }
 0x16e   : > { %1870 = vpow2.f32 %v241_v30 }
 0x17b   : > { %v1871_v31 = vpop.eup %1870 }
 0x17c   : > { %v243_v32 = vsel %vm236_vm2, %v1871_v31, 0.0 }
 0x17d   : > { %244 = vadd.xlane.f32.xlu0 %v243_v32 }
 0x193   : > { %524 = vrot.lane.b32.xlu0 %v412_v37, %s1928_s18 }
 0x197   : > { %1193 = vrot.lane.b32.xlu0 %v1083_v39, %s1928_s18 }
 0x19b   : > { %1417 = vrot.lane.b32.xlu0 %v2027_v41, %s1928_s18 }
 0x206   : > { %v245_v42 = vpop.xlane.xlu0 %244 }
 0x207   : > { %1872 = vrcp.f32 %v245_v42 }
 0x20a   : > { %v525_v50 = vpop.permute.xlu0 %524 }
 0x20b   : > { %v530_v51 = vsel %vm181_vm1, %v525_v50, 0 }
 0x20e   : > { %v1194_v1 = vpop.permute.xlu0 %1193 }
 0x212   : > { %v1418_v5 = vpop.permute.xlu0 %1417 }
 0x214   : > { %v1873_v43 = vpop.eup %1872 }
 0x215   : > { %v247_v45 = vmul.f32 %v1873_v43, %v1871_v31 }
 0x217   : > { %v248_v47 = vpack.c.bf16 %v247_v45, %v247_v45 }
 0x219   : > { %1722 = vmatmul.mubr.msk.bf16.vlgmr.msra.gmra.mxu1 %vm236_vm2, %v248_v47 }
 0x21a   : > { %1726 = vmatpush3.bf16.xpose.msra.mxu1 %v306_v46  ;;  %1727 = vmatprep.mubr.msk.bf16.mxu1 %vm1927_vm0, %v1926_v0 }
 0x21b   : > { %1737 = vmatprep.subr.bf16.mxu1 %v1926_v0 }
 0x221   : > { %1728 = vmatmul.mubr.msk.bf16.vlgmr.msra.gmra.mxu1 %vm181_vm1, %v298_v48 }
 0x222   : > { %1738 = vmatpush3.bf16.xpose.msra.mxu1 %v418_v49  ;;  %1739 = vmatprep.mubr.msk.bf16.mxu1 %vm1927_vm0, %v1926_v0 }
 0x223   : > { %1749 = vmatprep.subr.bf16.mxu1 %v1926_v0 }
 0x229   : > { %1740 = vmatmul.mubr.msk.bf16.vlgmr.msra.gmra.mxu1 %vm181_vm1, %v411_v16 }
 0x22a   : > { %1750 = vmatpush3.bf16.xpose.msra.mxu1 %v530_v51  ;;  %1751 = vmatprep.mubr.msk.bf16.mxu1 %vm1927_vm0, %v1926_v0 }
 0x22b   : > { %1761 = vmatprep.subr.bf16.mxu1 %v1926_v0 }
 0x231   : > { %1752 = vmatmul.mubr.msk.bf16.vlgmr.msra.gmra.mxu1 %vm181_vm1, %v522_v52 }
 0x232   : > { %1762 = vmatpush3.bf16.xpose.msra.mxu1 %v642_v53  ;;  %1763 = vmatprep.mubr.msk.bf16.mxu1 %vm1927_vm0, %v1926_v0 }
 0x233   : > { %1773 = vmatprep.subr.bf16.mxu1 %v1926_v0 }
 0x239   : > { %1764 = vmatmul.mubr.msk.bf16.vlgmr.msra.gmra.mxu1 %vm181_vm1, %v1991_v19 }
 0x23a   : > { %1774 = vmatpush3.bf16.xpose.msra.mxu1 %v754_v55  ;;  %1775 = vmatprep.mubr.msk.bf16.mxu1 %vm1927_vm0, %v1926_v0 }
 0x23b   : > { %1785 = vmatprep.subr.bf16.mxu1 %v1926_v0 }
 0x241   : > { %1776 = vmatmul.mubr.msk.bf16.vlgmr.msra.gmra.mxu1 %vm181_vm1, %v746_v56 }
 0x242   : > { %1786 = vmatpush3.bf16.xpose.msra.mxu1 %v866_v57  ;;  %1787 = vmatprep.mubr.msk.bf16.mxu1 %vm1927_vm0, %v1926_v0 }
 0x243   : > { %1797 = vmatprep.subr.bf16.mxu1 %v1926_v0 }
 0x249   : > { %1788 = vmatmul.mubr.msk.bf16.vlgmr.msra.gmra.mxu1 %vm181_vm1, %v2001_v23 }
 0x24a   : > { %1798 = vmatpush3.bf16.xpose.msra.mxu1 %v978_v59  ;;  %1799 = vmatprep.mubr.msk.bf16.mxu1 %vm1927_vm0, %v1926_v0 }
 0x24b   : > { %1809 = vmatprep.subr.bf16.mxu1 %v1926_v0 }
 0x251   : > { %1800 = vmatmul.mubr.msk.bf16.vlgmr.msra.gmra.mxu1 %vm181_vm1, %v970_v60 }
 0x252   : > { %1810 = vmatpush3.bf16.xpose.msra.mxu1 %v1090_v61  ;;  %1811 = vmatprep.mubr.msk.bf16.mxu1 %vm1927_vm0, %v1926_v0 }
 0x253   : > { %1821 = vmatprep.subr.bf16.mxu1 %v1926_v0 }
 0x259   : > { %1812 = vmatmul.mubr.msk.bf16.vlgmr.msra.gmra.mxu1 %vm181_vm1, %v1083_v39 }
 0x25a   : > { %1822 = vmatpush3.bf16.xpose.msra.mxu1 %v1202_v63  ;;  %1823 = vmatprep.mubr.msk.bf16.mxu1 %vm1927_vm0, %v1926_v0 }
 0x25b   : > { %1833 = vmatprep.subr.bf16.mxu1 %v1926_v0 }
 0x261   : > { %1824 = vmatmul.mubr.msk.bf16.vlgmr.msra.gmra.mxu1 %vm181_vm1, %v1194_v1 }
 0x262   : > { %1834 = vmatpush3.bf16.xpose.msra.mxu1 %v1314_v2  ;;  %1835 = vmatprep.mubr.msk.bf16.mxu1 %vm1927_vm0, %v1926_v0 }
 0x263   : > { %1845 = vmatprep.subr.bf16.mxu1 %v1926_v0 }
 0x269   : > { %1836 = vmatmul.mubr.msk.bf16.vlgmr.msra.gmra.mxu1 %vm181_vm1, %v2027_v41 }
 0x26a   : > { %1846 = vmatpush3.bf16.xpose.msra.mxu1 %v1426_v4  ;;  %1847 = vmatprep.mubr.msk.bf16.mxu1 %vm1927_vm0, %v1926_v0 }
 0x271   : > { %1848 = vmatmul.mubr.msk.bf16.vlgmr.msra.gmra.mxu1 %vm181_vm1, %v1418_v5 }
 0x2d9   : > { %v2093_v6 = vpop.f32.mrf.mxu1 }
 0x2db   : > { %v1723_v8 = vpop.f32.mrf.mxu1 }
 0x2dd   : > { %v293_v9 = vpop.f32.mrf.mxu1 }
 0x2df   : > { %v1724_v10 = vpop.f32.mrf.mxu1 }
 0x2e1   : > { %v342_v11 = vpop.f32.mrf.mxu1 }
 0x2e2   : > { %v348_v12 = vmul.f32 0.125, %v342_v11 }
 0x2e3   : > { %v1729_v13 = vpop.f32.mrf.mxu1 }
 0x2e4   : > { %v2096_v14 = vadd.f32 %v1977_v7, %v348_v12 }
 0x2e5   : > { %v345_v15 = vpop.f32.mrf.mxu1 }
 0x2e6   : > { %v350_v16 = vsel %vm236_vm2, %v2096_v14, -inf }
 0x2e7   : > { %351 = vmax.xlane.f32.xlu1 %v350_v16  ;;  %v1730_v17 = vpop.f32.mrf.mxu1 }
 0x2e9   : > { %v454_v18 = vpop.f32.mrf.mxu1 }
 0x2ea   : > { %v460_v19 = vmul.f32 0.125, %v454_v18 }
 0x2eb   : > { %v1741_v20 = vpop.f32.mrf.mxu1 }
 0x2ec   : > { %v2101_v21 = vadd.f32 %v1977_v7, %v460_v19 }
 0x2ed   : > { %v457_v22 = vpop.f32.mrf.mxu1 }
 0x2ee   : > { %v462_v23 = vsel %vm236_vm2, %v2101_v21, -inf }
 0x2ef   : > { %463 = vmax.xlane.f32.xlu0 %v462_v23  ;;  %v1742_v24 = vpop.f32.mrf.mxu1 }
 0x2f1   : > { %v566_v25 = vpop.f32.mrf.mxu1 }
 0x2f2   : > { %v572_v26 = vmul.f32 0.125, %v566_v25 }
 0x2f3   : > { %v1753_v27 = vpop.f32.mrf.mxu1 }
 0x2f4   : > { %v2106_v28 = vadd.f32 %v1977_v7, %v572_v26 }
 0x2f5   : > { %v569_v29 = vpop.f32.mrf.mxu1 }
 0x2f6   : > { %v574_v30 = vsel %vm236_vm2, %v2106_v28, -inf }
 0x2f7   : > { %575 = vmax.xlane.f32.xlu0 %v574_v30  ;;  %v1754_v31 = vpop.f32.mrf.mxu1 }
 0x2f9   : > { %v678_v32 = vpop.f32.mrf.mxu1 }
 0x2fa   : > { %v684_v33 = vmul.f32 0.125, %v678_v32 }
 0x2fb   : > { %v1765_v35 = vpop.f32.mrf.mxu1 }
 0x2fc   : > { %v2111_v36 = vadd.f32 %v1977_v7, %v684_v33 }
 0x2fd   : > { %v681_v37 = vpop.f32.mrf.mxu1 }
 0x2fe   : > { %v686_v38 = vsel %vm236_vm2, %v2111_v36, -inf }
 0x2ff   : > { %687 = vmax.xlane.f32.xlu1 %v686_v38  ;;  %v1766_v39 = vpop.f32.mrf.mxu1 }
 0x301   : > { %v790_v40 = vpop.f32.mrf.mxu1 }
 0x302   : > { %v796_v41 = vmul.f32 0.125, %v790_v40 }
 0x303   : > { %v1777_v42 = vpop.f32.mrf.mxu1 }
 0x304   : > { %v2116_v43 = vadd.f32 %v1977_v7, %v796_v41 }
 0x305   : > { %v793_v44 = vpop.f32.mrf.mxu1 }
 0x306   : > { %v798_v45 = vsel %vm236_vm2, %v2116_v43, -inf }
 0x307   : > { %799 = vmax.xlane.f32.xlu0 %v798_v45  ;;  %v1778_v46 = vpop.f32.mrf.mxu1 }
 0x309   : > { %v902_v47 = vpop.f32.mrf.mxu1 }
 0x30a   : > { %v908_v48 = vmul.f32 0.125, %v902_v47 }
 0x30b   : > { %v1789_v49 = vpop.f32.mrf.mxu1 }
 0x30c   : > { %v2121_v50 = vadd.f32 %v1977_v7, %v908_v48 }
 0x30d   : > { %v905_v51 = vpop.f32.mrf.mxu1 }
 0x30e   : > { %v910_v52 = vsel %vm236_vm2, %v2121_v50, -inf }
 0x30f   : > { %911 = vmax.xlane.f32.xlu1 %v910_v52  ;;  %v1790_v53 = vpop.f32.mrf.mxu1 }
 0x311   : > { %v1014_v54 = vpop.f32.mrf.mxu1 }
 0x312   : > { %v1020_v55 = vmul.f32 0.125, %v1014_v54 }
 0x313   : > { %v1801_v56 = vpop.f32.mrf.mxu1 }
 0x314   : > { %v2126_v57 = vadd.f32 %v1977_v7, %v1020_v55 }
 0x315   : > { %v1017_v58 = vpop.f32.mrf.mxu1 }
 0x316   : > { %v1022_v59 = vsel %vm236_vm2, %v2126_v57, -inf }
 0x317   : > { %1023 = vmax.xlane.f32.xlu0 %v1022_v59  ;;  %v1802_v60 = vpop.f32.mrf.mxu1 }
 0x319   : > { %v1126_v61 = vpop.f32.mrf.mxu1 }
 0x31a   : > { %v1132_v62 = vmul.f32 0.125, %v1126_v61 }
 0x31b   : > { %v1813_v63 = vpop.f32.mrf.mxu1 }
 0x31c   : > { %v2131_v1 = vadd.f32 %v1977_v7, %v1132_v62 }
 0x31d   : > { %v1129_v2 = vpop.f32.mrf.mxu1 }
 0x31e   : > { %v1134_v3 = vsel %vm236_vm2, %v2131_v1, -inf  ;;  %v173_v2 = vld [vmem:[%s1964_s14 + $0x70] sm:$0xff] }
 0x31f   : > { %1135 = vmax.xlane.f32.xlu1 %v1134_v3  ;;  %v1814_v4 = vpop.f32.mrf.mxu1  ;;  %v2193_v3 = vpack.c.bf16 %v173_v2, %v173_v2 }
 0x320   : > { %v174_v4 = vld [vmem:[%s1964_s14 + $0x78] sm:$0xff] }
 0x321   : > { %v1238_v5 = vpop.f32.mrf.mxu1 }
 0x322   : > { %v1244_v8 = vmul.f32 0.125, %v1238_v5  ;;  %v2198_v5 = vpack.c.bf16 %v174_v4, %v174_v4 }
 0x323   : > { %v1825_v9 = vpop.f32.mrf.mxu1 }
 0x324   : > { %v2136_v10 = vadd.f32 %v1977_v7, %v1244_v8  ;;  %v926_v2 = vsel %vm252_vm3, %v2198_v5, 0 }
 0x325   : > { %v1241_v11 = vpop.f32.mrf.mxu1 }
 0x326   : > { %v1246_v12 = vsel %vm236_vm2, %v2136_v10, -inf }
 0x327   : > { %1247 = vmax.xlane.f32.xlu0 %v1246_v12  ;;  %v1826_v13 = vpop.f32.mrf.mxu1 }
 0x329   : > { %v1350_v15 = vpop.f32.mrf.mxu1 }
 0x32a   : > { %v1356_v16 = vmul.f32 0.125, %v1350_v15 }
 0x32b   : > { %v1837_v17 = vpop.f32.mrf.mxu1 }
 0x32c   : > { %v2141_v18 = vadd.f32 %v1977_v7, %v1356_v16 }
 0x32d   : > { %v1353_v19 = vpop.f32.mrf.mxu1 }
 0x32e   : > { %v1358_v20 = vsel %vm236_vm2, %v2141_v18, -inf }
 0x32f   : > { %1359 = vmax.xlane.f32.xlu1 %v1358_v20  ;;  %v1838_v22 = vpop.f32.mrf.mxu1 }
 0x331   : > { %v1462_v23 = vpop.f32.mrf.mxu1 }
 0x332   : > { %v1468_v24 = vmul.f32 0.125, %v1462_v23 }
 0x333   : > { %v1849_v25 = vpop.f32.mrf.mxu1 }
 0x334   : > { %v2146_v26 = vadd.f32 %v1977_v7, %v1468_v24 }
 0x335   : > { %v1465_v27 = vpop.f32.mrf.mxu1 }
 0x336   : > { %v1470_v29 = vsel %vm236_vm2, %v2146_v26, -inf }
 0x337   : > { %1471 = vmax.xlane.f32.xlu0 %v1470_v29  ;;  %v1850_v30 = vpop.f32.mrf.mxu1 }
 0x370   : > { %v352_v31 = vpop.xlane.xlu1 %351 }
 0x371   : > { %v353_v32 = vsub.f32 %v2096_v14, %v352_v31 }
 0x373   : > { %v354_v33 = vmul.f32 1.442695, %v353_v32  ;;  %v175_v32 = vld [vmem:[%s1964_s14 + $0x80] sm:$0xff] }
 0x375   : > { %1874 = vpow2.f32 %v354_v33  ;;  %v2223_v33 = vpack.c.bf16 %v175_v32, %v175_v32 }
 0x378   : > { %v464_v35 = vpop.xlane.xlu0 %463 }
 0x379   : > { %v465_v37 = vsub.f32 %v2101_v21, %v464_v35  ;;  %v176_v35 = vld [vmem:[%s1964_s14 + $0x88] sm:$0xff] }
 0x37b   : > { %v466_v38 = vmul.f32 1.442695, %v465_v37  ;;  %v2228_v37 = vpack.c.bf16 %v176_v35, %v176_v35 }
 0x37d   : > { %1876 = vpow2.f32 %v466_v38 }
 0x380   : > { %v576_v39 = vpop.xlane.xlu0 %575 }
 0x381   : > { %v577_v7 = vsub.f32 %v2106_v28, %v576_v39  ;;  %v172_v28 = vld [vmem:[%s1964_s14 + $0x68] sm:$0xff] }
 0x382   : > { %v2153_v40 = vpop.eup %1874  ;;  %v2166_v46 = vpack.c.bf16 %v172_v28, %v172_v28 }
 0x383   : > { %v578_v41 = vmul.f32 1.442695, %v577_v7  ;;  %v356_v42 = vsel %vm236_vm2, %v2153_v40, 0.0 }
 0x384   : > { %357 = vadd.xlane.f32.xlu1 %v356_v42 }
 0x385   : > { %1878 = vpow2.f32 %v578_v41 }
 0x388   : > { %v688_v47 = vpop.xlane.xlu1 %687 }
 0x389   : > { %v689_v48 = vsub.f32 %v2111_v36, %v688_v47 }
 0x38a   : > { %v2157_v14 = vpop.eup %1876 }
 0x38b   : > { %v468_v44 = vsel %vm236_vm2, %v2157_v14, 0.0  ;;  %v690_v51 = vmul.f32 1.442695, %v689_v48 }
 0x38c   : > { %469 = vadd.xlane.f32.xlu0 %v468_v44 }
 0x38d   : > { %1880 = vpow2.f32 %v690_v51 }
 0x390   : > { %v800_v49 = vpop.xlane.xlu0 %799 }
 0x391   : > { %v801_v52 = vsub.f32 %v2116_v43, %v800_v49 }
 0x392   : > { %v2161_v21 = vpop.eup %1878 }
 0x393   : > { %v580_v45 = vsel %vm236_vm2, %v2161_v21, 0.0  ;;  %v802_v56 = vmul.f32 1.442695, %v801_v52 }
 0x394   : > { %581 = vadd.xlane.f32.xlu1 %v580_v45  ;;  %v478_v45 = vsel %vm252_vm3, %v2166_v46, 0 }
 0x395   : > { %1882 = vpow2.f32 %v802_v56 }
 0x398   : > { %v912_v53 = vpop.xlane.xlu1 %911 }
 0x399   : > { %v913_v55 = vsub.f32 %v2121_v50, %v912_v53  ;;  %v702_v53 = vsel %vm252_vm3, %v2193_v3, 0 }
 0x39b   : > { %v914_v59 = vmul.f32 1.442695, %v913_v55 }
 0x39d   : > { %1884 = vpow2.f32 %v914_v59 }
 0x3a0   : > { %v1024_v54 = vpop.xlane.xlu0 %1023 }
 0x3a1   : > { %v1025_v58 = vsub.f32 %v2126_v57, %v1024_v54 }
 0x3a2   : > { %587 = vrot.lane.b32.xlu0 %v2166_v46, %s1928_s18 }
 0x3a3   : > { %v1026_v60 = vmul.f32 1.442695, %v1025_v58 }
 0x3a5   : > { %363 = vrot.lane.b32.xlu1 %v2017_v34, %s1928_s18  ;;  %1886 = vpow2.f32 %v1026_v60  ;;  %v2176_v34 = vpop.eup %1880 }
 0x3a6   : > { %v692_v36 = vsel %vm236_vm2, %v2176_v34, 0.0  ;;  %v2180_v43 = vpop.eup %1882 }
 0x3a7   : > { %v804_v57 = vsel %vm236_vm2, %v2180_v43, 0.0 }
 0x3a8   : > { %v1136_v9 = vpop.xlane.xlu1 %1135 }
 0x3a9   : > { %v1137_v12 = vsub.f32 %v2131_v1, %v1136_v9 }
 0x3aa   : > { %v2182_v50 = vpop.eup %1884 }
 0x3ab   : > { %v916_v62 = vsel %vm236_vm2, %v2182_v50, 0.0  ;;  %v1138_v15 = vmul.f32 1.442695, %v1137_v12  ;;  %v1150_v12 = vsel %vm252_vm3, %v2223_v33, 0 }
 0x3ad   : > { %1888 = vpow2.f32 %v1138_v15 }
 0x3b0   : > { %v1248_v8 = vpop.xlane.xlu0 %1247 }
 0x3b1   : > { %v1249_v16 = vsub.f32 %v2136_v10, %v1248_v8 }
 0x3b2   : > { %v2186_v61 = vpop.eup %1886 }
 0x3b3   : > { %v1028_v63 = vsel %vm236_vm2, %v2186_v61, 0.0  ;;  %v1250_v20 = vmul.f32 1.442695, %v1249_v16 }
 0x3b8   : > { %v1360_v19 = vpop.xlane.xlu1 %1359 }
 0x3b9   : > { %v1361_v22 = vsub.f32 %v2141_v18, %v1360_v19 }
 0x3ba   : > { %v2206_v24 = vpop.eup %1888 }
 0x3bb   : > { %v1362_v23 = vmul.f32 1.442695, %v1361_v22  ;;  %v1140_v1 = vsel %vm236_vm2, %v2206_v24, 0.0 }
 0x3c0   : > { %v1472_v11 = vpop.xlane.xlu0 %1471 }
 0x3c1   : > { %693 = vadd.xlane.f32.xlu0 %v692_v36  ;;  %v1473_v13 = vsub.f32 %v2146_v26, %v1472_v11 }
 0x3c3   : > { %v1474_v17 = vmul.f32 1.442695, %v1473_v13 }
 0x3c5   : > { %805 = vadd.xlane.f32.xlu0 %v804_v57  ;;  %1890 = vpow2.f32 %v1474_v17 }
 0x3c6   : > { %1892 = vpow2.f32 %v1250_v20 }
 0x3c7   : > { %1894 = vpow2.f32 %v1362_v23 }
 0x3c9   : > { %917 = vadd.xlane.f32.xlu0 %v916_v62  ;;  %1029 = vadd.xlane.f32.xlu1 %v1028_v63 }
 0x3d2   : > { %v2208_v25 = vpop.eup %1890 }
 0x3d3   : > { %v1476_v10 = vsel %vm236_vm2, %v2208_v25, 0.0  ;;  %v2214_v26 = vpop.eup %1892 }
 0x3d4   : > { %v1252_v18 = vsel %vm236_vm2, %v2214_v26, 0.0  ;;  %v2218_v27 = vpop.eup %1894 }
 0x3d5   : > { %v1364_v29 = vsel %vm236_vm2, %v2218_v27, 0.0 }
 0x3da   : > { %811 = vrot.lane.b32.xlu1 %v2193_v3, %s1928_s18 }
 0x3df   : > { %1035 = vrot.lane.b32.xlu0 %v2198_v5, %s1928_s18 }
 0x3fe   : > { %1141 = vadd.xlane.f32.xlu0 %v1140_v1  ;;  %1477 = vadd.xlane.f32.xlu1 %v1476_v10 }
 0x402   : > { %1253 = vadd.xlane.f32.xlu0 %v1252_v18 }
 0x406   : > { %1365 = vadd.xlane.f32.xlu0 %v1364_v29 }
 0x40d   : > { %v358_v30 = vpop.xlane.xlu1 %357 }
 0x40e   : > { %1896 = vrcp.f32 %v358_v30 }
 0x415   : > { %v470_v31 = vpop.xlane.xlu0 %469 }
 0x416   : > { %1898 = vrcp.f32 %v470_v31 }
 0x419   : > { %v588_v47 = vpop.permute.xlu0 %587 }
 0x41a   : > { %v593_v51 = vsel %vm252_vm3, %v588_v47, 0 }
 0x41b   : > { %v1897_v38 = vpop.eup %1896 }
 0x41c   : > { %1259 = vrot.lane.b32.xlu0 %v2223_v33, %s1928_s18  ;;  %v360_v7 = vmul.f32 %v1897_v38, %v2153_v40 }
 0x41d   : > { %v582_v39 = vpop.xlane.xlu1 %581 }
 0x41e   : > { %1900 = vrcp.f32 %v582_v39  ;;  %v361_v44 = vpack.c.bf16 %v360_v7, %v360_v7 }
 0x420   : > { %1483 = vrot.lane.b32.xlu0 %v2228_v37, %s1928_s18 }
 0x421   : > { %v364_v41 = vpop.permute.xlu1 %363 }
 0x422   : > { %v369_v42 = vsel %vm252_vm3, %v364_v41, 0 }
 0x423   : > { %1732 = vmatpush3.bf16.msra.mxu0 %v369_v42  ;;  %v1899_v28 = vpop.eup %1898 }
 0x424   : > { %1743 = vmatprep.subr.bf16.mxu0 %v1926_v0  ;;  %v472_v40 = vmul.f32 %v1899_v28, %v2157_v14 }
 0x426   : > { %1734 = vmatmul.mubr.msk.bf16.vlgmr.msra.gmra.mxu0 %vm236_vm2, %v361_v44  ;;  %v473_v48 = vpack.c.bf16 %v472_v40, %v472_v40 }
 0x427   : > { %1744 = vmatpush3.bf16.msra.mxu0 %v478_v45  ;;  %1745 = vmatprep.mubr.msk.bf16.mxu0 %vm1927_vm0, %v1926_v0 }
 0x428   : > { %1755 = vmatprep.subr.bf16.mxu0 %v1926_v0 }
 0x42b   : > { %v1901_v49 = vpop.eup %1900 }
 0x42c   : > { %v584_v46 = vmul.f32 %v1901_v49, %v2161_v21 }
 0x42e   : > { %1746 = vmatmul.mubr.msk.bf16.vlgmr.msra.gmra.mxu0 %vm236_vm2, %v473_v48  ;;  %v585_v52 = vpack.c.bf16 %v584_v46, %v584_v46 }
 0x42f   : > { %1756 = vmatpush3.bf16.msra.mxu0 %v593_v51  ;;  %1757 = vmatprep.mubr.msk.bf16.mxu0 %vm1927_vm0, %v1926_v0 }
 0x430   : > { %1767 = vmatprep.subr.bf16.mxu0 %v1926_v0 }
 0x436   : > { %1758 = vmatmul.mubr.msk.bf16.vlgmr.msra.gmra.mxu0 %vm236_vm2, %v585_v52 }
 0x437   : > { %1768 = vmatpush3.bf16.msra.mxu0 %v702_v53  ;;  %1769 = vmatprep.mubr.msk.bf16.mxu0 %vm1927_vm0, %v1926_v0 }
 0x438   : > { %1779 = vmatprep.subr.bf16.mxu0 %v1926_v0 }
 0x44a   : > { %v694_v14 = vpop.xlane.xlu0 %693 }
 0x44b   : > { %1902 = vrcp.f32 %v694_v14 }
 0x44e   : > { %v806_v54 = vpop.xlane.xlu0 %805 }
 0x44f   : > { %1904 = vrcp.f32 %v806_v54 }
 0x452   : > { %v1030_v55 = vpop.xlane.xlu1 %1029  ;;  %v918_v21 = vpop.xlane.xlu0 %917 }
 0x453   : > { %1906 = vrcp.f32 %v918_v21 }
 0x454   : > { %1908 = vrcp.f32 %v1030_v55 }
 0x456   : > { %v812_v58 = vpop.permute.xlu1 %811  ;;  %v1036_v4 = vpop.permute.xlu0 %1035 }
 0x457   : > { %v817_v36 = vsel %vm252_vm3, %v812_v58, 0  ;;  %v1041_v9 = vsel %vm252_vm3, %v1036_v4, 0 }
 0x458   : > { %v1903_v56 = vpop.eup %1902 }
 0x459   : > { %v696_v59 = vmul.f32 %v1903_v56, %v2176_v34 }
 0x45b   : > { %v697_v60 = vpack.c.bf16 %v696_v59, %v696_v59 }
 0x45c   : > { %v1905_v57 = vpop.eup %1904 }
 0x45d   : > { %1770 = vmatmul.mubr.msk.bf16.vlgmr.msra.gmra.mxu0 %vm236_vm2, %v697_v60  ;;  %v808_v62 = vmul.f32 %v1905_v57, %v2180_v43 }
 0x45e   : > { %1780 = vmatpush3.bf16.msra.mxu0 %v817_v36  ;;  %1781 = vmatprep.mubr.msk.bf16.mxu0 %vm1927_vm0, %v1926_v0 }
 0x45f   : > { %1791 = vmatprep.subr.bf16.mxu0 %v1926_v0  ;;  %v809_v63 = vpack.c.bf16 %v808_v62, %v808_v62 }
 0x460   : > { %v1907_v34 = vpop.eup %1906 }
 0x461   : > { %v920_v3 = vmul.f32 %v1907_v34, %v2182_v50  ;;  %v1909_v43 = vpop.eup %1908 }
 0x462   : > { %v1032_v5 = vmul.f32 %v1909_v43, %v2186_v61 }
 0x463   : > { %v921_v8 = vpack.c.bf16 %v920_v3, %v920_v3 }
 0x464   : > { %v1033_v11 = vpack.c.bf16 %v1032_v5, %v1032_v5 }
 0x465   : > { %1782 = vmatmul.mubr.msk.bf16.vlgmr.msra.gmra.mxu0 %vm236_vm2, %v809_v63 }
 0x466   : > { %1792 = vmatpush3.bf16.msra.mxu0 %v926_v2  ;;  %1793 = vmatprep.mubr.msk.bf16.mxu0 %vm1927_vm0, %v1926_v0 }
 0x467   : > { %1803 = vmatprep.subr.bf16.mxu0 %v1926_v0 }
 0x46d   : > { %1794 = vmatmul.mubr.msk.bf16.vlgmr.msra.gmra.mxu0 %vm236_vm2, %v921_v8 }
 0x46e   : > { %1804 = vmatpush3.bf16.msra.mxu0 %v1041_v9  ;;  %1805 = vmatprep.mubr.msk.bf16.mxu0 %vm1927_vm0, %v1926_v0 }
 0x46f   : > { %1815 = vmatprep.subr.bf16.mxu0 %v1926_v0 }
 0x475   : > { %1806 = vmatmul.mubr.msk.bf16.vlgmr.msra.gmra.mxu0 %vm236_vm2, %v1033_v11 }
 0x476   : > { %1816 = vmatpush3.bf16.msra.mxu0 %v1150_v12  ;;  %1817 = vmatprep.mubr.msk.bf16.mxu0 %vm1927_vm0, %v1926_v0 }
 0x477   : > { %1827 = vmatprep.subr.bf16.mxu0 %v1926_v0 }
 0x487   : > { %v1142_v50 = vpop.xlane.xlu0 %1141  ;;  %v1478_v23 = vpop.xlane.xlu1 %1477 }
 0x488   : > { %1910 = vrcp.f32 %v1142_v50 }
 0x48b   : > { %v1254_v13 = vpop.xlane.xlu0 %1253 }
 0x48c   : > { %1912 = vrcp.f32 %v1254_v13 }
 0x48f   : > { %v1366_v15 = vpop.xlane.xlu0 %1365 }
 0x490   : > { %1914 = vrcp.f32 %v1366_v15 }
 0x491   : > { %1916 = vrcp.f32 %v1478_v23 }
 0x493   : > { %v1260_v16 = vpop.permute.xlu0 %1259 }
 0x494   : > { %v1265_v19 = vsel %vm252_vm3, %v1260_v16, 0 }
 0x495   : > { %v1911_v61 = vpop.eup %1910 }
 0x496   : > { %v1144_v17 = vmul.f32 %v1911_v61, %v2206_v24  ;;  %v1374_v24 = vsel %vm252_vm3, %v2228_v37, 0 }
 0x497   : > { %v1484_v30 = vpop.permute.xlu0 %1483 }
 0x498   : > { %v1145_v20 = vpack.c.bf16 %v1144_v17, %v1144_v17  ;;  %v1489_v31 = vsel %vm252_vm3, %v1484_v30, 0 }
 0x499   : > { %v1913_v22 = vpop.eup %1912 }
 0x49a   : > { %1818 = vmatmul.mubr.msk.bf16.vlgmr.msra.gmra.mxu0 %vm236_vm2, %v1145_v20  ;;  %v1256_v1 = vmul.f32 %v1913_v22, %v2214_v26 }
 0x49b   : > { %1828 = vmatpush3.bf16.msra.mxu0 %v1265_v19  ;;  %1829 = vmatprep.mubr.msk.bf16.mxu0 %vm1927_vm0, %v1926_v0 }
 0x49c   : > { %1839 = vmatprep.subr.bf16.mxu0 %v1926_v0  ;;  %v1257_v10 = vpack.c.bf16 %v1256_v1, %v1256_v1 }
 0x49d   : > { %v1915_v18 = vpop.eup %1914 }
 0x49e   : > { %v1368_v29 = vmul.f32 %v1915_v18, %v2218_v27  ;;  %v1917_v26 = vpop.eup %1916 }
 0x49f   : > { %v1480_v33 = vmul.f32 %v1917_v26, %v2208_v25 }
 0x4a0   : > { %v1369_v32 = vpack.c.bf16 %v1368_v29, %v1368_v29 }
 0x4a1   : > { %v1481_v35 = vpack.c.bf16 %v1480_v33, %v1480_v33 }
 0x4a2   : > { %1830 = vmatmul.mubr.msk.bf16.vlgmr.msra.gmra.mxu0 %vm236_vm2, %v1257_v10 }
 0x4a3   : > { %1840 = vmatpush3.bf16.msra.mxu0 %v1374_v24  ;;  %1841 = vmatprep.mubr.msk.bf16.mxu0 %vm1927_vm0, %v1926_v0 }
 0x4a4   : > { %1851 = vmatprep.subr.bf16.mxu0 %v1926_v0 }
 0x4aa   : > { %1842 = vmatmul.mubr.msk.bf16.vlgmr.msra.gmra.mxu0 %vm236_vm2, %v1369_v32 }
 0x4ab   : > { %1852 = vmatpush3.bf16.msra.mxu0 %v1489_v31  ;;  %1853 = vmatprep.mubr.msk.bf16.mxu0 %vm1927_vm0, %v1926_v0 }
 0x4b2   : > { %1854 = vmatmul.mubr.msk.bf16.vlgmr.msra.gmra.mxu0 %vm236_vm2, %v1481_v35 }
 0x4e6   : > { %v405_v37 = vpop.f32.mrf.mxu0 }
 0x4e7   : > { %1532 = vrot.lane.b32.xlu0 %v405_v37, %s1928_s18 }
 0x4e8   : > { %v1735_v27 = vpop.f32.mrf.mxu0 }
 0x4ea   : > { %v408_v38 = vpop.f32.mrf.mxu0 }
 0x4ec   : > { %v1736_v39 = vpop.f32.mrf.mxu0 }
 0x4ee   : > { %v514_v7 = vpop.f32.mrf.mxu0 }
 0x4f0   : > { %v1747_v41 = vpop.f32.mrf.mxu0 }
 0x4f2   : > { %v517_v42 = vpop.f32.mrf.mxu0 }
 0x4f4   : > { %v1748_v44 = vpop.f32.mrf.mxu0 }
 0x4f6   : > { %v629_v45 = vpop.f32.mrf.mxu0 }
 0x4f7   : > { %1536 = vrot.lane.b32.xlu0 %v629_v45, %s1928_s18 }
 0x4f8   : > { %v1759_v28 = vpop.f32.mrf.mxu0 }
 0x4fa   : > { %v632_v0 = vpop.f32.mrf.mxu0 }
 0x4fc   : > { %v1760_v40 = vpop.f32.mrf.mxu0 }
 0x51d   : > { %v738_v25 = vpop.f32.mrf.mxu0 }
 0x51f   : > { %v1771_v47 = vpop.f32.mrf.mxu0 }
 0x521   : > { %v741_v48 = vpop.f32.mrf.mxu0 }
 0x523   : > { %v1772_v49 = vpop.f32.mrf.mxu0 }
 0x525   : > { %v853_v51 = vpop.f32.mrf.mxu0 }
 0x526   : > { %1540 = vrot.lane.b32.xlu1 %v853_v51, %s1928_s18 }
 0x527   : > { %v1783_v46 = vpop.f32.mrf.mxu0 }
 0x529   : > { %v856_v52 = vpop.f32.mrf.mxu0 }
 0x52b   : > { %v1784_v53 = vpop.f32.mrf.mxu0 }
 0x52d   : > { %v962_v14 = vpop.f32.mrf.mxu0 }
 0x52f   : > { %v1795_v54 = vpop.f32.mrf.mxu0 }
 0x531   : > { %v965_v55 = vpop.f32.mrf.mxu0 }
 0x533   : > { %v1796_v21 = vpop.f32.mrf.mxu0 }
 0x535   : > { %v1077_v56 = vpop.f32.mrf.mxu0 }
 0x536   : > { %1544 = vrot.lane.b32.xlu0 %v1077_v56, %s1928_s18 }
 0x537   : > { %v1807_v58 = vpop.f32.mrf.mxu0 }
 0x539   : > { %v1080_v59 = vpop.f32.mrf.mxu0 }
 0x53b   : > { %v1808_v60 = vpop.f32.mrf.mxu0 }
 0x559   : > { %v1533_v36 = vpop.permute.xlu0 %1532 }
 0x55a   : > { %v1555_v57 = vsel %vm181_vm1, %v2093_v6, %v1533_v36  ;;  %v1186_v62 = vpop.f32.mrf.mxu0 }
 0x55b   : > { %1561 = vst [vmem:[%s2308_s22] sm:$0xff] %v1555_v57 }
 0x55c   : > { %v1819_v63 = vpop.f32.mrf.mxu0 }
 0x55e   : > { %v1189_v2 = vpop.f32.mrf.mxu0 }
 0x560   : > { %v1820_v34 = vpop.f32.mrf.mxu0 }
 0x562   : > { %v1301_v3 = vpop.f32.mrf.mxu0 }
 0x563   : > { %1548 = vrot.lane.b32.xlu0 %v1301_v3, %s1928_s18 }
 0x564   : > { %v1831_v4 = vpop.f32.mrf.mxu0 }
 0x566   : > { %v1304_v8 = vpop.f32.mrf.mxu0 }
 0x568   : > { %v1832_v43 = vpop.f32.mrf.mxu0 }
 0x569   : > { %v1537_v9 = vpop.permute.xlu0 %1536 }
 0x56a   : > { %v1556_v5 = vsel %vm181_vm1, %v514_v7, %v1537_v9  ;;  %v1410_v11 = vpop.f32.mrf.mxu0 }
 0x56b   : > { %1562 = vst [vmem:[%s2308_s22 + $0x8] sm:$0xff] %v1556_v5 }
 0x56c   : > { %v1843_v12 = vpop.f32.mrf.mxu0 }
 0x56e   : > { %v1413_v6 = vpop.f32.mrf.mxu0 }
 0x570   : > { %v1844_v50 = vpop.f32.mrf.mxu0 }
 0x572   : > { %v1525_v13 = vpop.f32.mrf.mxu0 }
 0x573   : > { %1552 = vrot.lane.b32.xlu0 %v1525_v13, %s1928_s18 }
 0x574   : > { %v1855_v15 = vpop.f32.mrf.mxu0 }
 0x576   : > { %v1528_v61 = vpop.f32.mrf.mxu0 }
 0x578   : > { %v1856_v16 = vpop.f32.mrf.mxu0 }
 0x598   : > { %v1541_v17 = vpop.permute.xlu1 %1540 }
 0x599   : > { %v1557_v19 = vsel %vm181_vm1, %v738_v25, %v1541_v17 }
 0x59a   : > { %1563 = vst [vmem:[%s2308_s22 + $0x10] sm:$0xff] %v1557_v19 }
 0x5a8   : > { %v1545_v20 = vpop.permute.xlu0 %1544 }
 0x5a9   : > { %v1558_v22 = vsel %vm181_vm1, %v962_v14, %v1545_v20 }
 0x5aa   : > { %1564 = vst [vmem:[%s2308_s22 + $0x18] sm:$0xff] %v1558_v22 }
 0x5d5   : > { %v1549_v23 = vpop.permute.xlu0 %1548 }
 0x5d6   : > { %v1559_v1 = vsel %vm181_vm1, %v1186_v62, %v1549_v23 }
 0x5d7   : > { %1565 = vst [vmem:[%s2308_s22 + $0x20] sm:$0xff] %v1559_v1 }
 0x5e5   : > { %v1553_v10 = vpop.permute.xlu0 %1552 }
 0x5e6   : > { %v1560_v24 = vsel %vm181_vm1, %v1410_v11, %v1553_v10 }
 0x5e7   : > { %1566 = vst [vmem:[%s2308_s22 + $0x28] sm:$0xff] %v1560_v24 }
 0x5e8 PF: > { %s12_s9 = sadd.s32 1, %s1924_s9  }
 0x5e9   : > { %p9_p4 = scmp.ge.s32.totalorder %s12_s9, 4  }
 0x5eb   :  { %11 = sbr.rel (!%p9_p4) target bundleno = 1 (0x1), region = 61 }

// kernel: bert_forward.17
= control target key start
LH: loop header
LB: loop body
LE: loop exit
PB: predicated region body
PF: predicated region fallthrough
CT: control target
= control target key end

     0   :  { %s3039_s12 = smov 0   ;;  %s3041_s13 = smov 0   ;;  %s3773_s0 = inlined_call_operand.vmem [shape: bf16[16,768], index: 0, kind: input, shape index: {}]   ;;  %s3774_s1 = inlined_call_operand.vmem [shape: bf16[768,3072], index: 1, kind: input, shape index: {}]   ;;  %s3775_s2 = inlined_call_operand.vmem [shape: f32[1,3072], index: 2, kind: input, shape index: {}]   ;;  %s3776_s3 = inlined_call_operand.vmem [shape: f32[16,3072], index: 3, kind: output, shape index: {}]  }
   0x1   :  { %s3043_s14 = smov 0   ;;  %s3045_s15 = smov 0  }
   0x2   :  { %s3047_s16 = smov 0  }
   0x3 LB: > { %s28_s17 = sadd.s32 1, %s3013_s15  ;;  %s2408_s18 = sadd.s32 4294967295, %s3017_s16   ;;  %s3017_s16 = sphi %s3047_s16, %s13_s16   ;;  %s3013_s15 = sphi %s3045_s15, %s3781_s15   ;;  %s3009_s14 = sphi %s3043_s14, %s3780_s14   ;;  %s3005_s13 = sphi %s3041_s13, %s3779_s13   ;;  %s3001_s12 = sphi %s3039_s12, %s3778_s12  }
   0x4   : > { %p30_p0 = scmp.ge.s32.totalorder %s28_s17, 6  ;;  %p76_p1 = scmp.ne.s32.totalorder %s3005_s13, %s3001_s12 }
   0x5   : > { %p77_p2 = scmp.eq.s32.totalorder %s3017_s16, 0  ;;  %p134_p4 = scmp.eq.s32.totalorder %s2408_s18, 5 }
   0x6   : > { %s3783_s17 = smov (%p30_p0, %s28_s17), 0  ;;  %s69_s20 = sadd.s32 1, %s3005_s13 }
   0x7   : > { %p78_p3 = por %p77_p2, %p76_p1  ;;  %s65_s19 = ssub.s32 %s3013_s15, %s3783_s17 }
   0x8   : > { %p67_p5 = scmp.eq.s32.totalorder %s65_s19, 0  ;;  %p3074_p6 = por %p134_p4, %p76_p1 }
   0x9   : > { %p2412_p7 = scmp.ge.s32.totalorder %s3017_s16, 6 }
   0xa   : > { %s3079_s22 = scalar_select %p67_p5, %s3005_s13, %s69_s20  }
   0xb   : > { %171 = sbr.rel (%p2412_p7) target bundleno = 116 (0x74), region = 20 }
  0x10   : > { %174 = sbr.rel (!%p78_p3) target bundleno = 116 (0x74), region = 24  ;;  %s176_s23 = sand.u32 (%p78_p3), 1, %s3005_s13  }
  0x11   : > { %s2621_s24 = sshll.u32 (%p78_p3), %s3013_s15, 4  ;;  %s2623_s25 = smul.u32 (%p78_p3), 1536, %s176_s23 }
  0x12   : > { %s3087_s28 = scalar_lea.vmem (%p78_p3), %s3774_s1, %s2621_s24 }
  0x13   : > { %v197_v0 = vld [vmem:[%s3087_s28] sm:$0xff] (%p78_p3)  ;;  %v199_v1 = vld [vmem:[%s3087_s28 + $0x8] sm:$0xff] (%p78_p3)  ;;  %s3095_s29 = scalar_lea.vmem (%p78_p3), [#allocation2], %s2623_s25 }
  0x14   : > { %v201_v2 = vld [vmem:[%s3087_s28 + $0x60] sm:$0xff] (%p78_p3)  ;;  %v203_v3 = vld [vmem:[%s3087_s28 + $0x68] sm:$0xff] (%p78_p3)  ;;  %198 = vst [vmem:[%s3095_s29] sm:$0xff] (%p78_p3), %v197_v0  ;;  %200 = vst [vmem:[%s3095_s29 + $0x8] sm:$0xff] (%p78_p3), %v199_v1 }
  0x15   : > { %v205_v4 = vld [vmem:[%s3087_s28 + $0xc0] sm:$0xff]  ;;  %v207_v5 = vld [vmem:[%s3087_s28 + $0xc8] sm:$0xff]  ;;  %202 = vst [vmem:[%s3095_s29 + $0x10] sm:$0xff] %v201_v2  ;;  %204 = vst [vmem:[%s3095_s29 + $0x18] sm:$0xff] %v203_v3 }
  0x16   : > { %206 = vst [vmem:[%s3095_s29 + $0x20] sm:$0xff] %v205_v4  ;;  %208 = vst [vmem:[%s3095_s29 + $0x28] sm:$0xff] %v207_v5  ;;  %v209_v6 = vld [vmem:[%s3087_s28 + $0x120] sm:$0xff]  ;;  %v211_v7 = vld [vmem:[%s3087_s28 + $0x128] sm:$0xff] }
  0x17   : > { %v213_v8 = vld [vmem:[%s3087_s28 + $0x180] sm:$0xff]  ;;  %210 = vst [vmem:[%s3095_s29 + $0x30] sm:$0xff] %v209_v6  ;;  %212 = vst [vmem:[%s3095_s29 + $0x38] sm:$0xff] %v211_v7  ;;  %v215_v9 = vld [vmem:[%s3087_s28 + $0x188] sm:$0xff] }
  0x18   : > { %214 = vst [vmem:[%s3095_s29 + $0x40] sm:$0xff] %v213_v8  ;;  %v217_v10 = vld [vmem:[%s3087_s28 + $0x1e0] sm:$0xff]  ;;  %v219_v11 = vld [vmem:[%s3087_s28 + $0x1e8] sm:$0xff]  ;;  %216 = vst [vmem:[%s3095_s29 + $0x48] sm:$0xff] %v215_v9 }
  0x19   : > { %218 = vst [vmem:[%s3095_s29 + $0x50] sm:$0xff] %v217_v10  ;;  %220 = vst [vmem:[%s3095_s29 + $0x58] sm:$0xff] %v219_v11  ;;  %v221_v12 = vld [vmem:[%s3087_s28 + $0x240] sm:$0xff]  ;;  %v223_v13 = vld [vmem:[%s3087_s28 + $0x248] sm:$0xff] }
  0x1a   : > { %v225_v14 = vld [vmem:[%s3087_s28 + $0x2a0] sm:$0xff]  ;;  %222 = vst [vmem:[%s3095_s29 + $0x60] sm:$0xff] %v221_v12  ;;  %224 = vst [vmem:[%s3095_s29 + $0x68] sm:$0xff] %v223_v13  ;;  %v227_v15 = vld [vmem:[%s3087_s28 + $0x2a8] sm:$0xff] }
  0x1b   : > { %226 = vst [vmem:[%s3095_s29 + $0x70] sm:$0xff] %v225_v14  ;;  %v229_v16 = vld [vmem:[%s3087_s28 + $0x300] sm:$0xff]  ;;  %v231_v17 = vld [vmem:[%s3087_s28 + $0x308] sm:$0xff]  ;;  %228 = vst [vmem:[%s3095_s29 + $0x78] sm:$0xff] %v227_v15 }
  0x1c   : > { %230 = vst [vmem:[%s3095_s29 + $0x80] sm:$0xff] %v229_v16  ;;  %232 = vst [vmem:[%s3095_s29 + $0x88] sm:$0xff] %v231_v17  ;;  %v233_v18 = vld [vmem:[%s3087_s28 + $0x360] sm:$0xff]  ;;  %v235_v19 = vld [vmem:[%s3087_s28 + $0x368] sm:$0xff] }
  0x1d   : > { %v237_v20 = vld [vmem:[%s3087_s28 + $0x3c0] sm:$0xff]  ;;  %234 = vst [vmem:[%s3095_s29 + $0x90] sm:$0xff] %v233_v18  ;;  %236 = vst [vmem:[%s3095_s29 + $0x98] sm:$0xff] %v235_v19  ;;  %v239_v21 = vld [vmem:[%s3087_s28 + $0x3c8] sm:$0xff] }
  0x1e   : > { %238 = vst [vmem:[%s3095_s29 + $0xa0] sm:$0xff] %v237_v20  ;;  %v241_v22 = vld [vmem:[%s3087_s28 + $0x420] sm:$0xff]  ;;  %v243_v23 = vld [vmem:[%s3087_s28 + $0x428] sm:$0xff]  ;;  %240 = vst [vmem:[%s3095_s29 + $0xa8] sm:$0xff] %v239_v21 }
  0x1f   : > { %242 = vst [vmem:[%s3095_s29 + $0xb0] sm:$0xff] %v241_v22  ;;  %244 = vst [vmem:[%s3095_s29 + $0xb8] sm:$0xff] %v243_v23  ;;  %v245_v24 = vld [vmem:[%s3087_s28 + $0x480] sm:$0xff]  ;;  %v247_v25 = vld [vmem:[%s3087_s28 + $0x488] sm:$0xff] }
  0x20   : > { %v249_v26 = vld [vmem:[%s3087_s28 + $0x4e0] sm:$0xff]  ;;  %246 = vst [vmem:[%s3095_s29 + $0xc0] sm:$0xff] %v245_v24  ;;  %248 = vst [vmem:[%s3095_s29 + $0xc8] sm:$0xff] %v247_v25  ;;  %v251_v27 = vld [vmem:[%s3087_s28 + $0x4e8] sm:$0xff] }
  0x21   : > { %250 = vst [vmem:[%s3095_s29 + $0xd0] sm:$0xff] %v249_v26  ;;  %v253_v28 = vld [vmem:[%s3087_s28 + $0x540] sm:$0xff]  ;;  %v255_v29 = vld [vmem:[%s3087_s28 + $0x548] sm:$0xff]  ;;  %252 = vst [vmem:[%s3095_s29 + $0xd8] sm:$0xff] %v251_v27 }
  0x22   : > { %254 = vst [vmem:[%s3095_s29 + $0xe0] sm:$0xff] %v253_v28  ;;  %256 = vst [vmem:[%s3095_s29 + $0xe8] sm:$0xff] %v255_v29  ;;  %v257_v30 = vld [vmem:[%s3087_s28 + $0x5a0] sm:$0xff]  ;;  %v259_v31 = vld [vmem:[%s3087_s28 + $0x5a8] sm:$0xff] }
  0x23   : > { %v261_v32 = vld [vmem:[%s3087_s28 + $0x600] sm:$0xff]  ;;  %258 = vst [vmem:[%s3095_s29 + $0xf0] sm:$0xff] %v257_v30  ;;  %260 = vst [vmem:[%s3095_s29 + $0xf8] sm:$0xff] %v259_v31  ;;  %v263_v33 = vld [vmem:[%s3087_s28 + $0x608] sm:$0xff] }
  0x24   : > { %262 = vst [vmem:[%s3095_s29 + $0x100] sm:$0xff] %v261_v32  ;;  %v265_v34 = vld [vmem:[%s3087_s28 + $0x660] sm:$0xff]  ;;  %v267_v35 = vld [vmem:[%s3087_s28 + $0x668] sm:$0xff]  ;;  %264 = vst [vmem:[%s3095_s29 + $0x108] sm:$0xff] %v263_v33 }
  0x25   : > { %266 = vst [vmem:[%s3095_s29 + $0x110] sm:$0xff] %v265_v34  ;;  %268 = vst [vmem:[%s3095_s29 + $0x118] sm:$0xff] %v267_v35  ;;  %v269_v36 = vld [vmem:[%s3087_s28 + $0x6c0] sm:$0xff]  ;;  %v271_v37 = vld [vmem:[%s3087_s28 + $0x6c8] sm:$0xff] }
  0x26   : > { %v273_v38 = vld [vmem:[%s3087_s28 + $0x720] sm:$0xff]  ;;  %270 = vst [vmem:[%s3095_s29 + $0x120] sm:$0xff] %v269_v36  ;;  %272 = vst [vmem:[%s3095_s29 + $0x128] sm:$0xff] %v271_v37  ;;  %v275_v39 = vld [vmem:[%s3087_s28 + $0x728] sm:$0xff] }
  0x27   : > { %274 = vst [vmem:[%s3095_s29 + $0x130] sm:$0xff] %v273_v38  ;;  %v277_v40 = vld [vmem:[%s3087_s28 + $0x780] sm:$0xff]  ;;  %v279_v41 = vld [vmem:[%s3087_s28 + $0x788] sm:$0xff]  ;;  %276 = vst [vmem:[%s3095_s29 + $0x138] sm:$0xff] %v275_v39 }
  0x28   : > { %278 = vst [vmem:[%s3095_s29 + $0x140] sm:$0xff] %v277_v40  ;;  %280 = vst [vmem:[%s3095_s29 + $0x148] sm:$0xff] %v279_v41  ;;  %v281_v42 = vld [vmem:[%s3087_s28 + $0x7e0] sm:$0xff]  ;;  %v283_v43 = vld [vmem:[%s3087_s28 + $0x7e8] sm:$0xff] }
  0x29   : > { %v285_v44 = vld [vmem:[%s3087_s28 + $0x840] sm:$0xff]  ;;  %282 = vst [vmem:[%s3095_s29 + $0x150] sm:$0xff] %v281_v42  ;;  %284 = vst [vmem:[%s3095_s29 + $0x158] sm:$0xff] %v283_v43  ;;  %v287_v45 = vld [vmem:[%s3087_s28 + $0x848] sm:$0xff] }
  0x2a   : > { %286 = vst [vmem:[%s3095_s29 + $0x160] sm:$0xff] %v285_v44  ;;  %v289_v46 = vld [vmem:[%s3087_s28 + $0x8a0] sm:$0xff]  ;;  %v291_v47 = vld [vmem:[%s3087_s28 + $0x8a8] sm:$0xff]  ;;  %288 = vst [vmem:[%s3095_s29 + $0x168] sm:$0xff] %v287_v45 }
  0x2b   : > { %290 = vst [vmem:[%s3095_s29 + $0x170] sm:$0xff] %v289_v46  ;;  %292 = vst [vmem:[%s3095_s29 + $0x178] sm:$0xff] %v291_v47  ;;  %v293_v48 = vld [vmem:[%s3087_s28 + $0x900] sm:$0xff]  ;;  %v295_v49 = vld [vmem:[%s3087_s28 + $0x908] sm:$0xff] }
  0x2c   : > { %v297_v50 = vld [vmem:[%s3087_s28 + $0x960] sm:$0xff]  ;;  %294 = vst [vmem:[%s3095_s29 + $0x180] sm:$0xff] %v293_v48  ;;  %296 = vst [vmem:[%s3095_s29 + $0x188] sm:$0xff] %v295_v49  ;;  %v299_v51 = vld [vmem:[%s3087_s28 + $0x968] sm:$0xff] }
  0x2d   : > { %298 = vst [vmem:[%s3095_s29 + $0x190] sm:$0xff] %v297_v50  ;;  %v301_v52 = vld [vmem:[%s3087_s28 + $0x9c0] sm:$0xff]  ;;  %v303_v53 = vld [vmem:[%s3087_s28 + $0x9c8] sm:$0xff]  ;;  %300 = vst [vmem:[%s3095_s29 + $0x198] sm:$0xff] %v299_v51 }
  0x2e   : > { %302 = vst [vmem:[%s3095_s29 + $0x1a0] sm:$0xff] %v301_v52  ;;  %304 = vst [vmem:[%s3095_s29 + $0x1a8] sm:$0xff] %v303_v53  ;;  %v305_v54 = vld [vmem:[%s3087_s28 + $0xa20] sm:$0xff]  ;;  %v307_v55 = vld [vmem:[%s3087_s28 + $0xa28] sm:$0xff] }
  0x2f   : > { %v309_v56 = vld [vmem:[%s3087_s28 + $0xa80] sm:$0xff]  ;;  %306 = vst [vmem:[%s3095_s29 + $0x1b0] sm:$0xff] %v305_v54  ;;  %308 = vst [vmem:[%s3095_s29 + $0x1b8] sm:$0xff] %v307_v55  ;;  %v311_v57 = vld [vmem:[%s3087_s28 + $0xa88] sm:$0xff] }
  0x30   : > { %310 = vst [vmem:[%s3095_s29 + $0x1c0] sm:$0xff] %v309_v56  ;;  %v313_v58 = vld [vmem:[%s3087_s28 + $0xae0] sm:$0xff]  ;;  %v315_v59 = vld [vmem:[%s3087_s28 + $0xae8] sm:$0xff]  ;;  %312 = vst [vmem:[%s3095_s29 + $0x1c8] sm:$0xff] %v311_v57 }
  0x31   : > { %314 = vst [vmem:[%s3095_s29 + $0x1d0] sm:$0xff] %v313_v58  ;;  %316 = vst [vmem:[%s3095_s29 + $0x1d8] sm:$0xff] %v315_v59  ;;  %v317_v60 = vld [vmem:[%s3087_s28 + $0xb40] sm:$0xff]  ;;  %v319_v61 = vld [vmem:[%s3087_s28 + $0xb48] sm:$0xff] }
  0x32   : > { %v321_v62 = vld [vmem:[%s3087_s28 + $0xba0] sm:$0xff]  ;;  %318 = vst [vmem:[%s3095_s29 + $0x1e0] sm:$0xff] %v317_v60  ;;  %320 = vst [vmem:[%s3095_s29 + $0x1e8] sm:$0xff] %v319_v61  ;;  %v323_v63 = vld [vmem:[%s3087_s28 + $0xba8] sm:$0xff] }
  0x33   : > { %322 = vst [vmem:[%s3095_s29 + $0x1f0] sm:$0xff] %v321_v62  ;;  %v325_v0 = vld [vmem:[%s3087_s28 + $0xc00] sm:$0xff]  ;;  %v327_v1 = vld [vmem:[%s3087_s28 + $0xc08] sm:$0xff]  ;;  %324 = vst [vmem:[%s3095_s29 + $0x1f8] sm:$0xff] %v323_v63 }
  0x34   : > { %326 = vst [vmem:[%s3095_s29 + $0x200] sm:$0xff] %v325_v0  ;;  %328 = vst [vmem:[%s3095_s29 + $0x208] sm:$0xff] %v327_v1  ;;  %v329_v2 = vld [vmem:[%s3087_s28 + $0xc60] sm:$0xff]  ;;  %v331_v3 = vld [vmem:[%s3087_s28 + $0xc68] sm:$0xff] }
  0x35   : > { %v333_v4 = vld [vmem:[%s3087_s28 + $0xcc0] sm:$0xff]  ;;  %330 = vst [vmem:[%s3095_s29 + $0x210] sm:$0xff] %v329_v2  ;;  %332 = vst [vmem:[%s3095_s29 + $0x218] sm:$0xff] %v331_v3  ;;  %v335_v5 = vld [vmem:[%s3087_s28 + $0xcc8] sm:$0xff] }
  0x36   : > { %334 = vst [vmem:[%s3095_s29 + $0x220] sm:$0xff] %v333_v4  ;;  %v337_v6 = vld [vmem:[%s3087_s28 + $0xd20] sm:$0xff]  ;;  %v339_v7 = vld [vmem:[%s3087_s28 + $0xd28] sm:$0xff]  ;;  %336 = vst [vmem:[%s3095_s29 + $0x228] sm:$0xff] %v335_v5 }
  0x37   : > { %338 = vst [vmem:[%s3095_s29 + $0x230] sm:$0xff] %v337_v6  ;;  %340 = vst [vmem:[%s3095_s29 + $0x238] sm:$0xff] %v339_v7  ;;  %v341_v8 = vld [vmem:[%s3087_s28 + $0xd80] sm:$0xff]  ;;  %v343_v9 = vld [vmem:[%s3087_s28 + $0xd88] sm:$0xff] }
  0x38   : > { %v345_v10 = vld [vmem:[%s3087_s28 + $0xde0] sm:$0xff]  ;;  %342 = vst [vmem:[%s3095_s29 + $0x240] sm:$0xff] %v341_v8  ;;  %344 = vst [vmem:[%s3095_s29 + $0x248] sm:$0xff] %v343_v9  ;;  %v347_v11 = vld [vmem:[%s3087_s28 + $0xde8] sm:$0xff] }
  0x39   : > { %346 = vst [vmem:[%s3095_s29 + $0x250] sm:$0xff] %v345_v10  ;;  %v349_v12 = vld [vmem:[%s3087_s28 + $0xe40] sm:$0xff]  ;;  %v351_v13 = vld [vmem:[%s3087_s28 + $0xe48] sm:$0xff]  ;;  %348 = vst [vmem:[%s3095_s29 + $0x258] sm:$0xff] %v347_v11 }
  0x3a   : > { %350 = vst [vmem:[%s3095_s29 + $0x260] sm:$0xff] %v349_v12  ;;  %352 = vst [vmem:[%s3095_s29 + $0x268] sm:$0xff] %v351_v13  ;;  %v353_v14 = vld [vmem:[%s3087_s28 + $0xea0] sm:$0xff]  ;;  %v355_v15 = vld [vmem:[%s3087_s28 + $0xea8] sm:$0xff] }
  0x3b   : > { %v357_v16 = vld [vmem:[%s3087_s28 + $0xf00] sm:$0xff]  ;;  %354 = vst [vmem:[%s3095_s29 + $0x270] sm:$0xff] %v353_v14  ;;  %356 = vst [vmem:[%s3095_s29 + $0x278] sm:$0xff] %v355_v15  ;;  %v359_v17 = vld [vmem:[%s3087_s28 + $0xf08] sm:$0xff] }
  0x3c   : > { %358 = vst [vmem:[%s3095_s29 + $0x280] sm:$0xff] %v357_v16  ;;  %v361_v18 = vld [vmem:[%s3087_s28 + $0xf60] sm:$0xff]  ;;  %v363_v19 = vld [vmem:[%s3087_s28 + $0xf68] sm:$0xff]  ;;  %360 = vst [vmem:[%s3095_s29 + $0x288] sm:$0xff] %v359_v17 }
  0x3d   : > { %362 = vst [vmem:[%s3095_s29 + $0x290] sm:$0xff] %v361_v18  ;;  %364 = vst [vmem:[%s3095_s29 + $0x298] sm:$0xff] %v363_v19  ;;  %v365_v20 = vld [vmem:[%s3087_s28 + $0xfc0] sm:$0xff]  ;;  %v367_v21 = vld [vmem:[%s3087_s28 + $0xfc8] sm:$0xff] }
  0x3e   : > { %v369_v22 = vld [vmem:[%s3087_s28 + $0x1020] sm:$0xff]  ;;  %366 = vst [vmem:[%s3095_s29 + $0x2a0] sm:$0xff] %v365_v20  ;;  %368 = vst [vmem:[%s3095_s29 + $0x2a8] sm:$0xff] %v367_v21  ;;  %v371_v23 = vld [vmem:[%s3087_s28 + $0x1028] sm:$0xff] }
  0x3f   : > { %370 = vst [vmem:[%s3095_s29 + $0x2b0] sm:$0xff] %v369_v22  ;;  %v373_v24 = vld [vmem:[%s3087_s28 + $0x1080] sm:$0xff]  ;;  %v375_v25 = vld [vmem:[%s3087_s28 + $0x1088] sm:$0xff]  ;;  %372 = vst [vmem:[%s3095_s29 + $0x2b8] sm:$0xff] %v371_v23 }
  0x40   : > { %374 = vst [vmem:[%s3095_s29 + $0x2c0] sm:$0xff] %v373_v24  ;;  %376 = vst [vmem:[%s3095_s29 + $0x2c8] sm:$0xff] %v375_v25  ;;  %v377_v26 = vld [vmem:[%s3087_s28 + $0x10e0] sm:$0xff]  ;;  %v379_v27 = vld [vmem:[%s3087_s28 + $0x10e8] sm:$0xff] }
  0x41   : > { %v381_v28 = vld [vmem:[%s3087_s28 + $0x1140] sm:$0xff]  ;;  %378 = vst [vmem:[%s3095_s29 + $0x2d0] sm:$0xff] %v377_v26  ;;  %380 = vst [vmem:[%s3095_s29 + $0x2d8] sm:$0xff] %v379_v27  ;;  %v383_v29 = vld [vmem:[%s3087_s28 + $0x1148] sm:$0xff] }
  0x42   : > { %382 = vst [vmem:[%s3095_s29 + $0x2e0] sm:$0xff] %v381_v28  ;;  %v385_v30 = vld [vmem:[%s3087_s28 + $0x11a0] sm:$0xff]  ;;  %v387_v31 = vld [vmem:[%s3087_s28 + $0x11a8] sm:$0xff]  ;;  %384 = vst [vmem:[%s3095_s29 + $0x2e8] sm:$0xff] %v383_v29 }
  0x43   : > { %386 = vst [vmem:[%s3095_s29 + $0x2f0] sm:$0xff] %v385_v30  ;;  %388 = vst [vmem:[%s3095_s29 + $0x2f8] sm:$0xff] %v387_v31  ;;  %v389_v32 = vld [vmem:[%s3087_s28 + $0x1200] sm:$0xff]  ;;  %v391_v33 = vld [vmem:[%s3087_s28 + $0x1208] sm:$0xff] }
  0x44   : > { %v393_v34 = vld [vmem:[%s3087_s28 + $0x1260] sm:$0xff]  ;;  %390 = vst [vmem:[%s3095_s29 + $0x300] sm:$0xff] %v389_v32  ;;  %392 = vst [vmem:[%s3095_s29 + $0x308] sm:$0xff] %v391_v33  ;;  %v395_v35 = vld [vmem:[%s3087_s28 + $0x1268] sm:$0xff] }
  0x45   : > { %394 = vst [vmem:[%s3095_s29 + $0x310] sm:$0xff] %v393_v34  ;;  %v397_v36 = vld [vmem:[%s3087_s28 + $0x12c0] sm:$0xff]  ;;  %v399_v37 = vld [vmem:[%s3087_s28 + $0x12c8] sm:$0xff]  ;;  %396 = vst [vmem:[%s3095_s29 + $0x318] sm:$0xff] %v395_v35 }
  0x46   : > { %398 = vst [vmem:[%s3095_s29 + $0x320] sm:$0xff] %v397_v36  ;;  %400 = vst [vmem:[%s3095_s29 + $0x328] sm:$0xff] %v399_v37  ;;  %v401_v38 = vld [vmem:[%s3087_s28 + $0x1320] sm:$0xff]  ;;  %v403_v39 = vld [vmem:[%s3087_s28 + $0x1328] sm:$0xff] }
  0x47   : > { %v405_v40 = vld [vmem:[%s3087_s28 + $0x1380] sm:$0xff]  ;;  %402 = vst [vmem:[%s3095_s29 + $0x330] sm:$0xff] %v401_v38  ;;  %404 = vst [vmem:[%s3095_s29 + $0x338] sm:$0xff] %v403_v39  ;;  %v407_v41 = vld [vmem:[%s3087_s28 + $0x1388] sm:$0xff] }
  0x48   : > { %406 = vst [vmem:[%s3095_s29 + $0x340] sm:$0xff] %v405_v40  ;;  %v409_v42 = vld [vmem:[%s3087_s28 + $0x13e0] sm:$0xff]  ;;  %v411_v43 = vld [vmem:[%s3087_s28 + $0x13e8] sm:$0xff]  ;;  %408 = vst [vmem:[%s3095_s29 + $0x348] sm:$0xff] %v407_v41 }
  0x49   : > { %410 = vst [vmem:[%s3095_s29 + $0x350] sm:$0xff] %v409_v42  ;;  %412 = vst [vmem:[%s3095_s29 + $0x358] sm:$0xff] %v411_v43  ;;  %v413_v44 = vld [vmem:[%s3087_s28 + $0x1440] sm:$0xff]  ;;  %v415_v45 = vld [vmem:[%s3087_s28 + $0x1448] sm:$0xff] }
  0x4a   : > { %v417_v46 = vld [vmem:[%s3087_s28 + $0x14a0] sm:$0xff]  ;;  %414 = vst [vmem:[%s3095_s29 + $0x360] sm:$0xff] %v413_v44  ;;  %416 = vst [vmem:[%s3095_s29 + $0x368] sm:$0xff] %v415_v45  ;;  %v419_v47 = vld [vmem:[%s3087_s28 + $0x14a8] sm:$0xff] }
  0x4b   : > { %418 = vst [vmem:[%s3095_s29 + $0x370] sm:$0xff] %v417_v46  ;;  %v421_v48 = vld [vmem:[%s3087_s28 + $0x1500] sm:$0xff]  ;;  %v423_v49 = vld [vmem:[%s3087_s28 + $0x1508] sm:$0xff]  ;;  %420 = vst [vmem:[%s3095_s29 + $0x378] sm:$0xff] %v419_v47 }
  0x4c   : > { %422 = vst [vmem:[%s3095_s29 + $0x380] sm:$0xff] %v421_v48  ;;  %424 = vst [vmem:[%s3095_s29 + $0x388] sm:$0xff] %v423_v49  ;;  %v425_v50 = vld [vmem:[%s3087_s28 + $0x1560] sm:$0xff]  ;;  %v427_v51 = vld [vmem:[%s3087_s28 + $0x1568] sm:$0xff] }
  0x4d   : > { %v429_v52 = vld [vmem:[%s3087_s28 + $0x15c0] sm:$0xff]  ;;  %426 = vst [vmem:[%s3095_s29 + $0x390] sm:$0xff] %v425_v50  ;;  %428 = vst [vmem:[%s3095_s29 + $0x398] sm:$0xff] %v427_v51  ;;  %v431_v53 = vld [vmem:[%s3087_s28 + $0x15c8] sm:$0xff] }
  0x4e   : > { %430 = vst [vmem:[%s3095_s29 + $0x3a0] sm:$0xff] %v429_v52  ;;  %v433_v54 = vld [vmem:[%s3087_s28 + $0x1620] sm:$0xff]  ;;  %v435_v55 = vld [vmem:[%s3087_s28 + $0x1628] sm:$0xff]  ;;  %432 = vst [vmem:[%s3095_s29 + $0x3a8] sm:$0xff] %v431_v53 }
  0x4f   : > { %434 = vst [vmem:[%s3095_s29 + $0x3b0] sm:$0xff] %v433_v54  ;;  %436 = vst [vmem:[%s3095_s29 + $0x3b8] sm:$0xff] %v435_v55  ;;  %v437_v56 = vld [vmem:[%s3087_s28 + $0x1680] sm:$0xff]  ;;  %v439_v57 = vld [vmem:[%s3087_s28 + $0x1688] sm:$0xff] }
  0x50   : > { %v441_v58 = vld [vmem:[%s3087_s28 + $0x16e0] sm:$0xff]  ;;  %438 = vst [vmem:[%s3095_s29 + $0x3c0] sm:$0xff] %v437_v56  ;;  %440 = vst [vmem:[%s3095_s29 + $0x3c8] sm:$0xff] %v439_v57  ;;  %v443_v59 = vld [vmem:[%s3087_s28 + $0x16e8] sm:$0xff] }
  0x51   : > { %442 = vst [vmem:[%s3095_s29 + $0x3d0] sm:$0xff] %v441_v58  ;;  %v445_v60 = vld [vmem:[%s3087_s28 + $0x1740] sm:$0xff]  ;;  %v447_v61 = vld [vmem:[%s3087_s28 + $0x1748] sm:$0xff]  ;;  %444 = vst [vmem:[%s3095_s29 + $0x3d8] sm:$0xff] %v443_v59 }
  0x52   : > { %446 = vst [vmem:[%s3095_s29 + $0x3e0] sm:$0xff] %v445_v60  ;;  %448 = vst [vmem:[%s3095_s29 + $0x3e8] sm:$0xff] %v447_v61  ;;  %v449_v62 = vld [vmem:[%s3087_s28 + $0x17a0] sm:$0xff]  ;;  %v451_v63 = vld [vmem:[%s3087_s28 + $0x17a8] sm:$0xff] }
  0x53   : > { %v453_v0 = vld [vmem:[%s3087_s28 + $0x1800] sm:$0xff]  ;;  %450 = vst [vmem:[%s3095_s29 + $0x3f0] sm:$0xff] %v449_v62  ;;  %452 = vst [vmem:[%s3095_s29 + $0x3f8] sm:$0xff] %v451_v63  ;;  %v455_v1 = vld [vmem:[%s3087_s28 + $0x1808] sm:$0xff] }
  0x54   : > { %454 = vst [vmem:[%s3095_s29 + $0x400] sm:$0xff] %v453_v0  ;;  %v457_v2 = vld [vmem:[%s3087_s28 + $0x1860] sm:$0xff]  ;;  %v459_v3 = vld [vmem:[%s3087_s28 + $0x1868] sm:$0xff]  ;;  %456 = vst [vmem:[%s3095_s29 + $0x408] sm:$0xff] %v455_v1 }
  0x55   : > { %458 = vst [vmem:[%s3095_s29 + $0x410] sm:$0xff] %v457_v2  ;;  %460 = vst [vmem:[%s3095_s29 + $0x418] sm:$0xff] %v459_v3  ;;  %v461_v4 = vld [vmem:[%s3087_s28 + $0x18c0] sm:$0xff]  ;;  %v463_v5 = vld [vmem:[%s3087_s28 + $0x18c8] sm:$0xff] }
  0x56   : > { %v465_v6 = vld [vmem:[%s3087_s28 + $0x1920] sm:$0xff]  ;;  %462 = vst [vmem:[%s3095_s29 + $0x420] sm:$0xff] %v461_v4  ;;  %464 = vst [vmem:[%s3095_s29 + $0x428] sm:$0xff] %v463_v5  ;;  %v467_v7 = vld [vmem:[%s3087_s28 + $0x1928] sm:$0xff] }
  0x57   : > { %466 = vst [vmem:[%s3095_s29 + $0x430] sm:$0xff] %v465_v6  ;;  %v469_v8 = vld [vmem:[%s3087_s28 + $0x1980] sm:$0xff]  ;;  %v471_v9 = vld [vmem:[%s3087_s28 + $0x1988] sm:$0xff]  ;;  %468 = vst [vmem:[%s3095_s29 + $0x438] sm:$0xff] %v467_v7 }
  0x58   : > { %470 = vst [vmem:[%s3095_s29 + $0x440] sm:$0xff] %v469_v8  ;;  %472 = vst [vmem:[%s3095_s29 + $0x448] sm:$0xff] %v471_v9  ;;  %v473_v10 = vld [vmem:[%s3087_s28 + $0x19e0] sm:$0xff]  ;;  %v475_v11 = vld [vmem:[%s3087_s28 + $0x19e8] sm:$0xff] }
  0x59   : > { %v477_v12 = vld [vmem:[%s3087_s28 + $0x1a40] sm:$0xff]  ;;  %474 = vst [vmem:[%s3095_s29 + $0x450] sm:$0xff] %v473_v10  ;;  %476 = vst [vmem:[%s3095_s29 + $0x458] sm:$0xff] %v475_v11  ;;  %v479_v13 = vld [vmem:[%s3087_s28 + $0x1a48] sm:$0xff] }
  0x5a   : > { %478 = vst [vmem:[%s3095_s29 + $0x460] sm:$0xff] %v477_v12  ;;  %v481_v14 = vld [vmem:[%s3087_s28 + $0x1aa0] sm:$0xff]  ;;  %v483_v15 = vld [vmem:[%s3087_s28 + $0x1aa8] sm:$0xff]  ;;  %480 = vst [vmem:[%s3095_s29 + $0x468] sm:$0xff] %v479_v13 }
  0x5b   : > { %482 = vst [vmem:[%s3095_s29 + $0x470] sm:$0xff] %v481_v14  ;;  %484 = vst [vmem:[%s3095_s29 + $0x478] sm:$0xff] %v483_v15  ;;  %v485_v16 = vld [vmem:[%s3087_s28 + $0x1b00] sm:$0xff]  ;;  %v487_v17 = vld [vmem:[%s3087_s28 + $0x1b08] sm:$0xff] }
  0x5c   : > { %v489_v18 = vld [vmem:[%s3087_s28 + $0x1b60] sm:$0xff]  ;;  %486 = vst [vmem:[%s3095_s29 + $0x480] sm:$0xff] %v485_v16  ;;  %488 = vst [vmem:[%s3095_s29 + $0x488] sm:$0xff] %v487_v17  ;;  %v491_v19 = vld [vmem:[%s3087_s28 + $0x1b68] sm:$0xff] }
  0x5d   : > { %490 = vst [vmem:[%s3095_s29 + $0x490] sm:$0xff] %v489_v18  ;;  %v493_v20 = vld [vmem:[%s3087_s28 + $0x1bc0] sm:$0xff]  ;;  %v495_v21 = vld [vmem:[%s3087_s28 + $0x1bc8] sm:$0xff]  ;;  %492 = vst [vmem:[%s3095_s29 + $0x498] sm:$0xff] %v491_v19 }
  0x5e   : > { %494 = vst [vmem:[%s3095_s29 + $0x4a0] sm:$0xff] %v493_v20  ;;  %496 = vst [vmem:[%s3095_s29 + $0x4a8] sm:$0xff] %v495_v21  ;;  %v497_v22 = vld [vmem:[%s3087_s28 + $0x1c20] sm:$0xff]  ;;  %v499_v23 = vld [vmem:[%s3087_s28 + $0x1c28] sm:$0xff] }
  0x5f   : > { %v501_v24 = vld [vmem:[%s3087_s28 + $0x1c80] sm:$0xff]  ;;  %498 = vst [vmem:[%s3095_s29 + $0x4b0] sm:$0xff] %v497_v22  ;;  %500 = vst [vmem:[%s3095_s29 + $0x4b8] sm:$0xff] %v499_v23  ;;  %v503_v25 = vld [vmem:[%s3087_s28 + $0x1c88] sm:$0xff] }
  0x60   : > { %502 = vst [vmem:[%s3095_s29 + $0x4c0] sm:$0xff] %v501_v24  ;;  %v505_v26 = vld [vmem:[%s3087_s28 + $0x1ce0] sm:$0xff]  ;;  %v507_v27 = vld [vmem:[%s3087_s28 + $0x1ce8] sm:$0xff]  ;;  %504 = vst [vmem:[%s3095_s29 + $0x4c8] sm:$0xff] %v503_v25 }
  0x61   : > { %506 = vst [vmem:[%s3095_s29 + $0x4d0] sm:$0xff] %v505_v26  ;;  %508 = vst [vmem:[%s3095_s29 + $0x4d8] sm:$0xff] %v507_v27  ;;  %v509_v28 = vld [vmem:[%s3087_s28 + $0x1d40] sm:$0xff]  ;;  %v511_v29 = vld [vmem:[%s3087_s28 + $0x1d48] sm:$0xff] }
  0x62   : > { %v513_v30 = vld [vmem:[%s3087_s28 + $0x1da0] sm:$0xff]  ;;  %510 = vst [vmem:[%s3095_s29 + $0x4e0] sm:$0xff] %v509_v28  ;;  %512 = vst [vmem:[%s3095_s29 + $0x4e8] sm:$0xff] %v511_v29  ;;  %v515_v31 = vld [vmem:[%s3087_s28 + $0x1da8] sm:$0xff] }
  0x63   : > { %514 = vst [vmem:[%s3095_s29 + $0x4f0] sm:$0xff] %v513_v30  ;;  %v517_v32 = vld [vmem:[%s3087_s28 + $0x1e00] sm:$0xff]  ;;  %v519_v33 = vld [vmem:[%s3087_s28 + $0x1e08] sm:$0xff]  ;;  %516 = vst [vmem:[%s3095_s29 + $0x4f8] sm:$0xff] %v515_v31 }
  0x64   : > { %518 = vst [vmem:[%s3095_s29 + $0x500] sm:$0xff] %v517_v32  ;;  %520 = vst [vmem:[%s3095_s29 + $0x508] sm:$0xff] %v519_v33  ;;  %v521_v34 = vld [vmem:[%s3087_s28 + $0x1e60] sm:$0xff]  ;;  %v523_v35 = vld [vmem:[%s3087_s28 + $0x1e68] sm:$0xff] }
  0x65   : > { %v525_v36 = vld [vmem:[%s3087_s28 + $0x1ec0] sm:$0xff]  ;;  %522 = vst [vmem:[%s3095_s29 + $0x510] sm:$0xff] %v521_v34  ;;  %524 = vst [vmem:[%s3095_s29 + $0x518] sm:$0xff] %v523_v35  ;;  %v527_v37 = vld [vmem:[%s3087_s28 + $0x1ec8] sm:$0xff] }
  0x66   : > { %526 = vst [vmem:[%s3095_s29 + $0x520] sm:$0xff] %v525_v36  ;;  %v529_v38 = vld [vmem:[%s3087_s28 + $0x1f20] sm:$0xff]  ;;  %v531_v39 = vld [vmem:[%s3087_s28 + $0x1f28] sm:$0xff]  ;;  %528 = vst [vmem:[%s3095_s29 + $0x528] sm:$0xff] %v527_v37 }
  0x67   : > { %530 = vst [vmem:[%s3095_s29 + $0x530] sm:$0xff] %v529_v38  ;;  %532 = vst [vmem:[%s3095_s29 + $0x538] sm:$0xff] %v531_v39  ;;  %v533_v40 = vld [vmem:[%s3087_s28 + $0x1f80] sm:$0xff]  ;;  %v535_v41 = vld [vmem:[%s3087_s28 + $0x1f88] sm:$0xff] }
  0x68   : > { %v537_v42 = vld [vmem:[%s3087_s28 + $0x1fe0] sm:$0xff]  ;;  %534 = vst [vmem:[%s3095_s29 + $0x540] sm:$0xff] %v533_v40  ;;  %536 = vst [vmem:[%s3095_s29 + $0x548] sm:$0xff] %v535_v41  ;;  %v539_v43 = vld [vmem:[%s3087_s28 + $0x1fe8] sm:$0xff] }
  0x69   : > { %538 = vst [vmem:[%s3095_s29 + $0x550] sm:$0xff] %v537_v42  ;;  %v541_v44 = vld [vmem:[%s3087_s28 + $0x2040] sm:$0xff]  ;;  %v543_v45 = vld [vmem:[%s3087_s28 + $0x2048] sm:$0xff]  ;;  %540 = vst [vmem:[%s3095_s29 + $0x558] sm:$0xff] %v539_v43 }
  0x6a   : > { %542 = vst [vmem:[%s3095_s29 + $0x560] sm:$0xff] %v541_v44  ;;  %544 = vst [vmem:[%s3095_s29 + $0x568] sm:$0xff] %v543_v45  ;;  %v545_v46 = vld [vmem:[%s3087_s28 + $0x20a0] sm:$0xff]  ;;  %v547_v47 = vld [vmem:[%s3087_s28 + $0x20a8] sm:$0xff] }
  0x6b   : > { %v549_v48 = vld [vmem:[%s3087_s28 + $0x2100] sm:$0xff]  ;;  %546 = vst [vmem:[%s3095_s29 + $0x570] sm:$0xff] %v545_v46  ;;  %548 = vst [vmem:[%s3095_s29 + $0x578] sm:$0xff] %v547_v47  ;;  %v551_v49 = vld [vmem:[%s3087_s28 + $0x2108] sm:$0xff] }
  0x6c   : > { %550 = vst [vmem:[%s3095_s29 + $0x580] sm:$0xff] %v549_v48  ;;  %v553_v50 = vld [vmem:[%s3087_s28 + $0x2160] sm:$0xff]  ;;  %v555_v51 = vld [vmem:[%s3087_s28 + $0x2168] sm:$0xff]  ;;  %552 = vst [vmem:[%s3095_s29 + $0x588] sm:$0xff] %v551_v49 }
  0x6d   : > { %554 = vst [vmem:[%s3095_s29 + $0x590] sm:$0xff] %v553_v50  ;;  %556 = vst [vmem:[%s3095_s29 + $0x598] sm:$0xff] %v555_v51  ;;  %v557_v52 = vld [vmem:[%s3087_s28 + $0x21c0] sm:$0xff]  ;;  %v559_v53 = vld [vmem:[%s3087_s28 + $0x21c8] sm:$0xff] }
  0x6e   : > { %v561_v54 = vld [vmem:[%s3087_s28 + $0x2220] sm:$0xff]  ;;  %558 = vst [vmem:[%s3095_s29 + $0x5a0] sm:$0xff] %v557_v52  ;;  %560 = vst [vmem:[%s3095_s29 + $0x5a8] sm:$0xff] %v559_v53  ;;  %v563_v55 = vld [vmem:[%s3087_s28 + $0x2228] sm:$0xff] }
  0x6f   : > { %562 = vst [vmem:[%s3095_s29 + $0x5b0] sm:$0xff] %v561_v54  ;;  %v565_v56 = vld [vmem:[%s3087_s28 + $0x2280] sm:$0xff]  ;;  %v567_v57 = vld [vmem:[%s3087_s28 + $0x2288] sm:$0xff]  ;;  %564 = vst [vmem:[%s3095_s29 + $0x5b8] sm:$0xff] %v563_v55 }
  0x70   : > { %566 = vst [vmem:[%s3095_s29 + $0x5c0] sm:$0xff] %v565_v56  ;;  %568 = vst [vmem:[%s3095_s29 + $0x5c8] sm:$0xff] %v567_v57  ;;  %v569_v58 = vld [vmem:[%s3087_s28 + $0x22e0] sm:$0xff]  ;;  %v571_v59 = vld [vmem:[%s3087_s28 + $0x22e8] sm:$0xff] }
  0x71   : > { %v573_v60 = vld [vmem:[%s3087_s28 + $0x2340] sm:$0xff]  ;;  %570 = vst [vmem:[%s3095_s29 + $0x5d0] sm:$0xff] %v569_v58  ;;  %572 = vst [vmem:[%s3095_s29 + $0x5d8] sm:$0xff] %v571_v59  ;;  %v575_v61 = vld [vmem:[%s3087_s28 + $0x2348] sm:$0xff] }
  0x72   : > { %574 = vst [vmem:[%s3095_s29 + $0x5e0] sm:$0xff] %v573_v60  ;;  %v577_v62 = vld [vmem:[%s3087_s28 + $0x23a0] sm:$0xff]  ;;  %v579_v63 = vld [vmem:[%s3087_s28 + $0x23a8] sm:$0xff]  ;;  %576 = vst [vmem:[%s3095_s29 + $0x5e8] sm:$0xff] %v575_v61 }
  0x73   : > { %578 = vst [vmem:[%s3095_s29 + $0x5f0] sm:$0xff] %v577_v62  ;;  %580 = vst [vmem:[%s3095_s29 + $0x5f8] sm:$0xff] %v579_v63 }
  0x74 PF: > { %p2415_p8 = scmp.ge.s32.totalorder %s3017_s16, 1  ;;  %p593_p9 = scmp.lt.s32.totalorder %s3017_s16, 7 }
  0x76   : > { %p594_p10 = pnand %p2415_p8, %p593_p9 }
  0x77   : > { %s600_s30 = sand.u32 (!%p594_p10), 1, %s3001_s12   ;;  %s2417_s26 = sshll.u32 (!%p594_p10), %s3009_s14, 2 }
  0x78   : > { %597 = sbr.rel (%p594_p10) target bundleno = 562 (0x232), region = 51  ;;  %p651_p11 = scmp.lt.s32.totalorder (!%p594_p10), %s2417_s26, 23 }
  0x79   : > { %s2624_s4 = smul.u32 (!%p594_p10), 1536, %s600_s30 }
  0x7b   : > { %s3491_s9 = scalar_lea.vmem (!%p594_p10), [#allocation2], %s2624_s4  ;;  %s2416_s4 = sshll.u32 (!%p594_p10), %s600_s30, 6 }
  0x7c   : > { %s3730_s5 = scalar_lea.vmem (!%p594_p10), [#allocation3], %s2416_s4 }
  0x7d   : > { %v3483_v0 = vld [vmem:[%s3773_s0 + $0x4] ss:$24 sps:$4 sm:$0xff]   ;;  %v2670_v4 = vld [vmem:[%s3491_s9 + $0xe0] ss:$16 sps:$4 sm:$0xff]   ;;  %s3785_s26 = smov (!%p651_p11, %s2417_s26), 23  ;;  %s2622_s12 = sshll.u32 (%p3074_p6), %s3009_s14, 5 }
  0x7e   : > { %v3488_v1 = vld [vmem:[%s3773_s0 + $0xc] ss:$24 sps:$4 sm:$0xff]   ;;  %1897 = vmatprep.mubr.bf16.mxu0 %v3483_v0  ;;  %v2671_v5 = vld [vmem:[%s3491_s9 + $0x2e0] ss:$16 sps:$4 sm:$0xff]   ;;  %s653_s29 = scalar_lea.vmem %s3775_s2, %s3785_s26  ;;  %s2272_s7 = scalar_lea.vmem (%p3074_p6), %s3776_s3, %s2622_s12 }
  0x7f   : > { %v2666_v2 = vld [vmem:[%s3491_s9 + $0xe4] ss:$16 sps:$4 sm:$0xff]   ;;  %1940 = vmatprep.mubr.bf16.mxu1 %v3488_v1  ;;  %v2676_v8 = vld [vmem:[%s3491_s9 + $0xc0] ss:$16 sps:$4 sm:$0xff]  }
  0x80   : > { %v2668_v3 = vld [vmem:[%s3491_s9 + $0x2e4] ss:$16 sps:$4 sm:$0xff]   ;;  %1865 = vmatprep.subr.bf16.mxu0 %v2666_v2  ;;  %v2677_v9 = vld [vmem:[%s3491_s9 + $0x2c0] ss:$16 sps:$4 sm:$0xff]  }
  0x81   : > { %1908 = vmatprep.subr.bf16.mxu1 %v2668_v3  ;;  %v2672_v6 = vld [vmem:[%s3491_s9 + $0xc4] ss:$16 sps:$4 sm:$0xff]   ;;  %1866 = vmatpush1.bf16.msra.mxu0 %v2670_v4  ;;  %v2682_v12 = vld [vmem:[%s3491_s9 + $0xa0] ss:$16 sps:$4 sm:$0xff]  }
  0x82   : > { %1909 = vmatpush1.bf16.msra.mxu1 %v2671_v5  ;;  %v2674_v7 = vld [vmem:[%s3491_s9 + $0x2c4] ss:$16 sps:$4 sm:$0xff]   ;;  %1867 = vmatprep.subr.bf16.mxu0 %v2672_v6  ;;  %v2683_v13 = vld [vmem:[%s3491_s9 + $0x2a0] ss:$16 sps:$4 sm:$0xff]   ;;  %v2773_v5 = vld [vmem:[%s3491_s9 + $0xec] ss:$16 sps:$4 sm:$0xff]  }
  0x83   : > { %1910 = vmatprep.subr.bf16.mxu1 %v2674_v7  ;;  %v2678_v10 = vld [vmem:[%s3491_s9 + $0xa4] ss:$16 sps:$4 sm:$0xff]   ;;  %v2688_v16 = vld [vmem:[%s3491_s9 + $0x80] ss:$16 sps:$4 sm:$0xff]  }
  0x84   : > { %v2680_v11 = vld [vmem:[%s3491_s9 + $0x2a4] ss:$16 sps:$4 sm:$0xff]   ;;  %v2689_v17 = vld [vmem:[%s3491_s9 + $0x280] ss:$16 sps:$4 sm:$0xff]  }
  0x85   : > { %1868 = vmatpush1.bf16.msra.mxu0 %v2676_v8  ;;  %v2684_v14 = vld [vmem:[%s3491_s9 + $0x84] ss:$16 sps:$4 sm:$0xff]   ;;  %v2694_v20 = vld [vmem:[%s3491_s9 + $0x60] ss:$16 sps:$4 sm:$0xff]  }
  0x86   : > { %1911 = vmatpush1.bf16.msra.mxu1 %v2677_v9  ;;  %1869 = vmatprep.subr.bf16.mxu0 %v2678_v10  ;;  %v2686_v15 = vld [vmem:[%s3491_s9 + $0x284] ss:$16 sps:$4 sm:$0xff]   ;;  %v2695_v21 = vld [vmem:[%s3491_s9 + $0x260] ss:$16 sps:$4 sm:$0xff]   ;;  %v2771_v9 = vld [vmem:[%s3491_s9 + $0xe8] ss:$16 sps:$4 sm:$0xff]  }
  0x87   : > { %1912 = vmatprep.subr.bf16.mxu1 %v2680_v11  ;;  %v2690_v18 = vld [vmem:[%s3491_s9 + $0x64] ss:$16 sps:$4 sm:$0xff]   ;;  %v2700_v24 = vld [vmem:[%s3491_s9 + $0x40] ss:$16 sps:$4 sm:$0xff]   ;;  %v2779_v11 = vld [vmem:[%s3491_s9 + $0xcc] ss:$16 sps:$4 sm:$0xff]  }
  0x88   : > { %v2692_v19 = vld [vmem:[%s3491_s9 + $0x264] ss:$16 sps:$4 sm:$0xff]   ;;  %v2701_v25 = vld [vmem:[%s3491_s9 + $0x240] ss:$16 sps:$4 sm:$0xff]  }
  0x89   : > { %1870 = vmatpush1.bf16.msra.mxu0 %v2682_v12  ;;  %v2696_v22 = vld [vmem:[%s3491_s9 + $0x44] ss:$16 sps:$4 sm:$0xff]   ;;  %v2706_v28 = vld [vmem:[%s3491_s9 + $0x20] ss:$16 sps:$4 sm:$0xff]  }
  0x8a   : > { %1913 = vmatpush1.bf16.msra.mxu1 %v2683_v13  ;;  %1871 = vmatprep.subr.bf16.mxu0 %v2684_v14  ;;  %v2698_v23 = vld [vmem:[%s3491_s9 + $0x244] ss:$16 sps:$4 sm:$0xff]   ;;  %v2707_v29 = vld [vmem:[%s3491_s9 + $0x220] ss:$16 sps:$4 sm:$0xff]   ;;  %v2777_v13 = vld [vmem:[%s3491_s9 + $0xc8] ss:$16 sps:$4 sm:$0xff]  }
  0x8b   : > { %1914 = vmatprep.subr.bf16.mxu1 %v2686_v15  ;;  %v2702_v26 = vld [vmem:[%s3491_s9 + $0x24] ss:$16 sps:$4 sm:$0xff]   ;;  %v2712_v32 = vld [vmem:[%s3491_s9] ss:$16 sps:$4 sm:$0xff]   ;;  %v2785_v15 = vld [vmem:[%s3491_s9 + $0xac] ss:$16 sps:$4 sm:$0xff]  }
  0x8c   : > { %v2704_v27 = vld [vmem:[%s3491_s9 + $0x224] ss:$16 sps:$4 sm:$0xff]   ;;  %v2713_v33 = vld [vmem:[%s3491_s9 + $0x200] ss:$16 sps:$4 sm:$0xff]  }
  0x8d   : > { %1872 = vmatpush1.bf16.msra.mxu0 %v2688_v16  ;;  %v2708_v30 = vld [vmem:[%s3491_s9 + $0x4] ss:$16 sps:$4 sm:$0xff]   ;;  %v2718_v36 = vld [vmem:[%s3491_s9 + $0x1e0] ss:$16 sps:$4 sm:$0xff]  }
  0x8e   : > { %1915 = vmatpush1.bf16.msra.mxu1 %v2689_v17  ;;  %1873 = vmatprep.subr.bf16.mxu0 %v2690_v18  ;;  %v2710_v31 = vld [vmem:[%s3491_s9 + $0x204] ss:$16 sps:$4 sm:$0xff]   ;;  %v2719_v37 = vld [vmem:[%s3491_s9 + $0x3e0] ss:$16 sps:$4 sm:$0xff]   ;;  %v2783_v17 = vld [vmem:[%s3491_s9 + $0xa8] ss:$16 sps:$4 sm:$0xff]  }
  0x8f   : > { %1916 = vmatprep.subr.bf16.mxu1 %v2692_v19  ;;  %v2714_v34 = vld [vmem:[%s3491_s9 + $0x1e4] ss:$16 sps:$4 sm:$0xff]   ;;  %v2724_v40 = vld [vmem:[%s3491_s9 + $0x1c0] ss:$16 sps:$4 sm:$0xff]   ;;  %v2791_v19 = vld [vmem:[%s3491_s9 + $0x8c] ss:$16 sps:$4 sm:$0xff]  }
  0x90   : > { %v2716_v35 = vld [vmem:[%s3491_s9 + $0x3e4] ss:$16 sps:$4 sm:$0xff]   ;;  %v2725_v41 = vld [vmem:[%s3491_s9 + $0x3c0] ss:$16 sps:$4 sm:$0xff]  }
  0x91   : > { %1874 = vmatpush1.bf16.msra.mxu0 %v2694_v20  ;;  %v2720_v38 = vld [vmem:[%s3491_s9 + $0x1c4] ss:$16 sps:$4 sm:$0xff]   ;;  %v2730_v44 = vld [vmem:[%s3491_s9 + $0x1a0] ss:$16 sps:$4 sm:$0xff]  }
  0x92   : > { %1917 = vmatpush1.bf16.msra.mxu1 %v2695_v21  ;;  %1875 = vmatprep.subr.bf16.mxu0 %v2696_v22  ;;  %v2722_v39 = vld [vmem:[%s3491_s9 + $0x3c4] ss:$16 sps:$4 sm:$0xff]   ;;  %v2731_v45 = vld [vmem:[%s3491_s9 + $0x3a0] ss:$16 sps:$4 sm:$0xff]   ;;  %v2789_v21 = vld [vmem:[%s3491_s9 + $0x88] ss:$16 sps:$4 sm:$0xff]  }
  0x93   : > { %1918 = vmatprep.subr.bf16.mxu1 %v2698_v23  ;;  %v2726_v42 = vld [vmem:[%s3491_s9 + $0x1a4] ss:$16 sps:$4 sm:$0xff]   ;;  %v2736_v48 = vld [vmem:[%s3491_s9 + $0x180] ss:$16 sps:$4 sm:$0xff]   ;;  %v2797_v22 = vld [vmem:[%s3491_s9 + $0x6c] ss:$16 sps:$4 sm:$0xff]  }
  0x94   : > { %v2728_v43 = vld [vmem:[%s3491_s9 + $0x3a4] ss:$16 sps:$4 sm:$0xff]   ;;  %v2737_v49 = vld [vmem:[%s3491_s9 + $0x380] ss:$16 sps:$4 sm:$0xff]  }
  0x95   : > { %1876 = vmatpush1.bf16.msra.mxu0 %v2700_v24  ;;  %v2732_v46 = vld [vmem:[%s3491_s9 + $0x184] ss:$16 sps:$4 sm:$0xff]   ;;  %v2742_v52 = vld [vmem:[%s3491_s9 + $0x160] ss:$16 sps:$4 sm:$0xff]   ;;  %v2795_v24 = vld [vmem:[%s3491_s9 + $0x68] ss:$16 sps:$4 sm:$0xff]  }
  0x96   : > { %1919 = vmatpush1.bf16.msra.mxu1 %v2701_v25  ;;  %1877 = vmatprep.subr.bf16.mxu0 %v2702_v26  ;;  %v2734_v47 = vld [vmem:[%s3491_s9 + $0x384] ss:$16 sps:$4 sm:$0xff]   ;;  %v2743_v53 = vld [vmem:[%s3491_s9 + $0x360] ss:$16 sps:$4 sm:$0xff]   ;;  %v2803_v26 = vld [vmem:[%s3491_s9 + $0x4c] ss:$16 sps:$4 sm:$0xff]  }
  0x97   : > { %1920 = vmatprep.subr.bf16.mxu1 %v2704_v27  ;;  %v2738_v50 = vld [vmem:[%s3491_s9 + $0x164] ss:$16 sps:$4 sm:$0xff]   ;;  %v2748_v56 = vld [vmem:[%s3491_s9 + $0x140] ss:$16 sps:$4 sm:$0xff]  }
  0x98   : > { %v2740_v51 = vld [vmem:[%s3491_s9 + $0x364] ss:$16 sps:$4 sm:$0xff]   ;;  %v2749_v57 = vld [vmem:[%s3491_s9 + $0x340] ss:$16 sps:$4 sm:$0xff]  }
  0x99   : > { %1878 = vmatpush1.bf16.msra.mxu0 %v2706_v28  ;;  %v2744_v54 = vld [vmem:[%s3491_s9 + $0x144] ss:$16 sps:$4 sm:$0xff]   ;;  %v2754_v60 = vld [vmem:[%s3491_s9 + $0x120] ss:$16 sps:$4 sm:$0xff]   ;;  %v2801_v28 = vld [vmem:[%s3491_s9 + $0x48] ss:$16 sps:$4 sm:$0xff]  }
  0x9a   : > { %1921 = vmatpush1.bf16.msra.mxu1 %v2707_v29  ;;  %1879 = vmatprep.subr.bf16.mxu0 %v2708_v30  ;;  %v2746_v55 = vld [vmem:[%s3491_s9 + $0x344] ss:$16 sps:$4 sm:$0xff]   ;;  %v2755_v61 = vld [vmem:[%s3491_s9 + $0x320] ss:$16 sps:$4 sm:$0xff]   ;;  %v2809_v30 = vld [vmem:[%s3491_s9 + $0x2c] ss:$16 sps:$4 sm:$0xff]  }
  0x9b   : > { %1922 = vmatprep.subr.bf16.mxu1 %v2710_v31  ;;  %v2750_v58 = vld [vmem:[%s3491_s9 + $0x124] ss:$16 sps:$4 sm:$0xff]   ;;  %v2760_v2 = vld [vmem:[%s3491_s9 + $0x100] ss:$16 sps:$4 sm:$0xff]  }
  0x9c   : > { %v2752_v59 = vld [vmem:[%s3491_s9 + $0x324] ss:$16 sps:$4 sm:$0xff]   ;;  %v2761_v3 = vld [vmem:[%s3491_s9 + $0x300] ss:$16 sps:$4 sm:$0xff]  }
  0x9d   : > { %1880 = vmatpush1.bf16.msra.mxu0 %v2712_v32  ;;  %v2756_v62 = vld [vmem:[%s3491_s9 + $0x104] ss:$16 sps:$4 sm:$0xff]   ;;  %v3563_v6 = vld [vmem:[%s3773_s0] ss:$24 sps:$4 sm:$0xff]  }
  0x9e   : > { %1923 = vmatpush1.bf16.msra.mxu1 %v2713_v33  ;;  %1881 = vmatprep.subr.bf16.mxu0 %v2714_v34  ;;  %v2758_v63 = vld [vmem:[%s3491_s9 + $0x304] ss:$16 sps:$4 sm:$0xff]   ;;  %v3568_v7 = vld [vmem:[%s3773_s0 + $0x8] ss:$24 sps:$4 sm:$0xff]  }
  0x9f   : > { %1924 = vmatprep.subr.bf16.mxu1 %v2716_v35  ;;  %v2770_v4 = vld [vmem:[%s3491_s9 + $0x4e4] ss:$16 sps:$4 sm:$0xff]   ;;  %v2768_v8 = vld [vmem:[%s3491_s9 + $0x4e0] ss:$16 sps:$4 sm:$0xff]   ;;  %v2807_v33 = vld [vmem:[%s3491_s9 + $0x28] ss:$16 sps:$4 sm:$0xff]  }
  0xa0   : > { %v2776_v10 = vld [vmem:[%s3491_s9 + $0x4c4] ss:$16 sps:$4 sm:$0xff]   ;;  %v2774_v12 = vld [vmem:[%s3491_s9 + $0x4c0] ss:$16 sps:$4 sm:$0xff]   ;;  %v2815_v35 = vld [vmem:[%s3491_s9 + $0xc] ss:$16 sps:$4 sm:$0xff]  }
  0xa1   : > { %1882 = vmatpush2.bf16.msra.mxu0 %v2718_v36  ;;  %v2782_v14 = vld [vmem:[%s3491_s9 + $0x4a4] ss:$16 sps:$4 sm:$0xff]   ;;  %v2780_v16 = vld [vmem:[%s3491_s9 + $0x4a0] ss:$16 sps:$4 sm:$0xff]  }
  0xa2   : > { %1925 = vmatpush2.bf16.msra.mxu1 %v2719_v37  ;;  %1883 = vmatprep.subr.bf16.mxu0 %v2720_v38  ;;  %v2788_v18 = vld [vmem:[%s3491_s9 + $0x484] ss:$16 sps:$4 sm:$0xff]   ;;  %v2786_v20 = vld [vmem:[%s3491_s9 + $0x480] ss:$16 sps:$4 sm:$0xff]   ;;  %v2813_v37 = vld [vmem:[%s3491_s9 + $0x8] ss:$16 sps:$4 sm:$0xff]  }
  0xa3   : > { %1926 = vmatprep.subr.bf16.mxu1 %v2722_v39  ;;  %v2792_v23 = vld [vmem:[%s3491_s9 + $0x460] ss:$16 sps:$4 sm:$0xff]   ;;  %v2800_v25 = vld [vmem:[%s3491_s9 + $0x444] ss:$16 sps:$4 sm:$0xff]   ;;  %v2821_v39 = vld [vmem:[%s3491_s9 + $0x1ec] ss:$16 sps:$4 sm:$0xff]  }
  0xa4   : > { %v2798_v27 = vld [vmem:[%s3491_s9 + $0x440] ss:$16 sps:$4 sm:$0xff]   ;;  %v2806_v29 = vld [vmem:[%s3491_s9 + $0x424] ss:$16 sps:$4 sm:$0xff]  }
  0xa5   : > { %1884 = vmatpush2.bf16.msra.mxu0 %v2724_v40  ;;  %v3600_v31 = vld [vmem:[%s3773_s0 + $0x14] ss:$24 sps:$4 sm:$0xff]   ;;  %v2804_v32 = vld [vmem:[%s3491_s9 + $0x420] ss:$16 sps:$4 sm:$0xff]  }
  0xa6   : > { %1927 = vmatpush2.bf16.msra.mxu1 %v2725_v41  ;;  %1885 = vmatprep.subr.bf16.mxu0 %v2726_v42  ;;  %v2812_v34 = vld [vmem:[%s3491_s9 + $0x404] ss:$16 sps:$4 sm:$0xff]   ;;  %v2810_v36 = vld [vmem:[%s3491_s9 + $0x400] ss:$16 sps:$4 sm:$0xff]   ;;  %v2819_v41 = vld [vmem:[%s3491_s9 + $0x1e8] ss:$16 sps:$4 sm:$0xff]  }
  0xa7   : > { %1928 = vmatprep.subr.bf16.mxu1 %v2728_v43  ;;  %v2818_v38 = vld [vmem:[%s3491_s9 + $0x5e4] ss:$16 sps:$4 sm:$0xff]   ;;  %v2816_v40 = vld [vmem:[%s3491_s9 + $0x5e0] ss:$16 sps:$4 sm:$0xff]   ;;  %v2827_v43 = vld [vmem:[%s3491_s9 + $0x1cc] ss:$16 sps:$4 sm:$0xff]  }
  0xa8   : > { %v2824_v42 = vld [vmem:[%s3491_s9 + $0x5c4] ss:$16 sps:$4 sm:$0xff]  }
  0xa9   : > { %1886 = vmatpush2.bf16.msra.mxu0 %v2730_v44  ;;  %v2822_v44 = vld [vmem:[%s3491_s9 + $0x5c0] ss:$16 sps:$4 sm:$0xff]  }
  0xaa   : > { %1929 = vmatpush2.bf16.msra.mxu1 %v2731_v45  ;;  %1887 = vmatprep.subr.bf16.mxu0 %v2732_v46  ;;  %v2825_v45 = vld [vmem:[%s3491_s9 + $0x1c8] ss:$16 sps:$4 sm:$0xff]   ;;  %v2830_v46 = vld [vmem:[%s3491_s9 + $0x5a4] ss:$16 sps:$4 sm:$0xff]  }
  0xab   : > { %1930 = vmatprep.subr.bf16.mxu1 %v2734_v47  ;;  %v2833_v47 = vld [vmem:[%s3491_s9 + $0x1ac] ss:$16 sps:$4 sm:$0xff]  }
  0xad   : > { %1888 = vmatpush2.bf16.msra.mxu0 %v2736_v48  ;;  %v2828_v48 = vld [vmem:[%s3491_s9 + $0x5a0] ss:$16 sps:$4 sm:$0xff]  }
  0xae   : > { %1931 = vmatpush2.bf16.msra.mxu1 %v2737_v49  ;;  %1889 = vmatprep.subr.bf16.mxu0 %v2738_v50  ;;  %v2831_v49 = vld [vmem:[%s3491_s9 + $0x1a8] ss:$16 sps:$4 sm:$0xff]   ;;  %v2836_v50 = vld [vmem:[%s3491_s9 + $0x584] ss:$16 sps:$4 sm:$0xff]  }
  0xaf   : > { %1932 = vmatprep.subr.bf16.mxu1 %v2740_v51  ;;  %v2839_v51 = vld [vmem:[%s3491_s9 + $0x18c] ss:$16 sps:$4 sm:$0xff]  }
  0xb1   : > { %1890 = vmatpush2.bf16.msra.mxu0 %v2742_v52  ;;  %v2834_v52 = vld [vmem:[%s3491_s9 + $0x580] ss:$16 sps:$4 sm:$0xff]  }
  0xb2   : > { %1933 = vmatpush2.bf16.msra.mxu1 %v2743_v53  ;;  %1891 = vmatprep.subr.bf16.mxu0 %v2744_v54  ;;  %v2837_v53 = vld [vmem:[%s3491_s9 + $0x188] ss:$16 sps:$4 sm:$0xff]   ;;  %v2842_v54 = vld [vmem:[%s3491_s9 + $0x564] ss:$16 sps:$4 sm:$0xff]  }
  0xb3   : > { %1934 = vmatprep.subr.bf16.mxu1 %v2746_v55  ;;  %v2845_v55 = vld [vmem:[%s3491_s9 + $0x16c] ss:$16 sps:$4 sm:$0xff]  }
  0xb5   : > { %1892 = vmatpush2.bf16.msra.mxu0 %v2748_v56  ;;  %v2840_v56 = vld [vmem:[%s3491_s9 + $0x560] ss:$16 sps:$4 sm:$0xff]  }
  0xb6   : > { %1935 = vmatpush2.bf16.msra.mxu1 %v2749_v57  ;;  %1893 = vmatprep.subr.bf16.mxu0 %v2750_v58  ;;  %v2843_v57 = vld [vmem:[%s3491_s9 + $0x168] ss:$16 sps:$4 sm:$0xff]   ;;  %v2848_v58 = vld [vmem:[%s3491_s9 + $0x544] ss:$16 sps:$4 sm:$0xff]  }
  0xb7   : > { %1936 = vmatprep.subr.bf16.mxu1 %v2752_v59  ;;  %v2851_v59 = vld [vmem:[%s3491_s9 + $0x14c] ss:$16 sps:$4 sm:$0xff]  }
  0xb9   : > { %1894 = vmatpush2.bf16.msra.mxu0 %v2754_v60  ;;  %v2846_v60 = vld [vmem:[%s3491_s9 + $0x540] ss:$16 sps:$4 sm:$0xff]  }
  0xba   : > { %1937 = vmatpush2.bf16.msra.mxu1 %v2755_v61  ;;  %1895 = vmatprep.subr.bf16.mxu0 %v2756_v62  ;;  %v2849_v61 = vld [vmem:[%s3491_s9 + $0x148] ss:$16 sps:$4 sm:$0xff]   ;;  %v2854_v62 = vld [vmem:[%s3491_s9 + $0x524] ss:$16 sps:$4 sm:$0xff]  }
  0xbb   : > { %1938 = vmatprep.subr.bf16.mxu1 %v2758_v63  ;;  %v2857_v63 = vld [vmem:[%s3491_s9 + $0x12c] ss:$16 sps:$4 sm:$0xff]  }
  0xbd   : > { %1896 = vmatpush2.bf16.msra.mxu0 %v2760_v2  ;;  %v2852_v2 = vld [vmem:[%s3491_s9 + $0x520] ss:$16 sps:$4 sm:$0xff]  }
  0xbe   : > { %1939 = vmatpush2.bf16.msra.mxu1 %v2761_v3  ;;  %1951 = vmatprep.subr.bf16.mxu0 %v2770_v4  ;;  %v2855_v3 = vld [vmem:[%s3491_s9 + $0x128] ss:$16 sps:$4 sm:$0xff]   ;;  %v2860_v4 = vld [vmem:[%s3491_s9 + $0x504] ss:$16 sps:$4 sm:$0xff]  }
  0xbf   : > { %1994 = vmatprep.subr.bf16.mxu1 %v2773_v5  ;;  %v2863_v5 = vld [vmem:[%s3491_s9 + $0x10c] ss:$16 sps:$4 sm:$0xff]  }
  0xc0   : > { %1898 = vmatmul.mubr.bf16.vlgmr.msra.gmra.mxu0 %v3563_v6 }
  0xc1   : > { %1941 = vmatmul.mubr.bf16.vlgmr.msra.gmra.mxu1 %v3568_v7  ;;  %1952 = vmatpush1.bf16.msra.mxu0 %v2768_v8  ;;  %v2858_v8 = vld [vmem:[%s3491_s9 + $0x500] ss:$16 sps:$4 sm:$0xff]  }
  0xc2   : > { %1995 = vmatpush1.bf16.msra.mxu1 %v2771_v9  ;;  %1953 = vmatprep.subr.bf16.mxu0 %v2776_v10  ;;  %v2861_v9 = vld [vmem:[%s3491_s9 + $0x108] ss:$16 sps:$4 sm:$0xff]   ;;  %v2869_v10 = vld [vmem:[%s3491_s9 + $0x2ec] ss:$16 sps:$4 sm:$0xff]  }
  0xc3   : > { %1996 = vmatprep.subr.bf16.mxu1 %v2779_v11  ;;  %2026 = vmatprep.mubr.bf16.mxu1 %v3483_v0  ;;  %v2794_v0 = vld [vmem:[%s3491_s9 + $0x464] ss:$16 sps:$4 sm:$0xff]   ;;  %v2872_v11 = vld [vmem:[%s3491_s9 + $0x4ec] ss:$16 sps:$4 sm:$0xff]  }
  0xc4   : > { %1983 = vmatprep.mubr.bf16.mxu0 %v3600_v31 }
  0xc5   : > { %1954 = vmatpush1.bf16.msra.mxu0 %v2774_v12  ;;  %v3646_v12 = vld [vmem:[%s3773_s0 + $0x10] ss:$24 sps:$4 sm:$0xff]  }
  0xc6   : > { %1997 = vmatpush1.bf16.msra.mxu1 %v2777_v13  ;;  %1955 = vmatprep.subr.bf16.mxu0 %v2782_v14  ;;  %v2867_v13 = vld [vmem:[%s3491_s9 + $0x2e8] ss:$16 sps:$4 sm:$0xff]  }
  0xc7   : > { %1998 = vmatprep.subr.bf16.mxu1 %v2785_v15  ;;  %v2870_v14 = vld [vmem:[%s3491_s9 + $0x4e8] ss:$16 sps:$4 sm:$0xff]   ;;  %v2875_v15 = vld [vmem:[%s3491_s9 + $0x2cc] ss:$16 sps:$4 sm:$0xff]  }
  0xc9   : > { %1956 = vmatpush1.bf16.msra.mxu0 %v2780_v16  ;;  %v2878_v16 = vld [vmem:[%s3491_s9 + $0x4cc] ss:$16 sps:$4 sm:$0xff]  }
  0xca   : > { %1999 = vmatpush1.bf16.msra.mxu1 %v2783_v17  ;;  %1957 = vmatprep.subr.bf16.mxu0 %v2788_v18  ;;  %v2873_v17 = vld [vmem:[%s3491_s9 + $0x2c8] ss:$16 sps:$4 sm:$0xff]  }
  0xcb   : > { %2000 = vmatprep.subr.bf16.mxu1 %v2791_v19  ;;  %v2876_v18 = vld [vmem:[%s3491_s9 + $0x4c8] ss:$16 sps:$4 sm:$0xff]   ;;  %v2881_v19 = vld [vmem:[%s3491_s9 + $0x2ac] ss:$16 sps:$4 sm:$0xff]  }
  0xcd   : > { %1958 = vmatpush1.bf16.msra.mxu0 %v2786_v20  ;;  %v2884_v20 = vld [vmem:[%s3491_s9 + $0x4ac] ss:$16 sps:$4 sm:$0xff]  }
  0xce   : > { %2001 = vmatpush1.bf16.msra.mxu1 %v2789_v21  ;;  %1959 = vmatprep.subr.bf16.mxu0 %v2794_v0  ;;  %v2882_v21 = vld [vmem:[%s3491_s9 + $0x4a8] ss:$16 sps:$4 sm:$0xff]   ;;  %v2887_v0 = vld [vmem:[%s3491_s9 + $0x28c] ss:$16 sps:$4 sm:$0xff]  }
  0xcf   : > { %2002 = vmatprep.subr.bf16.mxu1 %v2797_v22  ;;  %v2890_v22 = vld [vmem:[%s3491_s9 + $0x48c] ss:$16 sps:$4 sm:$0xff]  }
  0xd1   : > { %1960 = vmatpush1.bf16.msra.mxu0 %v2792_v23  ;;  %v2885_v23 = vld [vmem:[%s3491_s9 + $0x288] ss:$16 sps:$4 sm:$0xff]  }
  0xd2   : > { %2003 = vmatpush1.bf16.msra.mxu1 %v2795_v24  ;;  %1961 = vmatprep.subr.bf16.mxu0 %v2800_v25  ;;  %v2893_v24 = vld [vmem:[%s3491_s9 + $0x26c] ss:$16 sps:$4 sm:$0xff]  }
  0xd3   : > { %2004 = vmatprep.subr.bf16.mxu1 %v2803_v26  ;;  %v2896_v25 = vld [vmem:[%s3491_s9 + $0x46c] ss:$16 sps:$4 sm:$0xff]   ;;  %v2891_v26 = vld [vmem:[%s3491_s9 + $0x268] ss:$16 sps:$4 sm:$0xff]  }
  0xd5   : > { %1962 = vmatpush1.bf16.msra.mxu0 %v2798_v27  ;;  %v2894_v27 = vld [vmem:[%s3491_s9 + $0x468] ss:$16 sps:$4 sm:$0xff]  }
  0xd6   : > { %2005 = vmatpush1.bf16.msra.mxu1 %v2801_v28  ;;  %1963 = vmatprep.subr.bf16.mxu0 %v2806_v29  ;;  %v2899_v28 = vld [vmem:[%s3491_s9 + $0x24c] ss:$16 sps:$4 sm:$0xff]  }
  0xd7   : > { %2006 = vmatprep.subr.bf16.mxu1 %v2809_v30  ;;  %v2902_v29 = vld [vmem:[%s3491_s9 + $0x44c] ss:$16 sps:$4 sm:$0xff]   ;;  %v2897_v30 = vld [vmem:[%s3491_s9 + $0x248] ss:$16 sps:$4 sm:$0xff]  }
  0xd9   : > { %1964 = vmatpush1.bf16.msra.mxu0 %v2804_v32  ;;  %v2905_v32 = vld [vmem:[%s3491_s9 + $0x22c] ss:$16 sps:$4 sm:$0xff]  }
  0xda   : > { %2007 = vmatpush1.bf16.msra.mxu1 %v2807_v33  ;;  %1965 = vmatprep.subr.bf16.mxu0 %v2812_v34  ;;  %v2908_v33 = vld [vmem:[%s3491_s9 + $0x42c] ss:$16 sps:$4 sm:$0xff]   ;;  %v2903_v34 = vld [vmem:[%s3491_s9 + $0x228] ss:$16 sps:$4 sm:$0xff]  }
  0xdb   : > { %2008 = vmatprep.subr.bf16.mxu1 %v2815_v35  ;;  %v2906_v35 = vld [vmem:[%s3491_s9 + $0x428] ss:$16 sps:$4 sm:$0xff]  }
  0xdd   : > { %1966 = vmatpush1.bf16.msra.mxu0 %v2810_v36  ;;  %v2911_v36 = vld [vmem:[%s3491_s9 + $0x20c] ss:$16 sps:$4 sm:$0xff]  }
  0xde   : > { %2009 = vmatpush1.bf16.msra.mxu1 %v2813_v37  ;;  %1967 = vmatprep.subr.bf16.mxu0 %v2818_v38  ;;  %v2914_v37 = vld [vmem:[%s3491_s9 + $0x40c] ss:$16 sps:$4 sm:$0xff]   ;;  %v2909_v38 = vld [vmem:[%s3491_s9 + $0x208] ss:$16 sps:$4 sm:$0xff]  }
  0xdf   : > { %2010 = vmatprep.subr.bf16.mxu1 %v2821_v39  ;;  %v2912_v39 = vld [vmem:[%s3491_s9 + $0x408] ss:$16 sps:$4 sm:$0xff]  }
  0xe1   : > { %1968 = vmatpush2.bf16.msra.mxu0 %v2816_v40  ;;  %v2917_v40 = vld [vmem:[%s3491_s9 + $0x3ec] ss:$16 sps:$4 sm:$0xff]  }
  0xe2   : > { %2011 = vmatpush2.bf16.msra.mxu1 %v2819_v41  ;;  %1969 = vmatprep.subr.bf16.mxu0 %v2824_v42  ;;  %v2920_v41 = vld [vmem:[%s3491_s9 + $0x5ec] ss:$16 sps:$4 sm:$0xff]   ;;  %v2915_v42 = vld [vmem:[%s3491_s9 + $0x3e8] ss:$16 sps:$4 sm:$0xff]  }
  0xe3   : > { %2012 = vmatprep.subr.bf16.mxu1 %v2827_v43  ;;  %v2918_v43 = vld [vmem:[%s3491_s9 + $0x5e8] ss:$16 sps:$4 sm:$0xff]  }
  0xe5   : > { %1970 = vmatpush2.bf16.msra.mxu0 %v2822_v44  ;;  %v2923_v44 = vld [vmem:[%s3491_s9 + $0x3cc] ss:$16 sps:$4 sm:$0xff]  }
  0xe6   : > { %2013 = vmatpush2.bf16.msra.mxu1 %v2825_v45  ;;  %1971 = vmatprep.subr.bf16.mxu0 %v2830_v46  ;;  %v2926_v45 = vld [vmem:[%s3491_s9 + $0x5cc] ss:$16 sps:$4 sm:$0xff]   ;;  %v2921_v46 = vld [vmem:[%s3491_s9 + $0x3c8] ss:$16 sps:$4 sm:$0xff]  }
  0xe7   : > { %2014 = vmatprep.subr.bf16.mxu1 %v2833_v47  ;;  %v2924_v47 = vld [vmem:[%s3491_s9 + $0x5c8] ss:$16 sps:$4 sm:$0xff]  }
  0xe9   : > { %1972 = vmatpush2.bf16.msra.mxu0 %v2828_v48  ;;  %v2929_v48 = vld [vmem:[%s3491_s9 + $0x3ac] ss:$16 sps:$4 sm:$0xff]  }
  0xea   : > { %2015 = vmatpush2.bf16.msra.mxu1 %v2831_v49  ;;  %1973 = vmatprep.subr.bf16.mxu0 %v2836_v50  ;;  %v2932_v49 = vld [vmem:[%s3491_s9 + $0x5ac] ss:$16 sps:$4 sm:$0xff]   ;;  %v2927_v50 = vld [vmem:[%s3491_s9 + $0x3a8] ss:$16 sps:$4 sm:$0xff]  }
  0xeb   : > { %2016 = vmatprep.subr.bf16.mxu1 %v2839_v51  ;;  %v2930_v51 = vld [vmem:[%s3491_s9 + $0x5a8] ss:$16 sps:$4 sm:$0xff]  }
  0xed   : > { %1974 = vmatpush2.bf16.msra.mxu0 %v2834_v52  ;;  %v2935_v52 = vld [vmem:[%s3491_s9 + $0x38c] ss:$16 sps:$4 sm:$0xff]  }
  0xee   : > { %2017 = vmatpush2.bf16.msra.mxu1 %v2837_v53  ;;  %1975 = vmatprep.subr.bf16.mxu0 %v2842_v54  ;;  %v2938_v53 = vld [vmem:[%s3491_s9 + $0x58c] ss:$16 sps:$4 sm:$0xff]   ;;  %v2933_v54 = vld [vmem:[%s3491_s9 + $0x388] ss:$16 sps:$4 sm:$0xff]  }
  0xef   : > { %2018 = vmatprep.subr.bf16.mxu1 %v2845_v55  ;;  %v2936_v55 = vld [vmem:[%s3491_s9 + $0x588] ss:$16 sps:$4 sm:$0xff]  }
  0xf1   : > { %1976 = vmatpush2.bf16.msra.mxu0 %v2840_v56  ;;  %v2941_v56 = vld [vmem:[%s3491_s9 + $0x36c] ss:$16 sps:$4 sm:$0xff]  }
  0xf2   : > { %2019 = vmatpush2.bf16.msra.mxu1 %v2843_v57  ;;  %1977 = vmatprep.subr.bf16.mxu0 %v2848_v58  ;;  %v2944_v57 = vld [vmem:[%s3491_s9 + $0x56c] ss:$16 sps:$4 sm:$0xff]   ;;  %v2939_v58 = vld [vmem:[%s3491_s9 + $0x368] ss:$16 sps:$4 sm:$0xff]  }
  0xf3   : > { %2020 = vmatprep.subr.bf16.mxu1 %v2851_v59  ;;  %v2942_v59 = vld [vmem:[%s3491_s9 + $0x568] ss:$16 sps:$4 sm:$0xff]  }
  0xf5   : > { %1978 = vmatpush2.bf16.msra.mxu0 %v2846_v60  ;;  %v2947_v60 = vld [vmem:[%s3491_s9 + $0x34c] ss:$16 sps:$4 sm:$0xff]  }
  0xf6   : > { %2021 = vmatpush2.bf16.msra.mxu1 %v2849_v61  ;;  %1979 = vmatprep.subr.bf16.mxu0 %v2854_v62  ;;  %v2950_v61 = vld [vmem:[%s3491_s9 + $0x54c] ss:$16 sps:$4 sm:$0xff]   ;;  %v2945_v62 = vld [vmem:[%s3491_s9 + $0x348] ss:$16 sps:$4 sm:$0xff]  }
  0xf7   : > { %2022 = vmatprep.subr.bf16.mxu1 %v2857_v63  ;;  %v2948_v63 = vld [vmem:[%s3491_s9 + $0x548] ss:$16 sps:$4 sm:$0xff]  }
  0xf9   : > { %1980 = vmatpush2.bf16.msra.mxu0 %v2852_v2  ;;  %v2953_v2 = vld [vmem:[%s3491_s9 + $0x32c] ss:$16 sps:$4 sm:$0xff]  }
  0xfa   : > { %2023 = vmatpush2.bf16.msra.mxu1 %v2855_v3  ;;  %1981 = vmatprep.subr.bf16.mxu0 %v2860_v4  ;;  %v2956_v3 = vld [vmem:[%s3491_s9 + $0x52c] ss:$16 sps:$4 sm:$0xff]   ;;  %v2951_v4 = vld [vmem:[%s3491_s9 + $0x328] ss:$16 sps:$4 sm:$0xff]  }
  0xfb   : > { %2024 = vmatprep.subr.bf16.mxu1 %v2863_v5  ;;  %v2954_v5 = vld [vmem:[%s3491_s9 + $0x528] ss:$16 sps:$4 sm:$0xff]  }
  0xfd   : > { %1982 = vmatpush2.bf16.msra.mxu0 %v2858_v8  ;;  %v2959_v8 = vld [vmem:[%s3491_s9 + $0x30c] ss:$16 sps:$4 sm:$0xff]  }
  0xfe   : > { %2025 = vmatpush2.bf16.msra.mxu1 %v2861_v9  ;;  %2037 = vmatprep.subr.bf16.mxu0 %v2869_v10  ;;  %v2962_v9 = vld [vmem:[%s3491_s9 + $0x50c] ss:$16 sps:$4 sm:$0xff]   ;;  %v2957_v10 = vld [vmem:[%s3491_s9 + $0x308] ss:$16 sps:$4 sm:$0xff]  }
  0xff   : > { %2080 = vmatprep.subr.bf16.mxu1 %v2872_v11  ;;  %v2960_v11 = vld [vmem:[%s3491_s9 + $0x508] ss:$16 sps:$4 sm:$0xff]  }
 0x100   : > { %1984 = vmatmul.mubr.bf16.vlgmr.msra.gmra.mxu0 %v3646_v12 }
 0x101   : > { %2027 = vmatmul.mubr.bf16.vlgmr.msra.gmra.mxu1 %v3563_v6  ;;  %2038 = vmatpush1.bf16.msra.mxu0 %v2867_v13  ;;  %v2879_v6 = vld [vmem:[%s3491_s9 + $0x2a8] ss:$16 sps:$4 sm:$0xff]  }
 0x102   : > { %2081 = vmatpush1.bf16.msra.mxu1 %v2870_v14  ;;  %2039 = vmatprep.subr.bf16.mxu0 %v2875_v15  ;;  %v2152_v14 = vlaneseq }
 0x103   : > { %2082 = vmatprep.subr.bf16.mxu1 %v2878_v16  ;;  %2069 = vmatprep.mubr.bf16.mxu0 %v3488_v1  ;;  %v2888_v1 = vld [vmem:[%s3491_s9 + $0x488] ss:$16 sps:$4 sm:$0xff]  }
 0x104   : > { %2112 = vmatprep.mubr.bf16.mxu1 %v3600_v31  ;;  %v2900_v31 = vld [vmem:[%s3491_s9 + $0x448] ss:$16 sps:$4 sm:$0xff]  }
 0x105   : > { %2040 = vmatpush1.bf16.msra.mxu0 %v2873_v17  ;;  %v3717_v17 = vshrl.u32 %v2152_v14, 7 }
 0x106   : > { %2083 = vmatpush1.bf16.msra.mxu1 %v2876_v18  ;;  %2041 = vmatprep.subr.bf16.mxu0 %v2881_v19 }
 0x107   : > { %2084 = vmatprep.subr.bf16.mxu1 %v2884_v20  ;;  %v2154_v20 = vsub.s32 0, %v3717_v17 }
 0x109   : > { %2042 = vmatpush1.bf16.msra.mxu0 %v2879_v6  ;;  %v3723_v6 = vld [vmem:[%s653_s29] sm:$0xf] }
 0x10a   : > { %2085 = vmatpush1.bf16.msra.mxu1 %v2882_v21  ;;  %2043 = vmatprep.subr.bf16.mxu0 %v2887_v0  ;;  %v2158_v0 = vsub.s32 1, %v3717_v17 }
 0x10b   : > { %2086 = vmatprep.subr.bf16.mxu1 %v2890_v22 }
 0x10d   : > { %2044 = vmatpush1.bf16.msra.mxu0 %v2885_v23 }
 0x10e   : > { %2087 = vmatpush1.bf16.msra.mxu1 %v2888_v1  ;;  %2045 = vmatprep.subr.bf16.mxu0 %v2893_v24  ;;  %v2155_v24 = vrot.slane %v3723_v6, %v2154_v20 }
 0x10f   : > { %2088 = vmatprep.subr.bf16.mxu1 %v2896_v25 }
 0x111   : > { %2046 = vmatpush1.bf16.msra.mxu0 %v2891_v26 }
 0x112   : > { %2089 = vmatpush1.bf16.msra.mxu1 %v2894_v27  ;;  %2047 = vmatprep.subr.bf16.mxu0 %v2899_v28 }
 0x113   : > { %2090 = vmatprep.subr.bf16.mxu1 %v2902_v29  ;;  %v2159_v29 = vrot.slane %v3723_v6, %v2158_v0 }
 0x115   : > { %2048 = vmatpush1.bf16.msra.mxu0 %v2897_v30 }
 0x116   : > { %2091 = vmatpush1.bf16.msra.mxu1 %v2900_v31  ;;  %2049 = vmatprep.subr.bf16.mxu0 %v2905_v32 }
 0x117   : > { %2092 = vmatprep.subr.bf16.mxu1 %v2908_v33 }
 0x119   : > { %2050 = vmatpush1.bf16.msra.mxu0 %v2903_v34 }
 0x11a   : > { %2093 = vmatpush1.bf16.msra.mxu1 %v2906_v35  ;;  %2051 = vmatprep.subr.bf16.mxu0 %v2911_v36 }
 0x11b   : > { %2094 = vmatprep.subr.bf16.mxu1 %v2914_v37 }
 0x11d   : > { %2052 = vmatpush1.bf16.msra.mxu0 %v2909_v38 }
 0x11e   : > { %2095 = vmatpush1.bf16.msra.mxu1 %v2912_v39  ;;  %2053 = vmatprep.subr.bf16.mxu0 %v2917_v40 }
 0x11f   : > { %2096 = vmatprep.subr.bf16.mxu1 %v2920_v41 }
 0x121   : > { %2054 = vmatpush2.bf16.msra.mxu0 %v2915_v42 }
 0x122   : > { %2097 = vmatpush2.bf16.msra.mxu1 %v2918_v43  ;;  %2055 = vmatprep.subr.bf16.mxu0 %v2923_v44 }
 0x123   : > { %2098 = vmatprep.subr.bf16.mxu1 %v2926_v45 }
 0x125   : > { %2056 = vmatpush2.bf16.msra.mxu0 %v2921_v46 }
 0x126   : > { %2099 = vmatpush2.bf16.msra.mxu1 %v2924_v47  ;;  %2057 = vmatprep.subr.bf16.mxu0 %v2929_v48 }
 0x127   : > { %2100 = vmatprep.subr.bf16.mxu1 %v2932_v49 }
 0x129   : > { %2058 = vmatpush2.bf16.msra.mxu0 %v2927_v50 }
 0x12a   : > { %2101 = vmatpush2.bf16.msra.mxu1 %v2930_v51  ;;  %2059 = vmatprep.subr.bf16.mxu0 %v2935_v52 }
 0x12b   : > { %2102 = vmatprep.subr.bf16.mxu1 %v2938_v53 }
 0x12d   : > { %2060 = vmatpush2.bf16.msra.mxu0 %v2933_v54 }
 0x12e   : > { %2103 = vmatpush2.bf16.msra.mxu1 %v2936_v55  ;;  %2061 = vmatprep.subr.bf16.mxu0 %v2941_v56 }
 0x12f   : > { %2104 = vmatprep.subr.bf16.mxu1 %v2944_v57 }
 0x131   : > { %2062 = vmatpush2.bf16.msra.mxu0 %v2939_v58 }
 0x132   : > { %2105 = vmatpush2.bf16.msra.mxu1 %v2942_v59  ;;  %2063 = vmatprep.subr.bf16.mxu0 %v2947_v60 }
 0x133   : > { %2106 = vmatprep.subr.bf16.mxu1 %v2950_v61 }
 0x135   : > { %2064 = vmatpush2.bf16.msra.mxu0 %v2945_v62 }
 0x136   : > { %2107 = vmatpush2.bf16.msra.mxu1 %v2948_v63  ;;  %2065 = vmatprep.subr.bf16.mxu0 %v2953_v2 }
 0x137   : > { %2108 = vmatprep.subr.bf16.mxu1 %v2956_v3 }
 0x139   : > { %2066 = vmatpush2.bf16.msra.mxu0 %v2951_v4 }
 0x13a   : > { %2109 = vmatpush2.bf16.msra.mxu1 %v2954_v5  ;;  %2067 = vmatprep.subr.bf16.mxu0 %v2959_v8 }
 0x13b   : > { %2110 = vmatprep.subr.bf16.mxu1 %v2962_v9 }
 0x13d   : > { %2068 = vmatpush2.bf16.msra.mxu0 %v2957_v10 }
 0x13e   : > { %2111 = vmatpush2.bf16.msra.mxu1 %v2960_v11 }
 0x140   : > { %2070 = vmatmul.mubr.bf16.vlgmr.msra.gmra.mxu0 %v3568_v7 }
 0x141   : > { %2113 = vmatmul.mubr.bf16.vlgmr.msra.gmra.mxu1 %v3646_v12 }
 0x180   : > { %v1899_v13 = vpop.f32.mrf.mxu0 }
 0x181   : > { %v1942_v16 = vpop.f32.mrf.mxu1 }
 0x182   : > { %v1901_v15 = vpop.f32.mrf.mxu0  ;;  %v1943_v12 = vadd.f32 %v1942_v16, %v1899_v13 }
 0x183   : > { %v1944_v19 = vpop.f32.mrf.mxu1 }
 0x184   : > { %v1903_v18 = vpop.f32.mrf.mxu0  ;;  %v1945_v23 = vadd.f32 %v1944_v19, %v1901_v15 }
 0x185   : > { %v1946_v21 = vpop.f32.mrf.mxu1 }
 0x186   : > { %v1905_v7 = vpop.f32.mrf.mxu0  ;;  %v1947_v26 = vadd.f32 %v1946_v21, %v1903_v18 }
 0x187   : > { %v1948_v27 = vpop.f32.mrf.mxu1 }
 0x188   : > { %v1949_v33 = vadd.f32 %v1948_v27, %v1905_v7  ;;  %v2162_v7 = vsub.s32 2, %v3717_v17 }
 0x1c0   : > { %v1985_v22 = vpop.f32.mrf.mxu0 }
 0x1c1   : > { %v1986_v1 = vadd.f32 %v1985_v22, %v1943_v12  ;;  %v2028_v16 = vpop.f32.mrf.mxu1  ;;  %v2166_v22 = vsub.s32 3, %v3717_v17 }
 0x1c2   : > { %v1987_v25 = vpop.f32.mrf.mxu0 }
 0x1c3   : > { %v1988_v28 = vadd.f32 %v1987_v25, %v1945_v23  ;;  %v2172_v31 = vadd.f32 %v2155_v24, %v1986_v1  ;;  %v2030_v18 = vpop.f32.mrf.mxu1  ;;  %v2163_v25 = vrot.slane %v3723_v6, %v2162_v7 }
 0x1c4   : > { %v1989_v30 = vpop.f32.mrf.mxu0 }
 0x1c5   : > { %v1990_v32 = vadd.f32 %v1989_v30, %v1947_v26  ;;  %v2188_v35 = vmul.f32 0.044715, %v2172_v31  ;;  %v2173_v36 = vadd.f32 %v2159_v29, %v1988_v28  ;;  %v2180_v60 = vmul.f32 0.5, %v2172_v31  ;;  %v2032_v19 = vpop.f32.mrf.mxu1 }
 0x1c6   : > { %v1991_v34 = vpop.f32.mrf.mxu0 }
 0x1c7   : > { %v1992_v37 = vadd.f32 %v1991_v34, %v1949_v33  ;;  %v2196_v38 = vmul.f32 %v2188_v35, %v2172_v31  ;;  %v2189_v39 = vmul.f32 0.044715, %v2173_v36  ;;  %v2176_v40 = vadd.f32 %v2155_v24, %v1990_v32  ;;  %v2034_v20 = vpop.f32.mrf.mxu1 }
 0x1c8   : > { %v2181_v2 = vmul.f32 0.5, %v2173_v36 }
 0x1c9   : > { %v2204_v41 = vmul.f32 %v2196_v38, %v2172_v31  ;;  %v2197_v42 = vmul.f32 %v2189_v39, %v2173_v36  ;;  %v2192_v43 = vmul.f32 0.044715, %v2176_v40  ;;  %v2177_v44 = vadd.f32 %v2159_v29, %v1992_v37 }
 0x1ca   : > { %v2184_v8 = vmul.f32 0.5, %v2176_v40  ;;  %v2167_v29 = vrot.slane %v3723_v6, %v2166_v22 }
 0x1cb   : > { %v2212_v45 = vadd.f32 %v2204_v41, %v2172_v31  ;;  %v2205_v46 = vmul.f32 %v2197_v42, %v2173_v36  ;;  %v2200_v47 = vmul.f32 %v2192_v43, %v2176_v40  ;;  %v2193_v48 = vmul.f32 0.044715, %v2177_v44 }
 0x1cc   : > { %v2185_v13 = vmul.f32 0.5, %v2177_v44 }
 0x1cd   : > { %v2220_v49 = vmul.f32 0.7978846, %v2212_v45  ;;  %v2213_v50 = vadd.f32 %v2205_v46, %v2173_v36  ;;  %v2208_v51 = vmul.f32 %v2200_v47, %v2176_v40  ;;  %v2201_v52 = vmul.f32 %v2193_v48, %v2177_v44 }
 0x1cf   : > { %2963 = vtanh.f32 %v2220_v49  ;;  %v2221_v53 = vmul.f32 0.7978846, %v2213_v50  ;;  %v2216_v54 = vadd.f32 %v2208_v51, %v2176_v40  ;;  %v2209_v55 = vmul.f32 %v2201_v52, %v2177_v44 }
 0x1d1   : > { %2965 = vtanh.f32 %v2221_v53  ;;  %v2224_v56 = vmul.f32 0.7978846, %v2216_v54  ;;  %v2217_v57 = vadd.f32 %v2209_v55, %v2177_v44 }
 0x1d3   : > { %2967 = vtanh.f32 %v2224_v56  ;;  %v2225_v58 = vmul.f32 0.7978846, %v2217_v57 }
 0x1d5   : > { %2969 = vtanh.f32 %v2225_v58 }
 0x1dc   : > { %v2964_v59 = vpop.eup %2963 }
 0x1dd   : > { %v2236_v61 = vadd.f32 1.0, %v2964_v59 }
 0x1de   : > { %v2966_v62 = vpop.eup %2965 }
 0x1df   : > { %v2244_v63 = vmul.f32 %v2236_v61, %v2180_v60  ;;  %v2237_v3 = vadd.f32 1.0, %v2966_v62 }
 0x1e0   : > { %v2968_v4 = vpop.eup %2967 }
 0x1e1   : > { %2252 = vst [vmem:[%s3730_s5] sm:$0xff] %v2244_v63  ;;  %v2245_v5 = vmul.f32 %v2237_v3, %v2181_v2  ;;  %v2240_v9 = vadd.f32 1.0, %v2968_v4 }
 0x1e2   : > { %v2970_v10 = vpop.eup %2969 }
 0x1e3   : > { %2253 = vst [vmem:[%s3730_s5 + $0x8] sm:$0xff] %v2245_v5  ;;  %v2248_v11 = vmul.f32 %v2240_v9, %v2184_v8  ;;  %v2241_v14 = vadd.f32 1.0, %v2970_v10 }
 0x1e5   : > { %2256 = vst [vmem:[%s3730_s5 + $0x20] sm:$0xff] %v2248_v11  ;;  %v2249_v15 = vmul.f32 %v2241_v14, %v2185_v13 }
 0x1e7   : > { %2257 = vst [vmem:[%s3730_s5 + $0x28] sm:$0xff] %v2249_v15 }
 0x1ec   : > { %v2293_v7 = vld [vmem:[%s3730_s5 + $0x20] sm:$0xff] (%p3074_p6) }
 0x1ed   : > { %2294 = vst [vmem:[%s2272_s7 + $0xc0] sm:$0xff] (%p3074_p6), %v2293_v7 }
 0x200   : > { %v2071_v12 = vpop.f32.mrf.mxu0 }
 0x201   : > { %v2114_v21 = vpop.f32.mrf.mxu1  ;;  %v2072_v0 = vadd.f32 %v2071_v12, %v2028_v16  ;;  %v2285_v16 = vld [vmem:[%s3730_s5] sm:$0xff] (%p3074_p6)  ;;  %v2295_v12 = vld [vmem:[%s3730_s5 + $0x28] sm:$0xff] (%p3074_p6) }
 0x202   : > { %v2073_v23 = vpop.f32.mrf.mxu0  ;;  %2286 = vst [vmem:[%s2272_s7] sm:$0xff] (%p3074_p6), %v2285_v16  ;;  %2296 = vst [vmem:[%s2272_s7 + $0xc8] sm:$0xff] (%p3074_p6), %v2295_v12 }
 0x203   : > { %v2116_v1 = vpop.f32.mrf.mxu1  ;;  %v2115_v24 = vadd.f32 %v2114_v21, %v2072_v0  ;;  %v2074_v26 = vadd.f32 %v2073_v23, %v2030_v18  ;;  %v2287_v18 = vld [vmem:[%s3730_s5 + $0x8] sm:$0xff] (%p3074_p6) }
 0x204   : > { %v2075_v27 = vpop.f32.mrf.mxu0  ;;  %2288 = vst [vmem:[%s2272_s7 + $0x8] sm:$0xff] (%p3074_p6), %v2287_v18 }
 0x205   : > { %v2117_v28 = vadd.f32 %v2116_v1, %v2074_v26  ;;  %v2076_v30 = vadd.f32 %v2075_v27, %v2032_v19  ;;  %v2118_v31 = vpop.f32.mrf.mxu1  ;;  %v2174_v33 = vadd.f32 %v2163_v25, %v2115_v24 }
 0x206   : > { %v2077_v32 = vpop.f32.mrf.mxu0 }
 0x207   : > { %v2119_v34 = vadd.f32 %v2118_v31, %v2076_v30  ;;  %v2078_v35 = vadd.f32 %v2077_v32, %v2034_v20  ;;  %v2190_v36 = vmul.f32 0.044715, %v2174_v33  ;;  %v2175_v37 = vadd.f32 %v2167_v29, %v2117_v28  ;;  %v2120_v38 = vpop.f32.mrf.mxu1 }
 0x208   : > { %v2182_v60 = vmul.f32 0.5, %v2174_v33 }
 0x209   : > { %v2121_v17 = vadd.f32 %v2120_v38, %v2078_v35  ;;  %v2198_v39 = vmul.f32 %v2190_v36, %v2174_v33  ;;  %v2191_v40 = vmul.f32 0.044715, %v2175_v37  ;;  %v2178_v41 = vadd.f32 %v2163_v25, %v2119_v34 }
 0x20a   : > { %v2183_v2 = vmul.f32 0.5, %v2175_v37 }
 0x20b   : > { %v2206_v42 = vmul.f32 %v2198_v39, %v2174_v33  ;;  %v2199_v43 = vmul.f32 %v2191_v40, %v2175_v37  ;;  %v2194_v44 = vmul.f32 0.044715, %v2178_v41  ;;  %v2179_v45 = vadd.f32 %v2167_v29, %v2121_v17 }
 0x20c   : > { %v2186_v8 = vmul.f32 0.5, %v2178_v41 }
 0x20d   : > { %v2214_v46 = vadd.f32 %v2206_v42, %v2174_v33  ;;  %v2207_v47 = vmul.f32 %v2199_v43, %v2175_v37  ;;  %v2202_v6 = vmul.f32 %v2194_v44, %v2178_v41  ;;  %v2195_v48 = vmul.f32 0.044715, %v2179_v45 }
 0x20e   : > { %v2187_v13 = vmul.f32 0.5, %v2179_v45 }
 0x20f   : > { %v2222_v49 = vmul.f32 0.7978846, %v2214_v46  ;;  %v2215_v50 = vadd.f32 %v2207_v47, %v2175_v37  ;;  %v2210_v51 = vmul.f32 %v2202_v6, %v2178_v41  ;;  %v2203_v52 = vmul.f32 %v2195_v48, %v2179_v45 }
 0x211   : > { %2971 = vtanh.f32 %v2222_v49  ;;  %v2223_v53 = vmul.f32 0.7978846, %v2215_v50  ;;  %v2218_v54 = vadd.f32 %v2210_v51, %v2178_v41  ;;  %v2211_v55 = vmul.f32 %v2203_v52, %v2179_v45 }
 0x213   : > { %2973 = vtanh.f32 %v2223_v53  ;;  %v2226_v56 = vmul.f32 0.7978846, %v2218_v54  ;;  %v2219_v57 = vadd.f32 %v2211_v55, %v2179_v45 }
 0x215   : > { %2975 = vtanh.f32 %v2226_v56  ;;  %v2227_v58 = vmul.f32 0.7978846, %v2219_v57 }
 0x217   : > { %2977 = vtanh.f32 %v2227_v58 }
 0x21e   : > { %v2972_v59 = vpop.eup %2971 }
 0x21f   : > { %v2238_v61 = vadd.f32 1.0, %v2972_v59 }
 0x220   : > { %v2974_v62 = vpop.eup %2973 }
 0x221   : > { %v2246_v63 = vmul.f32 %v2238_v61, %v2182_v60  ;;  %v2239_v3 = vadd.f32 1.0, %v2974_v62 }
 0x222   : > { %v2976_v4 = vpop.eup %2975 }
 0x223   : > { %2254 = vst [vmem:[%s3730_s5 + $0x10] sm:$0xff] %v2246_v63  ;;  %v2247_v5 = vmul.f32 %v2239_v3, %v2183_v2  ;;  %v2242_v9 = vadd.f32 1.0, %v2976_v4 }
 0x224   : > { %v2978_v10 = vpop.eup %2977 }
 0x225   : > { %2255 = vst [vmem:[%s3730_s5 + $0x18] sm:$0xff] %v2247_v5  ;;  %v2250_v11 = vmul.f32 %v2242_v9, %v2186_v8  ;;  %v2243_v14 = vadd.f32 1.0, %v2978_v10  ;;  %2266 = sbr.rel (!%p3074_p6) target bundleno = 562 (0x232), region = 67 }
 0x227   : > { %2258 = vst [vmem:[%s3730_s5 + $0x30] sm:$0xff] %v2250_v11  ;;  %v2251_v15 = vmul.f32 %v2243_v14, %v2187_v13 }
 0x229   : > { %2259 = vst [vmem:[%s3730_s5 + $0x38] sm:$0xff] %v2251_v15 }
 0x22a   : > { %v2289_v19 = vld [vmem:[%s3730_s5 + $0x10] sm:$0xff] }
 0x22b   : > { %2290 = vst [vmem:[%s2272_s7 + $0x10] sm:$0xff] %v2289_v19 }
 0x22c   : > { %v2291_v20 = vld [vmem:[%s3730_s5 + $0x18] sm:$0xff] }
 0x22d   : > { %2292 = vst [vmem:[%s2272_s7 + $0x18] sm:$0xff] %v2291_v20 }
 0x22e   : > { %v2297_v21 = vld [vmem:[%s3730_s5 + $0x30] sm:$0xff] }
 0x22f   : > { %2298 = vst [vmem:[%s2272_s7 + $0xd0] sm:$0xff] %v2297_v21 }
 0x230   : > { %v2299_v0 = vld [vmem:[%s3730_s5 + $0x38] sm:$0xff] }
 0x231   : > { %2300 = vst [vmem:[%s2272_s7 + $0xd8] sm:$0xff] %v2299_v0 }
 0x232 PF: > { %s13_s16 = sadd.s32 1, %s3017_s16   ;;  %s3778_s12 = smov %s3005_s13 }
 0x233   : > { %p10_p12 = scmp.ge.s32.totalorder %s13_s16, 8   ;;  %s3779_s13 = smov %s3079_s22 }
 0x234   : > { %s3780_s14 = smov %s3013_s15  ;;  %s3781_s15 = smov %s3783_s17 }
 0x235   :  { %12 = sbr.rel (!%p10_p12) target bundleno = 3 (0x3), region = 127 }

// kernel: bert_forward.16
= control target key start
LH: loop header
LB: loop body
LE: loop exit
PB: predicated region body
PF: predicated region fallthrough
CT: control target
= control target key end

     0   :  { %s4326_s1 = inlined_call_operand.vmem [shape: bf16[768,768], index: 1, kind: input, shape index: {}]   ;;  %s4327_s0 = inlined_call_operand.vmem [shape: bf16[16,768], index: 0, kind: input, shape index: {}]   ;;  %s4328_s2 = inlined_call_operand.vmem [shape: f32[1,768], index: 2, kind: input, shape index: {}]   ;;  %s4329_s3 = inlined_call_operand.vmem [shape: f32[16,768], index: 3, kind: input, shape index: {}]   ;;  %s4330_s4 = inlined_call_operand.vmem [shape: f32[1,768], index: 4, kind: input, shape index: {}]   ;;  %s4331_s5 = inlined_call_operand.vmem [shape: f32[1,768], index: 5, kind: input, shape index: {}]   ;;  %s4332_s6 = inlined_call_operand.vmem [shape: f32[16,768], index: 6, kind: output, shape index: {}]  }
   0x1   :  { %v2781_v0 = vld [vmem:[%s4326_s1 + $0x154] ss:$24 sps:$4 sm:$0xff]   ;;  %v2785_v2 = vld [vmem:[%s4326_s1 + $0x150] ss:$24 sps:$4 sm:$0xff]   ;;  %v2787_v4 = vld [vmem:[%s4326_s1 + $0x124] ss:$24 sps:$4 sm:$0xff]  }
   0x2   :  { %v2783_v1 = vld [vmem:[%s4326_s1 + $0x454] ss:$24 sps:$4 sm:$0xff]   ;;  %1815 = vmatprep.subr.bf16.mxu0 %v2781_v0  ;;  %v2786_v3 = vld [vmem:[%s4326_s1 + $0x450] ss:$24 sps:$4 sm:$0xff]   ;;  %v2789_v5 = vld [vmem:[%s4326_s1 + $0x424] ss:$24 sps:$4 sm:$0xff]  }
   0x3   :  { %1858 = vmatprep.subr.bf16.mxu1 %v2783_v1  ;;  %1816 = vmatpush1.bf16.msra.mxu0 %v2785_v2  ;;  %v2791_v6 = vld [vmem:[%s4326_s1 + $0x120] ss:$24 sps:$4 sm:$0xff]   ;;  %v2793_v8 = vld [vmem:[%s4326_s1 + $0xf4] ss:$24 sps:$4 sm:$0xff]   ;;  %v2797_v10 = vld [vmem:[%s4326_s1 + $0xf0] ss:$24 sps:$4 sm:$0xff]  }
   0x4   :  { %1859 = vmatpush1.bf16.msra.mxu1 %v2786_v3  ;;  %1817 = vmatprep.subr.bf16.mxu0 %v2787_v4  ;;  %v2792_v7 = vld [vmem:[%s4326_s1 + $0x420] ss:$24 sps:$4 sm:$0xff]   ;;  %v2795_v9 = vld [vmem:[%s4326_s1 + $0x3f4] ss:$24 sps:$4 sm:$0xff]   ;;  %v2798_v11 = vld [vmem:[%s4326_s1 + $0x3f0] ss:$24 sps:$4 sm:$0xff]  }
   0x5   :  { %1860 = vmatprep.subr.bf16.mxu1 %v2789_v5  ;;  %v2799_v12 = vld [vmem:[%s4326_s1 + $0xc4] ss:$24 sps:$4 sm:$0xff]   ;;  %v2803_v14 = vld [vmem:[%s4326_s1 + $0xc0] ss:$24 sps:$4 sm:$0xff]   ;;  %v2805_v16 = vld [vmem:[%s4326_s1 + $0x94] ss:$24 sps:$4 sm:$0xff]  }
   0x6   :  { %v2801_v13 = vld [vmem:[%s4326_s1 + $0x3c4] ss:$24 sps:$4 sm:$0xff]   ;;  %v2804_v15 = vld [vmem:[%s4326_s1 + $0x3c0] ss:$24 sps:$4 sm:$0xff]   ;;  %v2807_v17 = vld [vmem:[%s4326_s1 + $0x394] ss:$24 sps:$4 sm:$0xff]  }
   0x7   :  { %1818 = vmatpush1.bf16.msra.mxu0 %v2791_v6  ;;  %v2809_v18 = vld [vmem:[%s4326_s1 + $0x90] ss:$24 sps:$4 sm:$0xff]   ;;  %v2811_v20 = vld [vmem:[%s4326_s1 + $0x64] ss:$24 sps:$4 sm:$0xff]   ;;  %v2815_v22 = vld [vmem:[%s4326_s1 + $0x60] ss:$24 sps:$4 sm:$0xff]  }
   0x8   :  { %1861 = vmatpush1.bf16.msra.mxu1 %v2792_v7  ;;  %1819 = vmatprep.subr.bf16.mxu0 %v2793_v8  ;;  %v2810_v19 = vld [vmem:[%s4326_s1 + $0x390] ss:$24 sps:$4 sm:$0xff]   ;;  %v2813_v21 = vld [vmem:[%s4326_s1 + $0x364] ss:$24 sps:$4 sm:$0xff]   ;;  %v2816_v23 = vld [vmem:[%s4326_s1 + $0x360] ss:$24 sps:$4 sm:$0xff]  }
   0x9   :  { %1862 = vmatprep.subr.bf16.mxu1 %v2795_v9  ;;  %v2817_v24 = vld [vmem:[%s4326_s1 + $0x34] ss:$24 sps:$4 sm:$0xff]   ;;  %v2821_v26 = vld [vmem:[%s4326_s1 + $0x30] ss:$24 sps:$4 sm:$0xff]   ;;  %v2823_v28 = vld [vmem:[%s4326_s1 + $0x4] ss:$24 sps:$4 sm:$0xff]  }
   0xa   :  { %v2819_v25 = vld [vmem:[%s4326_s1 + $0x334] ss:$24 sps:$4 sm:$0xff]   ;;  %v2822_v27 = vld [vmem:[%s4326_s1 + $0x330] ss:$24 sps:$4 sm:$0xff]   ;;  %v2825_v29 = vld [vmem:[%s4326_s1 + $0x304] ss:$24 sps:$4 sm:$0xff]  }
   0xb   :  { %1820 = vmatpush1.bf16.msra.mxu0 %v2797_v10  ;;  %v2827_v30 = vld [vmem:[%s4326_s1] ss:$24 sps:$4 sm:$0xff]   ;;  %v2829_v32 = vld [vmem:[%s4326_s1 + $0x2d4] ss:$24 sps:$4 sm:$0xff]   ;;  %v2833_v34 = vld [vmem:[%s4326_s1 + $0x2d0] ss:$24 sps:$4 sm:$0xff]  }
   0xc   :  { %1863 = vmatpush1.bf16.msra.mxu1 %v2798_v11  ;;  %1821 = vmatprep.subr.bf16.mxu0 %v2799_v12  ;;  %v2828_v31 = vld [vmem:[%s4326_s1 + $0x300] ss:$24 sps:$4 sm:$0xff]   ;;  %v2831_v33 = vld [vmem:[%s4326_s1 + $0x5d4] ss:$24 sps:$4 sm:$0xff]   ;;  %v2834_v35 = vld [vmem:[%s4326_s1 + $0x5d0] ss:$24 sps:$4 sm:$0xff]  }
   0xd   :  { %1864 = vmatprep.subr.bf16.mxu1 %v2801_v13  ;;  %v2835_v36 = vld [vmem:[%s4326_s1 + $0x2a4] ss:$24 sps:$4 sm:$0xff]   ;;  %v2839_v38 = vld [vmem:[%s4326_s1 + $0x2a0] ss:$24 sps:$4 sm:$0xff]   ;;  %v2841_v40 = vld [vmem:[%s4326_s1 + $0x274] ss:$24 sps:$4 sm:$0xff]  }
   0xe   :  { %v2837_v37 = vld [vmem:[%s4326_s1 + $0x5a4] ss:$24 sps:$4 sm:$0xff]   ;;  %v2840_v39 = vld [vmem:[%s4326_s1 + $0x5a0] ss:$24 sps:$4 sm:$0xff]   ;;  %v2843_v41 = vld [vmem:[%s4326_s1 + $0x574] ss:$24 sps:$4 sm:$0xff]  }
   0xf   :  { %1822 = vmatpush1.bf16.msra.mxu0 %v2803_v14  ;;  %v2845_v42 = vld [vmem:[%s4326_s1 + $0x270] ss:$24 sps:$4 sm:$0xff]   ;;  %v2847_v44 = vld [vmem:[%s4326_s1 + $0x244] ss:$24 sps:$4 sm:$0xff]   ;;  %v2851_v46 = vld [vmem:[%s4326_s1 + $0x240] ss:$24 sps:$4 sm:$0xff]  }
  0x10   :  { %1865 = vmatpush1.bf16.msra.mxu1 %v2804_v15  ;;  %1823 = vmatprep.subr.bf16.mxu0 %v2805_v16  ;;  %v2846_v43 = vld [vmem:[%s4326_s1 + $0x570] ss:$24 sps:$4 sm:$0xff]   ;;  %v2849_v45 = vld [vmem:[%s4326_s1 + $0x544] ss:$24 sps:$4 sm:$0xff]   ;;  %v2852_v47 = vld [vmem:[%s4326_s1 + $0x540] ss:$24 sps:$4 sm:$0xff]  }
  0x11   :  { %1866 = vmatprep.subr.bf16.mxu1 %v2807_v17  ;;  %v2877_v48 = vld [vmem:[%s4327_s0 + $0x4] ss:$24 sps:$4 sm:$0xff]   ;;  %v2853_v49 = vld [vmem:[%s4326_s1 + $0x214] ss:$24 sps:$4 sm:$0xff]   ;;  %v2857_v52 = vld [vmem:[%s4326_s1 + $0x210] ss:$24 sps:$4 sm:$0xff]  }
  0x12   :  { %v3418_v50 = vld [vmem:[%s4327_s0 + $0xc] ss:$24 sps:$4 sm:$0xff]   ;;  %1847 = vmatprep.mubr.bf16.mxu0 %v2877_v48  ;;  %v2858_v53 = vld [vmem:[%s4326_s1 + $0x510] ss:$24 sps:$4 sm:$0xff]   ;;  %v2863_v56 = vld [vmem:[%s4326_s1 + $0x1e0] ss:$24 sps:$4 sm:$0xff]  }
  0x13   :  { %1824 = vmatpush1.bf16.msra.mxu0 %v2809_v18  ;;  %v2855_v51 = vld [vmem:[%s4326_s1 + $0x514] ss:$24 sps:$4 sm:$0xff]   ;;  %1890 = vmatprep.mubr.bf16.mxu1 %v3418_v50  ;;  %v2859_v54 = vld [vmem:[%s4326_s1 + $0x1e4] ss:$24 sps:$4 sm:$0xff]   ;;  %v2864_v57 = vld [vmem:[%s4326_s1 + $0x4e0] ss:$24 sps:$4 sm:$0xff]  }
  0x14   :  { %1867 = vmatpush1.bf16.msra.mxu1 %v2810_v19  ;;  %1825 = vmatprep.subr.bf16.mxu0 %v2811_v20  ;;  %v2861_v55 = vld [vmem:[%s4326_s1 + $0x4e4] ss:$24 sps:$4 sm:$0xff]   ;;  %v2865_v58 = vld [vmem:[%s4326_s1 + $0x1b4] ss:$24 sps:$4 sm:$0xff]   ;;  %v2869_v60 = vld [vmem:[%s4326_s1 + $0x1b0] ss:$24 sps:$4 sm:$0xff]  }
  0x15   :  { %1868 = vmatprep.subr.bf16.mxu1 %v2813_v21  ;;  %v2867_v59 = vld [vmem:[%s4326_s1 + $0x4b4] ss:$24 sps:$4 sm:$0xff]   ;;  %v2870_v61 = vld [vmem:[%s4326_s1 + $0x4b0] ss:$24 sps:$4 sm:$0xff]   ;;  %v2871_v62 = vld [vmem:[%s4326_s1 + $0x184] ss:$24 sps:$4 sm:$0xff]  }
  0x16   :  { %v2873_v63 = vld [vmem:[%s4326_s1 + $0x484] ss:$24 sps:$4 sm:$0xff]   ;;  %v2875_v0 = vld [vmem:[%s4326_s1 + $0x180] ss:$24 sps:$4 sm:$0xff]   ;;  %v2885_v2 = vld [vmem:[%s4326_s1 + $0x754] ss:$24 sps:$4 sm:$0xff]  }
  0x17   :  { %1826 = vmatpush1.bf16.msra.mxu0 %v2815_v22  ;;  %v2876_v1 = vld [vmem:[%s4326_s1 + $0x480] ss:$24 sps:$4 sm:$0xff]   ;;  %v2888_v3 = vld [vmem:[%s4326_s1 + $0x15c] ss:$24 sps:$4 sm:$0xff]   ;;  %v2883_v6 = vld [vmem:[%s4326_s1 + $0x750] ss:$24 sps:$4 sm:$0xff]  }
  0x18   :  { %1869 = vmatpush1.bf16.msra.mxu1 %v2816_v23  ;;  %1827 = vmatprep.subr.bf16.mxu0 %v2817_v24  ;;  %v3475_v4 = vld [vmem:[%s4327_s0] ss:$24 sps:$4 sm:$0xff]   ;;  %v2891_v8 = vld [vmem:[%s4326_s1 + $0x724] ss:$24 sps:$4 sm:$0xff]   ;;  %v2897_v12 = vld [vmem:[%s4326_s1 + $0x6f4] ss:$24 sps:$4 sm:$0xff]  }
  0x19   :  { %1870 = vmatprep.subr.bf16.mxu1 %v2819_v25  ;;  %v3480_v5 = vld [vmem:[%s4327_s0 + $0x8] ss:$24 sps:$4 sm:$0xff]   ;;  %v2886_v7 = vld [vmem:[%s4326_s1 + $0x158] ss:$24 sps:$4 sm:$0xff]   ;;  %v2894_v9 = vld [vmem:[%s4326_s1 + $0x12c] ss:$24 sps:$4 sm:$0xff]  }
  0x1a   :  { %v2889_v10 = vld [vmem:[%s4326_s1 + $0x720] ss:$24 sps:$4 sm:$0xff]   ;;  %v2900_v13 = vld [vmem:[%s4326_s1 + $0xfc] ss:$24 sps:$4 sm:$0xff]   ;;  %v2895_v14 = vld [vmem:[%s4326_s1 + $0x6f0] ss:$24 sps:$4 sm:$0xff]  }
  0x1b   :  { %1828 = vmatpush1.bf16.msra.mxu0 %v2821_v26  ;;  %v2892_v11 = vld [vmem:[%s4326_s1 + $0x128] ss:$24 sps:$4 sm:$0xff]   ;;  %v2898_v15 = vld [vmem:[%s4326_s1 + $0xf8] ss:$24 sps:$4 sm:$0xff]   ;;  %v2903_v16 = vld [vmem:[%s4326_s1 + $0x6c4] ss:$24 sps:$4 sm:$0xff]  }
  0x1c   :  { %1871 = vmatpush1.bf16.msra.mxu1 %v2822_v27  ;;  %1829 = vmatprep.subr.bf16.mxu0 %v2823_v28  ;;  %v2906_v17 = vld [vmem:[%s4326_s1 + $0xcc] ss:$24 sps:$4 sm:$0xff]   ;;  %v2901_v18 = vld [vmem:[%s4326_s1 + $0x6c0] ss:$24 sps:$4 sm:$0xff]   ;;  %v2912_v21 = vld [vmem:[%s4326_s1 + $0x9c] ss:$24 sps:$4 sm:$0xff]  }
  0x1d   :  { %1872 = vmatprep.subr.bf16.mxu1 %v2825_v29  ;;  %v2904_v19 = vld [vmem:[%s4326_s1 + $0xc8] ss:$24 sps:$4 sm:$0xff]   ;;  %v2909_v20 = vld [vmem:[%s4326_s1 + $0x694] ss:$24 sps:$4 sm:$0xff]   ;;  %v2910_v23 = vld [vmem:[%s4326_s1 + $0x98] ss:$24 sps:$4 sm:$0xff]  }
  0x1e   :  { %v2907_v22 = vld [vmem:[%s4326_s1 + $0x690] ss:$24 sps:$4 sm:$0xff]   ;;  %v2915_v24 = vld [vmem:[%s4326_s1 + $0x664] ss:$24 sps:$4 sm:$0xff]   ;;  %v2913_v26 = vld [vmem:[%s4326_s1 + $0x660] ss:$24 sps:$4 sm:$0xff]  }
  0x1f   :  { %1830 = vmatpush1.bf16.msra.mxu0 %v2827_v30  ;;  %v2918_v25 = vld [vmem:[%s4326_s1 + $0x6c] ss:$24 sps:$4 sm:$0xff]   ;;  %v2916_v27 = vld [vmem:[%s4326_s1 + $0x68] ss:$24 sps:$4 sm:$0xff]   ;;  %v2924_v29 = vld [vmem:[%s4326_s1 + $0x3c] ss:$24 sps:$4 sm:$0xff]  }
  0x20   :  { %1873 = vmatpush1.bf16.msra.mxu1 %v2828_v31  ;;  %1831 = vmatprep.subr.bf16.mxu0 %v2829_v32  ;;  %v2921_v28 = vld [vmem:[%s4326_s1 + $0x634] ss:$24 sps:$4 sm:$0xff]   ;;  %v2919_v30 = vld [vmem:[%s4326_s1 + $0x630] ss:$24 sps:$4 sm:$0xff]   ;;  %v2927_v32 = vld [vmem:[%s4326_s1 + $0x604] ss:$24 sps:$4 sm:$0xff]  }
  0x21   :  { %1874 = vmatprep.subr.bf16.mxu1 %v2831_v33  ;;  %v2922_v31 = vld [vmem:[%s4326_s1 + $0x38] ss:$24 sps:$4 sm:$0xff]   ;;  %v2930_v33 = vld [vmem:[%s4326_s1 + $0xc] ss:$24 sps:$4 sm:$0xff]  }
  0x23   :  { %1832 = vmatpush2.bf16.msra.mxu0 %v2833_v34  ;;  %v3571_v34 = vld [vmem:[%s4327_s0 + $0x14] ss:$24 sps:$4 sm:$0xff]  }
  0x24   :  { %1875 = vmatpush2.bf16.msra.mxu1 %v2834_v35  ;;  %1833 = vmatprep.subr.bf16.mxu0 %v2835_v36  ;;  %v2925_v35 = vld [vmem:[%s4326_s1 + $0x600] ss:$24 sps:$4 sm:$0xff]  }
  0x25   :  { %1876 = vmatprep.subr.bf16.mxu1 %v2837_v37  ;;  %v2928_v36 = vld [vmem:[%s4326_s1 + $0x8] ss:$24 sps:$4 sm:$0xff]   ;;  %v2933_v37 = vld [vmem:[%s4326_s1 + $0x8d4] ss:$24 sps:$4 sm:$0xff]  }
  0x27   :  { %1834 = vmatpush2.bf16.msra.mxu0 %v2839_v38  ;;  %v2936_v38 = vld [vmem:[%s4326_s1 + $0x2dc] ss:$24 sps:$4 sm:$0xff]  }
  0x28   :  { %1877 = vmatpush2.bf16.msra.mxu1 %v2840_v39  ;;  %1835 = vmatprep.subr.bf16.mxu0 %v2841_v40  ;;  %v2931_v39 = vld [vmem:[%s4326_s1 + $0x8d0] ss:$24 sps:$4 sm:$0xff]  }
  0x29   :  { %1878 = vmatprep.subr.bf16.mxu1 %v2843_v41  ;;  %v2934_v40 = vld [vmem:[%s4326_s1 + $0x2d8] ss:$24 sps:$4 sm:$0xff]   ;;  %v2939_v41 = vld [vmem:[%s4326_s1 + $0x8a4] ss:$24 sps:$4 sm:$0xff]  }
  0x2b   :  { %1836 = vmatpush2.bf16.msra.mxu0 %v2845_v42  ;;  %v2942_v42 = vld [vmem:[%s4326_s1 + $0x2ac] ss:$24 sps:$4 sm:$0xff]  }
  0x2c   :  { %1879 = vmatpush2.bf16.msra.mxu1 %v2846_v43  ;;  %1837 = vmatprep.subr.bf16.mxu0 %v2847_v44  ;;  %v2937_v43 = vld [vmem:[%s4326_s1 + $0x8a0] ss:$24 sps:$4 sm:$0xff]  }
  0x2d   :  { %1880 = vmatprep.subr.bf16.mxu1 %v2849_v45  ;;  %v2940_v44 = vld [vmem:[%s4326_s1 + $0x2a8] ss:$24 sps:$4 sm:$0xff]   ;;  %v2945_v45 = vld [vmem:[%s4326_s1 + $0x874] ss:$24 sps:$4 sm:$0xff]  }
  0x2f   :  { %1838 = vmatpush2.bf16.msra.mxu0 %v2851_v46  ;;  %v2948_v46 = vld [vmem:[%s4326_s1 + $0x27c] ss:$24 sps:$4 sm:$0xff]  }
  0x30   :  { %1881 = vmatpush2.bf16.msra.mxu1 %v2852_v47  ;;  %1839 = vmatprep.subr.bf16.mxu0 %v2853_v49  ;;  %v2943_v47 = vld [vmem:[%s4326_s1 + $0x870] ss:$24 sps:$4 sm:$0xff]   ;;  %v2951_v49 = vld [vmem:[%s4326_s1 + $0x844] ss:$24 sps:$4 sm:$0xff]  }
  0x31   :  { %1882 = vmatprep.subr.bf16.mxu1 %v2855_v51  ;;  %v2954_v51 = vld [vmem:[%s4326_s1 + $0x24c] ss:$24 sps:$4 sm:$0xff]  }
  0x33   :  { %1840 = vmatpush2.bf16.msra.mxu0 %v2857_v52  ;;  %v2949_v52 = vld [vmem:[%s4326_s1 + $0x840] ss:$24 sps:$4 sm:$0xff]  }
  0x34   :  { %1883 = vmatpush2.bf16.msra.mxu1 %v2858_v53  ;;  %1841 = vmatprep.subr.bf16.mxu0 %v2859_v54  ;;  %v2952_v53 = vld [vmem:[%s4326_s1 + $0x248] ss:$24 sps:$4 sm:$0xff]   ;;  %v2957_v54 = vld [vmem:[%s4326_s1 + $0x814] ss:$24 sps:$4 sm:$0xff]  }
  0x35   :  { %1884 = vmatprep.subr.bf16.mxu1 %v2861_v55  ;;  %v2960_v55 = vld [vmem:[%s4326_s1 + $0x21c] ss:$24 sps:$4 sm:$0xff]  }
  0x37   :  { %1842 = vmatpush2.bf16.msra.mxu0 %v2863_v56  ;;  %v2955_v56 = vld [vmem:[%s4326_s1 + $0x810] ss:$24 sps:$4 sm:$0xff]  }
  0x38   :  { %1885 = vmatpush2.bf16.msra.mxu1 %v2864_v57  ;;  %1843 = vmatprep.subr.bf16.mxu0 %v2865_v58  ;;  %v2958_v57 = vld [vmem:[%s4326_s1 + $0x218] ss:$24 sps:$4 sm:$0xff]   ;;  %v2963_v58 = vld [vmem:[%s4326_s1 + $0x7e4] ss:$24 sps:$4 sm:$0xff]  }
  0x39   :  { %1886 = vmatprep.subr.bf16.mxu1 %v2867_v59  ;;  %v2966_v59 = vld [vmem:[%s4326_s1 + $0x1ec] ss:$24 sps:$4 sm:$0xff]  }
  0x3b   :  { %1844 = vmatpush2.bf16.msra.mxu0 %v2869_v60  ;;  %v2961_v60 = vld [vmem:[%s4326_s1 + $0x7e0] ss:$24 sps:$4 sm:$0xff]  }
  0x3c   :  { %1887 = vmatpush2.bf16.msra.mxu1 %v2870_v61  ;;  %1845 = vmatprep.subr.bf16.mxu0 %v2871_v62  ;;  %v2964_v61 = vld [vmem:[%s4326_s1 + $0x1e8] ss:$24 sps:$4 sm:$0xff]   ;;  %v2969_v62 = vld [vmem:[%s4326_s1 + $0x7b4] ss:$24 sps:$4 sm:$0xff]  }
  0x3d   :  { %1888 = vmatprep.subr.bf16.mxu1 %v2873_v63  ;;  %v2972_v63 = vld [vmem:[%s4326_s1 + $0x1bc] ss:$24 sps:$4 sm:$0xff]  }
  0x3f   :  { %1846 = vmatpush2.bf16.msra.mxu0 %v2875_v0  ;;  %v2967_v0 = vld [vmem:[%s4326_s1 + $0x7b0] ss:$24 sps:$4 sm:$0xff]  }
  0x40   :  { %1889 = vmatpush2.bf16.msra.mxu1 %v2876_v1  ;;  %1901 = vmatprep.subr.bf16.mxu0 %v2885_v2  ;;  %v2970_v1 = vld [vmem:[%s4326_s1 + $0x1b8] ss:$24 sps:$4 sm:$0xff]   ;;  %v2975_v2 = vld [vmem:[%s4326_s1 + $0x784] ss:$24 sps:$4 sm:$0xff]  }
  0x41   :  { %1944 = vmatprep.subr.bf16.mxu1 %v2888_v3  ;;  %v2978_v3 = vld [vmem:[%s4326_s1 + $0x18c] ss:$24 sps:$4 sm:$0xff]  }
  0x42   :  { %1848 = vmatmul.mubr.bf16.vlgmr.msra.gmra.mxu0 %v3475_v4 }
  0x43   :  { %1891 = vmatmul.mubr.bf16.vlgmr.msra.gmra.mxu1 %v3480_v5  ;;  %1902 = vmatpush1.bf16.msra.mxu0 %v2883_v6  ;;  %v2973_v6 = vld [vmem:[%s4326_s1 + $0x780] ss:$24 sps:$4 sm:$0xff]  }
  0x44   :  { %1945 = vmatpush1.bf16.msra.mxu1 %v2886_v7  ;;  %1903 = vmatprep.subr.bf16.mxu0 %v2891_v8  ;;  %v2976_v7 = vld [vmem:[%s4326_s1 + $0x188] ss:$24 sps:$4 sm:$0xff]   ;;  %v2984_v8 = vld [vmem:[%s4326_s1 + $0x45c] ss:$24 sps:$4 sm:$0xff]  }
  0x45   :  { %1946 = vmatprep.subr.bf16.mxu1 %v2894_v9  ;;  %1976 = vmatprep.mubr.bf16.mxu1 %v2877_v48  ;;  %v2946_v48 = vld [vmem:[%s4326_s1 + $0x278] ss:$24 sps:$4 sm:$0xff]   ;;  %v2987_v9 = vld [vmem:[%s4326_s1 + $0x75c] ss:$24 sps:$4 sm:$0xff]  }
  0x46   :  { %1933 = vmatprep.mubr.bf16.mxu0 %v3571_v34 }
  0x47   :  { %1904 = vmatpush1.bf16.msra.mxu0 %v2889_v10  ;;  %v3685_v10 = vld [vmem:[%s4327_s0 + $0x10] ss:$24 sps:$4 sm:$0xff]  }
  0x48   :  { %1947 = vmatpush1.bf16.msra.mxu1 %v2892_v11  ;;  %1905 = vmatprep.subr.bf16.mxu0 %v2897_v12  ;;  %v2982_v11 = vld [vmem:[%s4326_s1 + $0x458] ss:$24 sps:$4 sm:$0xff]  }
  0x49   :  { %1948 = vmatprep.subr.bf16.mxu1 %v2900_v13  ;;  %v2985_v12 = vld [vmem:[%s4326_s1 + $0x758] ss:$24 sps:$4 sm:$0xff]   ;;  %v2990_v13 = vld [vmem:[%s4326_s1 + $0x42c] ss:$24 sps:$4 sm:$0xff]  }
  0x4b   :  { %1906 = vmatpush1.bf16.msra.mxu0 %v2895_v14  ;;  %v2993_v14 = vld [vmem:[%s4326_s1 + $0x72c] ss:$24 sps:$4 sm:$0xff]  }
  0x4c   :  { %1949 = vmatpush1.bf16.msra.mxu1 %v2898_v15  ;;  %1907 = vmatprep.subr.bf16.mxu0 %v2903_v16  ;;  %v2988_v15 = vld [vmem:[%s4326_s1 + $0x428] ss:$24 sps:$4 sm:$0xff]  }
  0x4d   :  { %1950 = vmatprep.subr.bf16.mxu1 %v2906_v17  ;;  %v2991_v16 = vld [vmem:[%s4326_s1 + $0x728] ss:$24 sps:$4 sm:$0xff]   ;;  %v2996_v17 = vld [vmem:[%s4326_s1 + $0x3fc] ss:$24 sps:$4 sm:$0xff]  }
  0x4f   :  { %1908 = vmatpush1.bf16.msra.mxu0 %v2901_v18  ;;  %v2994_v18 = vld [vmem:[%s4326_s1 + $0x3f8] ss:$24 sps:$4 sm:$0xff]  }
  0x50   :  { %1951 = vmatpush1.bf16.msra.mxu1 %v2904_v19  ;;  %1909 = vmatprep.subr.bf16.mxu0 %v2909_v20  ;;  %v2997_v19 = vld [vmem:[%s4326_s1 + $0x6f8] ss:$24 sps:$4 sm:$0xff]   ;;  %v3002_v20 = vld [vmem:[%s4326_s1 + $0x3cc] ss:$24 sps:$4 sm:$0xff]  }
  0x51   :  { %1952 = vmatprep.subr.bf16.mxu1 %v2912_v21  ;;  %v3000_v21 = vld [vmem:[%s4326_s1 + $0x3c8] ss:$24 sps:$4 sm:$0xff]  }
  0x53   :  { %1910 = vmatpush1.bf16.msra.mxu0 %v2907_v22  ;;  %v3003_v22 = vld [vmem:[%s4326_s1 + $0x6c8] ss:$24 sps:$4 sm:$0xff]  }
  0x54   :  { %1953 = vmatpush1.bf16.msra.mxu1 %v2910_v23  ;;  %1911 = vmatprep.subr.bf16.mxu0 %v2915_v24  ;;  %v3008_v23 = vld [vmem:[%s4326_s1 + $0x39c] ss:$24 sps:$4 sm:$0xff]  }
  0x55   :  { %1954 = vmatprep.subr.bf16.mxu1 %v2918_v25  ;;  %v3011_v24 = vld [vmem:[%s4326_s1 + $0x69c] ss:$24 sps:$4 sm:$0xff]   ;;  %v3006_v25 = vld [vmem:[%s4326_s1 + $0x398] ss:$24 sps:$4 sm:$0xff]  }
  0x57   :  { %1912 = vmatpush1.bf16.msra.mxu0 %v2913_v26  ;;  %v3009_v26 = vld [vmem:[%s4326_s1 + $0x698] ss:$24 sps:$4 sm:$0xff]  }
  0x58   :  { %1955 = vmatpush1.bf16.msra.mxu1 %v2916_v27  ;;  %1913 = vmatprep.subr.bf16.mxu0 %v2921_v28  ;;  %v3014_v27 = vld [vmem:[%s4326_s1 + $0x36c] ss:$24 sps:$4 sm:$0xff]  }
  0x59   :  { %1956 = vmatprep.subr.bf16.mxu1 %v2924_v29  ;;  %v3017_v28 = vld [vmem:[%s4326_s1 + $0x66c] ss:$24 sps:$4 sm:$0xff]   ;;  %v3012_v29 = vld [vmem:[%s4326_s1 + $0x368] ss:$24 sps:$4 sm:$0xff]  }
  0x5b   :  { %1914 = vmatpush1.bf16.msra.mxu0 %v2919_v30  ;;  %v3015_v30 = vld [vmem:[%s4326_s1 + $0x668] ss:$24 sps:$4 sm:$0xff]  }
  0x5c   :  { %1957 = vmatpush1.bf16.msra.mxu1 %v2922_v31  ;;  %1915 = vmatprep.subr.bf16.mxu0 %v2927_v32  ;;  %v3020_v31 = vld [vmem:[%s4326_s1 + $0x33c] ss:$24 sps:$4 sm:$0xff]  }
  0x5d   :  { %1958 = vmatprep.subr.bf16.mxu1 %v2930_v33  ;;  %v3023_v32 = vld [vmem:[%s4326_s1 + $0x63c] ss:$24 sps:$4 sm:$0xff]   ;;  %v3018_v33 = vld [vmem:[%s4326_s1 + $0x338] ss:$24 sps:$4 sm:$0xff]  }
  0x5f   :  { %1916 = vmatpush1.bf16.msra.mxu0 %v2925_v35  ;;  %v3021_v35 = vld [vmem:[%s4326_s1 + $0x638] ss:$24 sps:$4 sm:$0xff]  }
  0x60   :  { %1959 = vmatpush1.bf16.msra.mxu1 %v2928_v36  ;;  %1917 = vmatprep.subr.bf16.mxu0 %v2933_v37  ;;  %v3026_v36 = vld [vmem:[%s4326_s1 + $0x30c] ss:$24 sps:$4 sm:$0xff]  }
  0x61   :  { %1960 = vmatprep.subr.bf16.mxu1 %v2936_v38  ;;  %v3029_v37 = vld [vmem:[%s4326_s1 + $0x60c] ss:$24 sps:$4 sm:$0xff]   ;;  %v3024_v38 = vld [vmem:[%s4326_s1 + $0x308] ss:$24 sps:$4 sm:$0xff]  }
  0x63   :  { %1918 = vmatpush2.bf16.msra.mxu0 %v2931_v39  ;;  %v3027_v39 = vld [vmem:[%s4326_s1 + $0x608] ss:$24 sps:$4 sm:$0xff]  }
  0x64   :  { %1961 = vmatpush2.bf16.msra.mxu1 %v2934_v40  ;;  %1919 = vmatprep.subr.bf16.mxu0 %v2939_v41  ;;  %v3032_v40 = vld [vmem:[%s4326_s1 + $0x5dc] ss:$24 sps:$4 sm:$0xff]  }
  0x65   :  { %1962 = vmatprep.subr.bf16.mxu1 %v2942_v42  ;;  %v3035_v41 = vld [vmem:[%s4326_s1 + $0x8dc] ss:$24 sps:$4 sm:$0xff]   ;;  %v3030_v42 = vld [vmem:[%s4326_s1 + $0x5d8] ss:$24 sps:$4 sm:$0xff]  }
  0x67   :  { %1920 = vmatpush2.bf16.msra.mxu0 %v2937_v43  ;;  %v3033_v43 = vld [vmem:[%s4326_s1 + $0x8d8] ss:$24 sps:$4 sm:$0xff]  }
  0x68   :  { %1963 = vmatpush2.bf16.msra.mxu1 %v2940_v44  ;;  %1921 = vmatprep.subr.bf16.mxu0 %v2945_v45  ;;  %v3038_v44 = vld [vmem:[%s4326_s1 + $0x5ac] ss:$24 sps:$4 sm:$0xff]  }
  0x69   :  { %1964 = vmatprep.subr.bf16.mxu1 %v2948_v46  ;;  %v3041_v45 = vld [vmem:[%s4326_s1 + $0x8ac] ss:$24 sps:$4 sm:$0xff]   ;;  %v3036_v46 = vld [vmem:[%s4326_s1 + $0x5a8] ss:$24 sps:$4 sm:$0xff]  }
  0x6b   :  { %1922 = vmatpush2.bf16.msra.mxu0 %v2943_v47  ;;  %v3039_v47 = vld [vmem:[%s4326_s1 + $0x8a8] ss:$24 sps:$4 sm:$0xff]  }
  0x6c   :  { %1965 = vmatpush2.bf16.msra.mxu1 %v2946_v48  ;;  %1923 = vmatprep.subr.bf16.mxu0 %v2951_v49  ;;  %v3044_v48 = vld [vmem:[%s4326_s1 + $0x57c] ss:$24 sps:$4 sm:$0xff]  }
  0x6d   :  { %1966 = vmatprep.subr.bf16.mxu1 %v2954_v51  ;;  %v3047_v49 = vld [vmem:[%s4326_s1 + $0x87c] ss:$24 sps:$4 sm:$0xff]   ;;  %v3042_v51 = vld [vmem:[%s4326_s1 + $0x578] ss:$24 sps:$4 sm:$0xff]  }
  0x6f   :  { %1924 = vmatpush2.bf16.msra.mxu0 %v2949_v52  ;;  %v3045_v52 = vld [vmem:[%s4326_s1 + $0x878] ss:$24 sps:$4 sm:$0xff]  }
  0x70   :  { %1967 = vmatpush2.bf16.msra.mxu1 %v2952_v53  ;;  %1925 = vmatprep.subr.bf16.mxu0 %v2957_v54  ;;  %v3050_v53 = vld [vmem:[%s4326_s1 + $0x54c] ss:$24 sps:$4 sm:$0xff]  }
  0x71   :  { %1968 = vmatprep.subr.bf16.mxu1 %v2960_v55  ;;  %v3053_v54 = vld [vmem:[%s4326_s1 + $0x84c] ss:$24 sps:$4 sm:$0xff]   ;;  %v3048_v55 = vld [vmem:[%s4326_s1 + $0x548] ss:$24 sps:$4 sm:$0xff]  }
  0x73   :  { %1926 = vmatpush2.bf16.msra.mxu0 %v2955_v56  ;;  %v3051_v56 = vld [vmem:[%s4326_s1 + $0x848] ss:$24 sps:$4 sm:$0xff]  }
  0x74   :  { %1969 = vmatpush2.bf16.msra.mxu1 %v2958_v57  ;;  %1927 = vmatprep.subr.bf16.mxu0 %v2963_v58  ;;  %v3056_v57 = vld [vmem:[%s4326_s1 + $0x51c] ss:$24 sps:$4 sm:$0xff]  }
  0x75   :  { %1970 = vmatprep.subr.bf16.mxu1 %v2966_v59  ;;  %v3059_v58 = vld [vmem:[%s4326_s1 + $0x81c] ss:$24 sps:$4 sm:$0xff]   ;;  %v3054_v59 = vld [vmem:[%s4326_s1 + $0x518] ss:$24 sps:$4 sm:$0xff]  }
  0x77   :  { %1928 = vmatpush2.bf16.msra.mxu0 %v2961_v60  ;;  %v3057_v60 = vld [vmem:[%s4326_s1 + $0x818] ss:$24 sps:$4 sm:$0xff]  }
  0x78   :  { %1971 = vmatpush2.bf16.msra.mxu1 %v2964_v61  ;;  %1929 = vmatprep.subr.bf16.mxu0 %v2969_v62  ;;  %v3062_v61 = vld [vmem:[%s4326_s1 + $0x4ec] ss:$24 sps:$4 sm:$0xff]  }
  0x79   :  { %1972 = vmatprep.subr.bf16.mxu1 %v2972_v63  ;;  %v3065_v62 = vld [vmem:[%s4326_s1 + $0x7ec] ss:$24 sps:$4 sm:$0xff]   ;;  %v3060_v63 = vld [vmem:[%s4326_s1 + $0x4e8] ss:$24 sps:$4 sm:$0xff]  }
  0x7b   :  { %1930 = vmatpush2.bf16.msra.mxu0 %v2967_v0  ;;  %v3063_v0 = vld [vmem:[%s4326_s1 + $0x7e8] ss:$24 sps:$4 sm:$0xff]  }
  0x7c   :  { %1973 = vmatpush2.bf16.msra.mxu1 %v2970_v1  ;;  %1931 = vmatprep.subr.bf16.mxu0 %v2975_v2  ;;  %v3068_v1 = vld [vmem:[%s4326_s1 + $0x4bc] ss:$24 sps:$4 sm:$0xff]  }
  0x7d   :  { %1974 = vmatprep.subr.bf16.mxu1 %v2978_v3  ;;  %v3071_v2 = vld [vmem:[%s4326_s1 + $0x7bc] ss:$24 sps:$4 sm:$0xff]   ;;  %v3066_v3 = vld [vmem:[%s4326_s1 + $0x4b8] ss:$24 sps:$4 sm:$0xff]  }
  0x7f   :  { %1932 = vmatpush2.bf16.msra.mxu0 %v2973_v6  ;;  %v3069_v6 = vld [vmem:[%s4326_s1 + $0x7b8] ss:$24 sps:$4 sm:$0xff]  }
  0x80   :  { %1975 = vmatpush2.bf16.msra.mxu1 %v2976_v7  ;;  %1987 = vmatprep.subr.bf16.mxu0 %v2984_v8  ;;  %v3074_v7 = vld [vmem:[%s4326_s1 + $0x48c] ss:$24 sps:$4 sm:$0xff]  }
  0x81   :  { %2030 = vmatprep.subr.bf16.mxu1 %v2987_v9  ;;  %v3077_v8 = vld [vmem:[%s4326_s1 + $0x78c] ss:$24 sps:$4 sm:$0xff]   ;;  %v3072_v9 = vld [vmem:[%s4326_s1 + $0x488] ss:$24 sps:$4 sm:$0xff]  }
  0x82   :  { %1934 = vmatmul.mubr.bf16.vlgmr.msra.gmra.mxu0 %v3685_v10 }
  0x83   :  { %1977 = vmatmul.mubr.bf16.vlgmr.msra.gmra.mxu1 %v3475_v4  ;;  %1988 = vmatpush1.bf16.msra.mxu0 %v2982_v11  ;;  %v2999_v4 = vld [vmem:[%s4326_s1 + $0x6fc] ss:$24 sps:$4 sm:$0xff]   ;;  %v3075_v11 = vld [vmem:[%s4326_s1 + $0x788] ss:$24 sps:$4 sm:$0xff]  }
  0x84   :  { %2031 = vmatpush1.bf16.msra.mxu1 %v2985_v12  ;;  %1989 = vmatprep.subr.bf16.mxu0 %v2990_v13  ;;  %v3080_v12 = vld [vmem:[%s4326_s1 + $0x164] ss:$24 sps:$4 sm:$0xff]  }
  0x85   :  { %2032 = vmatprep.subr.bf16.mxu1 %v2993_v14  ;;  %2019 = vmatprep.mubr.bf16.mxu0 %v3418_v50  ;;  %v3005_v50 = vld [vmem:[%s4326_s1 + $0x6cc] ss:$24 sps:$4 sm:$0xff]   ;;  %v3078_v14 = vld [vmem:[%s4326_s1 + $0x160] ss:$24 sps:$4 sm:$0xff]  }
  0x86   :  { %2062 = vmatprep.mubr.bf16.mxu1 %v3571_v34  ;;  %v3083_v13 = vld [vmem:[%s4326_s1 + $0x464] ss:$24 sps:$4 sm:$0xff]  }
  0x87   :  { %1990 = vmatpush1.bf16.msra.mxu0 %v2988_v15  ;;  %v3081_v15 = vld [vmem:[%s4326_s1 + $0x460] ss:$24 sps:$4 sm:$0xff]  }
  0x88   :  { %2033 = vmatpush1.bf16.msra.mxu1 %v2991_v16  ;;  %1991 = vmatprep.subr.bf16.mxu0 %v2996_v17  ;;  %v3086_v16 = vld [vmem:[%s4326_s1 + $0x134] ss:$24 sps:$4 sm:$0xff]  }
  0x89   :  { %2034 = vmatprep.subr.bf16.mxu1 %v2999_v4  ;;  %v3089_v17 = vld [vmem:[%s4326_s1 + $0x434] ss:$24 sps:$4 sm:$0xff]   ;;  %v3084_v4 = vld [vmem:[%s4326_s1 + $0x130] ss:$24 sps:$4 sm:$0xff]  }
  0x8b   :  { %1992 = vmatpush1.bf16.msra.mxu0 %v2994_v18  ;;  %v3087_v18 = vld [vmem:[%s4326_s1 + $0x430] ss:$24 sps:$4 sm:$0xff]  }
  0x8c   :  { %2035 = vmatpush1.bf16.msra.mxu1 %v2997_v19  ;;  %1993 = vmatprep.subr.bf16.mxu0 %v3002_v20  ;;  %v3092_v19 = vld [vmem:[%s4326_s1 + $0x104] ss:$24 sps:$4 sm:$0xff]  }
  0x8d   :  { %2036 = vmatprep.subr.bf16.mxu1 %v3005_v50  ;;  %v3226_v20 = vld [vmem:[%s4327_s0 + $0x4] ss:$24 sps:$4 sm:$0xff]  }
  0x8e   :  { %v3227_v50 = vld [vmem:[%s4327_s0 + $0xc] ss:$24 sps:$4 sm:$0xff]  }
  0x8f   :  { %1994 = vmatpush1.bf16.msra.mxu0 %v3000_v21  ;;  %v3090_v21 = vld [vmem:[%s4326_s1 + $0x100] ss:$24 sps:$4 sm:$0xff]  }
  0x90   :  { %2037 = vmatpush1.bf16.msra.mxu1 %v3003_v22  ;;  %1995 = vmatprep.subr.bf16.mxu0 %v3008_v23  ;;  %v3093_v22 = vld [vmem:[%s4326_s1 + $0x400] ss:$24 sps:$4 sm:$0xff]   ;;  %v3098_v23 = vld [vmem:[%s4326_s1 + $0xd4] ss:$24 sps:$4 sm:$0xff]  }
  0x91   :  { %2038 = vmatprep.subr.bf16.mxu1 %v3011_v24  ;;  %v3101_v24 = vld [vmem:[%s4326_s1 + $0x3d4] ss:$24 sps:$4 sm:$0xff]  }
  0x93   :  { %1996 = vmatpush1.bf16.msra.mxu0 %v3006_v25  ;;  %v3096_v25 = vld [vmem:[%s4326_s1 + $0xd0] ss:$24 sps:$4 sm:$0xff]  }
  0x94   :  { %2039 = vmatpush1.bf16.msra.mxu1 %v3009_v26  ;;  %1997 = vmatprep.subr.bf16.mxu0 %v3014_v27  ;;  %v3099_v26 = vld [vmem:[%s4326_s1 + $0x3d0] ss:$24 sps:$4 sm:$0xff]   ;;  %v3104_v27 = vld [vmem:[%s4326_s1 + $0xa4] ss:$24 sps:$4 sm:$0xff]  }
  0x95   :  { %2040 = vmatprep.subr.bf16.mxu1 %v3017_v28  ;;  %v3107_v28 = vld [vmem:[%s4326_s1 + $0x3a4] ss:$24 sps:$4 sm:$0xff]  }
  0x97   :  { %1998 = vmatpush1.bf16.msra.mxu0 %v3012_v29  ;;  %v3102_v29 = vld [vmem:[%s4326_s1 + $0xa0] ss:$24 sps:$4 sm:$0xff]  }
  0x98   :  { %2041 = vmatpush1.bf16.msra.mxu1 %v3015_v30  ;;  %1999 = vmatprep.subr.bf16.mxu0 %v3020_v31  ;;  %v3105_v30 = vld [vmem:[%s4326_s1 + $0x3a0] ss:$24 sps:$4 sm:$0xff]   ;;  %v3110_v31 = vld [vmem:[%s4326_s1 + $0x74] ss:$24 sps:$4 sm:$0xff]  }
  0x99   :  { %2042 = vmatprep.subr.bf16.mxu1 %v3023_v32  ;;  %v3113_v32 = vld [vmem:[%s4326_s1 + $0x374] ss:$24 sps:$4 sm:$0xff]  }
  0x9b   :  { %2000 = vmatpush1.bf16.msra.mxu0 %v3018_v33  ;;  %v3108_v33 = vld [vmem:[%s4326_s1 + $0x70] ss:$24 sps:$4 sm:$0xff]  }
  0x9c   :  { %2043 = vmatpush1.bf16.msra.mxu1 %v3021_v35  ;;  %2001 = vmatprep.subr.bf16.mxu0 %v3026_v36  ;;  %v3111_v35 = vld [vmem:[%s4326_s1 + $0x370] ss:$24 sps:$4 sm:$0xff]   ;;  %v3116_v36 = vld [vmem:[%s4326_s1 + $0x44] ss:$24 sps:$4 sm:$0xff]  }
  0x9d   :  { %2044 = vmatprep.subr.bf16.mxu1 %v3029_v37  ;;  %v3119_v37 = vld [vmem:[%s4326_s1 + $0x344] ss:$24 sps:$4 sm:$0xff]  }
  0x9f   :  { %2002 = vmatpush1.bf16.msra.mxu0 %v3024_v38  ;;  %v3114_v38 = vld [vmem:[%s4326_s1 + $0x40] ss:$24 sps:$4 sm:$0xff]  }
  0xa0   :  { %2045 = vmatpush1.bf16.msra.mxu1 %v3027_v39  ;;  %2003 = vmatprep.subr.bf16.mxu0 %v3032_v40  ;;  %v3117_v39 = vld [vmem:[%s4326_s1 + $0x340] ss:$24 sps:$4 sm:$0xff]   ;;  %v3122_v40 = vld [vmem:[%s4326_s1 + $0x14] ss:$24 sps:$4 sm:$0xff]  }
  0xa1   :  { %2046 = vmatprep.subr.bf16.mxu1 %v3035_v41  ;;  %v3125_v41 = vld [vmem:[%s4326_s1 + $0x314] ss:$24 sps:$4 sm:$0xff]  }
  0xa3   :  { %2004 = vmatpush2.bf16.msra.mxu0 %v3030_v42  ;;  %v3120_v42 = vld [vmem:[%s4326_s1 + $0x10] ss:$24 sps:$4 sm:$0xff]  }
  0xa4   :  { %2047 = vmatpush2.bf16.msra.mxu1 %v3033_v43  ;;  %2005 = vmatprep.subr.bf16.mxu0 %v3038_v44  ;;  %v3123_v43 = vld [vmem:[%s4326_s1 + $0x310] ss:$24 sps:$4 sm:$0xff]   ;;  %v3128_v44 = vld [vmem:[%s4326_s1 + $0x2e4] ss:$24 sps:$4 sm:$0xff]  }
  0xa5   :  { %2048 = vmatprep.subr.bf16.mxu1 %v3041_v45  ;;  %v3131_v45 = vld [vmem:[%s4326_s1 + $0x5e4] ss:$24 sps:$4 sm:$0xff]  }
  0xa7   :  { %2006 = vmatpush2.bf16.msra.mxu0 %v3036_v46  ;;  %v3126_v46 = vld [vmem:[%s4326_s1 + $0x2e0] ss:$24 sps:$4 sm:$0xff]  }
  0xa8   :  { %2049 = vmatpush2.bf16.msra.mxu1 %v3039_v47  ;;  %2007 = vmatprep.subr.bf16.mxu0 %v3044_v48  ;;  %v3129_v47 = vld [vmem:[%s4326_s1 + $0x5e0] ss:$24 sps:$4 sm:$0xff]   ;;  %v3134_v48 = vld [vmem:[%s4326_s1 + $0x2b4] ss:$24 sps:$4 sm:$0xff]  }
  0xa9   :  { %2050 = vmatprep.subr.bf16.mxu1 %v3047_v49  ;;  %v3137_v49 = vld [vmem:[%s4326_s1 + $0x5b4] ss:$24 sps:$4 sm:$0xff]  }
  0xab   :  { %2008 = vmatpush2.bf16.msra.mxu0 %v3042_v51  ;;  %v3132_v51 = vld [vmem:[%s4326_s1 + $0x2b0] ss:$24 sps:$4 sm:$0xff]  }
  0xac   :  { %2051 = vmatpush2.bf16.msra.mxu1 %v3045_v52  ;;  %2009 = vmatprep.subr.bf16.mxu0 %v3050_v53  ;;  %v3135_v52 = vld [vmem:[%s4326_s1 + $0x5b0] ss:$24 sps:$4 sm:$0xff]   ;;  %v3140_v53 = vld [vmem:[%s4326_s1 + $0x284] ss:$24 sps:$4 sm:$0xff]  }
  0xad   :  { %2052 = vmatprep.subr.bf16.mxu1 %v3053_v54  ;;  %v3143_v54 = vld [vmem:[%s4326_s1 + $0x584] ss:$24 sps:$4 sm:$0xff]  }
  0xaf   :  { %2010 = vmatpush2.bf16.msra.mxu0 %v3048_v55  ;;  %v3138_v55 = vld [vmem:[%s4326_s1 + $0x280] ss:$24 sps:$4 sm:$0xff]  }
  0xb0   :  { %2053 = vmatpush2.bf16.msra.mxu1 %v3051_v56  ;;  %2011 = vmatprep.subr.bf16.mxu0 %v3056_v57  ;;  %v3141_v56 = vld [vmem:[%s4326_s1 + $0x580] ss:$24 sps:$4 sm:$0xff]   ;;  %v3146_v57 = vld [vmem:[%s4326_s1 + $0x254] ss:$24 sps:$4 sm:$0xff]  }
  0xb1   :  { %2054 = vmatprep.subr.bf16.mxu1 %v3059_v58  ;;  %v3149_v58 = vld [vmem:[%s4326_s1 + $0x554] ss:$24 sps:$4 sm:$0xff]  }
  0xb3   :  { %2012 = vmatpush2.bf16.msra.mxu0 %v3054_v59  ;;  %v3144_v59 = vld [vmem:[%s4326_s1 + $0x250] ss:$24 sps:$4 sm:$0xff]  }
  0xb4   :  { %2055 = vmatpush2.bf16.msra.mxu1 %v3057_v60  ;;  %2013 = vmatprep.subr.bf16.mxu0 %v3062_v61  ;;  %v3147_v60 = vld [vmem:[%s4326_s1 + $0x550] ss:$24 sps:$4 sm:$0xff]   ;;  %v3152_v61 = vld [vmem:[%s4326_s1 + $0x224] ss:$24 sps:$4 sm:$0xff]  }
  0xb5   :  { %2056 = vmatprep.subr.bf16.mxu1 %v3065_v62  ;;  %v3155_v62 = vld [vmem:[%s4326_s1 + $0x524] ss:$24 sps:$4 sm:$0xff]  }
  0xb7   :  { %2014 = vmatpush2.bf16.msra.mxu0 %v3060_v63  ;;  %v3150_v63 = vld [vmem:[%s4326_s1 + $0x220] ss:$24 sps:$4 sm:$0xff]  }
  0xb8   :  { %2057 = vmatpush2.bf16.msra.mxu1 %v3063_v0  ;;  %2015 = vmatprep.subr.bf16.mxu0 %v3068_v1  ;;  %v3153_v0 = vld [vmem:[%s4326_s1 + $0x520] ss:$24 sps:$4 sm:$0xff]   ;;  %v3158_v1 = vld [vmem:[%s4326_s1 + $0x1f4] ss:$24 sps:$4 sm:$0xff]  }
  0xb9   :  { %2058 = vmatprep.subr.bf16.mxu1 %v3071_v2  ;;  %v3161_v2 = vld [vmem:[%s4326_s1 + $0x4f4] ss:$24 sps:$4 sm:$0xff]  }
  0xbb   :  { %2016 = vmatpush2.bf16.msra.mxu0 %v3066_v3  ;;  %v3156_v3 = vld [vmem:[%s4326_s1 + $0x1f0] ss:$24 sps:$4 sm:$0xff]  }
  0xbc   :  { %2059 = vmatpush2.bf16.msra.mxu1 %v3069_v6  ;;  %2017 = vmatprep.subr.bf16.mxu0 %v3074_v7  ;;  %v3159_v6 = vld [vmem:[%s4326_s1 + $0x4f0] ss:$24 sps:$4 sm:$0xff]   ;;  %v3164_v7 = vld [vmem:[%s4326_s1 + $0x1c4] ss:$24 sps:$4 sm:$0xff]  }
  0xbd   :  { %2060 = vmatprep.subr.bf16.mxu1 %v3077_v8  ;;  %v3167_v8 = vld [vmem:[%s4326_s1 + $0x4c4] ss:$24 sps:$4 sm:$0xff]  }
  0xbf   :  { %2018 = vmatpush2.bf16.msra.mxu0 %v3072_v9  ;;  %v3162_v9 = vld [vmem:[%s4326_s1 + $0x1c0] ss:$24 sps:$4 sm:$0xff]  }
  0xc0   :  { %2061 = vmatpush2.bf16.msra.mxu1 %v3075_v11  ;;  %2073 = vmatprep.subr.bf16.mxu0 %v3080_v12  ;;  %v3165_v11 = vld [vmem:[%s4326_s1 + $0x4c0] ss:$24 sps:$4 sm:$0xff]   ;;  %v3170_v12 = vld [vmem:[%s4326_s1 + $0x194] ss:$24 sps:$4 sm:$0xff]  }
  0xc1   :  { %2116 = vmatprep.subr.bf16.mxu1 %v3083_v13  ;;  %v3173_v13 = vld [vmem:[%s4326_s1 + $0x494] ss:$24 sps:$4 sm:$0xff]  }
  0xc2   :  { %2020 = vmatmul.mubr.bf16.vlgmr.msra.gmra.mxu0 %v3480_v5  ;;  %v3095_v5 = vld [vmem:[%s4326_s1 + $0x404] ss:$24 sps:$4 sm:$0xff]  }
  0xc3   :  { %2063 = vmatmul.mubr.bf16.vlgmr.msra.gmra.mxu1 %v3685_v10  ;;  %2074 = vmatpush1.bf16.msra.mxu0 %v3078_v14  ;;  %v3168_v14 = vld [vmem:[%s4326_s1 + $0x190] ss:$24 sps:$4 sm:$0xff]  }
  0xc4   :  { %2117 = vmatpush1.bf16.msra.mxu1 %v3081_v15  ;;  %2075 = vmatprep.subr.bf16.mxu0 %v3086_v16  ;;  %v3171_v15 = vld [vmem:[%s4326_s1 + $0x490] ss:$24 sps:$4 sm:$0xff]   ;;  %v3176_v16 = vld [vmem:[%s4326_s1 + $0x764] ss:$24 sps:$4 sm:$0xff]  }
  0xc5   :  { %2118 = vmatprep.subr.bf16.mxu1 %v3089_v17  ;;  %2105 = vmatprep.mubr.bf16.mxu0 %v3226_v20  ;;  %v3174_v17 = vld [vmem:[%s4326_s1 + $0x760] ss:$24 sps:$4 sm:$0xff]   ;;  %v3182_v20 = vld [vmem:[%s4326_s1 + $0x704] ss:$24 sps:$4 sm:$0xff]  }
  0xc6   :  { %2148 = vmatprep.mubr.bf16.mxu1 %v3227_v50  ;;  %v3180_v50 = vld [vmem:[%s4326_s1 + $0x700] ss:$24 sps:$4 sm:$0xff]  }
  0xc7   :  { %2076 = vmatpush1.bf16.msra.mxu0 %v3084_v4  ;;  %v3179_v4 = vld [vmem:[%s4326_s1 + $0x734] ss:$24 sps:$4 sm:$0xff]  }
  0xc8   :  { %2119 = vmatpush1.bf16.msra.mxu1 %v3087_v18  ;;  %2077 = vmatprep.subr.bf16.mxu0 %v3092_v19  ;;  %v3228_v18 = vld [vmem:[%s4327_s0] ss:$24 sps:$4 sm:$0xff]  }
  0xc9   :  { %2120 = vmatprep.subr.bf16.mxu1 %v3095_v5  ;;  %v3229_v19 = vld [vmem:[%s4327_s0 + $0x8] ss:$24 sps:$4 sm:$0xff]  }
  0xca   :  { %v3177_v5 = vld [vmem:[%s4326_s1 + $0x730] ss:$24 sps:$4 sm:$0xff]  }
  0xcb   :  { %2078 = vmatpush1.bf16.msra.mxu0 %v3090_v21  ;;  %v3185_v21 = vld [vmem:[%s4326_s1 + $0x6d4] ss:$24 sps:$4 sm:$0xff]  }
  0xcc   :  { %2121 = vmatpush1.bf16.msra.mxu1 %v3093_v22  ;;  %2079 = vmatprep.subr.bf16.mxu0 %v3098_v23  ;;  %v3188_v22 = vld [vmem:[%s4326_s1 + $0x6a4] ss:$24 sps:$4 sm:$0xff]   ;;  %v3186_v23 = vld [vmem:[%s4326_s1 + $0x6a0] ss:$24 sps:$4 sm:$0xff]  }
  0xcd   :  { %2122 = vmatprep.subr.bf16.mxu1 %v3101_v24  ;;  %v3191_v24 = vld [vmem:[%s4326_s1 + $0x674] ss:$24 sps:$4 sm:$0xff]  }
  0xcf   :  { %2080 = vmatpush1.bf16.msra.mxu0 %v3096_v25  ;;  %v3189_v25 = vld [vmem:[%s4326_s1 + $0x670] ss:$24 sps:$4 sm:$0xff]  }
  0xd0   :  { %2123 = vmatpush1.bf16.msra.mxu1 %v3099_v26  ;;  %2081 = vmatprep.subr.bf16.mxu0 %v3104_v27  ;;  %v3194_v26 = vld [vmem:[%s4326_s1 + $0x644] ss:$24 sps:$4 sm:$0xff]   ;;  %v3192_v27 = vld [vmem:[%s4326_s1 + $0x640] ss:$24 sps:$4 sm:$0xff]  }
  0xd1   :  { %2124 = vmatprep.subr.bf16.mxu1 %v3107_v28  ;;  %v3197_v28 = vld [vmem:[%s4326_s1 + $0x614] ss:$24 sps:$4 sm:$0xff]  }
  0xd3   :  { %2082 = vmatpush1.bf16.msra.mxu0 %v3102_v29  ;;  %v3195_v29 = vld [vmem:[%s4326_s1 + $0x610] ss:$24 sps:$4 sm:$0xff]  }
  0xd4   :  { %2125 = vmatpush1.bf16.msra.mxu1 %v3105_v30  ;;  %2083 = vmatprep.subr.bf16.mxu0 %v3110_v31  ;;  %v3200_v30 = vld [vmem:[%s4326_s1 + $0x8e4] ss:$24 sps:$4 sm:$0xff]   ;;  %v3198_v31 = vld [vmem:[%s4326_s1 + $0x8e0] ss:$24 sps:$4 sm:$0xff]  }
  0xd5   :  { %2126 = vmatprep.subr.bf16.mxu1 %v3113_v32  ;;  %v3203_v32 = vld [vmem:[%s4326_s1 + $0x8b4] ss:$24 sps:$4 sm:$0xff]  }
  0xd7   :  { %2084 = vmatpush1.bf16.msra.mxu0 %v3108_v33  ;;  %v3201_v33 = vld [vmem:[%s4326_s1 + $0x8b0] ss:$24 sps:$4 sm:$0xff]  }
  0xd8   :  { %2127 = vmatpush1.bf16.msra.mxu1 %v3111_v35  ;;  %2085 = vmatprep.subr.bf16.mxu0 %v3116_v36  ;;  %v3206_v35 = vld [vmem:[%s4326_s1 + $0x884] ss:$24 sps:$4 sm:$0xff]   ;;  %v3204_v36 = vld [vmem:[%s4326_s1 + $0x880] ss:$24 sps:$4 sm:$0xff]  }
  0xd9   :  { %2128 = vmatprep.subr.bf16.mxu1 %v3119_v37  ;;  %v3209_v37 = vld [vmem:[%s4326_s1 + $0x854] ss:$24 sps:$4 sm:$0xff]  }
  0xdb   :  { %2086 = vmatpush1.bf16.msra.mxu0 %v3114_v38  ;;  %v3207_v38 = vld [vmem:[%s4326_s1 + $0x850] ss:$24 sps:$4 sm:$0xff]  }
  0xdc   :  { %2129 = vmatpush1.bf16.msra.mxu1 %v3117_v39  ;;  %2087 = vmatprep.subr.bf16.mxu0 %v3122_v40  ;;  %v3212_v39 = vld [vmem:[%s4326_s1 + $0x824] ss:$24 sps:$4 sm:$0xff]   ;;  %v3210_v40 = vld [vmem:[%s4326_s1 + $0x820] ss:$24 sps:$4 sm:$0xff]  }
  0xdd   :  { %2130 = vmatprep.subr.bf16.mxu1 %v3125_v41  ;;  %v3215_v41 = vld [vmem:[%s4326_s1 + $0x7f4] ss:$24 sps:$4 sm:$0xff]  }
  0xdf   :  { %2088 = vmatpush1.bf16.msra.mxu0 %v3120_v42  ;;  %v3213_v42 = vld [vmem:[%s4326_s1 + $0x7f0] ss:$24 sps:$4 sm:$0xff]  }
  0xe0   :  { %2131 = vmatpush1.bf16.msra.mxu1 %v3123_v43  ;;  %2089 = vmatprep.subr.bf16.mxu0 %v3128_v44  ;;  %v3218_v43 = vld [vmem:[%s4326_s1 + $0x7c4] ss:$24 sps:$4 sm:$0xff]   ;;  %v3216_v44 = vld [vmem:[%s4326_s1 + $0x7c0] ss:$24 sps:$4 sm:$0xff]  }
  0xe1   :  { %2132 = vmatprep.subr.bf16.mxu1 %v3131_v45  ;;  %v3221_v45 = vld [vmem:[%s4326_s1 + $0x794] ss:$24 sps:$4 sm:$0xff]  }
  0xe3   :  { %2090 = vmatpush2.bf16.msra.mxu0 %v3126_v46  ;;  %v3219_v46 = vld [vmem:[%s4326_s1 + $0x790] ss:$24 sps:$4 sm:$0xff]  }
  0xe4   :  { %2133 = vmatpush2.bf16.msra.mxu1 %v3129_v47  ;;  %2091 = vmatprep.subr.bf16.mxu0 %v3134_v48 }
  0xe5   :  { %2134 = vmatprep.subr.bf16.mxu1 %v3137_v49 }
  0xe7   :  { %2092 = vmatpush2.bf16.msra.mxu0 %v3132_v51 }
  0xe8   :  { %2135 = vmatpush2.bf16.msra.mxu1 %v3135_v52  ;;  %2093 = vmatprep.subr.bf16.mxu0 %v3140_v53 }
  0xe9   :  { %2136 = vmatprep.subr.bf16.mxu1 %v3143_v54 }
  0xeb   :  { %2094 = vmatpush2.bf16.msra.mxu0 %v3138_v55 }
  0xec   :  { %2137 = vmatpush2.bf16.msra.mxu1 %v3141_v56  ;;  %2095 = vmatprep.subr.bf16.mxu0 %v3146_v57 }
  0xed   :  { %2138 = vmatprep.subr.bf16.mxu1 %v3149_v58 }
  0xef   :  { %2096 = vmatpush2.bf16.msra.mxu0 %v3144_v59 }
  0xf0   :  { %2139 = vmatpush2.bf16.msra.mxu1 %v3147_v60  ;;  %2097 = vmatprep.subr.bf16.mxu0 %v3152_v61 }
  0xf1   :  { %2140 = vmatprep.subr.bf16.mxu1 %v3155_v62 }
  0xf3   :  { %2098 = vmatpush2.bf16.msra.mxu0 %v3150_v63 }
  0xf4   :  { %2141 = vmatpush2.bf16.msra.mxu1 %v3153_v0  ;;  %2099 = vmatprep.subr.bf16.mxu0 %v3158_v1 }
  0xf5   :  { %2142 = vmatprep.subr.bf16.mxu1 %v3161_v2 }
  0xf7   :  { %2100 = vmatpush2.bf16.msra.mxu0 %v3156_v3 }
  0xf8   :  { %2143 = vmatpush2.bf16.msra.mxu1 %v3159_v6  ;;  %2101 = vmatprep.subr.bf16.mxu0 %v3164_v7 }
  0xf9   :  { %2144 = vmatprep.subr.bf16.mxu1 %v3167_v8 }
  0xfb   :  { %2102 = vmatpush2.bf16.msra.mxu0 %v3162_v9 }
  0xfc   :  { %2145 = vmatpush2.bf16.msra.mxu1 %v3165_v11  ;;  %2103 = vmatprep.subr.bf16.mxu0 %v3170_v12 }
  0xfd   :  { %2146 = vmatprep.subr.bf16.mxu1 %v3173_v13 }
  0xff   :  { %2104 = vmatpush2.bf16.msra.mxu0 %v3168_v14 }
 0x100   :  { %2147 = vmatpush2.bf16.msra.mxu1 %v3171_v15  ;;  %2159 = vmatprep.subr.bf16.mxu0 %v3176_v16 }
 0x102   :  { %2106 = vmatmul.mubr.bf16.vlgmr.msra.gmra.mxu0 %v3228_v18  ;;  %v1849_v47 = vpop.f32.mrf.mxu0 }
 0x103   :  { %2149 = vmatmul.mubr.bf16.vlgmr.msra.gmra.mxu1 %v3229_v19  ;;  %2160 = vmatpush1.bf16.msra.mxu0 %v3174_v17  ;;  %v1892_v48 = vpop.f32.mrf.mxu1 }
 0x104   :  { %2191 = vmatprep.mubr.bf16.mxu0 %v3571_v34  ;;  %2161 = vmatprep.subr.bf16.mxu0 %v3179_v4  ;;  %v3183_v34 = vld [vmem:[%s4326_s1 + $0x6d0] ss:$24 sps:$4 sm:$0xff]   ;;  %v1851_v49 = vpop.f32.mrf.mxu0  ;;  %v1893_v11 = vadd.f32 %v1892_v48, %v1849_v47  ;;  %v2241_v4 = vld [vmem:[%s4328_s2] sm:$0x3f] }
 0x105   :  { %v1894_v51 = vpop.f32.mrf.mxu1 }
 0x106   :  { %v1853_v52 = vpop.f32.mrf.mxu0  ;;  %v1895_v8 = vadd.f32 %v1894_v51, %v1851_v49  ;;  %v2292_v51 = vld [vmem:[%s4329_s3 + $0x38] sm:$0xff] }
 0x107   :  { %2162 = vmatpush1.bf16.msra.mxu0 %v3177_v5  ;;  %v1896_v53 = vpop.f32.mrf.mxu1 }
 0x108   :  { %2163 = vmatprep.subr.bf16.mxu0 %v3182_v20  ;;  %v1855_v54 = vpop.f32.mrf.mxu0 }
 0x109   :  { %v1898_v55 = vpop.f32.mrf.mxu1 }
 0x10a   :  { %v1899_v19 = vadd.f32 %v1898_v55, %v1855_v54 }
 0x10b   :  { %2164 = vmatpush1.bf16.msra.mxu0 %v3180_v50 }
 0x10c   :  { %2165 = vmatprep.subr.bf16.mxu0 %v3185_v21 }
 0x10f   :  { %2166 = vmatpush1.bf16.msra.mxu0 %v3183_v34  ;;  %v1897_v34 = vadd.f32 %v1896_v53, %v1853_v52 }
 0x110   :  { %2167 = vmatprep.subr.bf16.mxu0 %v3188_v22 }
 0x113   :  { %2168 = vmatpush1.bf16.msra.mxu0 %v3186_v23 }
 0x114   :  { %2169 = vmatprep.subr.bf16.mxu0 %v3191_v24 }
 0x117   :  { %2170 = vmatpush1.bf16.msra.mxu0 %v3189_v25 }
 0x118   :  { %2171 = vmatprep.subr.bf16.mxu0 %v3194_v26 }
 0x11b   :  { %2172 = vmatpush1.bf16.msra.mxu0 %v3192_v27 }
 0x11c   :  { %2173 = vmatprep.subr.bf16.mxu0 %v3197_v28 }
 0x11f   :  { %2174 = vmatpush1.bf16.msra.mxu0 %v3195_v29 }
 0x120   :  { %2175 = vmatprep.subr.bf16.mxu0 %v3200_v30 }
 0x123   :  { %2176 = vmatpush2.bf16.msra.mxu0 %v3198_v31 }
 0x124   :  { %2177 = vmatprep.subr.bf16.mxu0 %v3203_v32 }
 0x127   :  { %2178 = vmatpush2.bf16.msra.mxu0 %v3201_v33 }
 0x128   :  { %2179 = vmatprep.subr.bf16.mxu0 %v3206_v35 }
 0x12b   :  { %2180 = vmatpush2.bf16.msra.mxu0 %v3204_v36 }
 0x12c   :  { %2181 = vmatprep.subr.bf16.mxu0 %v3209_v37 }
 0x12f   :  { %2182 = vmatpush2.bf16.msra.mxu0 %v3207_v38  ;;  %v2286_v38 = vld [vmem:[%s4329_s3 + $0x8] sm:$0xff] }
 0x130   :  { %2183 = vmatprep.subr.bf16.mxu0 %v3212_v39 }
 0x133   :  { %2184 = vmatpush2.bf16.msra.mxu0 %v3210_v40 }
 0x134   :  { %2185 = vmatprep.subr.bf16.mxu0 %v3215_v41 }
 0x137   :  { %2186 = vmatpush2.bf16.msra.mxu0 %v3213_v42 }
 0x138   :  { %2187 = vmatprep.subr.bf16.mxu0 %v3218_v43  ;;  %v2285_v43 = vld [vmem:[%s4329_s3] sm:$0xff] }
 0x13b   :  { %2188 = vmatpush2.bf16.msra.mxu0 %v3216_v44  ;;  %v2287_v44 = vld [vmem:[%s4329_s3 + $0x10] sm:$0xff] }
 0x13c   :  { %2189 = vmatprep.subr.bf16.mxu0 %v3221_v45 }
 0x13f   :  { %2190 = vmatpush2.bf16.msra.mxu0 %v3219_v46 }
 0x142   :  { %2192 = vmatmul.mubr.bf16.vlgmr.msra.gmra.mxu0 %v3685_v10  ;;  %v1935_v56 = vpop.f32.mrf.mxu0  ;;  %v2243_v10 = vlaneseq }
 0x143   :  { %v1978_v57 = vpop.f32.mrf.mxu1  ;;  %v1936_v17 = vadd.f32 %v1935_v56, %v1893_v11 }
 0x144   :  { %v1937_v58 = vpop.f32.mrf.mxu0  ;;  %v2244_v7 = vshrl.u32 %v2243_v10, 7 }
 0x145   :  { %v1980_v59 = vpop.f32.mrf.mxu1  ;;  %v1938_v12 = vadd.f32 %v1937_v58, %v1895_v8 }
 0x146   :  { %v1939_v60 = vpop.f32.mrf.mxu0  ;;  %v4181_v15 = vsub.s32 0, %v2244_v7  ;;  %v4183_v16 = vsub.s32 1, %v2244_v7  ;;  %v4188_v18 = vsub.s32 2, %v2244_v7  ;;  %v4193_v28 = vsub.s32 3, %v2244_v7 }
 0x147   :  { %v1982_v61 = vpop.f32.mrf.mxu1  ;;  %v1940_v26 = vadd.f32 %v1939_v60, %v1897_v34  ;;  %v4207_v47 = vsub.s32 4, %v2244_v7  ;;  %v2288_v60 = vld [vmem:[%s4329_s3 + $0x18] sm:$0xff] }
 0x148   :  { %v1941_v62 = vpop.f32.mrf.mxu0  ;;  %v2246_v24 = vrot.slane %v2241_v4, %v4181_v15  ;;  %v2250_v25 = vrot.slane %v2241_v4, %v4183_v16  ;;  %v2254_v27 = vrot.slane %v2241_v4, %v4188_v18  ;;  %v2258_v36 = vrot.slane %v2241_v4, %v4193_v28 }
 0x149   :  { %v1984_v63 = vpop.f32.mrf.mxu1  ;;  %v1942_v22 = vadd.f32 %v1941_v62, %v1899_v19  ;;  %v2262_v10 = vrot.slane %v2241_v4, %v4207_v47  ;;  %v2294_v19 = vld [vmem:[%s4329_s3 + $0x48] sm:$0xff] }
 0x14a   :  { %v2274_v35 = vadd.f32 %v2250_v25, %v1938_v12  ;;  %v2273_v37 = vadd.f32 %v2246_v24, %v1936_v17  ;;  %v2279_v49 = vadd.f32 %v2246_v24, %v1940_v26  ;;  %v2290_v24 = vld [vmem:[%s4329_s3 + $0x28] sm:$0xff] }
 0x14b   :  { %v2280_v46 = vadd.f32 %v2250_v25, %v1942_v22 }
 0x14c   :  { %v4205_v45 = vadd.f32 %v2286_v38, %v2274_v35  ;;  %v2297_v48 = vadd.f32 %v2285_v43, %v2273_v37 }
 0x182   :  { %v2021_v0 = vpop.f32.mrf.mxu0 }
 0x183   :  { %v2064_v2 = vpop.f32.mrf.mxu1  ;;  %v2022_v9 = vadd.f32 %v2021_v0, %v1978_v57  ;;  %v2291_v57 = vld [vmem:[%s4329_s3 + $0x30] sm:$0xff]  ;;  %v2304_v0 = vadd.f32 %v2292_v51, %v2280_v46 }
 0x184   :  { %v2023_v1 = vpop.f32.mrf.mxu0 }
 0x185   :  { %v2066_v6 = vpop.f32.mrf.mxu1  ;;  %v2024_v5 = vadd.f32 %v2023_v1, %v1980_v59  ;;  %v2065_v20 = vadd.f32 %v2064_v2, %v2022_v9  ;;  %v4215_v59 = vsub.s32 5, %v2244_v7 }
 0x186   :  { %v2025_v3 = vpop.f32.mrf.mxu0 }
 0x187   :  { %v2068_v14 = vpop.f32.mrf.mxu1  ;;  %v2026_v50 = vadd.f32 %v2025_v3, %v1982_v61  ;;  %v2067_v29 = vadd.f32 %v2066_v6, %v2024_v5  ;;  %v2275_v42 = vadd.f32 %v2254_v27, %v2065_v20  ;;  %v2293_v61 = vld [vmem:[%s4329_s3 + $0x40] sm:$0xff]  ;;  %v2303_v3 = vadd.f32 %v2291_v57, %v2279_v49 }
 0x188   :  { %v2027_v13 = vpop.f32.mrf.mxu0  ;;  %v2266_v17 = vrot.slane %v2241_v4, %v4215_v59  ;;  %v2289_v20 = vld [vmem:[%s4329_s3 + $0x20] sm:$0xff] }
 0x189   :  { %v2070_v23 = vpop.f32.mrf.mxu1  ;;  %v2028_v30 = vadd.f32 %v2027_v13, %v1984_v63  ;;  %v2069_v31 = vadd.f32 %v2068_v14, %v2026_v50  ;;  %v2276_v54 = vadd.f32 %v2258_v36, %v2067_v29  ;;  %v2299_v55 = vadd.f32 %v2287_v44, %v2275_v42 }
 0x18a   :  { %v2309_v63 = vadd.f32 %v4205_v45, %v2297_v48  ;;  %v2316_v50 = vadd.f32 %v2304_v0, %v2303_v3 }
 0x18b   :  { %v2071_v39 = vadd.f32 %v2070_v23, %v2028_v30  ;;  %v2281_v56 = vadd.f32 %v2254_v27, %v2069_v31  ;;  %v2300_v8 = vadd.f32 %v2288_v60, %v2276_v54  ;;  %v2295_v31 = vld [vmem:[%s4329_s3 + $0x50] sm:$0xff] }
 0x18c   :  { %v2310_v9 = vadd.f32 %v2309_v63, %v2299_v55 }
 0x18d   :  { %v2282_v11 = vadd.f32 %v2258_v36, %v2071_v39  ;;  %v2305_v12 = vadd.f32 %v2293_v61, %v2281_v56  ;;  %v2296_v36 = vld [vmem:[%s4329_s3 + $0x58] sm:$0xff] }
 0x18e   :  { %v2311_v25 = vadd.f32 %v2310_v9, %v2300_v8 }
 0x18f   :  { %v2306_v4 = vadd.f32 %v2294_v19, %v2282_v11  ;;  %v2317_v26 = vadd.f32 %v2316_v50, %v2305_v12 }
 0x1c2   :  { %v2107_v21 = vpop.f32.mrf.mxu0 }
 0x1c3   :  { %v2150_v32 = vpop.f32.mrf.mxu1 }
 0x1c4   :  { %v2109_v33 = vpop.f32.mrf.mxu0  ;;  %v2151_v58 = vadd.f32 %v2150_v32, %v2107_v21 }
 0x1c5   :  { %v2152_v40 = vpop.f32.mrf.mxu1 }
 0x1c6   :  { %v2111_v41 = vpop.f32.mrf.mxu0  ;;  %v2153_v1 = vadd.f32 %v2152_v40, %v2109_v33  ;;  %v2318_v40 = vadd.f32 %v2317_v26, %v2306_v4 }
 0x1c7   :  { %v2154_v52 = vpop.f32.mrf.mxu1 }
 0x1c8   :  { %v2113_v53 = vpop.f32.mrf.mxu0  ;;  %v2155_v13 = vadd.f32 %v2154_v52, %v2111_v41 }
 0x1c9   :  { %v2156_v6 = vpop.f32.mrf.mxu1 }
 0x1ca   :  { %v2157_v21 = vadd.f32 %v2156_v6, %v2113_v53 }
 0x202   :  { %v2193_v62 = vpop.f32.mrf.mxu0 }
 0x203   :  { %v2194_v2 = vadd.f32 %v2193_v62, %v2151_v58 }
 0x204   :  { %v2195_v7 = vpop.f32.mrf.mxu0 }
 0x205   :  { %v2196_v14 = vadd.f32 %v2195_v7, %v2153_v1  ;;  %v2277_v22 = vadd.f32 %v2262_v10, %v2194_v2 }
 0x206   :  { %v2197_v5 = vpop.f32.mrf.mxu0 }
 0x207   :  { %v2198_v34 = vadd.f32 %v2197_v5, %v2155_v13  ;;  %v2278_v29 = vadd.f32 %v2266_v17, %v2196_v14  ;;  %v2301_v30 = vadd.f32 %v2289_v20, %v2277_v22 }
 0x208   :  { %v2199_v23 = vpop.f32.mrf.mxu0 }
 0x209   :  { %v2200_v27 = vadd.f32 %v2199_v23, %v2157_v21  ;;  %v2302_v32 = vadd.f32 %v2290_v24, %v2278_v29  ;;  %v2312_v33 = vadd.f32 %v2311_v25, %v2301_v30  ;;  %v2283_v35 = vadd.f32 %v2262_v10, %v2198_v34  ;;  %v2382_v29 = vld [vmem:[%s4330_s4] sm:$0x3f] }
 0x20b   :  { %v2313_v37 = vadd.f32 %v2312_v33, %v2302_v32  ;;  %v2284_v38 = vadd.f32 %v2266_v17, %v2200_v27  ;;  %v2307_v39 = vadd.f32 %v2295_v31, %v2283_v35  ;;  %v2387_v31 = vrot.slane %v2382_v29, %v4181_v15 }
 0x20c   :  { %v2395_v33 = vrot.slane %v2382_v29, %v4188_v18  ;;  %v2399_v35 = vrot.slane %v2382_v29, %v4193_v28 }
 0x20d   :  { %2314 = vadd.xlane.f32.xlu0 %v2313_v37  ;;  %v2308_v41 = vadd.f32 %v2296_v36, %v2284_v38  ;;  %v2319_v42 = vadd.f32 %v2318_v40, %v2307_v39  ;;  %v2403_v36 = vrot.slane %v2382_v29, %v4207_v47  ;;  %v2407_v37 = vrot.slane %v2382_v29, %v4215_v59 }
 0x20f   :  { %v2320_v43 = vadd.f32 %v2319_v42, %v2308_v41 }
 0x211   :  { %2321 = vadd.xlane.f32.xlu0 %v2320_v43 }
 0x296   :  { %v2315_v44 = vpop.xlane.xlu0 %2314 }
 0x297   :  { %v2324_v46 = vmul.f32 0.0013020834, %v2315_v44 }
 0x299   :  { %v2326_v49 = vsub.f32 %v2297_v48, %v2324_v46  ;;  %v2327_v51 = vsub.f32 %v4205_v45, %v2324_v46  ;;  %v2328_v52 = vsub.f32 %v2299_v55, %v2324_v46  ;;  %v2329_v54 = vsub.f32 %v2300_v8, %v2324_v46 }
 0x29a   :  { %v2322_v53 = vpop.xlane.xlu0 %2321  ;;  %v2330_v60 = vsub.f32 %v2301_v30, %v2324_v46  ;;  %v2331_v10 = vsub.f32 %v2302_v32, %v2324_v46  ;;  %v2426_v30 = vld [vmem:[%s4331_s5] sm:$0x3f]  ;;  %v2391_v32 = vrot.slane %v2382_v29, %v4183_v16 }
 0x29b   :  { %v2325_v56 = vmul.f32 0.0013020834, %v2322_v53  ;;  %v2338_v57 = vmul.f32 %v2326_v49, %v2326_v49  ;;  %v2339_v58 = vmul.f32 %v2327_v51, %v2327_v51  ;;  %v2340_v61 = vmul.f32 %v2328_v52, %v2328_v52 }
 0x29c   :  { %v2341_v6 = vmul.f32 %v2329_v54, %v2329_v54  ;;  %v2342_v8 = vmul.f32 %v2330_v60, %v2330_v60  ;;  %v2435_v40 = vrot.slane %v2426_v30, %v4183_v16  ;;  %v2443_v42 = vrot.slane %v2426_v30, %v4193_v28 }
 0x29d   :  { %v2350_v62 = vadd.f32 %v2339_v58, %v2338_v57  ;;  %v4242_v63 = vsub.f32 %v2303_v3, %v2325_v56  ;;  %v4244_v1 = vsub.f32 %v2304_v0, %v2325_v56  ;;  %v4246_v2 = vsub.f32 %v2305_v12, %v2325_v56 }
 0x29e   :  { %v4248_v7 = vsub.f32 %v2306_v4, %v2325_v56  ;;  %v4254_v11 = vsub.f32 %v2307_v39, %v2325_v56  ;;  %v2343_v12 = vmul.f32 %v2331_v10, %v2331_v10  ;;  %v4258_v14 = vsub.f32 %v2308_v41, %v2325_v56 }
 0x29f   :  { %v2351_v48 = vadd.f32 %v2350_v62, %v2340_v61  ;;  %v2344_v45 = vmul.f32 %v4242_v63, %v4242_v63  ;;  %v2345_v55 = vmul.f32 %v4244_v1, %v4244_v1  ;;  %v2346_v0 = vmul.f32 %v4246_v2, %v4246_v2 }
 0x2a0   :  { %v2347_v17 = vmul.f32 %v4248_v7, %v4248_v7  ;;  %v2348_v20 = vmul.f32 %v4254_v11, %v4254_v11  ;;  %v2349_v21 = vmul.f32 %v4258_v14, %v4258_v14  ;;  %v2431_v39 = vrot.slane %v2426_v30, %v4181_v15 }
 0x2a1   :  { %v2352_v9 = vadd.f32 %v2351_v48, %v2341_v6  ;;  %v2357_v3 = vadd.f32 %v2345_v55, %v2344_v45  ;;  %v2439_v41 = vrot.slane %v2426_v30, %v4188_v18  ;;  %v2447_v56 = vrot.slane %v2426_v30, %v4207_v47 }
 0x2a2   :  { %v2451_v57 = vrot.slane %v2426_v30, %v4215_v59 }
 0x2a3   :  { %v2353_v13 = vadd.f32 %v2352_v9, %v2342_v8  ;;  %v2358_v19 = vadd.f32 %v2357_v3, %v2346_v0 }
 0x2a5   :  { %v2354_v5 = vadd.f32 %v2353_v13, %v2343_v12  ;;  %v2359_v50 = vadd.f32 %v2358_v19, %v2347_v17 }
 0x2a7   :  { %2355 = vadd.xlane.f32.xlu1 %v2354_v5  ;;  %v2360_v34 = vadd.f32 %v2359_v50, %v2348_v20 }
 0x2a9   :  { %v2361_v22 = vadd.f32 %v2360_v34, %v2349_v21 }
 0x2ab   :  { %2362 = vadd.xlane.f32.xlu1 %v2361_v22 }
 0x330   :  { %v2356_v23 = vpop.xlane.xlu1 %2355 }
 0x331   :  { %v2364_v24 = vmul.f32 0.0013020834, %v2356_v23 }
 0x333   :  { %v2366_v25 = vadd.f32 1e-12, %v2364_v24 }
 0x334   :  { %v2363_v4 = vpop.xlane.xlu1 %2362 }
 0x335   :  { %3222 = vrsqrt.f32 %v2366_v25  ;;  %v2365_v26 = vmul.f32 0.0013020834, %v2363_v4 }
 0x337   :  { %v2367_v27 = vadd.f32 1e-12, %v2365_v26 }
 0x339   :  { %3224 = vrsqrt.f32 %v2367_v27 }
 0x342   :  { %v3223_v38 = vpop.eup %3222 }
 0x343   :  { %v2370_v43 = vmul.f32 %v3223_v38, %v2326_v49  ;;  %v2371_v44 = vmul.f32 %v3223_v38, %v2327_v51  ;;  %v2372_v46 = vmul.f32 %v3223_v38, %v2328_v52  ;;  %v2373_v53 = vmul.f32 %v3223_v38, %v2329_v54 }
 0x344   :  { %v2374_v58 = vmul.f32 %v3223_v38, %v2330_v60  ;;  %v2375_v61 = vmul.f32 %v3223_v38, %v2331_v10 }
 0x345   :  { %v2414_v62 = vmul.f32 %v2387_v31, %v2370_v43  ;;  %v2415_v6 = vmul.f32 %v2391_v32, %v2371_v44  ;;  %v2416_v48 = vmul.f32 %v2395_v33, %v2372_v46  ;;  %v2417_v15 = vmul.f32 %v2399_v35, %v2373_v53 }
 0x346   :  { %v3225_v45 = vpop.eup %3224  ;;  %v2418_v16 = vmul.f32 %v2403_v36, %v2374_v58  ;;  %v2419_v55 = vmul.f32 %v2407_v37, %v2375_v61 }
 0x347   :  { %v2458_v18 = vadd.f32 %v2431_v39, %v2414_v62  ;;  %v2459_v8 = vadd.f32 %v2435_v40, %v2415_v6  ;;  %v2460_v28 = vadd.f32 %v2439_v41, %v2416_v48  ;;  %v2461_v49 = vadd.f32 %v2443_v42, %v2417_v15 }
 0x348   :  { %v2462_v51 = vadd.f32 %v2447_v56, %v2418_v16  ;;  %v2463_v52 = vadd.f32 %v2451_v57, %v2419_v55  ;;  %v2376_v54 = vmul.f32 %v3225_v45, %v4242_v63  ;;  %v2377_v47 = vmul.f32 %v3225_v45, %v4244_v1 }
 0x349   :  { %2470 = vst [vmem:[%s4332_s6] sm:$0xff] %v2458_v18  ;;  %2471 = vst [vmem:[%s4332_s6 + $0x8] sm:$0xff] %v2459_v8  ;;  %v2378_v59 = vmul.f32 %v3225_v45, %v4246_v2  ;;  %v2379_v60 = vmul.f32 %v3225_v45, %v4248_v7  ;;  %v2380_v63 = vmul.f32 %v3225_v45, %v4254_v11 }
 0x34a   :  { %2472 = vst [vmem:[%s4332_s6 + $0x10] sm:$0xff] %v2460_v28  ;;  %2473 = vst [vmem:[%s4332_s6 + $0x18] sm:$0xff] %v2461_v49  ;;  %v2381_v1 = vmul.f32 %v3225_v45, %v4258_v14  ;;  %v2420_v10 = vmul.f32 %v2387_v31, %v2376_v54  ;;  %v2421_v9 = vmul.f32 %v2391_v32, %v2377_v47 }
 0x34b   :  { %2474 = vst [vmem:[%s4332_s6 + $0x20] sm:$0xff] %v2462_v51  ;;  %2475 = vst [vmem:[%s4332_s6 + $0x28] sm:$0xff] %v2463_v52  ;;  %v2422_v0 = vmul.f32 %v2395_v33, %v2378_v59  ;;  %v2423_v3 = vmul.f32 %v2399_v35, %v2379_v60  ;;  %v2424_v12 = vmul.f32 %v2403_v36, %v2380_v63 }
 0x34c   :  { %v2425_v2 = vmul.f32 %v2407_v37, %v2381_v1  ;;  %v2464_v13 = vadd.f32 %v2431_v39, %v2420_v10  ;;  %v2465_v7 = vadd.f32 %v2435_v40, %v2421_v9 }
 0x34d   :  { %v2466_v17 = vadd.f32 %v2439_v41, %v2422_v0  ;;  %v2467_v11 = vadd.f32 %v2443_v42, %v2423_v3  ;;  %v2468_v19 = vadd.f32 %v2447_v56, %v2424_v12 }
 0x34e   :  { %v2469_v14 = vadd.f32 %v2451_v57, %v2425_v2  ;;  %2476 = vst [vmem:[%s4332_s6 + $0x30] sm:$0xff] %v2464_v13  ;;  %2477 = vst [vmem:[%s4332_s6 + $0x38] sm:$0xff] %v2465_v7 }
 0x34f   :  { %2478 = vst [vmem:[%s4332_s6 + $0x40] sm:$0xff] %v2466_v17  ;;  %2479 = vst [vmem:[%s4332_s6 + $0x48] sm:$0xff] %v2467_v11 }
 0x350   :  { %2480 = vst [vmem:[%s4332_s6 + $0x50] sm:$0xff] %v2468_v19  ;;  %2481 = vst [vmem:[%s4332_s6 + $0x58] sm:$0xff] %v2469_v14 }

// kernel: bert_forward.18
= control target key start
LH: loop header
LB: loop body
LE: loop exit
PB: predicated region body
PF: predicated region fallthrough
CT: control target
= control target key end

     0   :  { %s3791_s21 = smov 0   ;;  %s3793_s22 = smov 0   ;;  %s4467_s0 = inlined_call_operand.vmem [shape: bf16[16,3072], index: 0, kind: input, shape index: {}]   ;;  %s4468_s1 = inlined_call_operand.vmem [shape: bf16[3072,768], index: 1, kind: input, shape index: {}]   ;;  %s4469_s2 = inlined_call_operand.vmem [shape: f32[1,768], index: 2, kind: input, shape index: {}]   ;;  %s4470_s3 = inlined_call_operand.vmem [shape: f32[16,768], index: 3, kind: input, shape index: {}]   ;;  %s4471_s4 = inlined_call_operand.vmem [shape: f32[1,768], index: 4, kind: input, shape index: {}]   ;;  %s4472_s5 = inlined_call_operand.vmem [shape: f32[1,768], index: 5, kind: input, shape index: {}]   ;;  %s4473_s6 = inlined_call_operand.vmem [shape: f32[16,768], index: 6, kind: output, shape index: {}]  }
   0x1   :  { %s3795_s23 = smov 0   ;;  %s3797_s24 = smov 0  }
   0x2   :  { %s3799_s25 = smov 0  }
   0x3 LB: > { %s25_s26 = sadd.s32 1, %s3749_s24  ;;  %p44_p1 = scmp.ne.s32.totalorder %s3741_s22, %s3737_s21  ;;  %s3753_s25 = sphi %s3799_s25, %s16_s25   ;;  %s3749_s24 = sphi %s3797_s24, %s4477_s24   ;;  %s3745_s23 = sphi %s3795_s23, %s4476_s23   ;;  %s3741_s22 = sphi %s3793_s22, %s4475_s22   ;;  %s3737_s21 = sphi %s3791_s21, %s4474_s21  }
   0x4   : > { %p26_p0 = scmp.ge.s32.totalorder %s25_s26, 4  ;;  %p45_p2 = scmp.eq.s32.totalorder %s3753_s25, 0 }
   0x5   : > { %s37_s28 = sadd.s32 1, %s3741_s22  ;;  %p2917_p5 = scmp.ge.s32.totalorder %s3753_s25, 4 }
   0x6   : > { %s4479_s26 = smov (%p26_p0, %s25_s26), 0  ;;  %p46_p3 = por %p45_p2, %p44_p1 }
   0x7   : > { %s33_s27 = ssub.s32 %s3749_s24, %s4479_s26  ;;  %230 = sbr.rel (%p2917_p5) target bundleno = 20 (0x14), region = 32 }
   0x8   : > { %p35_p4 = scmp.eq.s32.totalorder %s33_s27, 0 }
   0xa   : > { %s3826_s29 = scalar_select %p35_p4, %s3741_s22, %s37_s28  }
   0xc   : > { %233 = sbr.rel (!%p46_p3) target bundleno = 20 (0x14), region = 36  ;;  %s235_s30 = sand.u32 (%p46_p3), 1, %s3741_s22  }
   0xd   : > { %s3221_s7 = smul.u32 (%p46_p3), 24, %s3749_s24 }
   0xe   : > { %s3222_s8 = smul.u32 (%p46_p3), 48, %s235_s30 }
   0xf   : > { %s243_s11 = scalar_lea.vmem (%p46_p3), %s4467_s0, %s3221_s7 }
  0x10   : > { %v256_v0 = vld [vmem:[%s243_s11] sm:$0xff] (%p46_p3)  ;;  %v258_v1 = vld [vmem:[%s243_s11 + $0x8] sm:$0xff] (%p46_p3)  ;;  %v260_v2 = vld [vmem:[%s243_s11 + $0x10] sm:$0xff] (%p46_p3)  ;;  %s237_s12 = scalar_lea.vmem (%p46_p3), [#allocation2], %s3222_s8 }
  0x11   : > { %257 = vst [vmem:[%s237_s12] sm:$0xff] %v256_v0  ;;  %259 = vst [vmem:[%s237_s12 + $0x8] sm:$0xff] %v258_v1  ;;  %v262_v3 = vld [vmem:[%s243_s11 + $0x60] sm:$0xff]  ;;  %v264_v4 = vld [vmem:[%s243_s11 + $0x68] sm:$0xff] }
  0x12   : > { %261 = vst [vmem:[%s237_s12 + $0x10] sm:$0xff] %v260_v2  ;;  %v266_v5 = vld [vmem:[%s243_s11 + $0x70] sm:$0xff]  ;;  %263 = vst [vmem:[%s237_s12 + $0x18] sm:$0xff] %v262_v3 }
  0x13   : > { %265 = vst [vmem:[%s237_s12 + $0x20] sm:$0xff] %v264_v4  ;;  %267 = vst [vmem:[%s237_s12 + $0x28] sm:$0xff] %v266_v5 }
  0x14 PF: > { %p2919_p6 = scmp.ge.s32.totalorder %s3753_s25, 1  ;;  %p282_p7 = scmp.lt.s32.totalorder %s3753_s25, 5 }
  0x16   : > { %p283_p8 = pnand %p2919_p6, %p282_p7 }
  0x17   : > { %s289_s13 = sand.u32 (!%p283_p8), 1, %s3737_s21   ;;  %s333_s14 = smul.u32 (!%p283_p8), 96, %s3745_s23 }
  0x18   : > { %286 = sbr.rel (%p283_p8) target bundleno = 912 (0x390), region = 63  ;;  %p2921_p10 = scmp.ne.s32.totalorder (!%p283_p8), %s3745_s23, 0 }
  0x19   : > { %s3223_s15 = smul.u32 (!%p283_p8), 48, %s289_s13  ;;  %p334_p9 = scmp.lt.s32.totalorder (!%p283_p8), %s333_s14, 383 }
  0x1b   : > { %s3843_s20 = scalar_lea.vmem (!%p283_p8), [#allocation2], %s3223_s15 }
  0x1d   : > { %s4481_s14 = smov (!%p334_p9, %s333_s14), 383  ;;  %357 = sbr.rel (%p2921_p10) target bundleno = 41 (0x29), region = 71 }
  0x1e   : > { %s3224_s16 = smul.u32 24, %s4481_s14 }
  0x20   : > { %s3841_s19 = scalar_lea.vmem %s4468_s1, %s3224_s16 }
  0x22   : > { %v3755_v6 = vmov 0.0  }
  0x23   : > { %358 = vst [vmem:[%s4473_s6] sm:$0xff] %v3755_v6  ;;  %359 = vst [vmem:[%s4473_s6 + $0x8] sm:$0xff] %v3755_v6 }
  0x24   : > { %360 = vst [vmem:[%s4473_s6 + $0x10] sm:$0xff] %v3755_v6  ;;  %361 = vst [vmem:[%s4473_s6 + $0x18] sm:$0xff] %v3755_v6 }
  0x25   : > { %362 = vst [vmem:[%s4473_s6 + $0x20] sm:$0xff] %v3755_v6  ;;  %363 = vst [vmem:[%s4473_s6 + $0x28] sm:$0xff] %v3755_v6 }
  0x26   : > { %364 = vst [vmem:[%s4473_s6 + $0x30] sm:$0xff] %v3755_v6  ;;  %365 = vst [vmem:[%s4473_s6 + $0x38] sm:$0xff] %v3755_v6 }
  0x27   : > { %366 = vst [vmem:[%s4473_s6 + $0x40] sm:$0xff] %v3755_v6  ;;  %367 = vst [vmem:[%s4473_s6 + $0x48] sm:$0xff] %v3755_v6 }
  0x28   : > { %368 = vst [vmem:[%s4473_s6 + $0x50] sm:$0xff] %v3755_v6  ;;  %369 = vst [vmem:[%s4473_s6 + $0x58] sm:$0xff] %v3755_v6 }
  0x29 PF: > { %v3266_v7 = vld [vmem:[%s3841_s19 + $0x154] ss:$24 sps:$4 sm:$0xff]   ;;  %v3270_v9 = vld [vmem:[%s3841_s19 + $0x150] ss:$24 sps:$4 sm:$0xff]   ;;  %v3272_v11 = vld [vmem:[%s3841_s19 + $0x124] ss:$24 sps:$4 sm:$0xff]  }
  0x2a   : > { %v3268_v8 = vld [vmem:[%s3841_s19 + $0x454] ss:$24 sps:$4 sm:$0xff]   ;;  %2146 = vmatprep.subr.bf16.mxu0 %v3266_v7  ;;  %v3271_v10 = vld [vmem:[%s3841_s19 + $0x450] ss:$24 sps:$4 sm:$0xff]   ;;  %v3274_v12 = vld [vmem:[%s3841_s19 + $0x424] ss:$24 sps:$4 sm:$0xff]  }
  0x2b   : > { %2189 = vmatprep.subr.bf16.mxu1 %v3268_v8  ;;  %2147 = vmatpush1.bf16.msra.mxu0 %v3270_v9  ;;  %v3276_v13 = vld [vmem:[%s3841_s19 + $0x120] ss:$24 sps:$4 sm:$0xff]   ;;  %v3278_v15 = vld [vmem:[%s3841_s19 + $0xf4] ss:$24 sps:$4 sm:$0xff]   ;;  %v3282_v17 = vld [vmem:[%s3841_s19 + $0xf0] ss:$24 sps:$4 sm:$0xff]  }
  0x2c   : > { %2190 = vmatpush1.bf16.msra.mxu1 %v3271_v10  ;;  %2148 = vmatprep.subr.bf16.mxu0 %v3272_v11  ;;  %v3277_v14 = vld [vmem:[%s3841_s19 + $0x420] ss:$24 sps:$4 sm:$0xff]   ;;  %v3280_v16 = vld [vmem:[%s3841_s19 + $0x3f4] ss:$24 sps:$4 sm:$0xff]   ;;  %v3283_v18 = vld [vmem:[%s3841_s19 + $0x3f0] ss:$24 sps:$4 sm:$0xff]  }
  0x2d   : > { %2191 = vmatprep.subr.bf16.mxu1 %v3274_v12  ;;  %v3284_v19 = vld [vmem:[%s3841_s19 + $0xc4] ss:$24 sps:$4 sm:$0xff]   ;;  %v3288_v21 = vld [vmem:[%s3841_s19 + $0xc0] ss:$24 sps:$4 sm:$0xff]   ;;  %v3290_v23 = vld [vmem:[%s3841_s19 + $0x94] ss:$24 sps:$4 sm:$0xff]  }
  0x2e   : > { %v3286_v20 = vld [vmem:[%s3841_s19 + $0x3c4] ss:$24 sps:$4 sm:$0xff]   ;;  %v3289_v22 = vld [vmem:[%s3841_s19 + $0x3c0] ss:$24 sps:$4 sm:$0xff]   ;;  %v3292_v24 = vld [vmem:[%s3841_s19 + $0x394] ss:$24 sps:$4 sm:$0xff]  }
  0x2f   : > { %2149 = vmatpush1.bf16.msra.mxu0 %v3276_v13  ;;  %v3294_v25 = vld [vmem:[%s3841_s19 + $0x90] ss:$24 sps:$4 sm:$0xff]   ;;  %v3296_v27 = vld [vmem:[%s3841_s19 + $0x64] ss:$24 sps:$4 sm:$0xff]   ;;  %v3300_v29 = vld [vmem:[%s3841_s19 + $0x60] ss:$24 sps:$4 sm:$0xff]  }
  0x30   : > { %2192 = vmatpush1.bf16.msra.mxu1 %v3277_v14  ;;  %2150 = vmatprep.subr.bf16.mxu0 %v3278_v15  ;;  %v3295_v26 = vld [vmem:[%s3841_s19 + $0x390] ss:$24 sps:$4 sm:$0xff]   ;;  %v3298_v28 = vld [vmem:[%s3841_s19 + $0x364] ss:$24 sps:$4 sm:$0xff]   ;;  %v3301_v30 = vld [vmem:[%s3841_s19 + $0x360] ss:$24 sps:$4 sm:$0xff]  }
  0x31   : > { %2193 = vmatprep.subr.bf16.mxu1 %v3280_v16  ;;  %v3302_v31 = vld [vmem:[%s3841_s19 + $0x34] ss:$24 sps:$4 sm:$0xff]   ;;  %v3306_v33 = vld [vmem:[%s3841_s19 + $0x30] ss:$24 sps:$4 sm:$0xff]   ;;  %v3308_v35 = vld [vmem:[%s3841_s19 + $0x4] ss:$24 sps:$4 sm:$0xff]  }
  0x32   : > { %v3304_v32 = vld [vmem:[%s3841_s19 + $0x334] ss:$24 sps:$4 sm:$0xff]   ;;  %v3307_v34 = vld [vmem:[%s3841_s19 + $0x330] ss:$24 sps:$4 sm:$0xff]   ;;  %v3310_v36 = vld [vmem:[%s3841_s19 + $0x304] ss:$24 sps:$4 sm:$0xff]  }
  0x33   : > { %2151 = vmatpush1.bf16.msra.mxu0 %v3282_v17  ;;  %v3312_v37 = vld [vmem:[%s3841_s19] ss:$24 sps:$4 sm:$0xff]   ;;  %v3314_v39 = vld [vmem:[%s3841_s19 + $0x2d4] ss:$24 sps:$4 sm:$0xff]   ;;  %v3318_v41 = vld [vmem:[%s3841_s19 + $0x2d0] ss:$24 sps:$4 sm:$0xff]  }
  0x34   : > { %2194 = vmatpush1.bf16.msra.mxu1 %v3283_v18  ;;  %2152 = vmatprep.subr.bf16.mxu0 %v3284_v19  ;;  %v3313_v38 = vld [vmem:[%s3841_s19 + $0x300] ss:$24 sps:$4 sm:$0xff]   ;;  %v3316_v40 = vld [vmem:[%s3841_s19 + $0x5d4] ss:$24 sps:$4 sm:$0xff]   ;;  %v3319_v42 = vld [vmem:[%s3841_s19 + $0x5d0] ss:$24 sps:$4 sm:$0xff]  }
  0x35   : > { %2195 = vmatprep.subr.bf16.mxu1 %v3286_v20  ;;  %v3320_v43 = vld [vmem:[%s3841_s19 + $0x2a4] ss:$24 sps:$4 sm:$0xff]   ;;  %v3324_v45 = vld [vmem:[%s3841_s19 + $0x2a0] ss:$24 sps:$4 sm:$0xff]   ;;  %v3326_v47 = vld [vmem:[%s3841_s19 + $0x274] ss:$24 sps:$4 sm:$0xff]  }
  0x36   : > { %v3322_v44 = vld [vmem:[%s3841_s19 + $0x5a4] ss:$24 sps:$4 sm:$0xff]   ;;  %v3325_v46 = vld [vmem:[%s3841_s19 + $0x5a0] ss:$24 sps:$4 sm:$0xff]   ;;  %v3328_v48 = vld [vmem:[%s3841_s19 + $0x574] ss:$24 sps:$4 sm:$0xff]  }
  0x37   : > { %2153 = vmatpush1.bf16.msra.mxu0 %v3288_v21  ;;  %v3330_v49 = vld [vmem:[%s3841_s19 + $0x270] ss:$24 sps:$4 sm:$0xff]   ;;  %v3332_v51 = vld [vmem:[%s3841_s19 + $0x244] ss:$24 sps:$4 sm:$0xff]   ;;  %v3336_v53 = vld [vmem:[%s3841_s19 + $0x240] ss:$24 sps:$4 sm:$0xff]  }
  0x38   : > { %2196 = vmatpush1.bf16.msra.mxu1 %v3289_v22  ;;  %2154 = vmatprep.subr.bf16.mxu0 %v3290_v23  ;;  %v3331_v50 = vld [vmem:[%s3841_s19 + $0x570] ss:$24 sps:$4 sm:$0xff]   ;;  %v3334_v52 = vld [vmem:[%s3841_s19 + $0x544] ss:$24 sps:$4 sm:$0xff]   ;;  %v3337_v54 = vld [vmem:[%s3841_s19 + $0x540] ss:$24 sps:$4 sm:$0xff]  }
  0x39   : > { %2197 = vmatprep.subr.bf16.mxu1 %v3292_v24  ;;  %v3362_v55 = vld [vmem:[%s3843_s20 + $0x4] ss:$24 sps:$4 sm:$0xff]   ;;  %v3342_v59 = vld [vmem:[%s3841_s19 + $0x210] ss:$24 sps:$4 sm:$0xff]   ;;  %v3348_v63 = vld [vmem:[%s3841_s19 + $0x1e0] ss:$24 sps:$4 sm:$0xff]  }
  0x3a   : > { %v3338_v56 = vld [vmem:[%s3841_s19 + $0x214] ss:$24 sps:$4 sm:$0xff]   ;;  %2178 = vmatprep.mubr.bf16.mxu0 %v3362_v55  ;;  %v3343_v60 = vld [vmem:[%s3841_s19 + $0x510] ss:$24 sps:$4 sm:$0xff]   ;;  %v3344_v61 = vld [vmem:[%s3841_s19 + $0x1e4] ss:$24 sps:$4 sm:$0xff]  }
  0x3b   : > { %2155 = vmatpush1.bf16.msra.mxu0 %v3294_v25  ;;  %v3933_v57 = vld [vmem:[%s3843_s20 + $0xc] ss:$24 sps:$4 sm:$0xff]   ;;  %v3349_v0 = vld [vmem:[%s3841_s19 + $0x4e0] ss:$24 sps:$4 sm:$0xff]   ;;  %v3354_v3 = vld [vmem:[%s3841_s19 + $0x1b0] ss:$24 sps:$4 sm:$0xff]  }
  0x3c   : > { %2198 = vmatpush1.bf16.msra.mxu1 %v3295_v26  ;;  %2156 = vmatprep.subr.bf16.mxu0 %v3296_v27  ;;  %v3340_v58 = vld [vmem:[%s3841_s19 + $0x514] ss:$24 sps:$4 sm:$0xff]   ;;  %v3346_v62 = vld [vmem:[%s3841_s19 + $0x4e4] ss:$24 sps:$4 sm:$0xff]   ;;  %v3355_v4 = vld [vmem:[%s3841_s19 + $0x4b0] ss:$24 sps:$4 sm:$0xff]  }
  0x3d   : > { %2199 = vmatprep.subr.bf16.mxu1 %v3298_v28  ;;  %2221 = vmatprep.mubr.bf16.mxu1 %v3933_v57  ;;  %v3350_v1 = vld [vmem:[%s3841_s19 + $0x1b4] ss:$24 sps:$4 sm:$0xff]   ;;  %v3356_v5 = vld [vmem:[%s3841_s19 + $0x184] ss:$24 sps:$4 sm:$0xff]   ;;  %v3360_v7 = vld [vmem:[%s3841_s19 + $0x180] ss:$24 sps:$4 sm:$0xff]  }
  0x3e   : > { %v3352_v2 = vld [vmem:[%s3841_s19 + $0x4b4] ss:$24 sps:$4 sm:$0xff]   ;;  %v3358_v6 = vld [vmem:[%s3841_s19 + $0x484] ss:$24 sps:$4 sm:$0xff]   ;;  %v3361_v8 = vld [vmem:[%s3841_s19 + $0x480] ss:$24 sps:$4 sm:$0xff]  }
  0x3f   : > { %2157 = vmatpush1.bf16.msra.mxu0 %v3300_v29  ;;  %v3370_v9 = vld [vmem:[%s3841_s19 + $0x754] ss:$24 sps:$4 sm:$0xff]   ;;  %v3954_v11 = vld [vmem:[%s3843_s20] ss:$24 sps:$4 sm:$0xff]   ;;  %v3376_v15 = vld [vmem:[%s3841_s19 + $0x724] ss:$24 sps:$4 sm:$0xff]  }
  0x40   : > { %2200 = vmatpush1.bf16.msra.mxu1 %v3301_v30  ;;  %2158 = vmatprep.subr.bf16.mxu0 %v3302_v31  ;;  %v3373_v10 = vld [vmem:[%s3841_s19 + $0x15c] ss:$24 sps:$4 sm:$0xff]   ;;  %v3957_v12 = vld [vmem:[%s3843_s20 + $0x8] ss:$24 sps:$4 sm:$0xff]   ;;  %v3379_v16 = vld [vmem:[%s3841_s19 + $0x12c] ss:$24 sps:$4 sm:$0xff]  }
  0x41   : > { %2201 = vmatprep.subr.bf16.mxu1 %v3304_v32  ;;  %v3368_v13 = vld [vmem:[%s3841_s19 + $0x750] ss:$24 sps:$4 sm:$0xff]   ;;  %v3374_v17 = vld [vmem:[%s3841_s19 + $0x720] ss:$24 sps:$4 sm:$0xff]   ;;  %v3382_v19 = vld [vmem:[%s3841_s19 + $0x6f4] ss:$24 sps:$4 sm:$0xff]  }
  0x42   : > { %v3371_v14 = vld [vmem:[%s3841_s19 + $0x158] ss:$24 sps:$4 sm:$0xff]   ;;  %v3377_v18 = vld [vmem:[%s3841_s19 + $0x128] ss:$24 sps:$4 sm:$0xff]   ;;  %v3385_v20 = vld [vmem:[%s3841_s19 + $0xfc] ss:$24 sps:$4 sm:$0xff]  }
  0x43   : > { %2159 = vmatpush1.bf16.msra.mxu0 %v3306_v33  ;;  %v3380_v21 = vld [vmem:[%s3841_s19 + $0x6f0] ss:$24 sps:$4 sm:$0xff]   ;;  %v3388_v23 = vld [vmem:[%s3841_s19 + $0x6c4] ss:$24 sps:$4 sm:$0xff]   ;;  %v3386_v25 = vld [vmem:[%s3841_s19 + $0x6c0] ss:$24 sps:$4 sm:$0xff]  }
  0x44   : > { %2202 = vmatpush1.bf16.msra.mxu1 %v3307_v34  ;;  %2160 = vmatprep.subr.bf16.mxu0 %v3308_v35  ;;  %v3383_v22 = vld [vmem:[%s3841_s19 + $0xf8] ss:$24 sps:$4 sm:$0xff]   ;;  %v3391_v24 = vld [vmem:[%s3841_s19 + $0xcc] ss:$24 sps:$4 sm:$0xff]   ;;  %v3389_v26 = vld [vmem:[%s3841_s19 + $0xc8] ss:$24 sps:$4 sm:$0xff]  }
  0x45   : > { %2203 = vmatprep.subr.bf16.mxu1 %v3310_v36  ;;  %v3394_v27 = vld [vmem:[%s3841_s19 + $0x694] ss:$24 sps:$4 sm:$0xff]   ;;  %v3392_v29 = vld [vmem:[%s3841_s19 + $0x690] ss:$24 sps:$4 sm:$0xff]   ;;  %v3400_v31 = vld [vmem:[%s3841_s19 + $0x664] ss:$24 sps:$4 sm:$0xff]  }
  0x46   : > { %v3397_v28 = vld [vmem:[%s3841_s19 + $0x9c] ss:$24 sps:$4 sm:$0xff]   ;;  %v3395_v30 = vld [vmem:[%s3841_s19 + $0x98] ss:$24 sps:$4 sm:$0xff]   ;;  %v3403_v32 = vld [vmem:[%s3841_s19 + $0x6c] ss:$24 sps:$4 sm:$0xff]  }
  0x47   : > { %2161 = vmatpush1.bf16.msra.mxu0 %v3312_v37  ;;  %v3398_v33 = vld [vmem:[%s3841_s19 + $0x660] ss:$24 sps:$4 sm:$0xff]   ;;  %v3406_v35 = vld [vmem:[%s3841_s19 + $0x634] ss:$24 sps:$4 sm:$0xff]   ;;  %v3404_v37 = vld [vmem:[%s3841_s19 + $0x630] ss:$24 sps:$4 sm:$0xff]  }
  0x48   : > { %2204 = vmatpush1.bf16.msra.mxu1 %v3313_v38  ;;  %2162 = vmatprep.subr.bf16.mxu0 %v3314_v39  ;;  %v3401_v34 = vld [vmem:[%s3841_s19 + $0x68] ss:$24 sps:$4 sm:$0xff]   ;;  %v3409_v36 = vld [vmem:[%s3841_s19 + $0x3c] ss:$24 sps:$4 sm:$0xff]   ;;  %v3407_v38 = vld [vmem:[%s3841_s19 + $0x38] ss:$24 sps:$4 sm:$0xff]  }
  0x49   : > { %2205 = vmatprep.subr.bf16.mxu1 %v3316_v40  ;;  %v3412_v39 = vld [vmem:[%s3841_s19 + $0x604] ss:$24 sps:$4 sm:$0xff]   ;;  %p3216_p11 = scmp.ne.s32.totalorder %s3745_s23, 3 }
  0x4a   : > { %v3415_v40 = vld [vmem:[%s3841_s19 + $0xc] ss:$24 sps:$4 sm:$0xff]  }
  0x4b   : > { %2163 = vmatpush2.bf16.msra.mxu0 %v3318_v41  ;;  %v3990_v41 = vld [vmem:[%s3843_s20 + $0x14] ss:$24 sps:$4 sm:$0xff]  }
  0x4c   : > { %2206 = vmatpush2.bf16.msra.mxu1 %v3319_v42  ;;  %2164 = vmatprep.subr.bf16.mxu0 %v3320_v43  ;;  %v3410_v42 = vld [vmem:[%s3841_s19 + $0x600] ss:$24 sps:$4 sm:$0xff]  }
  0x4d   : > { %2207 = vmatprep.subr.bf16.mxu1 %v3322_v44  ;;  %v3413_v43 = vld [vmem:[%s3841_s19 + $0x8] ss:$24 sps:$4 sm:$0xff]   ;;  %v3418_v44 = vld [vmem:[%s3841_s19 + $0x8d4] ss:$24 sps:$4 sm:$0xff]  }
  0x4f   : > { %2165 = vmatpush2.bf16.msra.mxu0 %v3324_v45  ;;  %v3421_v45 = vld [vmem:[%s3841_s19 + $0x2dc] ss:$24 sps:$4 sm:$0xff]  }
  0x50   : > { %2208 = vmatpush2.bf16.msra.mxu1 %v3325_v46  ;;  %2166 = vmatprep.subr.bf16.mxu0 %v3326_v47  ;;  %v3416_v46 = vld [vmem:[%s3841_s19 + $0x8d0] ss:$24 sps:$4 sm:$0xff]  }
  0x51   : > { %2209 = vmatprep.subr.bf16.mxu1 %v3328_v48  ;;  %v3419_v47 = vld [vmem:[%s3841_s19 + $0x2d8] ss:$24 sps:$4 sm:$0xff]   ;;  %v3424_v48 = vld [vmem:[%s3841_s19 + $0x8a4] ss:$24 sps:$4 sm:$0xff]  }
  0x53   : > { %2167 = vmatpush2.bf16.msra.mxu0 %v3330_v49  ;;  %v3427_v49 = vld [vmem:[%s3841_s19 + $0x2ac] ss:$24 sps:$4 sm:$0xff]  }
  0x54   : > { %2210 = vmatpush2.bf16.msra.mxu1 %v3331_v50  ;;  %2168 = vmatprep.subr.bf16.mxu0 %v3332_v51  ;;  %v3422_v50 = vld [vmem:[%s3841_s19 + $0x8a0] ss:$24 sps:$4 sm:$0xff]  }
  0x55   : > { %2211 = vmatprep.subr.bf16.mxu1 %v3334_v52  ;;  %v3425_v51 = vld [vmem:[%s3841_s19 + $0x2a8] ss:$24 sps:$4 sm:$0xff]   ;;  %v3430_v52 = vld [vmem:[%s3841_s19 + $0x874] ss:$24 sps:$4 sm:$0xff]  }
  0x57   : > { %2169 = vmatpush2.bf16.msra.mxu0 %v3336_v53  ;;  %v3433_v53 = vld [vmem:[%s3841_s19 + $0x27c] ss:$24 sps:$4 sm:$0xff]  }
  0x58   : > { %2212 = vmatpush2.bf16.msra.mxu1 %v3337_v54  ;;  %2170 = vmatprep.subr.bf16.mxu0 %v3338_v56  ;;  %v3428_v54 = vld [vmem:[%s3841_s19 + $0x870] ss:$24 sps:$4 sm:$0xff]   ;;  %v3436_v56 = vld [vmem:[%s3841_s19 + $0x844] ss:$24 sps:$4 sm:$0xff]  }
  0x59   : > { %2213 = vmatprep.subr.bf16.mxu1 %v3340_v58  ;;  %v3439_v58 = vld [vmem:[%s3841_s19 + $0x24c] ss:$24 sps:$4 sm:$0xff]  }
  0x5b   : > { %2171 = vmatpush2.bf16.msra.mxu0 %v3342_v59  ;;  %v3434_v59 = vld [vmem:[%s3841_s19 + $0x840] ss:$24 sps:$4 sm:$0xff]  }
  0x5c   : > { %2214 = vmatpush2.bf16.msra.mxu1 %v3343_v60  ;;  %2172 = vmatprep.subr.bf16.mxu0 %v3344_v61  ;;  %v3437_v60 = vld [vmem:[%s3841_s19 + $0x248] ss:$24 sps:$4 sm:$0xff]   ;;  %v3442_v61 = vld [vmem:[%s3841_s19 + $0x814] ss:$24 sps:$4 sm:$0xff]  }
  0x5d   : > { %2215 = vmatprep.subr.bf16.mxu1 %v3346_v62  ;;  %v3445_v62 = vld [vmem:[%s3841_s19 + $0x21c] ss:$24 sps:$4 sm:$0xff]  }
  0x5f   : > { %2173 = vmatpush2.bf16.msra.mxu0 %v3348_v63  ;;  %v3440_v63 = vld [vmem:[%s3841_s19 + $0x810] ss:$24 sps:$4 sm:$0xff]  }
  0x60   : > { %2216 = vmatpush2.bf16.msra.mxu1 %v3349_v0  ;;  %2174 = vmatprep.subr.bf16.mxu0 %v3350_v1  ;;  %v3443_v0 = vld [vmem:[%s3841_s19 + $0x218] ss:$24 sps:$4 sm:$0xff]   ;;  %v3448_v1 = vld [vmem:[%s3841_s19 + $0x7e4] ss:$24 sps:$4 sm:$0xff]  }
  0x61   : > { %2217 = vmatprep.subr.bf16.mxu1 %v3352_v2  ;;  %v3451_v2 = vld [vmem:[%s3841_s19 + $0x1ec] ss:$24 sps:$4 sm:$0xff]  }
  0x63   : > { %2175 = vmatpush2.bf16.msra.mxu0 %v3354_v3  ;;  %v3446_v3 = vld [vmem:[%s3841_s19 + $0x7e0] ss:$24 sps:$4 sm:$0xff]  }
  0x64   : > { %2218 = vmatpush2.bf16.msra.mxu1 %v3355_v4  ;;  %2176 = vmatprep.subr.bf16.mxu0 %v3356_v5  ;;  %v3449_v4 = vld [vmem:[%s3841_s19 + $0x1e8] ss:$24 sps:$4 sm:$0xff]   ;;  %v3454_v5 = vld [vmem:[%s3841_s19 + $0x7b4] ss:$24 sps:$4 sm:$0xff]  }
  0x65   : > { %2219 = vmatprep.subr.bf16.mxu1 %v3358_v6  ;;  %v3457_v6 = vld [vmem:[%s3841_s19 + $0x1bc] ss:$24 sps:$4 sm:$0xff]  }
  0x67   : > { %2177 = vmatpush2.bf16.msra.mxu0 %v3360_v7  ;;  %v3452_v7 = vld [vmem:[%s3841_s19 + $0x7b0] ss:$24 sps:$4 sm:$0xff]  }
  0x68   : > { %2220 = vmatpush2.bf16.msra.mxu1 %v3361_v8  ;;  %2232 = vmatprep.subr.bf16.mxu0 %v3370_v9  ;;  %v3455_v8 = vld [vmem:[%s3841_s19 + $0x1b8] ss:$24 sps:$4 sm:$0xff]   ;;  %v3460_v9 = vld [vmem:[%s3841_s19 + $0x784] ss:$24 sps:$4 sm:$0xff]  }
  0x69   : > { %2275 = vmatprep.subr.bf16.mxu1 %v3373_v10  ;;  %v3463_v10 = vld [vmem:[%s3841_s19 + $0x18c] ss:$24 sps:$4 sm:$0xff]  }
  0x6a   : > { %2179 = vmatmul.mubr.bf16.vlgmr.msra.gmra.mxu0 %v3954_v11 }
  0x6b   : > { %2222 = vmatmul.mubr.bf16.vlgmr.msra.gmra.mxu1 %v3957_v12  ;;  %2233 = vmatpush1.bf16.msra.mxu0 %v3368_v13  ;;  %v3458_v13 = vld [vmem:[%s3841_s19 + $0x780] ss:$24 sps:$4 sm:$0xff]  }
  0x6c   : > { %2276 = vmatpush1.bf16.msra.mxu1 %v3371_v14  ;;  %2234 = vmatprep.subr.bf16.mxu0 %v3376_v15  ;;  %v3461_v14 = vld [vmem:[%s3841_s19 + $0x188] ss:$24 sps:$4 sm:$0xff]   ;;  %v3469_v15 = vld [vmem:[%s3841_s19 + $0x45c] ss:$24 sps:$4 sm:$0xff]  }
  0x6d   : > { %2277 = vmatprep.subr.bf16.mxu1 %v3379_v16  ;;  %2307 = vmatprep.mubr.bf16.mxu1 %v3362_v55  ;;  %v3431_v55 = vld [vmem:[%s3841_s19 + $0x278] ss:$24 sps:$4 sm:$0xff]   ;;  %v3472_v16 = vld [vmem:[%s3841_s19 + $0x75c] ss:$24 sps:$4 sm:$0xff]  }
  0x6e   : > { %2264 = vmatprep.mubr.bf16.mxu0 %v3990_v41 }
  0x6f   : > { %2235 = vmatpush1.bf16.msra.mxu0 %v3374_v17  ;;  %v4030_v17 = vld [vmem:[%s3843_s20 + $0x10] ss:$24 sps:$4 sm:$0xff]  }
  0x70   : > { %2278 = vmatpush1.bf16.msra.mxu1 %v3377_v18  ;;  %2236 = vmatprep.subr.bf16.mxu0 %v3382_v19  ;;  %v3467_v18 = vld [vmem:[%s3841_s19 + $0x458] ss:$24 sps:$4 sm:$0xff]  }
  0x71   : > { %2279 = vmatprep.subr.bf16.mxu1 %v3385_v20  ;;  %v3470_v19 = vld [vmem:[%s3841_s19 + $0x758] ss:$24 sps:$4 sm:$0xff]   ;;  %v3475_v20 = vld [vmem:[%s3841_s19 + $0x42c] ss:$24 sps:$4 sm:$0xff]  }
  0x73   : > { %2237 = vmatpush1.bf16.msra.mxu0 %v3380_v21  ;;  %v3478_v21 = vld [vmem:[%s3841_s19 + $0x72c] ss:$24 sps:$4 sm:$0xff]  }
  0x74   : > { %2280 = vmatpush1.bf16.msra.mxu1 %v3383_v22  ;;  %2238 = vmatprep.subr.bf16.mxu0 %v3388_v23  ;;  %v3473_v22 = vld [vmem:[%s3841_s19 + $0x428] ss:$24 sps:$4 sm:$0xff]  }
  0x75   : > { %2281 = vmatprep.subr.bf16.mxu1 %v3391_v24  ;;  %v3476_v23 = vld [vmem:[%s3841_s19 + $0x728] ss:$24 sps:$4 sm:$0xff]   ;;  %v3481_v24 = vld [vmem:[%s3841_s19 + $0x3fc] ss:$24 sps:$4 sm:$0xff]  }
  0x77   : > { %2239 = vmatpush1.bf16.msra.mxu0 %v3386_v25  ;;  %v3484_v25 = vld [vmem:[%s3841_s19 + $0x6fc] ss:$24 sps:$4 sm:$0xff]  }
  0x78   : > { %2282 = vmatpush1.bf16.msra.mxu1 %v3389_v26  ;;  %2240 = vmatprep.subr.bf16.mxu0 %v3394_v27  ;;  %v3479_v26 = vld [vmem:[%s3841_s19 + $0x3f8] ss:$24 sps:$4 sm:$0xff]   ;;  %v3487_v27 = vld [vmem:[%s3841_s19 + $0x3cc] ss:$24 sps:$4 sm:$0xff]  }
  0x79   : > { %2283 = vmatprep.subr.bf16.mxu1 %v3397_v28  ;;  %v3490_v28 = vld [vmem:[%s3841_s19 + $0x6cc] ss:$24 sps:$4 sm:$0xff]  }
  0x7b   : > { %2241 = vmatpush1.bf16.msra.mxu0 %v3392_v29  ;;  %v3485_v29 = vld [vmem:[%s3841_s19 + $0x3c8] ss:$24 sps:$4 sm:$0xff]  }
  0x7c   : > { %2284 = vmatpush1.bf16.msra.mxu1 %v3395_v30  ;;  %2242 = vmatprep.subr.bf16.mxu0 %v3400_v31  ;;  %v3488_v30 = vld [vmem:[%s3841_s19 + $0x6c8] ss:$24 sps:$4 sm:$0xff]   ;;  %v3496_v31 = vld [vmem:[%s3841_s19 + $0x69c] ss:$24 sps:$4 sm:$0xff]  }
  0x7d   : > { %2285 = vmatprep.subr.bf16.mxu1 %v3403_v32  ;;  %v3491_v32 = vld [vmem:[%s3841_s19 + $0x398] ss:$24 sps:$4 sm:$0xff]  }
  0x7f   : > { %2243 = vmatpush1.bf16.msra.mxu0 %v3398_v33  ;;  %v3494_v33 = vld [vmem:[%s3841_s19 + $0x698] ss:$24 sps:$4 sm:$0xff]  }
  0x80   : > { %2286 = vmatpush1.bf16.msra.mxu1 %v3401_v34  ;;  %2244 = vmatprep.subr.bf16.mxu0 %v3406_v35  ;;  %v3499_v34 = vld [vmem:[%s3841_s19 + $0x36c] ss:$24 sps:$4 sm:$0xff]  }
  0x81   : > { %2287 = vmatprep.subr.bf16.mxu1 %v3409_v36  ;;  %v3502_v35 = vld [vmem:[%s3841_s19 + $0x66c] ss:$24 sps:$4 sm:$0xff]   ;;  %v3497_v36 = vld [vmem:[%s3841_s19 + $0x368] ss:$24 sps:$4 sm:$0xff]  }
  0x83   : > { %2245 = vmatpush1.bf16.msra.mxu0 %v3404_v37  ;;  %v3500_v37 = vld [vmem:[%s3841_s19 + $0x668] ss:$24 sps:$4 sm:$0xff]  }
  0x84   : > { %2288 = vmatpush1.bf16.msra.mxu1 %v3407_v38  ;;  %2246 = vmatprep.subr.bf16.mxu0 %v3412_v39  ;;  %v3505_v38 = vld [vmem:[%s3841_s19 + $0x33c] ss:$24 sps:$4 sm:$0xff]  }
  0x85   : > { %2289 = vmatprep.subr.bf16.mxu1 %v3415_v40  ;;  %v3508_v39 = vld [vmem:[%s3841_s19 + $0x63c] ss:$24 sps:$4 sm:$0xff]   ;;  %v3503_v40 = vld [vmem:[%s3841_s19 + $0x338] ss:$24 sps:$4 sm:$0xff]  }
  0x87   : > { %2247 = vmatpush1.bf16.msra.mxu0 %v3410_v42  ;;  %v3506_v42 = vld [vmem:[%s3841_s19 + $0x638] ss:$24 sps:$4 sm:$0xff]  }
  0x88   : > { %2290 = vmatpush1.bf16.msra.mxu1 %v3413_v43  ;;  %2248 = vmatprep.subr.bf16.mxu0 %v3418_v44  ;;  %v3511_v43 = vld [vmem:[%s3841_s19 + $0x30c] ss:$24 sps:$4 sm:$0xff]  }
  0x89   : > { %2291 = vmatprep.subr.bf16.mxu1 %v3421_v45  ;;  %v3514_v44 = vld [vmem:[%s3841_s19 + $0x60c] ss:$24 sps:$4 sm:$0xff]   ;;  %v3509_v45 = vld [vmem:[%s3841_s19 + $0x308] ss:$24 sps:$4 sm:$0xff]  }
  0x8b   : > { %2249 = vmatpush2.bf16.msra.mxu0 %v3416_v46  ;;  %v3512_v46 = vld [vmem:[%s3841_s19 + $0x608] ss:$24 sps:$4 sm:$0xff]  }
  0x8c   : > { %2292 = vmatpush2.bf16.msra.mxu1 %v3419_v47  ;;  %2250 = vmatprep.subr.bf16.mxu0 %v3424_v48  ;;  %v3517_v47 = vld [vmem:[%s3841_s19 + $0x5dc] ss:$24 sps:$4 sm:$0xff]  }
  0x8d   : > { %2293 = vmatprep.subr.bf16.mxu1 %v3427_v49  ;;  %v3520_v48 = vld [vmem:[%s3841_s19 + $0x8dc] ss:$24 sps:$4 sm:$0xff]   ;;  %v3515_v49 = vld [vmem:[%s3841_s19 + $0x5d8] ss:$24 sps:$4 sm:$0xff]  }
  0x8f   : > { %2251 = vmatpush2.bf16.msra.mxu0 %v3422_v50  ;;  %v3518_v50 = vld [vmem:[%s3841_s19 + $0x8d8] ss:$24 sps:$4 sm:$0xff]  }
  0x90   : > { %2294 = vmatpush2.bf16.msra.mxu1 %v3425_v51  ;;  %2252 = vmatprep.subr.bf16.mxu0 %v3430_v52  ;;  %v3523_v51 = vld [vmem:[%s3841_s19 + $0x5ac] ss:$24 sps:$4 sm:$0xff]  }
  0x91   : > { %2295 = vmatprep.subr.bf16.mxu1 %v3433_v53  ;;  %v3526_v52 = vld [vmem:[%s3841_s19 + $0x8ac] ss:$24 sps:$4 sm:$0xff]   ;;  %v3521_v53 = vld [vmem:[%s3841_s19 + $0x5a8] ss:$24 sps:$4 sm:$0xff]  }
  0x93   : > { %2253 = vmatpush2.bf16.msra.mxu0 %v3428_v54  ;;  %v3524_v54 = vld [vmem:[%s3841_s19 + $0x8a8] ss:$24 sps:$4 sm:$0xff]  }
  0x94   : > { %2296 = vmatpush2.bf16.msra.mxu1 %v3431_v55  ;;  %2254 = vmatprep.subr.bf16.mxu0 %v3436_v56  ;;  %v3529_v55 = vld [vmem:[%s3841_s19 + $0x57c] ss:$24 sps:$4 sm:$0xff]  }
  0x95   : > { %2297 = vmatprep.subr.bf16.mxu1 %v3439_v58  ;;  %v3532_v56 = vld [vmem:[%s3841_s19 + $0x87c] ss:$24 sps:$4 sm:$0xff]   ;;  %v3527_v58 = vld [vmem:[%s3841_s19 + $0x578] ss:$24 sps:$4 sm:$0xff]  }
  0x97   : > { %2255 = vmatpush2.bf16.msra.mxu0 %v3434_v59  ;;  %v3530_v59 = vld [vmem:[%s3841_s19 + $0x878] ss:$24 sps:$4 sm:$0xff]  }
  0x98   : > { %2298 = vmatpush2.bf16.msra.mxu1 %v3437_v60  ;;  %2256 = vmatprep.subr.bf16.mxu0 %v3442_v61  ;;  %v3535_v60 = vld [vmem:[%s3841_s19 + $0x54c] ss:$24 sps:$4 sm:$0xff]  }
  0x99   : > { %2299 = vmatprep.subr.bf16.mxu1 %v3445_v62  ;;  %v3538_v61 = vld [vmem:[%s3841_s19 + $0x84c] ss:$24 sps:$4 sm:$0xff]   ;;  %v3533_v62 = vld [vmem:[%s3841_s19 + $0x548] ss:$24 sps:$4 sm:$0xff]  }
  0x9b   : > { %2257 = vmatpush2.bf16.msra.mxu0 %v3440_v63  ;;  %v3536_v63 = vld [vmem:[%s3841_s19 + $0x848] ss:$24 sps:$4 sm:$0xff]  }
  0x9c   : > { %2300 = vmatpush2.bf16.msra.mxu1 %v3443_v0  ;;  %2258 = vmatprep.subr.bf16.mxu0 %v3448_v1  ;;  %v3541_v0 = vld [vmem:[%s3841_s19 + $0x51c] ss:$24 sps:$4 sm:$0xff]  }
  0x9d   : > { %2301 = vmatprep.subr.bf16.mxu1 %v3451_v2  ;;  %v3544_v1 = vld [vmem:[%s3841_s19 + $0x81c] ss:$24 sps:$4 sm:$0xff]   ;;  %v3539_v2 = vld [vmem:[%s3841_s19 + $0x518] ss:$24 sps:$4 sm:$0xff]  }
  0x9f   : > { %2259 = vmatpush2.bf16.msra.mxu0 %v3446_v3  ;;  %v3542_v3 = vld [vmem:[%s3841_s19 + $0x818] ss:$24 sps:$4 sm:$0xff]  }
  0xa0   : > { %2302 = vmatpush2.bf16.msra.mxu1 %v3449_v4  ;;  %2260 = vmatprep.subr.bf16.mxu0 %v3454_v5  ;;  %v3547_v4 = vld [vmem:[%s3841_s19 + $0x4ec] ss:$24 sps:$4 sm:$0xff]  }
  0xa1   : > { %2303 = vmatprep.subr.bf16.mxu1 %v3457_v6  ;;  %v3550_v5 = vld [vmem:[%s3841_s19 + $0x7ec] ss:$24 sps:$4 sm:$0xff]   ;;  %v3545_v6 = vld [vmem:[%s3841_s19 + $0x4e8] ss:$24 sps:$4 sm:$0xff]  }
  0xa3   : > { %2261 = vmatpush2.bf16.msra.mxu0 %v3452_v7  ;;  %v3548_v7 = vld [vmem:[%s3841_s19 + $0x7e8] ss:$24 sps:$4 sm:$0xff]  }
  0xa4   : > { %2304 = vmatpush2.bf16.msra.mxu1 %v3455_v8  ;;  %2262 = vmatprep.subr.bf16.mxu0 %v3460_v9  ;;  %v3553_v8 = vld [vmem:[%s3841_s19 + $0x4bc] ss:$24 sps:$4 sm:$0xff]  }
  0xa5   : > { %2305 = vmatprep.subr.bf16.mxu1 %v3463_v10  ;;  %v3556_v9 = vld [vmem:[%s3841_s19 + $0x7bc] ss:$24 sps:$4 sm:$0xff]   ;;  %v3551_v10 = vld [vmem:[%s3841_s19 + $0x4b8] ss:$24 sps:$4 sm:$0xff]  }
  0xa7   : > { %2263 = vmatpush2.bf16.msra.mxu0 %v3458_v13  ;;  %v3554_v13 = vld [vmem:[%s3841_s19 + $0x7b8] ss:$24 sps:$4 sm:$0xff]  }
  0xa8   : > { %2306 = vmatpush2.bf16.msra.mxu1 %v3461_v14  ;;  %2318 = vmatprep.subr.bf16.mxu0 %v3469_v15  ;;  %v3559_v14 = vld [vmem:[%s3841_s19 + $0x48c] ss:$24 sps:$4 sm:$0xff]  }
  0xa9   : > { %2361 = vmatprep.subr.bf16.mxu1 %v3472_v16  ;;  %v3562_v15 = vld [vmem:[%s3841_s19 + $0x78c] ss:$24 sps:$4 sm:$0xff]   ;;  %v3557_v16 = vld [vmem:[%s3841_s19 + $0x488] ss:$24 sps:$4 sm:$0xff]  }
  0xaa   : > { %2265 = vmatmul.mubr.bf16.vlgmr.msra.gmra.mxu0 %v4030_v17 }
  0xab   : > { %2308 = vmatmul.mubr.bf16.vlgmr.msra.gmra.mxu1 %v3954_v11  ;;  %2319 = vmatpush1.bf16.msra.mxu0 %v3467_v18  ;;  %v3482_v11 = vld [vmem:[%s3841_s19 + $0x6f8] ss:$24 sps:$4 sm:$0xff]   ;;  %v3560_v18 = vld [vmem:[%s3841_s19 + $0x788] ss:$24 sps:$4 sm:$0xff]  }
  0xac   : > { %2362 = vmatpush1.bf16.msra.mxu1 %v3470_v19  ;;  %2320 = vmatprep.subr.bf16.mxu0 %v3475_v20  ;;  %v3565_v19 = vld [vmem:[%s3841_s19 + $0x164] ss:$24 sps:$4 sm:$0xff]  }
  0xad   : > { %2363 = vmatprep.subr.bf16.mxu1 %v3478_v21  ;;  %2350 = vmatprep.mubr.bf16.mxu0 %v3933_v57  ;;  %v3493_v57 = vld [vmem:[%s3841_s19 + $0x39c] ss:$24 sps:$4 sm:$0xff]   ;;  %v3563_v21 = vld [vmem:[%s3841_s19 + $0x160] ss:$24 sps:$4 sm:$0xff]  }
  0xae   : > { %2393 = vmatprep.mubr.bf16.mxu1 %v3990_v41  ;;  %v3568_v20 = vld [vmem:[%s3841_s19 + $0x464] ss:$24 sps:$4 sm:$0xff]  }
  0xaf   : > { %2321 = vmatpush1.bf16.msra.mxu0 %v3473_v22  ;;  %v3566_v22 = vld [vmem:[%s3841_s19 + $0x460] ss:$24 sps:$4 sm:$0xff]  }
  0xb0   : > { %2364 = vmatpush1.bf16.msra.mxu1 %v3476_v23  ;;  %2322 = vmatprep.subr.bf16.mxu0 %v3481_v24  ;;  %v3571_v23 = vld [vmem:[%s3841_s19 + $0x134] ss:$24 sps:$4 sm:$0xff]  }
  0xb1   : > { %2365 = vmatprep.subr.bf16.mxu1 %v3484_v25  ;;  %v3574_v24 = vld [vmem:[%s3841_s19 + $0x434] ss:$24 sps:$4 sm:$0xff]   ;;  %v3569_v25 = vld [vmem:[%s3841_s19 + $0x130] ss:$24 sps:$4 sm:$0xff]  }
  0xb3   : > { %2323 = vmatpush1.bf16.msra.mxu0 %v3479_v26  ;;  %v3572_v26 = vld [vmem:[%s3841_s19 + $0x430] ss:$24 sps:$4 sm:$0xff]  }
  0xb4   : > { %2366 = vmatpush1.bf16.msra.mxu1 %v3482_v11  ;;  %2324 = vmatprep.subr.bf16.mxu0 %v3487_v27  ;;  %v3577_v11 = vld [vmem:[%s3841_s19 + $0x104] ss:$24 sps:$4 sm:$0xff]  }
  0xb5   : > { %2367 = vmatprep.subr.bf16.mxu1 %v3490_v28  ;;  %v3580_v27 = vld [vmem:[%s3841_s19 + $0x404] ss:$24 sps:$4 sm:$0xff]  }
  0xb6   : > { %v3707_v28 = vld [vmem:[%s3843_s20 + $0x4] ss:$24 sps:$4 sm:$0xff]  }
  0xb7   : > { %2325 = vmatpush1.bf16.msra.mxu0 %v3485_v29  ;;  %v3708_v29 = vld [vmem:[%s3843_s20 + $0xc] ss:$24 sps:$4 sm:$0xff]  }
  0xb8   : > { %2368 = vmatpush1.bf16.msra.mxu1 %v3488_v30  ;;  %2326 = vmatprep.subr.bf16.mxu0 %v3493_v57  ;;  %v3578_v30 = vld [vmem:[%s3841_s19 + $0x400] ss:$24 sps:$4 sm:$0xff]   ;;  %v3583_v57 = vld [vmem:[%s3841_s19 + $0xd4] ss:$24 sps:$4 sm:$0xff]  }
  0xb9   : > { %2369 = vmatprep.subr.bf16.mxu1 %v3496_v31  ;;  %v3586_v31 = vld [vmem:[%s3841_s19 + $0x3d4] ss:$24 sps:$4 sm:$0xff]  }
  0xbb   : > { %2327 = vmatpush1.bf16.msra.mxu0 %v3491_v32  ;;  %v3581_v32 = vld [vmem:[%s3841_s19 + $0xd0] ss:$24 sps:$4 sm:$0xff]  }
  0xbc   : > { %2370 = vmatpush1.bf16.msra.mxu1 %v3494_v33  ;;  %2328 = vmatprep.subr.bf16.mxu0 %v3499_v34  ;;  %v3584_v33 = vld [vmem:[%s3841_s19 + $0x3d0] ss:$24 sps:$4 sm:$0xff]   ;;  %v3589_v34 = vld [vmem:[%s3841_s19 + $0xa4] ss:$24 sps:$4 sm:$0xff]  }
  0xbd   : > { %2371 = vmatprep.subr.bf16.mxu1 %v3502_v35  ;;  %v3592_v35 = vld [vmem:[%s3841_s19 + $0x3a4] ss:$24 sps:$4 sm:$0xff]  }
  0xbf   : > { %2329 = vmatpush1.bf16.msra.mxu0 %v3497_v36  ;;  %v3587_v36 = vld [vmem:[%s3841_s19 + $0xa0] ss:$24 sps:$4 sm:$0xff]  }
  0xc0   : > { %2372 = vmatpush1.bf16.msra.mxu1 %v3500_v37  ;;  %2330 = vmatprep.subr.bf16.mxu0 %v3505_v38  ;;  %v3590_v37 = vld [vmem:[%s3841_s19 + $0x3a0] ss:$24 sps:$4 sm:$0xff]   ;;  %v3595_v38 = vld [vmem:[%s3841_s19 + $0x74] ss:$24 sps:$4 sm:$0xff]  }
  0xc1   : > { %2373 = vmatprep.subr.bf16.mxu1 %v3508_v39  ;;  %v3598_v39 = vld [vmem:[%s3841_s19 + $0x374] ss:$24 sps:$4 sm:$0xff]  }
  0xc3   : > { %2331 = vmatpush1.bf16.msra.mxu0 %v3503_v40  ;;  %v3593_v40 = vld [vmem:[%s3841_s19 + $0x70] ss:$24 sps:$4 sm:$0xff]  }
  0xc4   : > { %2374 = vmatpush1.bf16.msra.mxu1 %v3506_v42  ;;  %2332 = vmatprep.subr.bf16.mxu0 %v3511_v43  ;;  %v3596_v42 = vld [vmem:[%s3841_s19 + $0x370] ss:$24 sps:$4 sm:$0xff]   ;;  %v3601_v43 = vld [vmem:[%s3841_s19 + $0x44] ss:$24 sps:$4 sm:$0xff]  }
  0xc5   : > { %2375 = vmatprep.subr.bf16.mxu1 %v3514_v44  ;;  %v3604_v44 = vld [vmem:[%s3841_s19 + $0x344] ss:$24 sps:$4 sm:$0xff]  }
  0xc7   : > { %2333 = vmatpush1.bf16.msra.mxu0 %v3509_v45  ;;  %v3599_v45 = vld [vmem:[%s3841_s19 + $0x40] ss:$24 sps:$4 sm:$0xff]  }
  0xc8   : > { %2376 = vmatpush1.bf16.msra.mxu1 %v3512_v46  ;;  %2334 = vmatprep.subr.bf16.mxu0 %v3517_v47  ;;  %v3602_v46 = vld [vmem:[%s3841_s19 + $0x340] ss:$24 sps:$4 sm:$0xff]   ;;  %v3607_v47 = vld [vmem:[%s3841_s19 + $0x14] ss:$24 sps:$4 sm:$0xff]  }
  0xc9   : > { %2377 = vmatprep.subr.bf16.mxu1 %v3520_v48  ;;  %v3610_v48 = vld [vmem:[%s3841_s19 + $0x314] ss:$24 sps:$4 sm:$0xff]  }
  0xcb   : > { %2335 = vmatpush2.bf16.msra.mxu0 %v3515_v49  ;;  %v3605_v49 = vld [vmem:[%s3841_s19 + $0x10] ss:$24 sps:$4 sm:$0xff]  }
  0xcc   : > { %2378 = vmatpush2.bf16.msra.mxu1 %v3518_v50  ;;  %2336 = vmatprep.subr.bf16.mxu0 %v3523_v51  ;;  %v3608_v50 = vld [vmem:[%s3841_s19 + $0x310] ss:$24 sps:$4 sm:$0xff]   ;;  %v3613_v51 = vld [vmem:[%s3841_s19 + $0x2e4] ss:$24 sps:$4 sm:$0xff]  }
  0xcd   : > { %2379 = vmatprep.subr.bf16.mxu1 %v3526_v52  ;;  %v3616_v52 = vld [vmem:[%s3841_s19 + $0x5e4] ss:$24 sps:$4 sm:$0xff]  }
  0xcf   : > { %2337 = vmatpush2.bf16.msra.mxu0 %v3521_v53  ;;  %v3611_v53 = vld [vmem:[%s3841_s19 + $0x2e0] ss:$24 sps:$4 sm:$0xff]  }
  0xd0   : > { %2380 = vmatpush2.bf16.msra.mxu1 %v3524_v54  ;;  %2338 = vmatprep.subr.bf16.mxu0 %v3529_v55  ;;  %v3614_v54 = vld [vmem:[%s3841_s19 + $0x5e0] ss:$24 sps:$4 sm:$0xff]   ;;  %v3619_v55 = vld [vmem:[%s3841_s19 + $0x2b4] ss:$24 sps:$4 sm:$0xff]  }
  0xd1   : > { %2381 = vmatprep.subr.bf16.mxu1 %v3532_v56  ;;  %v3622_v56 = vld [vmem:[%s3841_s19 + $0x5b4] ss:$24 sps:$4 sm:$0xff]  }
  0xd3   : > { %2339 = vmatpush2.bf16.msra.mxu0 %v3527_v58  ;;  %v3617_v58 = vld [vmem:[%s3841_s19 + $0x2b0] ss:$24 sps:$4 sm:$0xff]  }
  0xd4   : > { %2382 = vmatpush2.bf16.msra.mxu1 %v3530_v59  ;;  %2340 = vmatprep.subr.bf16.mxu0 %v3535_v60  ;;  %v3620_v59 = vld [vmem:[%s3841_s19 + $0x5b0] ss:$24 sps:$4 sm:$0xff]   ;;  %v3625_v60 = vld [vmem:[%s3841_s19 + $0x284] ss:$24 sps:$4 sm:$0xff]  }
  0xd5   : > { %2383 = vmatprep.subr.bf16.mxu1 %v3538_v61  ;;  %v3628_v61 = vld [vmem:[%s3841_s19 + $0x584] ss:$24 sps:$4 sm:$0xff]  }
  0xd7   : > { %2341 = vmatpush2.bf16.msra.mxu0 %v3533_v62  ;;  %v3623_v62 = vld [vmem:[%s3841_s19 + $0x280] ss:$24 sps:$4 sm:$0xff]  }
  0xd8   : > { %2384 = vmatpush2.bf16.msra.mxu1 %v3536_v63  ;;  %2342 = vmatprep.subr.bf16.mxu0 %v3541_v0  ;;  %v3626_v63 = vld [vmem:[%s3841_s19 + $0x580] ss:$24 sps:$4 sm:$0xff]   ;;  %v3631_v0 = vld [vmem:[%s3841_s19 + $0x254] ss:$24 sps:$4 sm:$0xff]  }
  0xd9   : > { %2385 = vmatprep.subr.bf16.mxu1 %v3544_v1  ;;  %v3634_v1 = vld [vmem:[%s3841_s19 + $0x554] ss:$24 sps:$4 sm:$0xff]  }
  0xdb   : > { %2343 = vmatpush2.bf16.msra.mxu0 %v3539_v2  ;;  %v3629_v2 = vld [vmem:[%s3841_s19 + $0x250] ss:$24 sps:$4 sm:$0xff]  }
  0xdc   : > { %2386 = vmatpush2.bf16.msra.mxu1 %v3542_v3  ;;  %2344 = vmatprep.subr.bf16.mxu0 %v3547_v4  ;;  %v3632_v3 = vld [vmem:[%s3841_s19 + $0x550] ss:$24 sps:$4 sm:$0xff]   ;;  %v3637_v4 = vld [vmem:[%s3841_s19 + $0x224] ss:$24 sps:$4 sm:$0xff]  }
  0xdd   : > { %2387 = vmatprep.subr.bf16.mxu1 %v3550_v5  ;;  %v3640_v5 = vld [vmem:[%s3841_s19 + $0x524] ss:$24 sps:$4 sm:$0xff]  }
  0xdf   : > { %2345 = vmatpush2.bf16.msra.mxu0 %v3545_v6  ;;  %v3635_v6 = vld [vmem:[%s3841_s19 + $0x220] ss:$24 sps:$4 sm:$0xff]  }
  0xe0   : > { %2388 = vmatpush2.bf16.msra.mxu1 %v3548_v7  ;;  %2346 = vmatprep.subr.bf16.mxu0 %v3553_v8  ;;  %v3638_v7 = vld [vmem:[%s3841_s19 + $0x520] ss:$24 sps:$4 sm:$0xff]   ;;  %v3643_v8 = vld [vmem:[%s3841_s19 + $0x1f4] ss:$24 sps:$4 sm:$0xff]  }
  0xe1   : > { %2389 = vmatprep.subr.bf16.mxu1 %v3556_v9  ;;  %v3646_v9 = vld [vmem:[%s3841_s19 + $0x4f4] ss:$24 sps:$4 sm:$0xff]  }
  0xe3   : > { %2347 = vmatpush2.bf16.msra.mxu0 %v3551_v10  ;;  %v3641_v10 = vld [vmem:[%s3841_s19 + $0x1f0] ss:$24 sps:$4 sm:$0xff]  }
  0xe4   : > { %2390 = vmatpush2.bf16.msra.mxu1 %v3554_v13  ;;  %2348 = vmatprep.subr.bf16.mxu0 %v3559_v14  ;;  %v3644_v13 = vld [vmem:[%s3841_s19 + $0x4f0] ss:$24 sps:$4 sm:$0xff]   ;;  %v3649_v14 = vld [vmem:[%s3841_s19 + $0x1c4] ss:$24 sps:$4 sm:$0xff]  }
  0xe5   : > { %2391 = vmatprep.subr.bf16.mxu1 %v3562_v15  ;;  %v3652_v15 = vld [vmem:[%s3841_s19 + $0x4c4] ss:$24 sps:$4 sm:$0xff]  }
  0xe7   : > { %2349 = vmatpush2.bf16.msra.mxu0 %v3557_v16  ;;  %v3647_v16 = vld [vmem:[%s3841_s19 + $0x1c0] ss:$24 sps:$4 sm:$0xff]  }
  0xe8   : > { %2392 = vmatpush2.bf16.msra.mxu1 %v3560_v18  ;;  %2404 = vmatprep.subr.bf16.mxu0 %v3565_v19  ;;  %v3650_v18 = vld [vmem:[%s3841_s19 + $0x4c0] ss:$24 sps:$4 sm:$0xff]   ;;  %v3655_v19 = vld [vmem:[%s3841_s19 + $0x194] ss:$24 sps:$4 sm:$0xff]  }
  0xe9   : > { %2447 = vmatprep.subr.bf16.mxu1 %v3568_v20  ;;  %v3658_v20 = vld [vmem:[%s3841_s19 + $0x494] ss:$24 sps:$4 sm:$0xff]  }
  0xea   : > { %2351 = vmatmul.mubr.bf16.vlgmr.msra.gmra.mxu0 %v3957_v12  ;;  %v3575_v12 = vld [vmem:[%s3841_s19 + $0x100] ss:$24 sps:$4 sm:$0xff]  }
  0xeb   : > { %2394 = vmatmul.mubr.bf16.vlgmr.msra.gmra.mxu1 %v4030_v17  ;;  %2405 = vmatpush1.bf16.msra.mxu0 %v3563_v21  ;;  %v3653_v21 = vld [vmem:[%s3841_s19 + $0x190] ss:$24 sps:$4 sm:$0xff]  }
  0xec   : > { %2448 = vmatpush1.bf16.msra.mxu1 %v3566_v22  ;;  %2406 = vmatprep.subr.bf16.mxu0 %v3571_v23  ;;  %v3656_v22 = vld [vmem:[%s3841_s19 + $0x490] ss:$24 sps:$4 sm:$0xff]   ;;  %v3661_v23 = vld [vmem:[%s3841_s19 + $0x764] ss:$24 sps:$4 sm:$0xff]  }
  0xed   : > { %2449 = vmatprep.subr.bf16.mxu1 %v3574_v24  ;;  %2436 = vmatprep.mubr.bf16.mxu0 %v3707_v28  ;;  %v3659_v24 = vld [vmem:[%s3841_s19 + $0x760] ss:$24 sps:$4 sm:$0xff]   ;;  %v3667_v28 = vld [vmem:[%s3841_s19 + $0x704] ss:$24 sps:$4 sm:$0xff]  }
  0xee   : > { %2479 = vmatprep.mubr.bf16.mxu1 %v3708_v29  ;;  %v3665_v29 = vld [vmem:[%s3841_s19 + $0x700] ss:$24 sps:$4 sm:$0xff]  }
  0xef   : > { %2407 = vmatpush1.bf16.msra.mxu0 %v3569_v25  ;;  %v3664_v25 = vld [vmem:[%s3841_s19 + $0x734] ss:$24 sps:$4 sm:$0xff]  }
  0xf0   : > { %2450 = vmatpush1.bf16.msra.mxu1 %v3572_v26  ;;  %2408 = vmatprep.subr.bf16.mxu0 %v3577_v11  ;;  %v3709_v26 = vld [vmem:[%s3843_s20] ss:$24 sps:$4 sm:$0xff]  }
  0xf1   : > { %2451 = vmatprep.subr.bf16.mxu1 %v3580_v27  ;;  %v3710_v11 = vld [vmem:[%s3843_s20 + $0x8] ss:$24 sps:$4 sm:$0xff]  }
  0xf2   : > { %v3662_v27 = vld [vmem:[%s3841_s19 + $0x730] ss:$24 sps:$4 sm:$0xff]  }
  0xf3   : > { %2409 = vmatpush1.bf16.msra.mxu0 %v3575_v12  ;;  %v3670_v12 = vld [vmem:[%s3841_s19 + $0x6d4] ss:$24 sps:$4 sm:$0xff]  }
  0xf4   : > { %2452 = vmatpush1.bf16.msra.mxu1 %v3578_v30  ;;  %2410 = vmatprep.subr.bf16.mxu0 %v3583_v57  ;;  %v3668_v30 = vld [vmem:[%s3841_s19 + $0x6d0] ss:$24 sps:$4 sm:$0xff]   ;;  %v3673_v57 = vld [vmem:[%s3841_s19 + $0x6a4] ss:$24 sps:$4 sm:$0xff]  }
  0xf5   : > { %2453 = vmatprep.subr.bf16.mxu1 %v3586_v31  ;;  %v3671_v31 = vld [vmem:[%s3841_s19 + $0x6a0] ss:$24 sps:$4 sm:$0xff]  }
  0xf7   : > { %2411 = vmatpush1.bf16.msra.mxu0 %v3581_v32  ;;  %v3674_v32 = vld [vmem:[%s3841_s19 + $0x670] ss:$24 sps:$4 sm:$0xff]  }
  0xf8   : > { %2454 = vmatpush1.bf16.msra.mxu1 %v3584_v33  ;;  %2412 = vmatprep.subr.bf16.mxu0 %v3589_v34  ;;  %v3679_v33 = vld [vmem:[%s3841_s19 + $0x644] ss:$24 sps:$4 sm:$0xff]   ;;  %v3677_v34 = vld [vmem:[%s3841_s19 + $0x640] ss:$24 sps:$4 sm:$0xff]  }
  0xf9   : > { %2455 = vmatprep.subr.bf16.mxu1 %v3592_v35  ;;  %v3682_v35 = vld [vmem:[%s3841_s19 + $0x614] ss:$24 sps:$4 sm:$0xff]  }
  0xfb   : > { %2413 = vmatpush1.bf16.msra.mxu0 %v3587_v36  ;;  %v3680_v36 = vld [vmem:[%s3841_s19 + $0x610] ss:$24 sps:$4 sm:$0xff]  }
  0xfc   : > { %2456 = vmatpush1.bf16.msra.mxu1 %v3590_v37  ;;  %2414 = vmatprep.subr.bf16.mxu0 %v3595_v38  ;;  %v3685_v37 = vld [vmem:[%s3841_s19 + $0x8e4] ss:$24 sps:$4 sm:$0xff]   ;;  %v3683_v38 = vld [vmem:[%s3841_s19 + $0x8e0] ss:$24 sps:$4 sm:$0xff]  }
  0xfd   : > { %2457 = vmatprep.subr.bf16.mxu1 %v3598_v39  ;;  %v3688_v39 = vld [vmem:[%s3841_s19 + $0x8b4] ss:$24 sps:$4 sm:$0xff]  }
  0xff   : > { %2415 = vmatpush1.bf16.msra.mxu0 %v3593_v40  ;;  %v3686_v40 = vld [vmem:[%s3841_s19 + $0x8b0] ss:$24 sps:$4 sm:$0xff]  }
 0x100   : > { %2458 = vmatpush1.bf16.msra.mxu1 %v3596_v42  ;;  %2416 = vmatprep.subr.bf16.mxu0 %v3601_v43  ;;  %v3691_v42 = vld [vmem:[%s3841_s19 + $0x884] ss:$24 sps:$4 sm:$0xff]   ;;  %v3689_v43 = vld [vmem:[%s3841_s19 + $0x880] ss:$24 sps:$4 sm:$0xff]  }
 0x101   : > { %2459 = vmatprep.subr.bf16.mxu1 %v3604_v44  ;;  %v3694_v44 = vld [vmem:[%s3841_s19 + $0x854] ss:$24 sps:$4 sm:$0xff]  }
 0x103   : > { %2417 = vmatpush1.bf16.msra.mxu0 %v3599_v45  ;;  %v3692_v45 = vld [vmem:[%s3841_s19 + $0x850] ss:$24 sps:$4 sm:$0xff]  }
 0x104   : > { %2460 = vmatpush1.bf16.msra.mxu1 %v3602_v46  ;;  %2418 = vmatprep.subr.bf16.mxu0 %v3607_v47  ;;  %v3697_v46 = vld [vmem:[%s3841_s19 + $0x824] ss:$24 sps:$4 sm:$0xff]   ;;  %v3695_v47 = vld [vmem:[%s3841_s19 + $0x820] ss:$24 sps:$4 sm:$0xff]  }
 0x105   : > { %2461 = vmatprep.subr.bf16.mxu1 %v3610_v48  ;;  %v3700_v48 = vld [vmem:[%s3841_s19 + $0x7f4] ss:$24 sps:$4 sm:$0xff]  }
 0x107   : > { %2419 = vmatpush1.bf16.msra.mxu0 %v3605_v49  ;;  %v3698_v49 = vld [vmem:[%s3841_s19 + $0x7f0] ss:$24 sps:$4 sm:$0xff]  }
 0x108   : > { %2462 = vmatpush1.bf16.msra.mxu1 %v3608_v50  ;;  %2420 = vmatprep.subr.bf16.mxu0 %v3613_v51  ;;  %v3703_v51 = vld [vmem:[%s3841_s19 + $0x7c4] ss:$24 sps:$4 sm:$0xff]  }
 0x109   : > { %2463 = vmatprep.subr.bf16.mxu1 %v3616_v52  ;;  %v3701_v52 = vld [vmem:[%s3841_s19 + $0x7c0] ss:$24 sps:$4 sm:$0xff]  }
 0x10b   : > { %2421 = vmatpush2.bf16.msra.mxu0 %v3611_v53 }
 0x10c   : > { %2464 = vmatpush2.bf16.msra.mxu1 %v3614_v54  ;;  %2422 = vmatprep.subr.bf16.mxu0 %v3619_v55  ;;  %v3706_v55 = vld [vmem:[%s3841_s19 + $0x794] ss:$24 sps:$4 sm:$0xff]  }
 0x10d   : > { %2465 = vmatprep.subr.bf16.mxu1 %v3622_v56  ;;  %v3704_v56 = vld [vmem:[%s3841_s19 + $0x790] ss:$24 sps:$4 sm:$0xff]  }
 0x10f   : > { %2423 = vmatpush2.bf16.msra.mxu0 %v3617_v58 }
 0x110   : > { %2466 = vmatpush2.bf16.msra.mxu1 %v3620_v59  ;;  %2424 = vmatprep.subr.bf16.mxu0 %v3625_v60 }
 0x111   : > { %2467 = vmatprep.subr.bf16.mxu1 %v3628_v61 }
 0x113   : > { %2425 = vmatpush2.bf16.msra.mxu0 %v3623_v62 }
 0x114   : > { %2468 = vmatpush2.bf16.msra.mxu1 %v3626_v63  ;;  %2426 = vmatprep.subr.bf16.mxu0 %v3631_v0  ;;  %v370_v63 = vld [vmem:[%s4473_s6] sm:$0xff] }
 0x115   : > { %2469 = vmatprep.subr.bf16.mxu1 %v3634_v1 }
 0x117   : > { %2427 = vmatpush2.bf16.msra.mxu0 %v3629_v2 }
 0x118   : > { %2470 = vmatpush2.bf16.msra.mxu1 %v3632_v3  ;;  %2428 = vmatprep.subr.bf16.mxu0 %v3637_v4  ;;  %v371_v4 = vld [vmem:[%s4473_s6 + $0x8] sm:$0xff] }
 0x119   : > { %2471 = vmatprep.subr.bf16.mxu1 %v3640_v5 }
 0x11b   : > { %2429 = vmatpush2.bf16.msra.mxu0 %v3635_v6 }
 0x11c   : > { %2472 = vmatpush2.bf16.msra.mxu1 %v3638_v7  ;;  %2430 = vmatprep.subr.bf16.mxu0 %v3643_v8 }
 0x11d   : > { %2473 = vmatprep.subr.bf16.mxu1 %v3646_v9  ;;  %v376_v9 = vld [vmem:[%s4473_s6 + $0x30] sm:$0xff] }
 0x11f   : > { %2431 = vmatpush2.bf16.msra.mxu0 %v3641_v10 }
 0x120   : > { %2474 = vmatpush2.bf16.msra.mxu1 %v3644_v13  ;;  %2432 = vmatprep.subr.bf16.mxu0 %v3649_v14 }
 0x121   : > { %2475 = vmatprep.subr.bf16.mxu1 %v3652_v15  ;;  %v377_v15 = vld [vmem:[%s4473_s6 + $0x38] sm:$0xff] }
 0x123   : > { %2433 = vmatpush2.bf16.msra.mxu0 %v3647_v16 }
 0x124   : > { %2476 = vmatpush2.bf16.msra.mxu1 %v3650_v18  ;;  %2434 = vmatprep.subr.bf16.mxu0 %v3655_v19 }
 0x125   : > { %2477 = vmatprep.subr.bf16.mxu1 %v3658_v20 }
 0x127   : > { %2435 = vmatpush2.bf16.msra.mxu0 %v3653_v21 }
 0x128   : > { %2478 = vmatpush2.bf16.msra.mxu1 %v3656_v22  ;;  %2490 = vmatprep.subr.bf16.mxu0 %v3661_v23 }
 0x12a   : > { %2437 = vmatmul.mubr.bf16.vlgmr.msra.gmra.mxu0 %v3709_v26  ;;  %v2180_v50 = vpop.f32.mrf.mxu0 }
 0x12b   : > { %2480 = vmatmul.mubr.bf16.vlgmr.msra.gmra.mxu1 %v3710_v11  ;;  %2491 = vmatpush1.bf16.msra.mxu0 %v3659_v24  ;;  %v2223_v53 = vpop.f32.mrf.mxu1 }
 0x12c   : > { %2522 = vmatprep.mubr.bf16.mxu0 %v3990_v41  ;;  %2492 = vmatprep.subr.bf16.mxu0 %v3664_v25  ;;  %v3676_v41 = vld [vmem:[%s3841_s19 + $0x674] ss:$24 sps:$4 sm:$0xff]   ;;  %v2182_v54 = vpop.f32.mrf.mxu0  ;;  %v2224_v62 = vadd.f32 %v2223_v53, %v2180_v50 }
 0x12d   : > { %v2225_v58 = vpop.f32.mrf.mxu1 }
 0x12e   : > { %v2184_v59 = vpop.f32.mrf.mxu0  ;;  %v2226_v1 = vadd.f32 %v2225_v58, %v2182_v54  ;;  %v374_v54 = vld [vmem:[%s4473_s6 + $0x20] sm:$0xff] }
 0x12f   : > { %2493 = vmatpush1.bf16.msra.mxu0 %v3662_v27  ;;  %v2227_v60 = vpop.f32.mrf.mxu1 }
 0x130   : > { %2494 = vmatprep.subr.bf16.mxu0 %v3667_v28  ;;  %v2186_v61 = vpop.f32.mrf.mxu0  ;;  %v2228_v6 = vadd.f32 %v2227_v60, %v2184_v59  ;;  %v372_v28 = vld [vmem:[%s4473_s6 + $0x10] sm:$0xff]  ;;  %v375_v60 = vld [vmem:[%s4473_s6 + $0x28] sm:$0xff] }
 0x131   : > { %v2229_v3 = vpop.f32.mrf.mxu1 }
 0x132   : > { %v2230_v13 = vadd.f32 %v2229_v3, %v2186_v61 }
 0x133   : > { %2495 = vmatpush1.bf16.msra.mxu0 %v3665_v29 }
 0x134   : > { %2496 = vmatprep.subr.bf16.mxu0 %v3670_v12 }
 0x137   : > { %2497 = vmatpush1.bf16.msra.mxu0 %v3668_v30 }
 0x138   : > { %2498 = vmatprep.subr.bf16.mxu0 %v3673_v57 }
 0x13b   : > { %2499 = vmatpush1.bf16.msra.mxu0 %v3671_v31  ;;  %v373_v31 = vld [vmem:[%s4473_s6 + $0x18] sm:$0xff] }
 0x13c   : > { %2500 = vmatprep.subr.bf16.mxu0 %v3676_v41 }
 0x13f   : > { %2501 = vmatpush1.bf16.msra.mxu0 %v3674_v32 }
 0x140   : > { %2502 = vmatprep.subr.bf16.mxu0 %v3679_v33 }
 0x143   : > { %2503 = vmatpush1.bf16.msra.mxu0 %v3677_v34 }
 0x144   : > { %2504 = vmatprep.subr.bf16.mxu0 %v3682_v35 }
 0x147   : > { %2505 = vmatpush1.bf16.msra.mxu0 %v3680_v36  ;;  %v378_v36 = vld [vmem:[%s4473_s6 + $0x40] sm:$0xff] }
 0x148   : > { %2506 = vmatprep.subr.bf16.mxu0 %v3685_v37 }
 0x14b   : > { %2507 = vmatpush2.bf16.msra.mxu0 %v3683_v38 }
 0x14c   : > { %2508 = vmatprep.subr.bf16.mxu0 %v3688_v39 }
 0x14f   : > { %2509 = vmatpush2.bf16.msra.mxu0 %v3686_v40 }
 0x150   : > { %2510 = vmatprep.subr.bf16.mxu0 %v3691_v42  ;;  %v379_v42 = vld [vmem:[%s4473_s6 + $0x48] sm:$0xff] }
 0x153   : > { %2511 = vmatpush2.bf16.msra.mxu0 %v3689_v43 }
 0x154   : > { %2512 = vmatprep.subr.bf16.mxu0 %v3694_v44 }
 0x157   : > { %2513 = vmatpush2.bf16.msra.mxu0 %v3692_v45 }
 0x158   : > { %2514 = vmatprep.subr.bf16.mxu0 %v3697_v46 }
 0x15b   : > { %2515 = vmatpush2.bf16.msra.mxu0 %v3695_v47 }
 0x15c   : > { %2516 = vmatprep.subr.bf16.mxu0 %v3700_v48 }
 0x15f   : > { %2517 = vmatpush2.bf16.msra.mxu0 %v3698_v49 }
 0x160   : > { %2518 = vmatprep.subr.bf16.mxu0 %v3703_v51 }
 0x163   : > { %2519 = vmatpush2.bf16.msra.mxu0 %v3701_v52 }
 0x164   : > { %2520 = vmatprep.subr.bf16.mxu0 %v3706_v55 }
 0x167   : > { %2521 = vmatpush2.bf16.msra.mxu0 %v3704_v56 }
 0x16a   : > { %v2266_v0 = vpop.f32.mrf.mxu0  ;;  %2523 = vmatmul.mubr.bf16.vlgmr.msra.gmra.mxu0 %v4030_v17 }
 0x16b   : > { %v2267_v2 = vadd.f32 %v2266_v0, %v2224_v62  ;;  %v2309_v21 = vpop.f32.mrf.mxu1 }
 0x16c   : > { %v2268_v5 = vpop.f32.mrf.mxu0 }
 0x16d   : > { %v2533_v7 = vadd.f32 %v2267_v2, %v370_v63  ;;  %v2269_v8 = vadd.f32 %v2268_v5, %v2226_v1  ;;  %v2311_v22 = vpop.f32.mrf.mxu1  ;;  %v380_v1 = vld [vmem:[%s4473_s6 + $0x50] sm:$0xff] }
 0x16e   : > { %v2270_v10 = vpop.f32.mrf.mxu0 }
 0x16f   : > { %2545 = vst [vmem:[%s4473_s6] sm:$0xff] %v2533_v7  ;;  %v2534_v17 = vadd.f32 %v2269_v8, %v371_v4  ;;  %v2271_v14 = vadd.f32 %v2270_v10, %v2228_v6  ;;  %v2313_v23 = vpop.f32.mrf.mxu1  ;;  %v381_v6 = vld [vmem:[%s4473_s6 + $0x58] sm:$0xff] }
 0x170   : > { %v2272_v16 = vpop.f32.mrf.mxu0 }
 0x171   : > { %2546 = vst [vmem:[%s4473_s6 + $0x8] sm:$0xff] %v2534_v17  ;;  %v2539_v18 = vadd.f32 %v2271_v14, %v376_v9  ;;  %v2273_v19 = vadd.f32 %v2272_v16, %v2230_v13  ;;  %v2315_v24 = vpop.f32.mrf.mxu1 }
 0x173   : > { %2551 = vst [vmem:[%s4473_s6 + $0x30] sm:$0xff] %v2539_v18  ;;  %v2540_v20 = vadd.f32 %v2273_v19, %v377_v15 }
 0x175   : > { %2552 = vst [vmem:[%s4473_s6 + $0x38] sm:$0xff] %v2540_v20 }
 0x1aa   : > { %v2352_v25 = vpop.f32.mrf.mxu0 }
 0x1ab   : > { %v2395_v26 = vpop.f32.mrf.mxu1  ;;  %v2353_v11 = vadd.f32 %v2352_v25, %v2309_v21 }
 0x1ac   : > { %v2354_v27 = vpop.f32.mrf.mxu0 }
 0x1ad   : > { %v2397_v29 = vpop.f32.mrf.mxu1  ;;  %v2355_v12 = vadd.f32 %v2354_v27, %v2311_v22  ;;  %v2396_v30 = vadd.f32 %v2395_v26, %v2353_v11 }
 0x1ae   : > { %v2356_v57 = vpop.f32.mrf.mxu0 }
 0x1af   : > { %v2399_v41 = vpop.f32.mrf.mxu1  ;;  %v2535_v32 = vadd.f32 %v2396_v30, %v372_v28  ;;  %v2357_v33 = vadd.f32 %v2356_v57, %v2313_v23  ;;  %v2398_v34 = vadd.f32 %v2397_v29, %v2355_v12 }
 0x1b0   : > { %v2358_v35 = vpop.f32.mrf.mxu0 }
 0x1b1   : > { %v2401_v37 = vpop.f32.mrf.mxu1  ;;  %2547 = vst [vmem:[%s4473_s6 + $0x10] sm:$0xff] %v2535_v32  ;;  %v2536_v38 = vadd.f32 %v2398_v34, %v373_v31  ;;  %v2359_v39 = vadd.f32 %v2358_v35, %v2315_v24  ;;  %v2400_v40 = vadd.f32 %v2399_v41, %v2357_v33 }
 0x1b3   : > { %2548 = vst [vmem:[%s4473_s6 + $0x18] sm:$0xff] %v2536_v38  ;;  %v2541_v43 = vadd.f32 %v2400_v40, %v378_v36  ;;  %v2402_v44 = vadd.f32 %v2401_v37, %v2359_v39 }
 0x1b5   : > { %2553 = vst [vmem:[%s4473_s6 + $0x40] sm:$0xff] %v2541_v43  ;;  %v2542_v45 = vadd.f32 %v2402_v44, %v379_v42 }
 0x1b7   : > { %2554 = vst [vmem:[%s4473_s6 + $0x48] sm:$0xff] %v2542_v45 }
 0x1ea   : > { %v2438_v46 = vpop.f32.mrf.mxu0 }
 0x1eb   : > { %v2481_v47 = vpop.f32.mrf.mxu1 }
 0x1ec   : > { %v2440_v48 = vpop.f32.mrf.mxu0  ;;  %v2482_v53 = vadd.f32 %v2481_v47, %v2438_v46 }
 0x1ed   : > { %v2483_v49 = vpop.f32.mrf.mxu1 }
 0x1ee   : > { %v2442_v50 = vpop.f32.mrf.mxu0  ;;  %v2484_v56 = vadd.f32 %v2483_v49, %v2440_v48 }
 0x1ef   : > { %v2485_v51 = vpop.f32.mrf.mxu1 }
 0x1f0   : > { %v2444_v52 = vpop.f32.mrf.mxu0  ;;  %v2486_v62 = vadd.f32 %v2485_v51, %v2442_v50 }
 0x1f1   : > { %v2487_v59 = vpop.f32.mrf.mxu1 }
 0x1f2   : > { %v2488_v3 = vadd.f32 %v2487_v59, %v2444_v52 }
 0x22a   : > { %v2524_v55 = vpop.f32.mrf.mxu0 }
 0x22b   : > { %v2525_v58 = vadd.f32 %v2524_v55, %v2482_v53 }
 0x22c   : > { %v2526_v61 = vpop.f32.mrf.mxu0 }
 0x22d   : > { %v2537_v63 = vadd.f32 %v2525_v58, %v374_v54  ;;  %v2527_v0 = vadd.f32 %v2526_v61, %v2484_v56 }
 0x22e   : > { %v2528_v2 = vpop.f32.mrf.mxu0 }
 0x22f   : > { %2549 = vst [vmem:[%s4473_s6 + $0x20] sm:$0xff] %v2537_v63  ;;  %v2538_v4 = vadd.f32 %v2527_v0, %v375_v60  ;;  %v2529_v5 = vadd.f32 %v2528_v2, %v2486_v62 }
 0x230   : > { %v2530_v7 = vpop.f32.mrf.mxu0 }
 0x231   : > { %2550 = vst [vmem:[%s4473_s6 + $0x28] sm:$0xff] %v2538_v4  ;;  %v2543_v8 = vadd.f32 %v2529_v5, %v380_v1  ;;  %v2531_v9 = vadd.f32 %v2530_v7, %v2488_v3  ;;  %2560 = sbr.rel (%p3216_p11) target bundleno = 912 (0x390), region = 75 }
 0x233   : > { %2555 = vst [vmem:[%s4473_s6 + $0x50] sm:$0xff] %v2543_v8  ;;  %v2544_v10 = vadd.f32 %v2531_v9, %v381_v6 }
 0x235   : > { %2556 = vst [vmem:[%s4473_s6 + $0x58] sm:$0xff] %v2544_v10 }
 0x236   : > { %v2575_v13 = vlaneseq  ;;  %v2573_v14 = vld [vmem:[%s4469_s2] sm:$0x3f]  ;;  %v2562_v21 = vld [vmem:[%s4473_s6 + $0x8] sm:$0xff]  ;;  %v2563_v22 = vld [vmem:[%s4473_s6 + $0x10] sm:$0xff] }
 0x237   : > { %v2561_v15 = vld [vmem:[%s4473_s6] sm:$0xff]  ;;  %v2564_v23 = vld [vmem:[%s4473_s6 + $0x18] sm:$0xff]  ;;  %v2618_v31 = vld [vmem:[%s4470_s3 + $0x8] sm:$0xff] }
 0x238   : > { %v2576_v17 = vshrl.u32 %v2575_v13, 7  ;;  %v2565_v26 = vld [vmem:[%s4473_s6 + $0x20] sm:$0xff]  ;;  %v2619_v41 = vld [vmem:[%s4470_s3 + $0x10] sm:$0xff]  ;;  %v2566_v32 = vld [vmem:[%s4473_s6 + $0x28] sm:$0xff] }
 0x239   : > { %v2617_v57 = vld [vmem:[%s4470_s3] sm:$0xff]  ;;  %v2620_v38 = vld [vmem:[%s4470_s3 + $0x18] sm:$0xff]  ;;  %v2567_v44 = vld [vmem:[%s4473_s6 + $0x30] sm:$0xff] }
 0x23a   : > { %v4281_v16 = vsub.s32 0, %v2576_v17  ;;  %v4283_v18 = vsub.s32 1, %v2576_v17  ;;  %v4285_v19 = vsub.s32 2, %v2576_v17  ;;  %v4287_v20 = vsub.s32 3, %v2576_v17  ;;  %v2621_v39 = vld [vmem:[%s4470_s3 + $0x20] sm:$0xff]  ;;  %v2568_v46 = vld [vmem:[%s4473_s6 + $0x38] sm:$0xff] }
 0x23b   : > { %v4298_v24 = vsub.s32 4, %v2576_v17  ;;  %v4300_v25 = vsub.s32 5, %v2576_v17  ;;  %v2569_v47 = vld [vmem:[%s4473_s6 + $0x40] sm:$0xff]  ;;  %v2570_v48 = vld [vmem:[%s4473_s6 + $0x48] sm:$0xff]  ;;  %v2623_v52 = vld [vmem:[%s4470_s3 + $0x30] sm:$0xff] }
 0x23c   : > { %v2578_v11 = vrot.slane %v2573_v14, %v4281_v16  ;;  %v2582_v27 = vrot.slane %v2573_v14, %v4283_v18  ;;  %v2586_v28 = vrot.slane %v2573_v14, %v4285_v19  ;;  %v2590_v29 = vrot.slane %v2573_v14, %v4287_v20  ;;  %v2622_v49 = vld [vmem:[%s4470_s3 + $0x28] sm:$0xff]  ;;  %v2571_v54 = vld [vmem:[%s4473_s6 + $0x50] sm:$0xff]  ;;  %v2624_v56 = vld [vmem:[%s4470_s3 + $0x38] sm:$0xff] }
 0x23d   : > { %v2594_v12 = vrot.slane %v2573_v14, %v4298_v24  ;;  %v2598_v30 = vrot.slane %v2573_v14, %v4300_v25  ;;  %v2625_v58 = vld [vmem:[%s4470_s3 + $0x40] sm:$0xff]  ;;  %v2572_v0 = vld [vmem:[%s4473_s6 + $0x58] sm:$0xff]  ;;  %v2626_v1 = vld [vmem:[%s4470_s3 + $0x48] sm:$0xff] }
 0x23e   : > { %v2605_v33 = vadd.f32 %v2578_v11, %v2561_v15  ;;  %v2606_v34 = vadd.f32 %v2582_v27, %v2562_v21  ;;  %v2607_v35 = vadd.f32 %v2586_v28, %v2563_v22  ;;  %v2608_v36 = vadd.f32 %v2590_v29, %v2564_v23  ;;  %v2627_v7 = vld [vmem:[%s4470_s3 + $0x50] sm:$0xff]  ;;  %v2628_v17 = vld [vmem:[%s4470_s3 + $0x58] sm:$0xff] }
 0x23f   : > { %v2609_v37 = vadd.f32 %v2594_v12, %v2565_v26  ;;  %v2610_v45 = vadd.f32 %v2598_v30, %v2566_v32  ;;  %v2611_v55 = vadd.f32 %v2578_v11, %v2567_v44  ;;  %v2612_v60 = vadd.f32 %v2582_v27, %v2568_v46 }
 0x240   : > { %v2629_v40 = vadd.f32 %v2617_v57, %v2605_v33  ;;  %v2630_v42 = vadd.f32 %v2618_v31, %v2606_v34  ;;  %v2631_v43 = vadd.f32 %v2619_v41, %v2607_v35  ;;  %v2632_v50 = vadd.f32 %v2620_v38, %v2608_v36 }
 0x241   : > { %v2633_v53 = vadd.f32 %v2621_v39, %v2609_v37  ;;  %v2613_v61 = vadd.f32 %v2586_v28, %v2569_v47  ;;  %v2614_v62 = vadd.f32 %v2590_v29, %v2570_v48  ;;  %v2634_v63 = vadd.f32 %v2622_v49, %v2610_v45 }
 0x242   : > { %v2641_v51 = vadd.f32 %v2630_v42, %v2629_v40  ;;  %v2635_v2 = vadd.f32 %v2623_v52, %v2611_v55  ;;  %v2615_v4 = vadd.f32 %v2594_v12, %v2571_v54  ;;  %v2636_v5 = vadd.f32 %v2624_v56, %v2612_v60 }
 0x243   : > { %v2637_v6 = vadd.f32 %v2625_v58, %v2613_v61  ;;  %v2616_v9 = vadd.f32 %v2598_v30, %v2572_v0  ;;  %v2638_v10 = vadd.f32 %v2626_v1, %v2614_v62 }
 0x244   : > { %v2642_v59 = vadd.f32 %v2641_v51, %v2631_v43  ;;  %v2648_v13 = vadd.f32 %v2636_v5, %v2635_v2  ;;  %v2639_v15 = vadd.f32 %v2627_v7, %v2615_v4  ;;  %v2758_v7 = vld [vmem:[%s4472_s5] sm:$0x3f] }
 0x245   : > { %v2640_v22 = vadd.f32 %v2628_v17, %v2616_v9 }
 0x246   : > { %v2643_v3 = vadd.f32 %v2642_v59, %v2632_v50  ;;  %v2649_v21 = vadd.f32 %v2648_v13, %v2637_v6 }
 0x248   : > { %v2644_v8 = vadd.f32 %v2643_v3, %v2633_v53  ;;  %v2650_v23 = vadd.f32 %v2649_v21, %v2638_v10  ;;  %v2763_v21 = vrot.slane %v2758_v7, %v4281_v16 }
 0x24a   : > { %v2645_v14 = vadd.f32 %v2644_v8, %v2634_v63  ;;  %v2651_v26 = vadd.f32 %v2650_v23, %v2639_v15  ;;  %v2771_v23 = vrot.slane %v2758_v7, %v4285_v19 }
 0x24c   : > { %2646 = vadd.xlane.f32.xlu0 %v2645_v14  ;;  %v2652_v11 = vadd.f32 %v2651_v26, %v2640_v22  ;;  %v2775_v26 = vrot.slane %v2758_v7, %v4287_v20 }
 0x250   : > { %2653 = vadd.xlane.f32.xlu0 %v2652_v11 }
 0x2d5   : > { %v2647_v27 = vpop.xlane.xlu0 %2646 }
 0x2d6   : > { %v2656_v28 = vmul.f32 0.0013020834, %v2647_v27 }
 0x2d8   : > { %v2658_v29 = vsub.f32 %v2629_v40, %v2656_v28  ;;  %v2659_v12 = vsub.f32 %v2630_v42, %v2656_v28  ;;  %v2660_v30 = vsub.f32 %v2631_v43, %v2656_v28  ;;  %v2661_v57 = vsub.f32 %v2632_v50, %v2656_v28 }
 0x2d9   : > { %v2654_v32 = vpop.xlane.xlu0 %2653  ;;  %v2662_v33 = vsub.f32 %v2633_v53, %v2656_v28  ;;  %v2663_v37 = vsub.f32 %v2634_v63, %v2656_v28 }
 0x2da   : > { %v2670_v31 = vmul.f32 %v2658_v29, %v2658_v29  ;;  %v2671_v41 = vmul.f32 %v2659_v12, %v2659_v12  ;;  %v2657_v34 = vmul.f32 0.0013020834, %v2654_v32  ;;  %v2672_v35 = vmul.f32 %v2660_v30, %v2660_v30 }
 0x2db   : > { %v2673_v38 = vmul.f32 %v2661_v57, %v2661_v57  ;;  %v2674_v40 = vmul.f32 %v2662_v33, %v2662_v33  ;;  %v2675_v49 = vmul.f32 %v2663_v37, %v2663_v37  ;;  %v2783_v32 = vrot.slane %v2758_v7, %v4300_v25 }
 0x2dc   : > { %v2682_v36 = vadd.f32 %v2671_v41, %v2670_v31  ;;  %v4368_v44 = vsub.f32 %v2635_v2, %v2657_v34  ;;  %v4370_v45 = vsub.f32 %v2636_v5, %v2657_v34  ;;  %v4372_v46 = vsub.f32 %v2637_v6, %v2657_v34  ;;  %v2714_v6 = vld [vmem:[%s4471_s4] sm:$0x3f] }
 0x2dd   : > { %v4374_v43 = vsub.f32 %v2638_v10, %v2657_v34  ;;  %v4380_v51 = vsub.f32 %v2639_v15, %v2657_v34  ;;  %v4384_v55 = vsub.f32 %v2640_v22, %v2657_v34  ;;  %v2719_v8 = vrot.slane %v2714_v6, %v4281_v16 }
 0x2de   : > { %v2683_v39 = vadd.f32 %v2682_v36, %v2672_v35  ;;  %v2676_v47 = vmul.f32 %v4368_v44, %v4368_v44  ;;  %v2677_v48 = vmul.f32 %v4370_v45, %v4370_v45  ;;  %v2678_v52 = vmul.f32 %v4372_v46, %v4372_v46 }
 0x2df   : > { %v2679_v56 = vmul.f32 %v4374_v43, %v4374_v43  ;;  %v2680_v59 = vmul.f32 %v4380_v51, %v4380_v51  ;;  %v2681_v61 = vmul.f32 %v4384_v55, %v4384_v55  ;;  %v2723_v9 = vrot.slane %v2714_v6, %v4283_v18 }
 0x2e0   : > { %v2684_v42 = vadd.f32 %v2683_v39, %v2673_v38  ;;  %v2689_v53 = vadd.f32 %v2677_v48, %v2676_v47  ;;  %v2727_v10 = vrot.slane %v2714_v6, %v4285_v19  ;;  %v2731_v13 = vrot.slane %v2714_v6, %v4287_v20 }
 0x2e1   : > { %v2735_v17 = vrot.slane %v2714_v6, %v4298_v24  ;;  %v2739_v14 = vrot.slane %v2714_v6, %v4300_v25  ;;  %v2767_v22 = vrot.slane %v2758_v7, %v4283_v18  ;;  %v2779_v41 = vrot.slane %v2758_v7, %v4298_v24 }
 0x2e2   : > { %v2685_v50 = vadd.f32 %v2684_v42, %v2674_v40  ;;  %v2690_v58 = vadd.f32 %v2689_v53, %v2678_v52 }
 0x2e4   : > { %v2686_v54 = vadd.f32 %v2685_v50, %v2675_v49  ;;  %v2691_v60 = vadd.f32 %v2690_v58, %v2679_v56 }
 0x2e6   : > { %2687 = vadd.xlane.f32.xlu1 %v2686_v54  ;;  %v2692_v62 = vadd.f32 %v2691_v60, %v2680_v59 }
 0x2e8   : > { %v2693_v63 = vadd.f32 %v2692_v62, %v2681_v61 }
 0x2ea   : > { %2694 = vadd.xlane.f32.xlu1 %v2693_v63 }
 0x36f   : > { %v2688_v0 = vpop.xlane.xlu1 %2687 }
 0x370   : > { %v2696_v1 = vmul.f32 0.0013020834, %v2688_v0 }
 0x372   : > { %v2698_v2 = vadd.f32 1e-12, %v2696_v1 }
 0x373   : > { %v2695_v3 = vpop.xlane.xlu1 %2694 }
 0x374   : > { %3711 = vrsqrt.f32 %v2698_v2  ;;  %v2697_v4 = vmul.f32 0.0013020834, %v2695_v3 }
 0x376   : > { %v2699_v5 = vadd.f32 1e-12, %v2697_v4 }
 0x378   : > { %3713 = vrsqrt.f32 %v2699_v5 }
 0x381   : > { %v3712_v15 = vpop.eup %3711 }
 0x382   : > { %v2702_v11 = vmul.f32 %v3712_v15, %v2658_v29  ;;  %v2703_v27 = vmul.f32 %v3712_v15, %v2659_v12  ;;  %v2704_v28 = vmul.f32 %v3712_v15, %v2660_v30  ;;  %v2705_v31 = vmul.f32 %v3712_v15, %v2661_v57 }
 0x383   : > { %v2706_v34 = vmul.f32 %v3712_v15, %v2662_v33  ;;  %v2707_v35 = vmul.f32 %v3712_v15, %v2663_v37 }
 0x384   : > { %v2746_v36 = vmul.f32 %v2719_v8, %v2702_v11  ;;  %v2747_v38 = vmul.f32 %v2723_v9, %v2703_v27  ;;  %v2748_v39 = vmul.f32 %v2727_v10, %v2704_v28  ;;  %v2749_v16 = vmul.f32 %v2731_v13, %v2705_v31 }
 0x385   : > { %v2750_v40 = vmul.f32 %v2735_v17, %v2706_v34  ;;  %v2751_v18 = vmul.f32 %v2739_v14, %v2707_v35  ;;  %v3714_v29 = vpop.eup %3713 }
 0x386   : > { %v2790_v42 = vadd.f32 %v2763_v21, %v2746_v36  ;;  %v2791_v19 = vadd.f32 %v2767_v22, %v2747_v38  ;;  %v2792_v47 = vadd.f32 %v2771_v23, %v2748_v39  ;;  %v2793_v20 = vadd.f32 %v2775_v26, %v2749_v16 }
 0x387   : > { %v2794_v12 = vadd.f32 %v2779_v41, %v2750_v40  ;;  %v2795_v30 = vadd.f32 %v2783_v32, %v2751_v18  ;;  %v2708_v24 = vmul.f32 %v3714_v29, %v4368_v44  ;;  %v2709_v25 = vmul.f32 %v3714_v29, %v4370_v45 }
 0x388   : > { %2802 = vst [vmem:[%s4473_s6] sm:$0xff] %v2790_v42  ;;  %2803 = vst [vmem:[%s4473_s6 + $0x8] sm:$0xff] %v2791_v19  ;;  %v2710_v57 = vmul.f32 %v3714_v29, %v4372_v46  ;;  %v2711_v33 = vmul.f32 %v3714_v29, %v4374_v43  ;;  %v2712_v37 = vmul.f32 %v3714_v29, %v4380_v51 }
 0x389   : > { %2804 = vst [vmem:[%s4473_s6 + $0x10] sm:$0xff] %v2792_v47  ;;  %2805 = vst [vmem:[%s4473_s6 + $0x18] sm:$0xff] %v2793_v20  ;;  %v2713_v48 = vmul.f32 %v3714_v29, %v4384_v55  ;;  %v2752_v49 = vmul.f32 %v2719_v8, %v2708_v24  ;;  %v2753_v44 = vmul.f32 %v2723_v9, %v2709_v25 }
 0x38a   : > { %2806 = vst [vmem:[%s4473_s6 + $0x20] sm:$0xff] %v2794_v12  ;;  %2807 = vst [vmem:[%s4473_s6 + $0x28] sm:$0xff] %v2795_v30  ;;  %v2754_v50 = vmul.f32 %v2727_v10, %v2710_v57  ;;  %v2755_v45 = vmul.f32 %v2731_v13, %v2711_v33  ;;  %v2756_v52 = vmul.f32 %v2735_v17, %v2712_v37 }
 0x38b   : > { %v2757_v46 = vmul.f32 %v2739_v14, %v2713_v48  ;;  %v2796_v53 = vadd.f32 %v2763_v21, %v2752_v49  ;;  %v2797_v43 = vadd.f32 %v2767_v22, %v2753_v44 }
 0x38c   : > { %v2798_v54 = vadd.f32 %v2771_v23, %v2754_v50  ;;  %v2799_v56 = vadd.f32 %v2775_v26, %v2755_v45  ;;  %v2800_v58 = vadd.f32 %v2779_v41, %v2756_v52 }
 0x38d   : > { %v2801_v59 = vadd.f32 %v2783_v32, %v2757_v46  ;;  %2808 = vst [vmem:[%s4473_s6 + $0x30] sm:$0xff] %v2796_v53  ;;  %2809 = vst [vmem:[%s4473_s6 + $0x38] sm:$0xff] %v2797_v43 }
 0x38e   : > { %2810 = vst [vmem:[%s4473_s6 + $0x40] sm:$0xff] %v2798_v54  ;;  %2811 = vst [vmem:[%s4473_s6 + $0x48] sm:$0xff] %v2799_v56 }
 0x38f   : > { %2812 = vst [vmem:[%s4473_s6 + $0x50] sm:$0xff] %v2800_v58  ;;  %2813 = vst [vmem:[%s4473_s6 + $0x58] sm:$0xff] %v2801_v59 }
 0x390 PF: > { %s16_s25 = sadd.s32 1, %s3753_s25   ;;  %s4474_s21 = smov %s3741_s22 }
 0x391   : > { %p13_p12 = scmp.ge.s32.totalorder %s16_s25, 6   ;;  %s4475_s22 = smov %s3826_s29 }
 0x392   : > { %s4476_s23 = smov %s3749_s24  ;;  %s4477_s24 = smov %s4479_s26 }
 0x393   :  { %15 = sbr.rel (!%p13_p12) target bundleno = 3 (0x3), region = 116 }

// kernel: bert_forward.25
= control target key start
LH: loop header
LB: loop body
LE: loop exit
PB: predicated region body
PF: predicated region fallthrough
CT: control target
= control target key end

     0   :  { %v765_v22 = vmov 1966171168   ;;  %v123_v24 = vlaneseq  ;;  %s952_s1 = inlined_call_operand.vmem [shape: bf16[768,128], index: 1, kind: input, shape index: {}]   ;;  %s953_s0 = inlined_call_operand.vmem [shape: bf16[2,768], index: 0, kind: input, shape index: {}]   ;;  %s954_s3 = inlined_call_operand.vmem [shape: f32[2,128], index: 3, kind: output, shape index: {}]   ;;  %s955_s2 = inlined_call_operand.vmem [shape: f32[1,128], index: 2, kind: input, shape index: {}]  }
   0x1   :  { %v716_v0 = vld [vmem:[%s952_s1 + $0x78] sm:$0xff]   ;;  %v720_v4 = vld [vmem:[%s952_s1 + $0x70] sm:$0xff]   ;;  %v724_v8 = vld [vmem:[%s952_s1 + $0x68] sm:$0xff]   ;;  %v121_v23 = vunpack.c.l.s4 %v765_v22 }
   0x2   :  { %v717_v1 = vld [vmem:[%s952_s1 + $0xf8] sm:$0xff]   ;;  %648 = vmatprep.subr.bf16.mxu0 %v716_v0  ;;  %v721_v5 = vld [vmem:[%s952_s1 + $0xf0] sm:$0xff]   ;;  %v725_v9 = vld [vmem:[%s952_s1 + $0xe8] sm:$0xff]   ;;  %v124_v30 = vshrl.u32 %v123_v24, 7 }
   0x3   :  { %v718_v2 = vld [vmem:[%s952_s1 + $0x38] sm:$0xff]   ;;  %670 = vmatprep.subr.bf16.mxu1 %v717_v1  ;;  %v722_v6 = vld [vmem:[%s952_s1 + $0x30] sm:$0xff]   ;;  %v726_v10 = vld [vmem:[%s952_s1 + $0x28] sm:$0xff]   ;;  %v122_v29 = vunpack.c.0.s8 %v121_v23 }
   0x4   :  { %v719_v3 = vld [vmem:[%s952_s1 + $0xb8] sm:$0xff]   ;;  %649 = vmatpush3.bf16.msra.mxu0 %v718_v2  ;;  %v723_v7 = vld [vmem:[%s952_s1 + $0xb0] sm:$0xff]   ;;  %v727_v11 = vld [vmem:[%s952_s1 + $0xa8] sm:$0xff]   ;;  %v766_v2 = vmov 0.0  }
   0x5   :  { %671 = vmatpush3.bf16.msra.mxu1 %v719_v3  ;;  %650 = vmatprep.subr.bf16.mxu0 %v720_v4  ;;  %v728_v12 = vld [vmem:[%s952_s1 + $0x60] sm:$0xff]   ;;  %v732_v16 = vld [vmem:[%s952_s1 + $0x58] sm:$0xff]   ;;  %v736_v20 = vld [vmem:[%s952_s1 + $0x50] sm:$0xff]   ;;  %v125_v35 = vsub.s32 %v122_v29, %v124_v30  ;;  %19 = vst [vmem:[%s954_s3] sm:$0x3] %v766_v2 }
   0x6   :  { %672 = vmatprep.subr.bf16.mxu1 %v721_v5  ;;  %v729_v13 = vld [vmem:[%s952_s1 + $0xe0] sm:$0xff]   ;;  %v733_v17 = vld [vmem:[%s952_s1 + $0xd8] sm:$0xff]   ;;  %v737_v21 = vld [vmem:[%s952_s1 + $0xd0] sm:$0xff]  }
   0x7   :  { %v730_v14 = vld [vmem:[%s952_s1 + $0x20] sm:$0xff]   ;;  %v734_v18 = vld [vmem:[%s952_s1 + $0x18] sm:$0xff]   ;;  %v738_v25 = vld [vmem:[%s952_s1 + $0x10] sm:$0xff]  }
   0x8   :  { %651 = vmatpush3.bf16.msra.mxu0 %v722_v6  ;;  %v731_v15 = vld [vmem:[%s952_s1 + $0xa0] sm:$0xff]   ;;  %v735_v19 = vld [vmem:[%s952_s1 + $0x98] sm:$0xff]   ;;  %v739_v26 = vld [vmem:[%s952_s1 + $0x90] sm:$0xff]  }
   0x9   :  { %673 = vmatpush3.bf16.msra.mxu1 %v723_v7  ;;  %652 = vmatprep.subr.bf16.mxu0 %v724_v8  ;;  %v740_v27 = vld [vmem:[%s952_s1 + $0x48] sm:$0xff]   ;;  %v744_v33 = vld [vmem:[%s952_s1 + $0x40] sm:$0xff]   ;;  %v749_v41 = vld [vmem:[%s952_s1 + $0x178] sm:$0xff]  }
   0xa   :  { %674 = vmatprep.subr.bf16.mxu1 %v725_v9  ;;  %v741_v28 = vld [vmem:[%s952_s1 + $0xc8] sm:$0xff]   ;;  %v745_v34 = vld [vmem:[%s952_s1 + $0xc0] sm:$0xff]   ;;  %v750_v46 = vld [vmem:[%s952_s1 + $0x138] sm:$0xff]  }
   0xb   :  { %v742_v31 = vld [vmem:[%s952_s1 + $0x8] sm:$0xff]   ;;  %v746_v36 = vld [vmem:[%s952_s1] sm:$0xff]   ;;  %v751_v49 = vld [vmem:[%s952_s1 + $0x170] sm:$0xff]  }
   0xc   :  { %653 = vmatpush3.bf16.msra.mxu0 %v726_v10  ;;  %v743_v32 = vld [vmem:[%s952_s1 + $0x88] sm:$0xff]   ;;  %v747_v37 = vld [vmem:[%s952_s1 + $0x80] sm:$0xff]   ;;  %v752_v52 = vld [vmem:[%s952_s1 + $0x130] sm:$0xff]  }
   0xd   :  { %675 = vmatpush3.bf16.msra.mxu1 %v727_v11  ;;  %654 = vmatprep.subr.bf16.mxu0 %v728_v12  ;;  %v21_v38 = vld [vmem:[%s953_s0] sm:$0x3f]  ;;  %v753_v53 = vld [vmem:[%s952_s1 + $0x168] sm:$0xff]   ;;  %v757_v57 = vld [vmem:[%s952_s1 + $0x158] sm:$0xff]  }
   0xe   :  { %676 = vmatprep.subr.bf16.mxu1 %v729_v13  ;;  %v119_v39 = vcombine.high %v21_v38, %v21_v38  ;;  %v126_v40 = vrot.slane %v21_v38, %v125_v35  ;;  %v754_v54 = vld [vmem:[%s952_s1 + $0x128] sm:$0xff]   ;;  %v755_v55 = vld [vmem:[%s952_s1 + $0x160] sm:$0xff]   ;;  %v758_v58 = vld [vmem:[%s952_s1 + $0x118] sm:$0xff]  }
   0xf   :  { %v756_v56 = vld [vmem:[%s952_s1 + $0x120] sm:$0xff]   ;;  %v759_v59 = vld [vmem:[%s952_s1 + $0x150] sm:$0xff]   ;;  %v761_v61 = vld [vmem:[%s952_s1 + $0x148] sm:$0xff]  }
  0x10   :  { %655 = vmatpush3.bf16.msra.mxu0 %v730_v14  ;;  %v134_v42 = vcombine.high %v126_v40, %v126_v40  ;;  %v142_v43 = vrot.slane %v126_v40, %v125_v35  ;;  %v133_v44 = vrot.slane %v119_v39, %v125_v35  ;;  %v760_v60 = vld [vmem:[%s952_s1 + $0x110] sm:$0xff]   ;;  %v762_v62 = vld [vmem:[%s952_s1 + $0x108] sm:$0xff]   ;;  %v763_v63 = vld [vmem:[%s952_s1 + $0x140] sm:$0xff]  }
  0x11   :  { %677 = vmatpush3.bf16.msra.mxu1 %v731_v15  ;;  %656 = vmatprep.subr.bf16.mxu0 %v732_v16  ;;  %v764_v0 = vld [vmem:[%s952_s1 + $0x100] sm:$0xff]  }
  0x12   :  { %678 = vmatprep.subr.bf16.mxu1 %v733_v17  ;;  %v156_v45 = vrot.slane %v134_v42, %v125_v35  ;;  %v135_v47 = vcombine.high %v133_v44, %v133_v44  ;;  %v164_v48 = vcombine.high %v142_v43, %v142_v43  ;;  %v149_v1 = vrot.slane %v133_v44, %v125_v35  ;;  %v20_v17 = vld [vmem:[%s954_s3] sm:$0x3] }
  0x13   :  { %v647_v22 = vld [vmem:[%s955_s2] ss:$0 sm:$0xff] }
  0x14   :  { %657 = vmatpush3.bf16.msra.mxu0 %v734_v18  ;;  %492 = vmatprep.mubr.bf16.mxu0 %v156_v45  ;;  %v165_v50 = vcombine.high %v156_v45, %v156_v45  ;;  %v163_v51 = vrot.slane %v135_v47, %v125_v35 }
  0x15   :  { %679 = vmatpush3.bf16.msra.mxu1 %v735_v19  ;;  %658 = vmatprep.subr.bf16.mxu0 %v736_v20 }
  0x16   :  { %680 = vmatprep.subr.bf16.mxu1 %v737_v21  ;;  %532 = vmatprep.mubr.bf16.mxu1 %v165_v50 }
  0x18   :  { %659 = vmatpush3.bf16.msra.mxu0 %v738_v25 }
  0x19   :  { %681 = vmatpush3.bf16.msra.mxu1 %v739_v26  ;;  %660 = vmatprep.subr.bf16.mxu0 %v740_v27 }
  0x1a   :  { %682 = vmatprep.subr.bf16.mxu1 %v741_v28 }
  0x1c   :  { %661 = vmatpush3.bf16.msra.mxu0 %v742_v31 }
  0x1d   :  { %683 = vmatpush3.bf16.msra.mxu1 %v743_v32  ;;  %662 = vmatprep.subr.bf16.mxu0 %v744_v33 }
  0x1e   :  { %684 = vmatprep.subr.bf16.mxu1 %v745_v34 }
  0x20   :  { %663 = vmatpush3.bf16.msra.mxu0 %v746_v36 }
  0x21   :  { %685 = vmatpush3.bf16.msra.mxu1 %v747_v37  ;;  %692 = vmatprep.subr.bf16.mxu0 %v749_v41 }
  0x23   :  { %493 = vmatmul.mubr.bf16.vlgmr.msra.gmra.mxu0 %v142_v43 }
  0x24   :  { %693 = vmatpush3.bf16.msra.mxu0 %v750_v46  ;;  %533 = vmatmul.mubr.bf16.vlgmr.msra.gmra.mxu1 %v164_v48 }
  0x25   :  { %694 = vmatprep.subr.bf16.mxu0 %v751_v49  ;;  %572 = vmatprep.mubr.bf16.mxu0 %v163_v51 }
  0x28   :  { %695 = vmatpush3.bf16.msra.mxu0 %v752_v52 }
  0x29   :  { %696 = vmatprep.subr.bf16.mxu0 %v753_v53 }
  0x2c   :  { %697 = vmatpush3.bf16.msra.mxu0 %v754_v54 }
  0x2d   :  { %698 = vmatprep.subr.bf16.mxu0 %v755_v55 }
  0x30   :  { %699 = vmatpush3.bf16.msra.mxu0 %v756_v56 }
  0x31   :  { %700 = vmatprep.subr.bf16.mxu0 %v757_v57 }
  0x34   :  { %701 = vmatpush3.bf16.msra.mxu0 %v758_v58 }
  0x35   :  { %702 = vmatprep.subr.bf16.mxu0 %v759_v59 }
  0x38   :  { %703 = vmatpush3.bf16.msra.mxu0 %v760_v60 }
  0x39   :  { %704 = vmatprep.subr.bf16.mxu0 %v761_v61 }
  0x3c   :  { %705 = vmatpush3.bf16.msra.mxu0 %v762_v62 }
  0x3d   :  { %706 = vmatprep.subr.bf16.mxu0 %v763_v63 }
  0x40   :  { %707 = vmatpush3.bf16.msra.mxu0 %v764_v0 }
  0x43   :  { %573 = vmatmul.mubr.bf16.vlgmr.msra.gmra.mxu0 %v149_v1 }
  0xe3   :  { %v664_v3 = vpop.f32.mrf.mxu0 }
  0xe4   :  { %v686_v4 = vpop.f32.mrf.mxu1 }
  0xe5   :  { %v665_v5 = vpop.f32.mrf.mxu0 }
  0xe6   :  { %v687_v6 = vpop.f32.mrf.mxu1  ;;  %v666_v11 = vadd.f32 %v665_v5, %v664_v3 }
  0xe7   :  { %v667_v7 = vpop.f32.mrf.mxu0  ;;  %v688_v12 = vadd.f32 %v687_v6, %v686_v4 }
  0xe8   :  { %v689_v9 = vpop.f32.mrf.mxu1 }
  0xe9   :  { %v668_v8 = vpop.f32.mrf.mxu0  ;;  %v535_v15 = vadd.f32 %v688_v12, %v666_v11 }
  0xea   :  { %v690_v10 = vpop.f32.mrf.mxu1 }
 0x103   :  { %v708_v13 = vpop.f32.mrf.mxu0 }
 0x105   :  { %v709_v14 = vpop.f32.mrf.mxu0 }
 0x106   :  { %v710_v16 = vadd.f32 %v709_v14, %v708_v13 }
 0x107   :  { %v711_v18 = vpop.f32.mrf.mxu0 }
 0x108   :  { %v575_v19 = vadd.f32 %v710_v16, %v535_v15 }
 0x109   :  { %v712_v20 = vpop.f32.mrf.mxu0 }
 0x10a   :  { %v580_v21 = vadd.f32 %v575_v19, %v20_v17 }
 0x10c   :  { %581 = vst [vmem:[%s954_s3] sm:$0x3] %v580_v21 }
 0x113   :  { %v585_v23 = vld [vmem:[%s954_s3] sm:$0x3] }
 0x114   :  { %v593_v24 = vadd.f32 %v647_v22, %v585_v23 }
 0x116   :  { %594 = vst [vmem:[%s954_s3] sm:$0x3] %v593_v24 }

// kernel: bert_forward.24
= control target key start
LH: loop header
LB: loop body
LE: loop exit
PB: predicated region body
PF: predicated region fallthrough
CT: control target
= control target key end

     0   :  { %s2837_s12 = smov 0   ;;  %s2839_s13 = smov 0   ;;  %s3506_s0 = inlined_call_operand.vmem [shape: bf16[2,768], index: 0, kind: input, shape index: {}]   ;;  %s3507_s1 = inlined_call_operand.vmem [shape: bf16[768,768], index: 1, kind: input, shape index: {}]   ;;  %s3508_s2 = inlined_call_operand.vmem [shape: f32[1,768], index: 2, kind: input, shape index: {}]   ;;  %s3509_s3 = inlined_call_operand.vmem [shape: f32[2,768], index: 3, kind: output, shape index: {}]  }
   0x1   :  { %s2841_s14 = smov 0   ;;  %s2843_s15 = smov 0  }
   0x2   :  { %s2845_s16 = smov 0  }
   0x3 LB: > { %s28_s17 = sadd.s32 1, %s2808_s15  ;;  %p76_p1 = scmp.ne.s32.totalorder %s2800_s13, %s2796_s12  ;;  %s2812_s16 = sphi %s2845_s16, %s13_s16   ;;  %s2808_s15 = sphi %s2843_s15, %s3513_s15   ;;  %s2804_s14 = sphi %s2841_s14, %s3512_s14   ;;  %s2800_s13 = sphi %s2839_s13, %s3511_s13   ;;  %s2796_s12 = sphi %s2837_s12, %s3510_s12  }
   0x4   : > { %p30_p0 = scmp.ge.s32.totalorder %s28_s17, 2  ;;  %p77_p2 = scmp.eq.s32.totalorder %s2812_s16, 0 }
   0x5   : > { %s69_s19 = sadd.s32 1, %s2800_s13  ;;  %p2125_p5 = scmp.ge.s32.totalorder %s2812_s16, 2 }
   0x6   : > { %s3515_s17 = smov (%p30_p0, %s28_s17), 0  ;;  %p78_p3 = por %p77_p2, %p76_p1 }
   0x7   : > { %s65_s18 = ssub.s32 %s2808_s15, %s3515_s17  ;;  %168 = sbr.rel (%p2125_p5) target bundleno = 129 (0x81), region = 20 }
   0x8   : > { %p67_p4 = scmp.eq.s32.totalorder %s65_s18, 0 }
   0xa   : > { %s2872_s20 = scalar_select %p67_p4, %s2800_s13, %s69_s19  }
   0xc   : > { %171 = sbr.rel (!%p78_p3) target bundleno = 129 (0x81), region = 24  ;;  %s173_s21 = sand.u32 (%p78_p3), 1, %s2800_s13  }
   0xd   : > { %s2467_s22 = smul.u32 (%p78_p3), 12, %s2808_s15 }
   0xe   : > { %s2534_s23 = smul.u32 (%p78_p3), 1152, %s173_s21 }
   0xf   : > { %s2880_s26 = scalar_lea.vmem (%p78_p3), %s3507_s1, %s2467_s22 }
  0x10   : > { %v196_v0 = vld [vmem:[%s2880_s26] sm:$0xff] (%p78_p3)  ;;  %v198_v1 = vld [vmem:[%s2880_s26 + $0x18] sm:$0xff] (%p78_p3)  ;;  %v200_v2 = vld [vmem:[%s2880_s26 + $0x30] sm:$0xff] (%p78_p3)  ;;  %s2885_s27 = scalar_lea.vmem (%p78_p3), [#allocation2], %s2534_s23 }
  0x11   : > { %197 = vst [vmem:[%s2885_s27] sm:$0xff] %v196_v0  ;;  %199 = vst [vmem:[%s2885_s27 + $0xc] sm:$0xff] %v198_v1  ;;  %v202_v3 = vld [vmem:[%s2880_s26 + $0x48] sm:$0xff]  ;;  %v204_v4 = vld [vmem:[%s2880_s26 + $0x60] sm:$0xff] }
  0x12   : > { %201 = vst [vmem:[%s2885_s27 + $0x18] sm:$0xff] %v200_v2  ;;  %v206_v5 = vld [vmem:[%s2880_s26 + $0x78] sm:$0xff]  ;;  %203 = vst [vmem:[%s2885_s27 + $0x24] sm:$0xff] %v202_v3  ;;  %v208_v6 = vld [vmem:[%s2880_s26 + $0x90] sm:$0xff] }
  0x13   : > { %205 = vst [vmem:[%s2885_s27 + $0x30] sm:$0xff] %v204_v4  ;;  %207 = vst [vmem:[%s2885_s27 + $0x3c] sm:$0xff] %v206_v5  ;;  %v210_v7 = vld [vmem:[%s2880_s26 + $0xa8] sm:$0xff]  ;;  %v212_v8 = vld [vmem:[%s2880_s26 + $0xc0] sm:$0xff] }
  0x14   : > { %209 = vst [vmem:[%s2885_s27 + $0x48] sm:$0xff] %v208_v6  ;;  %211 = vst [vmem:[%s2885_s27 + $0x54] sm:$0xff] %v210_v7  ;;  %v214_v9 = vld [vmem:[%s2880_s26 + $0xd8] sm:$0xff]  ;;  %v216_v10 = vld [vmem:[%s2880_s26 + $0xf0] sm:$0xff] }
  0x15   : > { %213 = vst [vmem:[%s2885_s27 + $0x60] sm:$0xff] %v212_v8  ;;  %v218_v11 = vld [vmem:[%s2880_s26 + $0x108] sm:$0xff]  ;;  %215 = vst [vmem:[%s2885_s27 + $0x6c] sm:$0xff] %v214_v9  ;;  %v220_v12 = vld [vmem:[%s2880_s26 + $0x120] sm:$0xff] }
  0x16   : > { %217 = vst [vmem:[%s2885_s27 + $0x78] sm:$0xff] %v216_v10  ;;  %219 = vst [vmem:[%s2885_s27 + $0x84] sm:$0xff] %v218_v11  ;;  %v222_v13 = vld [vmem:[%s2880_s26 + $0x138] sm:$0xff]  ;;  %v224_v14 = vld [vmem:[%s2880_s26 + $0x150] sm:$0xff] }
  0x17   : > { %221 = vst [vmem:[%s2885_s27 + $0x90] sm:$0xff] %v220_v12  ;;  %223 = vst [vmem:[%s2885_s27 + $0x9c] sm:$0xff] %v222_v13  ;;  %v226_v15 = vld [vmem:[%s2880_s26 + $0x168] sm:$0xff]  ;;  %v228_v16 = vld [vmem:[%s2880_s26 + $0x180] sm:$0xff] }
  0x18   : > { %225 = vst [vmem:[%s2885_s27 + $0xa8] sm:$0xff] %v224_v14  ;;  %v230_v17 = vld [vmem:[%s2880_s26 + $0x198] sm:$0xff]  ;;  %227 = vst [vmem:[%s2885_s27 + $0xb4] sm:$0xff] %v226_v15  ;;  %v232_v18 = vld [vmem:[%s2880_s26 + $0x1b0] sm:$0xff] }
  0x19   : > { %229 = vst [vmem:[%s2885_s27 + $0xc0] sm:$0xff] %v228_v16  ;;  %231 = vst [vmem:[%s2885_s27 + $0xcc] sm:$0xff] %v230_v17  ;;  %v234_v19 = vld [vmem:[%s2880_s26 + $0x1c8] sm:$0xff]  ;;  %v236_v20 = vld [vmem:[%s2880_s26 + $0x1e0] sm:$0xff] }
  0x1a   : > { %233 = vst [vmem:[%s2885_s27 + $0xd8] sm:$0xff] %v232_v18  ;;  %235 = vst [vmem:[%s2885_s27 + $0xe4] sm:$0xff] %v234_v19  ;;  %v238_v21 = vld [vmem:[%s2880_s26 + $0x1f8] sm:$0xff]  ;;  %v240_v22 = vld [vmem:[%s2880_s26 + $0x210] sm:$0xff] }
  0x1b   : > { %237 = vst [vmem:[%s2885_s27 + $0xf0] sm:$0xff] %v236_v20  ;;  %v242_v23 = vld [vmem:[%s2880_s26 + $0x228] sm:$0xff]  ;;  %239 = vst [vmem:[%s2885_s27 + $0xfc] sm:$0xff] %v238_v21  ;;  %v244_v24 = vld [vmem:[%s2880_s26 + $0x240] sm:$0xff] }
  0x1c   : > { %241 = vst [vmem:[%s2885_s27 + $0x108] sm:$0xff] %v240_v22  ;;  %243 = vst [vmem:[%s2885_s27 + $0x114] sm:$0xff] %v242_v23  ;;  %v246_v25 = vld [vmem:[%s2880_s26 + $0x258] sm:$0xff]  ;;  %v248_v26 = vld [vmem:[%s2880_s26 + $0x270] sm:$0xff] }
  0x1d   : > { %245 = vst [vmem:[%s2885_s27 + $0x120] sm:$0xff] %v244_v24  ;;  %247 = vst [vmem:[%s2885_s27 + $0x12c] sm:$0xff] %v246_v25  ;;  %v250_v27 = vld [vmem:[%s2880_s26 + $0x288] sm:$0xff]  ;;  %v252_v28 = vld [vmem:[%s2880_s26 + $0x2a0] sm:$0xff] }
  0x1e   : > { %249 = vst [vmem:[%s2885_s27 + $0x138] sm:$0xff] %v248_v26  ;;  %v254_v29 = vld [vmem:[%s2880_s26 + $0x2b8] sm:$0xff]  ;;  %251 = vst [vmem:[%s2885_s27 + $0x144] sm:$0xff] %v250_v27  ;;  %v256_v30 = vld [vmem:[%s2880_s26 + $0x2d0] sm:$0xff] }
  0x1f   : > { %253 = vst [vmem:[%s2885_s27 + $0x150] sm:$0xff] %v252_v28  ;;  %255 = vst [vmem:[%s2885_s27 + $0x15c] sm:$0xff] %v254_v29  ;;  %v258_v31 = vld [vmem:[%s2880_s26 + $0x2e8] sm:$0xff]  ;;  %v260_v32 = vld [vmem:[%s2880_s26 + $0x300] sm:$0xff] }
  0x20   : > { %257 = vst [vmem:[%s2885_s27 + $0x168] sm:$0xff] %v256_v30  ;;  %259 = vst [vmem:[%s2885_s27 + $0x174] sm:$0xff] %v258_v31  ;;  %v262_v33 = vld [vmem:[%s2880_s26 + $0x318] sm:$0xff]  ;;  %v264_v34 = vld [vmem:[%s2880_s26 + $0x330] sm:$0xff] }
  0x21   : > { %261 = vst [vmem:[%s2885_s27 + $0x180] sm:$0xff] %v260_v32  ;;  %v266_v35 = vld [vmem:[%s2880_s26 + $0x348] sm:$0xff]  ;;  %263 = vst [vmem:[%s2885_s27 + $0x18c] sm:$0xff] %v262_v33  ;;  %v268_v36 = vld [vmem:[%s2880_s26 + $0x360] sm:$0xff] }
  0x22   : > { %265 = vst [vmem:[%s2885_s27 + $0x198] sm:$0xff] %v264_v34  ;;  %267 = vst [vmem:[%s2885_s27 + $0x1a4] sm:$0xff] %v266_v35  ;;  %v270_v37 = vld [vmem:[%s2880_s26 + $0x378] sm:$0xff]  ;;  %v272_v38 = vld [vmem:[%s2880_s26 + $0x390] sm:$0xff] }
  0x23   : > { %269 = vst [vmem:[%s2885_s27 + $0x1b0] sm:$0xff] %v268_v36  ;;  %271 = vst [vmem:[%s2885_s27 + $0x1bc] sm:$0xff] %v270_v37  ;;  %v274_v39 = vld [vmem:[%s2880_s26 + $0x3a8] sm:$0xff]  ;;  %v276_v40 = vld [vmem:[%s2880_s26 + $0x3c0] sm:$0xff] }
  0x24   : > { %273 = vst [vmem:[%s2885_s27 + $0x1c8] sm:$0xff] %v272_v38  ;;  %v278_v41 = vld [vmem:[%s2880_s26 + $0x3d8] sm:$0xff]  ;;  %275 = vst [vmem:[%s2885_s27 + $0x1d4] sm:$0xff] %v274_v39  ;;  %v280_v42 = vld [vmem:[%s2880_s26 + $0x3f0] sm:$0xff] }
  0x25   : > { %277 = vst [vmem:[%s2885_s27 + $0x1e0] sm:$0xff] %v276_v40  ;;  %279 = vst [vmem:[%s2885_s27 + $0x1ec] sm:$0xff] %v278_v41  ;;  %v282_v43 = vld [vmem:[%s2880_s26 + $0x408] sm:$0xff]  ;;  %v284_v44 = vld [vmem:[%s2880_s26 + $0x420] sm:$0xff] }
  0x26   : > { %281 = vst [vmem:[%s2885_s27 + $0x1f8] sm:$0xff] %v280_v42  ;;  %283 = vst [vmem:[%s2885_s27 + $0x204] sm:$0xff] %v282_v43  ;;  %v286_v45 = vld [vmem:[%s2880_s26 + $0x438] sm:$0xff]  ;;  %v288_v46 = vld [vmem:[%s2880_s26 + $0x450] sm:$0xff] }
  0x27   : > { %285 = vst [vmem:[%s2885_s27 + $0x210] sm:$0xff] %v284_v44  ;;  %v290_v47 = vld [vmem:[%s2880_s26 + $0x468] sm:$0xff]  ;;  %287 = vst [vmem:[%s2885_s27 + $0x21c] sm:$0xff] %v286_v45  ;;  %v292_v48 = vld [vmem:[%s2880_s26 + $0x480] sm:$0xff] }
  0x28   : > { %289 = vst [vmem:[%s2885_s27 + $0x228] sm:$0xff] %v288_v46  ;;  %291 = vst [vmem:[%s2885_s27 + $0x234] sm:$0xff] %v290_v47  ;;  %v294_v49 = vld [vmem:[%s2880_s26 + $0x498] sm:$0xff]  ;;  %v296_v50 = vld [vmem:[%s2880_s26 + $0x4b0] sm:$0xff] }
  0x29   : > { %293 = vst [vmem:[%s2885_s27 + $0x240] sm:$0xff] %v292_v48  ;;  %295 = vst [vmem:[%s2885_s27 + $0x24c] sm:$0xff] %v294_v49  ;;  %v298_v51 = vld [vmem:[%s2880_s26 + $0x4c8] sm:$0xff]  ;;  %v300_v52 = vld [vmem:[%s2880_s26 + $0x4e0] sm:$0xff] }
  0x2a   : > { %297 = vst [vmem:[%s2885_s27 + $0x258] sm:$0xff] %v296_v50  ;;  %v302_v53 = vld [vmem:[%s2880_s26 + $0x4f8] sm:$0xff]  ;;  %299 = vst [vmem:[%s2885_s27 + $0x264] sm:$0xff] %v298_v51  ;;  %v304_v54 = vld [vmem:[%s2880_s26 + $0x510] sm:$0xff] }
  0x2b   : > { %301 = vst [vmem:[%s2885_s27 + $0x270] sm:$0xff] %v300_v52  ;;  %303 = vst [vmem:[%s2885_s27 + $0x27c] sm:$0xff] %v302_v53  ;;  %v306_v55 = vld [vmem:[%s2880_s26 + $0x528] sm:$0xff]  ;;  %v308_v56 = vld [vmem:[%s2880_s26 + $0x540] sm:$0xff] }
  0x2c   : > { %305 = vst [vmem:[%s2885_s27 + $0x288] sm:$0xff] %v304_v54  ;;  %307 = vst [vmem:[%s2885_s27 + $0x294] sm:$0xff] %v306_v55  ;;  %v310_v57 = vld [vmem:[%s2880_s26 + $0x558] sm:$0xff]  ;;  %v312_v58 = vld [vmem:[%s2880_s26 + $0x570] sm:$0xff] }
  0x2d   : > { %309 = vst [vmem:[%s2885_s27 + $0x2a0] sm:$0xff] %v308_v56  ;;  %v314_v59 = vld [vmem:[%s2880_s26 + $0x588] sm:$0xff]  ;;  %311 = vst [vmem:[%s2885_s27 + $0x2ac] sm:$0xff] %v310_v57  ;;  %v316_v60 = vld [vmem:[%s2880_s26 + $0x5a0] sm:$0xff] }
  0x2e   : > { %313 = vst [vmem:[%s2885_s27 + $0x2b8] sm:$0xff] %v312_v58  ;;  %315 = vst [vmem:[%s2885_s27 + $0x2c4] sm:$0xff] %v314_v59  ;;  %v318_v61 = vld [vmem:[%s2880_s26 + $0x5b8] sm:$0xff]  ;;  %v320_v62 = vld [vmem:[%s2880_s26 + $0x5d0] sm:$0xff] }
  0x2f   : > { %317 = vst [vmem:[%s2885_s27 + $0x2d0] sm:$0xff] %v316_v60  ;;  %319 = vst [vmem:[%s2885_s27 + $0x2dc] sm:$0xff] %v318_v61  ;;  %v322_v63 = vld [vmem:[%s2880_s26 + $0x5e8] sm:$0xff]  ;;  %v324_v0 = vld [vmem:[%s2880_s26 + $0x600] sm:$0xff] }
  0x30   : > { %321 = vst [vmem:[%s2885_s27 + $0x2e8] sm:$0xff] %v320_v62  ;;  %v326_v1 = vld [vmem:[%s2880_s26 + $0x618] sm:$0xff]  ;;  %323 = vst [vmem:[%s2885_s27 + $0x2f4] sm:$0xff] %v322_v63  ;;  %v328_v2 = vld [vmem:[%s2880_s26 + $0x630] sm:$0xff] }
  0x31   : > { %325 = vst [vmem:[%s2885_s27 + $0x300] sm:$0xff] %v324_v0  ;;  %327 = vst [vmem:[%s2885_s27 + $0x30c] sm:$0xff] %v326_v1  ;;  %v330_v3 = vld [vmem:[%s2880_s26 + $0x648] sm:$0xff]  ;;  %v332_v4 = vld [vmem:[%s2880_s26 + $0x660] sm:$0xff] }
  0x32   : > { %329 = vst [vmem:[%s2885_s27 + $0x318] sm:$0xff] %v328_v2  ;;  %331 = vst [vmem:[%s2885_s27 + $0x324] sm:$0xff] %v330_v3  ;;  %v334_v5 = vld [vmem:[%s2880_s26 + $0x678] sm:$0xff]  ;;  %v336_v6 = vld [vmem:[%s2880_s26 + $0x690] sm:$0xff] }
  0x33   : > { %333 = vst [vmem:[%s2885_s27 + $0x330] sm:$0xff] %v332_v4  ;;  %v338_v7 = vld [vmem:[%s2880_s26 + $0x6a8] sm:$0xff]  ;;  %335 = vst [vmem:[%s2885_s27 + $0x33c] sm:$0xff] %v334_v5  ;;  %v340_v8 = vld [vmem:[%s2880_s26 + $0x6c0] sm:$0xff] }
  0x34   : > { %337 = vst [vmem:[%s2885_s27 + $0x348] sm:$0xff] %v336_v6  ;;  %339 = vst [vmem:[%s2885_s27 + $0x354] sm:$0xff] %v338_v7  ;;  %v342_v9 = vld [vmem:[%s2880_s26 + $0x6d8] sm:$0xff]  ;;  %v344_v10 = vld [vmem:[%s2880_s26 + $0x6f0] sm:$0xff] }
  0x35   : > { %341 = vst [vmem:[%s2885_s27 + $0x360] sm:$0xff] %v340_v8  ;;  %343 = vst [vmem:[%s2885_s27 + $0x36c] sm:$0xff] %v342_v9  ;;  %v346_v11 = vld [vmem:[%s2880_s26 + $0x708] sm:$0xff]  ;;  %v348_v12 = vld [vmem:[%s2880_s26 + $0x720] sm:$0xff] }
  0x36   : > { %345 = vst [vmem:[%s2885_s27 + $0x378] sm:$0xff] %v344_v10  ;;  %v350_v13 = vld [vmem:[%s2880_s26 + $0x738] sm:$0xff]  ;;  %347 = vst [vmem:[%s2885_s27 + $0x384] sm:$0xff] %v346_v11  ;;  %v352_v14 = vld [vmem:[%s2880_s26 + $0x750] sm:$0xff] }
  0x37   : > { %349 = vst [vmem:[%s2885_s27 + $0x390] sm:$0xff] %v348_v12  ;;  %351 = vst [vmem:[%s2885_s27 + $0x39c] sm:$0xff] %v350_v13  ;;  %v354_v15 = vld [vmem:[%s2880_s26 + $0x768] sm:$0xff]  ;;  %v356_v16 = vld [vmem:[%s2880_s26 + $0x780] sm:$0xff] }
  0x38   : > { %353 = vst [vmem:[%s2885_s27 + $0x3a8] sm:$0xff] %v352_v14  ;;  %355 = vst [vmem:[%s2885_s27 + $0x3b4] sm:$0xff] %v354_v15  ;;  %v358_v17 = vld [vmem:[%s2880_s26 + $0x798] sm:$0xff]  ;;  %v360_v18 = vld [vmem:[%s2880_s26 + $0x7b0] sm:$0xff] }
  0x39   : > { %357 = vst [vmem:[%s2885_s27 + $0x3c0] sm:$0xff] %v356_v16  ;;  %v362_v19 = vld [vmem:[%s2880_s26 + $0x7c8] sm:$0xff]  ;;  %359 = vst [vmem:[%s2885_s27 + $0x3cc] sm:$0xff] %v358_v17  ;;  %v364_v20 = vld [vmem:[%s2880_s26 + $0x7e0] sm:$0xff] }
  0x3a   : > { %361 = vst [vmem:[%s2885_s27 + $0x3d8] sm:$0xff] %v360_v18  ;;  %363 = vst [vmem:[%s2885_s27 + $0x3e4] sm:$0xff] %v362_v19  ;;  %v366_v21 = vld [vmem:[%s2880_s26 + $0x7f8] sm:$0xff]  ;;  %v368_v22 = vld [vmem:[%s2880_s26 + $0x810] sm:$0xff] }
  0x3b   : > { %365 = vst [vmem:[%s2885_s27 + $0x3f0] sm:$0xff] %v364_v20  ;;  %367 = vst [vmem:[%s2885_s27 + $0x3fc] sm:$0xff] %v366_v21  ;;  %v370_v23 = vld [vmem:[%s2880_s26 + $0x828] sm:$0xff]  ;;  %v372_v24 = vld [vmem:[%s2880_s26 + $0x840] sm:$0xff] }
  0x3c   : > { %369 = vst [vmem:[%s2885_s27 + $0x408] sm:$0xff] %v368_v22  ;;  %v374_v25 = vld [vmem:[%s2880_s26 + $0x858] sm:$0xff]  ;;  %371 = vst [vmem:[%s2885_s27 + $0x414] sm:$0xff] %v370_v23  ;;  %v376_v26 = vld [vmem:[%s2880_s26 + $0x870] sm:$0xff] }
  0x3d   : > { %373 = vst [vmem:[%s2885_s27 + $0x420] sm:$0xff] %v372_v24  ;;  %375 = vst [vmem:[%s2885_s27 + $0x42c] sm:$0xff] %v374_v25  ;;  %v378_v27 = vld [vmem:[%s2880_s26 + $0x888] sm:$0xff]  ;;  %v380_v28 = vld [vmem:[%s2880_s26 + $0x8a0] sm:$0xff] }
  0x3e   : > { %377 = vst [vmem:[%s2885_s27 + $0x438] sm:$0xff] %v376_v26  ;;  %379 = vst [vmem:[%s2885_s27 + $0x444] sm:$0xff] %v378_v27  ;;  %v382_v29 = vld [vmem:[%s2880_s26 + $0x8b8] sm:$0xff]  ;;  %v384_v30 = vld [vmem:[%s2880_s26 + $0x8d0] sm:$0xff] }
  0x3f   : > { %381 = vst [vmem:[%s2885_s27 + $0x450] sm:$0xff] %v380_v28  ;;  %v386_v31 = vld [vmem:[%s2880_s26 + $0x8e8] sm:$0xff]  ;;  %383 = vst [vmem:[%s2885_s27 + $0x45c] sm:$0xff] %v382_v29  ;;  %v2129_v33 = vld [vmem:[%s2880_s26 + $0x20] sm:$0xf] }
  0x40   : > { %385 = vst [vmem:[%s2885_s27 + $0x468] sm:$0xff] %v384_v30  ;;  %387 = vst [vmem:[%s2885_s27 + $0x474] sm:$0xff] %v386_v31  ;;  %v2127_v32 = vld [vmem:[%s2880_s26 + $0x8] sm:$0xf]  ;;  %v2131_v34 = vld [vmem:[%s2880_s26 + $0x38] sm:$0xf] }
  0x41   : > { %2128 = vst [vmem:[%s2885_s27 + $0x8] sm:$0xf] %v2127_v32  ;;  %2130 = vst [vmem:[%s2885_s27 + $0x14] sm:$0xf] %v2129_v33  ;;  %v2133_v35 = vld [vmem:[%s2880_s26 + $0x50] sm:$0xf] }
  0x42   : > { %2132 = vst [vmem:[%s2885_s27 + $0x20] sm:$0xf] %v2131_v34  ;;  %v2135_v36 = vld [vmem:[%s2880_s26 + $0x68] sm:$0xf]  ;;  %v2137_v37 = vld [vmem:[%s2880_s26 + $0x80] sm:$0xf] }
  0x43   : > { %2134 = vst [vmem:[%s2885_s27 + $0x2c] sm:$0xf] %v2133_v35  ;;  %2136 = vst [vmem:[%s2885_s27 + $0x38] sm:$0xf] %v2135_v36  ;;  %v2139_v38 = vld [vmem:[%s2880_s26 + $0x98] sm:$0xf] }
  0x44   : > { %2138 = vst [vmem:[%s2885_s27 + $0x44] sm:$0xf] %v2137_v37  ;;  %v2141_v39 = vld [vmem:[%s2880_s26 + $0xb0] sm:$0xf]  ;;  %v2143_v40 = vld [vmem:[%s2880_s26 + $0xc8] sm:$0xf] }
  0x45   : > { %2140 = vst [vmem:[%s2885_s27 + $0x50] sm:$0xf] %v2139_v38  ;;  %2142 = vst [vmem:[%s2885_s27 + $0x5c] sm:$0xf] %v2141_v39  ;;  %v2145_v41 = vld [vmem:[%s2880_s26 + $0xe0] sm:$0xf] }
  0x46   : > { %2144 = vst [vmem:[%s2885_s27 + $0x68] sm:$0xf] %v2143_v40  ;;  %v2147_v42 = vld [vmem:[%s2880_s26 + $0xf8] sm:$0xf]  ;;  %v2149_v43 = vld [vmem:[%s2880_s26 + $0x110] sm:$0xf] }
  0x47   : > { %2146 = vst [vmem:[%s2885_s27 + $0x74] sm:$0xf] %v2145_v41  ;;  %2148 = vst [vmem:[%s2885_s27 + $0x80] sm:$0xf] %v2147_v42  ;;  %v2151_v44 = vld [vmem:[%s2880_s26 + $0x128] sm:$0xf] }
  0x48   : > { %2150 = vst [vmem:[%s2885_s27 + $0x8c] sm:$0xf] %v2149_v43  ;;  %v2153_v45 = vld [vmem:[%s2880_s26 + $0x140] sm:$0xf]  ;;  %v2155_v46 = vld [vmem:[%s2880_s26 + $0x158] sm:$0xf] }
  0x49   : > { %2152 = vst [vmem:[%s2885_s27 + $0x98] sm:$0xf] %v2151_v44  ;;  %2154 = vst [vmem:[%s2885_s27 + $0xa4] sm:$0xf] %v2153_v45  ;;  %v2157_v47 = vld [vmem:[%s2880_s26 + $0x170] sm:$0xf] }
  0x4a   : > { %2156 = vst [vmem:[%s2885_s27 + $0xb0] sm:$0xf] %v2155_v46  ;;  %v2159_v48 = vld [vmem:[%s2880_s26 + $0x188] sm:$0xf]  ;;  %v2161_v49 = vld [vmem:[%s2880_s26 + $0x1a0] sm:$0xf] }
  0x4b   : > { %2158 = vst [vmem:[%s2885_s27 + $0xbc] sm:$0xf] %v2157_v47  ;;  %2160 = vst [vmem:[%s2885_s27 + $0xc8] sm:$0xf] %v2159_v48  ;;  %v2163_v50 = vld [vmem:[%s2880_s26 + $0x1b8] sm:$0xf] }
  0x4c   : > { %2162 = vst [vmem:[%s2885_s27 + $0xd4] sm:$0xf] %v2161_v49  ;;  %v2165_v51 = vld [vmem:[%s2880_s26 + $0x1d0] sm:$0xf]  ;;  %v2167_v52 = vld [vmem:[%s2880_s26 + $0x1e8] sm:$0xf] }
  0x4d   : > { %2164 = vst [vmem:[%s2885_s27 + $0xe0] sm:$0xf] %v2163_v50  ;;  %2166 = vst [vmem:[%s2885_s27 + $0xec] sm:$0xf] %v2165_v51  ;;  %v2169_v53 = vld [vmem:[%s2880_s26 + $0x200] sm:$0xf] }
  0x4e   : > { %2168 = vst [vmem:[%s2885_s27 + $0xf8] sm:$0xf] %v2167_v52  ;;  %v2171_v54 = vld [vmem:[%s2880_s26 + $0x218] sm:$0xf]  ;;  %v2173_v55 = vld [vmem:[%s2880_s26 + $0x230] sm:$0xf] }
  0x4f   : > { %2170 = vst [vmem:[%s2885_s27 + $0x104] sm:$0xf] %v2169_v53  ;;  %2172 = vst [vmem:[%s2885_s27 + $0x110] sm:$0xf] %v2171_v54  ;;  %v2175_v56 = vld [vmem:[%s2880_s26 + $0x248] sm:$0xf] }
  0x50   : > { %2174 = vst [vmem:[%s2885_s27 + $0x11c] sm:$0xf] %v2173_v55  ;;  %v2177_v57 = vld [vmem:[%s2880_s26 + $0x260] sm:$0xf]  ;;  %v2179_v58 = vld [vmem:[%s2880_s26 + $0x278] sm:$0xf] }
  0x51   : > { %2176 = vst [vmem:[%s2885_s27 + $0x128] sm:$0xf] %v2175_v56  ;;  %2178 = vst [vmem:[%s2885_s27 + $0x134] sm:$0xf] %v2177_v57  ;;  %v2181_v59 = vld [vmem:[%s2880_s26 + $0x290] sm:$0xf] }
  0x52   : > { %2180 = vst [vmem:[%s2885_s27 + $0x140] sm:$0xf] %v2179_v58  ;;  %v2183_v60 = vld [vmem:[%s2880_s26 + $0x2a8] sm:$0xf]  ;;  %v2185_v61 = vld [vmem:[%s2880_s26 + $0x2c0] sm:$0xf] }
  0x53   : > { %2182 = vst [vmem:[%s2885_s27 + $0x14c] sm:$0xf] %v2181_v59  ;;  %2184 = vst [vmem:[%s2885_s27 + $0x158] sm:$0xf] %v2183_v60  ;;  %v2187_v62 = vld [vmem:[%s2880_s26 + $0x2d8] sm:$0xf] }
  0x54   : > { %2186 = vst [vmem:[%s2885_s27 + $0x164] sm:$0xf] %v2185_v61  ;;  %v2189_v63 = vld [vmem:[%s2880_s26 + $0x2f0] sm:$0xf]  ;;  %v2191_v0 = vld [vmem:[%s2880_s26 + $0x308] sm:$0xf] }
  0x55   : > { %2188 = vst [vmem:[%s2885_s27 + $0x170] sm:$0xf] %v2187_v62  ;;  %2190 = vst [vmem:[%s2885_s27 + $0x17c] sm:$0xf] %v2189_v63  ;;  %v2193_v1 = vld [vmem:[%s2880_s26 + $0x320] sm:$0xf] }
  0x56   : > { %2192 = vst [vmem:[%s2885_s27 + $0x188] sm:$0xf] %v2191_v0  ;;  %v2195_v2 = vld [vmem:[%s2880_s26 + $0x338] sm:$0xf]  ;;  %v2197_v3 = vld [vmem:[%s2880_s26 + $0x350] sm:$0xf] }
  0x57   : > { %2194 = vst [vmem:[%s2885_s27 + $0x194] sm:$0xf] %v2193_v1  ;;  %2196 = vst [vmem:[%s2885_s27 + $0x1a0] sm:$0xf] %v2195_v2  ;;  %v2199_v4 = vld [vmem:[%s2880_s26 + $0x368] sm:$0xf] }
  0x58   : > { %2198 = vst [vmem:[%s2885_s27 + $0x1ac] sm:$0xf] %v2197_v3  ;;  %v2201_v5 = vld [vmem:[%s2880_s26 + $0x380] sm:$0xf]  ;;  %v2203_v6 = vld [vmem:[%s2880_s26 + $0x398] sm:$0xf] }
  0x59   : > { %2200 = vst [vmem:[%s2885_s27 + $0x1b8] sm:$0xf] %v2199_v4  ;;  %2202 = vst [vmem:[%s2885_s27 + $0x1c4] sm:$0xf] %v2201_v5  ;;  %v2205_v7 = vld [vmem:[%s2880_s26 + $0x3b0] sm:$0xf] }
  0x5a   : > { %2204 = vst [vmem:[%s2885_s27 + $0x1d0] sm:$0xf] %v2203_v6  ;;  %v2207_v8 = vld [vmem:[%s2880_s26 + $0x3c8] sm:$0xf]  ;;  %v2209_v9 = vld [vmem:[%s2880_s26 + $0x3e0] sm:$0xf] }
  0x5b   : > { %2206 = vst [vmem:[%s2885_s27 + $0x1dc] sm:$0xf] %v2205_v7  ;;  %2208 = vst [vmem:[%s2885_s27 + $0x1e8] sm:$0xf] %v2207_v8  ;;  %v2211_v10 = vld [vmem:[%s2880_s26 + $0x3f8] sm:$0xf] }
  0x5c   : > { %2210 = vst [vmem:[%s2885_s27 + $0x1f4] sm:$0xf] %v2209_v9  ;;  %v2213_v11 = vld [vmem:[%s2880_s26 + $0x410] sm:$0xf]  ;;  %v2215_v12 = vld [vmem:[%s2880_s26 + $0x428] sm:$0xf] }
  0x5d   : > { %2212 = vst [vmem:[%s2885_s27 + $0x200] sm:$0xf] %v2211_v10  ;;  %2214 = vst [vmem:[%s2885_s27 + $0x20c] sm:$0xf] %v2213_v11  ;;  %v2217_v13 = vld [vmem:[%s2880_s26 + $0x440] sm:$0xf] }
  0x5e   : > { %2216 = vst [vmem:[%s2885_s27 + $0x218] sm:$0xf] %v2215_v12  ;;  %v2219_v14 = vld [vmem:[%s2880_s26 + $0x458] sm:$0xf]  ;;  %v2221_v15 = vld [vmem:[%s2880_s26 + $0x470] sm:$0xf] }
  0x5f   : > { %2218 = vst [vmem:[%s2885_s27 + $0x224] sm:$0xf] %v2217_v13  ;;  %2220 = vst [vmem:[%s2885_s27 + $0x230] sm:$0xf] %v2219_v14  ;;  %v2223_v16 = vld [vmem:[%s2880_s26 + $0x488] sm:$0xf] }
  0x60   : > { %2222 = vst [vmem:[%s2885_s27 + $0x23c] sm:$0xf] %v2221_v15  ;;  %v2225_v17 = vld [vmem:[%s2880_s26 + $0x4a0] sm:$0xf]  ;;  %v2227_v18 = vld [vmem:[%s2880_s26 + $0x4b8] sm:$0xf] }
  0x61   : > { %2224 = vst [vmem:[%s2885_s27 + $0x248] sm:$0xf] %v2223_v16  ;;  %2226 = vst [vmem:[%s2885_s27 + $0x254] sm:$0xf] %v2225_v17  ;;  %v2229_v19 = vld [vmem:[%s2880_s26 + $0x4d0] sm:$0xf] }
  0x62   : > { %2228 = vst [vmem:[%s2885_s27 + $0x260] sm:$0xf] %v2227_v18  ;;  %v2231_v20 = vld [vmem:[%s2880_s26 + $0x4e8] sm:$0xf]  ;;  %v2233_v21 = vld [vmem:[%s2880_s26 + $0x500] sm:$0xf] }
  0x63   : > { %2230 = vst [vmem:[%s2885_s27 + $0x26c] sm:$0xf] %v2229_v19  ;;  %2232 = vst [vmem:[%s2885_s27 + $0x278] sm:$0xf] %v2231_v20  ;;  %v2235_v22 = vld [vmem:[%s2880_s26 + $0x518] sm:$0xf] }
  0x64   : > { %2234 = vst [vmem:[%s2885_s27 + $0x284] sm:$0xf] %v2233_v21  ;;  %v2237_v23 = vld [vmem:[%s2880_s26 + $0x530] sm:$0xf]  ;;  %v2239_v24 = vld [vmem:[%s2880_s26 + $0x548] sm:$0xf] }
  0x65   : > { %2236 = vst [vmem:[%s2885_s27 + $0x290] sm:$0xf] %v2235_v22  ;;  %2238 = vst [vmem:[%s2885_s27 + $0x29c] sm:$0xf] %v2237_v23  ;;  %v2241_v25 = vld [vmem:[%s2880_s26 + $0x560] sm:$0xf] }
  0x66   : > { %2240 = vst [vmem:[%s2885_s27 + $0x2a8] sm:$0xf] %v2239_v24  ;;  %v2243_v26 = vld [vmem:[%s2880_s26 + $0x578] sm:$0xf]  ;;  %v2245_v27 = vld [vmem:[%s2880_s26 + $0x590] sm:$0xf] }
  0x67   : > { %2242 = vst [vmem:[%s2885_s27 + $0x2b4] sm:$0xf] %v2241_v25  ;;  %2244 = vst [vmem:[%s2885_s27 + $0x2c0] sm:$0xf] %v2243_v26  ;;  %v2247_v28 = vld [vmem:[%s2880_s26 + $0x5a8] sm:$0xf] }
  0x68   : > { %2246 = vst [vmem:[%s2885_s27 + $0x2cc] sm:$0xf] %v2245_v27  ;;  %v2249_v29 = vld [vmem:[%s2880_s26 + $0x5c0] sm:$0xf]  ;;  %v2251_v30 = vld [vmem:[%s2880_s26 + $0x5d8] sm:$0xf] }
  0x69   : > { %2248 = vst [vmem:[%s2885_s27 + $0x2d8] sm:$0xf] %v2247_v28  ;;  %2250 = vst [vmem:[%s2885_s27 + $0x2e4] sm:$0xf] %v2249_v29  ;;  %v2253_v31 = vld [vmem:[%s2880_s26 + $0x5f0] sm:$0xf] }
  0x6a   : > { %2252 = vst [vmem:[%s2885_s27 + $0x2f0] sm:$0xf] %v2251_v30  ;;  %v2255_v32 = vld [vmem:[%s2880_s26 + $0x608] sm:$0xf]  ;;  %v2257_v33 = vld [vmem:[%s2880_s26 + $0x620] sm:$0xf] }
  0x6b   : > { %2254 = vst [vmem:[%s2885_s27 + $0x2fc] sm:$0xf] %v2253_v31  ;;  %2256 = vst [vmem:[%s2885_s27 + $0x308] sm:$0xf] %v2255_v32  ;;  %v2259_v34 = vld [vmem:[%s2880_s26 + $0x638] sm:$0xf] }
  0x6c   : > { %2258 = vst [vmem:[%s2885_s27 + $0x314] sm:$0xf] %v2257_v33  ;;  %v2261_v35 = vld [vmem:[%s2880_s26 + $0x650] sm:$0xf]  ;;  %v2263_v36 = vld [vmem:[%s2880_s26 + $0x668] sm:$0xf] }
  0x6d   : > { %2260 = vst [vmem:[%s2885_s27 + $0x320] sm:$0xf] %v2259_v34  ;;  %2262 = vst [vmem:[%s2885_s27 + $0x32c] sm:$0xf] %v2261_v35  ;;  %v2265_v37 = vld [vmem:[%s2880_s26 + $0x680] sm:$0xf] }
  0x6e   : > { %2264 = vst [vmem:[%s2885_s27 + $0x338] sm:$0xf] %v2263_v36  ;;  %v2267_v38 = vld [vmem:[%s2880_s26 + $0x698] sm:$0xf]  ;;  %v2269_v39 = vld [vmem:[%s2880_s26 + $0x6b0] sm:$0xf] }
  0x6f   : > { %2266 = vst [vmem:[%s2885_s27 + $0x344] sm:$0xf] %v2265_v37  ;;  %2268 = vst [vmem:[%s2885_s27 + $0x350] sm:$0xf] %v2267_v38  ;;  %v2271_v40 = vld [vmem:[%s2880_s26 + $0x6c8] sm:$0xf] }
  0x70   : > { %2270 = vst [vmem:[%s2885_s27 + $0x35c] sm:$0xf] %v2269_v39  ;;  %v2273_v41 = vld [vmem:[%s2880_s26 + $0x6e0] sm:$0xf]  ;;  %v2275_v42 = vld [vmem:[%s2880_s26 + $0x6f8] sm:$0xf] }
  0x71   : > { %2272 = vst [vmem:[%s2885_s27 + $0x368] sm:$0xf] %v2271_v40  ;;  %2274 = vst [vmem:[%s2885_s27 + $0x374] sm:$0xf] %v2273_v41  ;;  %v2277_v43 = vld [vmem:[%s2880_s26 + $0x710] sm:$0xf] }
  0x72   : > { %2276 = vst [vmem:[%s2885_s27 + $0x380] sm:$0xf] %v2275_v42  ;;  %v2279_v44 = vld [vmem:[%s2880_s26 + $0x728] sm:$0xf]  ;;  %v2281_v45 = vld [vmem:[%s2880_s26 + $0x740] sm:$0xf] }
  0x73   : > { %2278 = vst [vmem:[%s2885_s27 + $0x38c] sm:$0xf] %v2277_v43  ;;  %2280 = vst [vmem:[%s2885_s27 + $0x398] sm:$0xf] %v2279_v44  ;;  %v2283_v46 = vld [vmem:[%s2880_s26 + $0x758] sm:$0xf] }
  0x74   : > { %2282 = vst [vmem:[%s2885_s27 + $0x3a4] sm:$0xf] %v2281_v45  ;;  %v2285_v47 = vld [vmem:[%s2880_s26 + $0x770] sm:$0xf]  ;;  %v2287_v48 = vld [vmem:[%s2880_s26 + $0x788] sm:$0xf] }
  0x75   : > { %2284 = vst [vmem:[%s2885_s27 + $0x3b0] sm:$0xf] %v2283_v46  ;;  %2286 = vst [vmem:[%s2885_s27 + $0x3bc] sm:$0xf] %v2285_v47  ;;  %v2289_v49 = vld [vmem:[%s2880_s26 + $0x7a0] sm:$0xf] }
  0x76   : > { %2288 = vst [vmem:[%s2885_s27 + $0x3c8] sm:$0xf] %v2287_v48  ;;  %v2291_v50 = vld [vmem:[%s2880_s26 + $0x7b8] sm:$0xf]  ;;  %v2293_v51 = vld [vmem:[%s2880_s26 + $0x7d0] sm:$0xf] }
  0x77   : > { %2290 = vst [vmem:[%s2885_s27 + $0x3d4] sm:$0xf] %v2289_v49  ;;  %2292 = vst [vmem:[%s2885_s27 + $0x3e0] sm:$0xf] %v2291_v50  ;;  %v2295_v52 = vld [vmem:[%s2880_s26 + $0x7e8] sm:$0xf] }
  0x78   : > { %2294 = vst [vmem:[%s2885_s27 + $0x3ec] sm:$0xf] %v2293_v51  ;;  %v2297_v53 = vld [vmem:[%s2880_s26 + $0x800] sm:$0xf]  ;;  %v2299_v54 = vld [vmem:[%s2880_s26 + $0x818] sm:$0xf] }
  0x79   : > { %2296 = vst [vmem:[%s2885_s27 + $0x3f8] sm:$0xf] %v2295_v52  ;;  %2298 = vst [vmem:[%s2885_s27 + $0x404] sm:$0xf] %v2297_v53  ;;  %v2301_v55 = vld [vmem:[%s2880_s26 + $0x830] sm:$0xf] }
  0x7a   : > { %2300 = vst [vmem:[%s2885_s27 + $0x410] sm:$0xf] %v2299_v54  ;;  %v2303_v56 = vld [vmem:[%s2880_s26 + $0x848] sm:$0xf]  ;;  %v2305_v57 = vld [vmem:[%s2880_s26 + $0x860] sm:$0xf] }
  0x7b   : > { %2302 = vst [vmem:[%s2885_s27 + $0x41c] sm:$0xf] %v2301_v55  ;;  %2304 = vst [vmem:[%s2885_s27 + $0x428] sm:$0xf] %v2303_v56  ;;  %v2307_v58 = vld [vmem:[%s2880_s26 + $0x878] sm:$0xf] }
  0x7c   : > { %2306 = vst [vmem:[%s2885_s27 + $0x434] sm:$0xf] %v2305_v57  ;;  %v2309_v59 = vld [vmem:[%s2880_s26 + $0x890] sm:$0xf]  ;;  %v2311_v60 = vld [vmem:[%s2880_s26 + $0x8a8] sm:$0xf] }
  0x7d   : > { %2308 = vst [vmem:[%s2885_s27 + $0x440] sm:$0xf] %v2307_v58  ;;  %2310 = vst [vmem:[%s2885_s27 + $0x44c] sm:$0xf] %v2309_v59  ;;  %v2313_v61 = vld [vmem:[%s2880_s26 + $0x8c0] sm:$0xf] }
  0x7e   : > { %2312 = vst [vmem:[%s2885_s27 + $0x458] sm:$0xf] %v2311_v60  ;;  %v2315_v62 = vld [vmem:[%s2880_s26 + $0x8d8] sm:$0xf]  ;;  %v2317_v63 = vld [vmem:[%s2880_s26 + $0x8f0] sm:$0xf] }
  0x7f   : > { %2314 = vst [vmem:[%s2885_s27 + $0x464] sm:$0xf] %v2313_v61  ;;  %2316 = vst [vmem:[%s2885_s27 + $0x470] sm:$0xf] %v2315_v62 }
  0x80   : > { %2318 = vst [vmem:[%s2885_s27 + $0x47c] sm:$0xf] %v2317_v63 }
  0x81 PF: > { %p2319_p6 = scmp.ge.s32.totalorder %s2812_s16, 1  ;;  %p600_p7 = scmp.lt.s32.totalorder %s2812_s16, 3 }
  0x83   : > { %p601_p8 = pnand %p2319_p6, %p600_p7 }
  0x84   : > { %s607_s28 = sand.u32 (!%p601_p8), 1, %s2796_s12   ;;  %s657_s6 = smul.u32 (!%p601_p8), 3, %s2804_s14 }
  0x85   : > { %604 = sbr.rel (%p601_p8) target bundleno = 529 (0x211), region = 54 }
  0x86   : > { %s2535_s29 = smul.u32 (!%p601_p8), 1152, %s607_s28  ;;  %p658_p9 = scmp.lt.s32.totalorder (!%p601_p8), %s657_s6, 5 }
  0x88   : > { %s3276_s5 = scalar_lea.vmem (!%p601_p8), [#allocation2], %s2535_s29 }
  0x8a   : > { %v877_v0 = vlaneseq  ;;  %v2814_v1 = vmov 1966171168   ;;  %v679_v3 = vld [vmem:[%s3506_s0] sm:$0x3f]  ;;  %v2579_v7 = vld [vmem:[%s3276_s5 + $0xac] ss:$12 sps:$4 sm:$0xff]  }
  0x8b   : > { %v875_v2 = vunpack.c.l.s4 %v2814_v1  ;;  %v873_v6 = vcombine.high %v679_v3, %v679_v3  ;;  %v2581_v8 = vld [vmem:[%s3276_s5 + $0x22c] ss:$12 sps:$4 sm:$0xff]   ;;  %1694 = vmatprep.subr.bf16.mxu0 %v2579_v7  ;;  %v2583_v10 = vld [vmem:[%s3276_s5 + $0xa8] ss:$12 sps:$4 sm:$0xff]   ;;  %v2589_v16 = vld [vmem:[%s3276_s5 + $0x90] ss:$12 sps:$4 sm:$0xff]  }
  0x8c   : > { %v3274_v4 = vshrl.u32 %v877_v0, 7  ;;  %v2584_v11 = vld [vmem:[%s3276_s5 + $0x228] ss:$12 sps:$4 sm:$0xff]   ;;  %1735 = vmatprep.subr.bf16.mxu1 %v2581_v8  ;;  %1695 = vmatpush1.bf16.msra.mxu0 %v2583_v10  ;;  %v2590_v17 = vld [vmem:[%s3276_s5 + $0x210] ss:$12 sps:$4 sm:$0xff]   ;;  %s3517_s6 = smov (!%p658_p9, %s657_s6), 5 }
  0x8d   : > { %v876_v5 = vunpack.c.0.s8 %v875_v2  ;;  %v2585_v12 = vld [vmem:[%s3276_s5 + $0x94] ss:$12 sps:$4 sm:$0xff]   ;;  %1736 = vmatpush1.bf16.msra.mxu1 %v2584_v11  ;;  %v2591_v20 = vld [vmem:[%s3276_s5 + $0x7c] ss:$12 sps:$4 sm:$0xff]   ;;  %v2595_v22 = vld [vmem:[%s3276_s5 + $0x78] ss:$12 sps:$4 sm:$0xff]   ;;  %s660_s14 = scalar_lea.vmem %s3508_s2, %s3517_s6 }
  0x8e   : > { %v2587_v15 = vld [vmem:[%s3276_s5 + $0x214] ss:$12 sps:$4 sm:$0xff]   ;;  %1696 = vmatprep.subr.bf16.mxu0 %v2585_v12  ;;  %v2593_v21 = vld [vmem:[%s3276_s5 + $0x1fc] ss:$12 sps:$4 sm:$0xff]   ;;  %v2596_v23 = vld [vmem:[%s3276_s5 + $0x1f8] ss:$12 sps:$4 sm:$0xff]  }
  0x8f   : > { %v3281_v9 = vsub.s32 %v876_v5, %v3274_v4  ;;  %1737 = vmatprep.subr.bf16.mxu1 %v2587_v15  ;;  %v2597_v25 = vld [vmem:[%s3276_s5 + $0x64] ss:$12 sps:$4 sm:$0xff]   ;;  %v2601_v28 = vld [vmem:[%s3276_s5 + $0x60] ss:$12 sps:$4 sm:$0xff]   ;;  %v2607_v32 = vld [vmem:[%s3276_s5 + $0x48] ss:$12 sps:$4 sm:$0xff]  }
  0x90   : > { %1697 = vmatpush1.bf16.msra.mxu0 %v2589_v16  ;;  %v2599_v26 = vld [vmem:[%s3276_s5 + $0x1e4] ss:$12 sps:$4 sm:$0xff]   ;;  %v2602_v29 = vld [vmem:[%s3276_s5 + $0x1e0] ss:$12 sps:$4 sm:$0xff]   ;;  %v2608_v33 = vld [vmem:[%s3276_s5 + $0x1c8] ss:$12 sps:$4 sm:$0xff]  }
  0x91   : > { %v3287_v13 = vrot.slane %v679_v3, %v3281_v9  ;;  %v3290_v14 = vrot.slane %v873_v6, %v3281_v9  ;;  %1738 = vmatpush1.bf16.msra.mxu1 %v2590_v17  ;;  %1698 = vmatprep.subr.bf16.mxu0 %v2591_v20  ;;  %v2603_v30 = vld [vmem:[%s3276_s5 + $0x4c] ss:$12 sps:$4 sm:$0xff]   ;;  %v2609_v34 = vld [vmem:[%s3276_s5 + $0x34] ss:$12 sps:$4 sm:$0xff]   ;;  %v2613_v36 = vld [vmem:[%s3276_s5 + $0x30] ss:$12 sps:$4 sm:$0xff]  }
  0x92   : > { %1739 = vmatprep.subr.bf16.mxu1 %v2593_v21  ;;  %v2605_v31 = vld [vmem:[%s3276_s5 + $0x1cc] ss:$12 sps:$4 sm:$0xff]   ;;  %v2611_v35 = vld [vmem:[%s3276_s5 + $0x1b4] ss:$12 sps:$4 sm:$0xff]   ;;  %v2614_v37 = vld [vmem:[%s3276_s5 + $0x1b0] ss:$12 sps:$4 sm:$0xff]  }
  0x93   : > { %v888_v18 = vcombine.high %v3287_v13, %v3287_v13  ;;  %v3299_v19 = vrot.slane %v3290_v14, %v3281_v9  ;;  %v2615_v38 = vld [vmem:[%s3276_s5 + $0x1c] ss:$12 sps:$4 sm:$0xff]   ;;  %v2619_v40 = vld [vmem:[%s3276_s5 + $0x18] ss:$12 sps:$4 sm:$0xff]   ;;  %v2625_v44 = vld [vmem:[%s3276_s5] ss:$12 sps:$4 sm:$0xff]   ;;  %v3367_v17 = vrot.slane %v3287_v13, %v3281_v9 }
  0x94   : > { %1699 = vmatpush1.bf16.msra.mxu0 %v2595_v22  ;;  %v2617_v39 = vld [vmem:[%s3276_s5 + $0x19c] ss:$12 sps:$4 sm:$0xff]   ;;  %v2620_v41 = vld [vmem:[%s3276_s5 + $0x198] ss:$12 sps:$4 sm:$0xff]   ;;  %v2626_v45 = vld [vmem:[%s3276_s5 + $0x180] ss:$12 sps:$4 sm:$0xff]   ;;  %v889_v22 = vcombine.high %v3290_v14, %v3290_v14 }
  0x95   : > { %v3306_v24 = vrot.slane %v888_v18, %v3281_v9  ;;  %1740 = vmatpush1.bf16.msra.mxu1 %v2596_v23  ;;  %1700 = vmatprep.subr.bf16.mxu0 %v2597_v25  ;;  %v2621_v42 = vld [vmem:[%s3276_s5 + $0x4] ss:$12 sps:$4 sm:$0xff]   ;;  %v2627_v46 = vld [vmem:[%s3276_s5 + $0x16c] ss:$12 sps:$4 sm:$0xff]   ;;  %v2631_v48 = vld [vmem:[%s3276_s5 + $0x168] ss:$12 sps:$4 sm:$0xff]   ;;  %v3376_v23 = vcombine.high %v3367_v17, %v3367_v17 }
  0x96   : > { %1741 = vmatprep.subr.bf16.mxu1 %v2599_v26  ;;  %v2623_v43 = vld [vmem:[%s3276_s5 + $0x184] ss:$12 sps:$4 sm:$0xff]   ;;  %v2629_v47 = vld [vmem:[%s3276_s5 + $0x2ec] ss:$12 sps:$4 sm:$0xff]   ;;  %v2632_v49 = vld [vmem:[%s3276_s5 + $0x2e8] ss:$12 sps:$4 sm:$0xff]  }
  0x97   : > { %v3312_v27 = vcombine.high %v3306_v24, %v3306_v24  ;;  %1726 = vmatprep.mubr.bf16.mxu0 %v3306_v24  ;;  %v2633_v50 = vld [vmem:[%s3276_s5 + $0x154] ss:$12 sps:$4 sm:$0xff]   ;;  %v2637_v52 = vld [vmem:[%s3276_s5 + $0x150] ss:$12 sps:$4 sm:$0xff]   ;;  %v2643_v56 = vld [vmem:[%s3276_s5 + $0x138] ss:$12 sps:$4 sm:$0xff]  }
  0x98   : > { %1701 = vmatpush1.bf16.msra.mxu0 %v2601_v28  ;;  %v2635_v51 = vld [vmem:[%s3276_s5 + $0x2d4] ss:$12 sps:$4 sm:$0xff]   ;;  %v2638_v53 = vld [vmem:[%s3276_s5 + $0x2d0] ss:$12 sps:$4 sm:$0xff]   ;;  %v2644_v57 = vld [vmem:[%s3276_s5 + $0x2b8] ss:$12 sps:$4 sm:$0xff]  }
  0x99   : > { %1767 = vmatprep.mubr.bf16.mxu1 %v3312_v27  ;;  %1742 = vmatpush1.bf16.msra.mxu1 %v2602_v29  ;;  %v2639_v54 = vld [vmem:[%s3276_s5 + $0x13c] ss:$12 sps:$4 sm:$0xff]   ;;  %v2645_v58 = vld [vmem:[%s3276_s5 + $0x124] ss:$12 sps:$4 sm:$0xff]   ;;  %v2649_v60 = vld [vmem:[%s3276_s5 + $0x120] ss:$12 sps:$4 sm:$0xff]  }
  0x9a   : > { %1702 = vmatprep.subr.bf16.mxu0 %v2603_v30  ;;  %1743 = vmatprep.subr.bf16.mxu1 %v2605_v31  ;;  %v2641_v55 = vld [vmem:[%s3276_s5 + $0x2bc] ss:$12 sps:$4 sm:$0xff]   ;;  %v2647_v59 = vld [vmem:[%s3276_s5 + $0x2a4] ss:$12 sps:$4 sm:$0xff]   ;;  %v2650_v61 = vld [vmem:[%s3276_s5 + $0x2a0] ss:$12 sps:$4 sm:$0xff]   ;;  %v3384_v30 = vrot.slane %v889_v22, %v3281_v9 }
  0x9b   : > { %v2651_v62 = vld [vmem:[%s3276_s5 + $0x10c] ss:$12 sps:$4 sm:$0xff]   ;;  %v2655_v0 = vld [vmem:[%s3276_s5 + $0x108] ss:$12 sps:$4 sm:$0xff]   ;;  %v2661_v5 = vld [vmem:[%s3276_s5 + $0xf0] ss:$12 sps:$4 sm:$0xff]  }
  0x9c   : > { %1703 = vmatpush1.bf16.msra.mxu0 %v2607_v32  ;;  %v2653_v63 = vld [vmem:[%s3276_s5 + $0x28c] ss:$12 sps:$4 sm:$0xff]   ;;  %v2656_v1 = vld [vmem:[%s3276_s5 + $0x288] ss:$12 sps:$4 sm:$0xff]   ;;  %v2662_v6 = vld [vmem:[%s3276_s5 + $0x270] ss:$12 sps:$4 sm:$0xff]  }
  0x9d   : > { %1744 = vmatpush1.bf16.msra.mxu1 %v2608_v33  ;;  %1704 = vmatprep.subr.bf16.mxu0 %v2609_v34  ;;  %v2657_v2 = vld [vmem:[%s3276_s5 + $0xf4] ss:$12 sps:$4 sm:$0xff]   ;;  %v2663_v7 = vld [vmem:[%s3276_s5 + $0xdc] ss:$12 sps:$4 sm:$0xff]   ;;  %v2667_v10 = vld [vmem:[%s3276_s5 + $0xd8] ss:$12 sps:$4 sm:$0xff]  }
  0x9e   : > { %1745 = vmatprep.subr.bf16.mxu1 %v2611_v35  ;;  %v2659_v3 = vld [vmem:[%s3276_s5 + $0x274] ss:$12 sps:$4 sm:$0xff]   ;;  %v2665_v8 = vld [vmem:[%s3276_s5 + $0x25c] ss:$12 sps:$4 sm:$0xff]   ;;  %v2668_v11 = vld [vmem:[%s3276_s5 + $0x258] ss:$12 sps:$4 sm:$0xff]  }
  0x9f   : > { %v2669_v12 = vld [vmem:[%s3276_s5 + $0xc4] ss:$12 sps:$4 sm:$0xff]   ;;  %v2673_v16 = vld [vmem:[%s3276_s5 + $0xc0] ss:$12 sps:$4 sm:$0xff]   ;;  %v2675_v13 = vld [vmem:[%s3276_s5 + $0x3a8] ss:$12 sps:$4 sm:$0xff]  }
  0xa0   : > { %1705 = vmatpush1.bf16.msra.mxu0 %v2613_v36  ;;  %v2671_v15 = vld [vmem:[%s3276_s5 + $0x244] ss:$12 sps:$4 sm:$0xff]   ;;  %v2674_v18 = vld [vmem:[%s3276_s5 + $0x240] ss:$12 sps:$4 sm:$0xff]   ;;  %v2687_v31 = vld [vmem:[%s3276_s5 + $0x37c] ss:$12 sps:$4 sm:$0xff]  }
  0xa1   : > { %1746 = vmatpush1.bf16.msra.mxu1 %v2614_v37  ;;  %1706 = vmatprep.subr.bf16.mxu0 %v2615_v38  ;;  %v2677_v20 = vld [vmem:[%s3276_s5 + $0x3ac] ss:$12 sps:$4 sm:$0xff]   ;;  %v2678_v21 = vld [vmem:[%s3276_s5 + $0x170] ss:$12 sps:$4 sm:$0xff]   ;;  %v2682_v26 = vld [vmem:[%s3276_s5 + $0x394] ss:$12 sps:$4 sm:$0xff]  }
  0xa2   : > { %1747 = vmatprep.subr.bf16.mxu1 %v2617_v39  ;;  %v2679_v25 = vld [vmem:[%s3276_s5 + $0xb0] ss:$12 sps:$4 sm:$0xff]   ;;  %v2683_v28 = vld [vmem:[%s3276_s5 + $0x158] ss:$12 sps:$4 sm:$0xff]   ;;  %v2688_v32 = vld [vmem:[%s3276_s5 + $0x140] ss:$12 sps:$4 sm:$0xff]  }
  0xa3   : > { %v2680_v29 = vld [vmem:[%s3276_s5 + $0x390] ss:$12 sps:$4 sm:$0xff]   ;;  %v2684_v14 = vld [vmem:[%s3276_s5 + $0x98] ss:$12 sps:$4 sm:$0xff]   ;;  %v2689_v33 = vld [vmem:[%s3276_s5 + $0x80] ss:$12 sps:$4 sm:$0xff]  }
  0xa4   : > { %1707 = vmatpush1.bf16.msra.mxu0 %v2619_v40  ;;  %v2685_v9 = vld [vmem:[%s3276_s5 + $0x378] ss:$12 sps:$4 sm:$0xff]   ;;  %v2693_v35 = vld [vmem:[%s3276_s5 + $0x128] ss:$12 sps:$4 sm:$0xff]   ;;  %v2690_v36 = vld [vmem:[%s3276_s5 + $0x360] ss:$12 sps:$4 sm:$0xff]  }
  0xa5   : > { %1748 = vmatpush1.bf16.msra.mxu1 %v2620_v41  ;;  %1708 = vmatprep.subr.bf16.mxu0 %v2621_v42  ;;  %v2692_v34 = vld [vmem:[%s3276_s5 + $0x364] ss:$12 sps:$4 sm:$0xff]   ;;  %v2694_v37 = vld [vmem:[%s3276_s5 + $0x68] ss:$12 sps:$4 sm:$0xff]   ;;  %s2320_s7 = sshll.u32 %s3517_s6, 1 }
  0xa6   : > { %1749 = vmatprep.subr.bf16.mxu1 %v2623_v43  ;;  %v2698_v38 = vld [vmem:[%s3276_s5 + $0x110] ss:$12 sps:$4 sm:$0xff]   ;;  %v2695_v39 = vld [vmem:[%s3276_s5 + $0x348] ss:$12 sps:$4 sm:$0xff]   ;;  %v2703_v42 = vld [vmem:[%s3276_s5 + $0xf8] ss:$12 sps:$4 sm:$0xff]   ;;  %s3476_s10 = scalar_lea.vmem %s3509_s3, %s2320_s7 }
  0xa7   : > { %v2699_v40 = vld [vmem:[%s3276_s5 + $0x50] ss:$12 sps:$4 sm:$0xff]   ;;  %v2702_v41 = vld [vmem:[%s3276_s5 + $0x334] ss:$12 sps:$4 sm:$0xff]  }
  0xa8   : > { %1709 = vmatpush1.bf16.msra.mxu0 %v2625_v44  ;;  %v2700_v43 = vld [vmem:[%s3276_s5 + $0x330] ss:$12 sps:$4 sm:$0xff]   ;;  %v2704_v44 = vld [vmem:[%s3276_s5 + $0x38] ss:$12 sps:$4 sm:$0xff]   ;;  %v2753_v22 = vld [vmem:[%s3276_s5 + $0x248] ss:$12 sps:$4 sm:$0xff]  }
  0xa9   : > { %1750 = vmatpush1.bf16.msra.mxu1 %v2626_v45  ;;  %1710 = vmatprep.subr.bf16.mxu0 %v2627_v46  ;;  %v2707_v45 = vld [vmem:[%s3276_s5 + $0x31c] ss:$12 sps:$4 sm:$0xff]   ;;  %v2708_v46 = vld [vmem:[%s3276_s5 + $0xe0] ss:$12 sps:$4 sm:$0xff]  }
  0xaa   : > { %1751 = vmatprep.subr.bf16.mxu1 %v2629_v47  ;;  %v2705_v47 = vld [vmem:[%s3276_s5 + $0x318] ss:$12 sps:$4 sm:$0xff]  }
  0xac   : > { %1711 = vmatpush2.bf16.msra.mxu0 %v2631_v48  ;;  %v2709_v48 = vld [vmem:[%s3276_s5 + $0x20] ss:$12 sps:$4 sm:$0xff]  }
  0xad   : > { %1752 = vmatpush2.bf16.msra.mxu1 %v2632_v49  ;;  %1712 = vmatprep.subr.bf16.mxu0 %v2633_v50  ;;  %v2712_v49 = vld [vmem:[%s3276_s5 + $0x304] ss:$12 sps:$4 sm:$0xff]   ;;  %v2713_v50 = vld [vmem:[%s3276_s5 + $0xc8] ss:$12 sps:$4 sm:$0xff]  }
  0xae   : > { %1753 = vmatprep.subr.bf16.mxu1 %v2635_v51  ;;  %v2710_v51 = vld [vmem:[%s3276_s5 + $0x300] ss:$12 sps:$4 sm:$0xff]  }
  0xb0   : > { %1713 = vmatpush2.bf16.msra.mxu0 %v2637_v52  ;;  %v2714_v52 = vld [vmem:[%s3276_s5 + $0x8] ss:$12 sps:$4 sm:$0xff]  }
  0xb1   : > { %1754 = vmatpush2.bf16.msra.mxu1 %v2638_v53  ;;  %1714 = vmatprep.subr.bf16.mxu0 %v2639_v54  ;;  %v2717_v53 = vld [vmem:[%s3276_s5 + $0x46c] ss:$12 sps:$4 sm:$0xff]   ;;  %v2718_v54 = vld [vmem:[%s3276_s5 + $0x2f0] ss:$12 sps:$4 sm:$0xff]  }
  0xb2   : > { %1755 = vmatprep.subr.bf16.mxu1 %v2641_v55  ;;  %v2715_v55 = vld [vmem:[%s3276_s5 + $0x468] ss:$12 sps:$4 sm:$0xff]  }
  0xb4   : > { %1715 = vmatpush2.bf16.msra.mxu0 %v2643_v56  ;;  %v2719_v56 = vld [vmem:[%s3276_s5 + $0x230] ss:$12 sps:$4 sm:$0xff]  }
  0xb5   : > { %1756 = vmatpush2.bf16.msra.mxu1 %v2644_v57  ;;  %1716 = vmatprep.subr.bf16.mxu0 %v2645_v58  ;;  %v2722_v57 = vld [vmem:[%s3276_s5 + $0x454] ss:$12 sps:$4 sm:$0xff]   ;;  %v2723_v58 = vld [vmem:[%s3276_s5 + $0x2d8] ss:$12 sps:$4 sm:$0xff]  }
  0xb6   : > { %1757 = vmatprep.subr.bf16.mxu1 %v2647_v59  ;;  %v2720_v59 = vld [vmem:[%s3276_s5 + $0x450] ss:$12 sps:$4 sm:$0xff]  }
  0xb8   : > { %1717 = vmatpush2.bf16.msra.mxu0 %v2649_v60  ;;  %v2724_v60 = vld [vmem:[%s3276_s5 + $0x218] ss:$12 sps:$4 sm:$0xff]  }
  0xb9   : > { %1758 = vmatpush2.bf16.msra.mxu1 %v2650_v61  ;;  %1718 = vmatprep.subr.bf16.mxu0 %v2651_v62  ;;  %v2727_v61 = vld [vmem:[%s3276_s5 + $0x43c] ss:$12 sps:$4 sm:$0xff]   ;;  %v2728_v62 = vld [vmem:[%s3276_s5 + $0x2c0] ss:$12 sps:$4 sm:$0xff]  }
  0xba   : > { %1759 = vmatprep.subr.bf16.mxu1 %v2653_v63  ;;  %v2725_v63 = vld [vmem:[%s3276_s5 + $0x438] ss:$12 sps:$4 sm:$0xff]  }
  0xbc   : > { %1719 = vmatpush2.bf16.msra.mxu0 %v2655_v0  ;;  %v2729_v0 = vld [vmem:[%s3276_s5 + $0x200] ss:$12 sps:$4 sm:$0xff]  }
  0xbd   : > { %1760 = vmatpush2.bf16.msra.mxu1 %v2656_v1  ;;  %1720 = vmatprep.subr.bf16.mxu0 %v2657_v2  ;;  %v2732_v1 = vld [vmem:[%s3276_s5 + $0x424] ss:$12 sps:$4 sm:$0xff]   ;;  %v2733_v2 = vld [vmem:[%s3276_s5 + $0x2a8] ss:$12 sps:$4 sm:$0xff]  }
  0xbe   : > { %1761 = vmatprep.subr.bf16.mxu1 %v2659_v3  ;;  %v2730_v3 = vld [vmem:[%s3276_s5 + $0x420] ss:$12 sps:$4 sm:$0xff]  }
  0xc0   : > { %1721 = vmatpush2.bf16.msra.mxu0 %v2661_v5  ;;  %v2734_v5 = vld [vmem:[%s3276_s5 + $0x1e8] ss:$12 sps:$4 sm:$0xff]  }
  0xc1   : > { %1762 = vmatpush2.bf16.msra.mxu1 %v2662_v6  ;;  %1722 = vmatprep.subr.bf16.mxu0 %v2663_v7  ;;  %v2737_v6 = vld [vmem:[%s3276_s5 + $0x40c] ss:$12 sps:$4 sm:$0xff]   ;;  %v2735_v7 = vld [vmem:[%s3276_s5 + $0x408] ss:$12 sps:$4 sm:$0xff]  }
  0xc2   : > { %1763 = vmatprep.subr.bf16.mxu1 %v2665_v8  ;;  %v2739_v8 = vld [vmem:[%s3276_s5 + $0x1d0] ss:$12 sps:$4 sm:$0xff]  }
  0xc4   : > { %1723 = vmatpush2.bf16.msra.mxu0 %v2667_v10  ;;  %v2742_v10 = vld [vmem:[%s3276_s5 + $0x3f4] ss:$12 sps:$4 sm:$0xff]  }
  0xc5   : > { %1764 = vmatpush2.bf16.msra.mxu1 %v2668_v11  ;;  %1724 = vmatprep.subr.bf16.mxu0 %v2669_v12  ;;  %v2743_v11 = vld [vmem:[%s3276_s5 + $0x278] ss:$12 sps:$4 sm:$0xff]   ;;  %v2740_v12 = vld [vmem:[%s3276_s5 + $0x3f0] ss:$12 sps:$4 sm:$0xff]  }
  0xc6   : > { %1765 = vmatprep.subr.bf16.mxu1 %v2671_v15  ;;  %v2744_v15 = vld [vmem:[%s3276_s5 + $0x1b8] ss:$12 sps:$4 sm:$0xff]  }
  0xc8   : > { %1725 = vmatpush2.bf16.msra.mxu0 %v2673_v16  ;;  %v2747_v16 = vld [vmem:[%s3276_s5 + $0x3dc] ss:$12 sps:$4 sm:$0xff]  }
  0xc9   : > { %1766 = vmatpush2.bf16.msra.mxu1 %v2674_v18  ;;  %1776 = vmatprep.subr.bf16.mxu0 %v2677_v20  ;;  %v2745_v18 = vld [vmem:[%s3276_s5 + $0x3d8] ss:$12 sps:$4 sm:$0xff]   ;;  %v2749_v20 = vld [vmem:[%s3276_s5 + $0x1a0] ss:$12 sps:$4 sm:$0xff]  }
  0xca   : > { %2468 = vmatprep.subr.bf16.mxu1 %v2678_v21  ;;  %v2752_v21 = vld [vmem:[%s3276_s5 + $0x3c4] ss:$12 sps:$4 sm:$0xff]  }
  0xcb   : > { %1727 = vmatmul.mubr.bf16.vlgmr.msra.gmra.mxu0 %v3367_v17 }
  0xcc   : > { %1768 = vmatmul.mubr.bf16.vlgmr.msra.gmra.mxu1 %v3376_v23  ;;  %1777 = vmatpush1.bf16.msra.mxu0 %v2675_v13  ;;  %v2750_v13 = vld [vmem:[%s3276_s5 + $0x3c0] ss:$12 sps:$4 sm:$0xff]  }
  0xcd   : > { %2469 = vmatpush3.bf16.msra.mxu1 %v2679_v25  ;;  %1778 = vmatprep.subr.bf16.mxu0 %v2682_v26  ;;  %v2754_v25 = vld [vmem:[%s3276_s5 + $0x188] ss:$12 sps:$4 sm:$0xff]   ;;  %v2756_v26 = vld [vmem:[%s3276_s5 + $0x470] ss:$12 sps:$4 sm:$0xff]  }
  0xce   : > { %2470 = vmatprep.subr.bf16.mxu1 %v2683_v28  ;;  %1849 = vmatprep.mubr.bf16.mxu1 %v3306_v24  ;;  %v2697_v24 = vld [vmem:[%s3276_s5 + $0x34c] ss:$12 sps:$4 sm:$0xff]   ;;  %v2757_v28 = vld [vmem:[%s3276_s5 + $0x3b0] ss:$12 sps:$4 sm:$0xff]  }
  0xcf   : > { %1808 = vmatprep.mubr.bf16.mxu0 %v3384_v30 }
  0xd0   : > { %1779 = vmatpush1.bf16.msra.mxu0 %v2680_v29  ;;  %v2758_v29 = vld [vmem:[%s3276_s5 + $0x458] ss:$12 sps:$4 sm:$0xff]  }
  0xd1   : > { %2471 = vmatpush3.bf16.msra.mxu1 %v2684_v14  ;;  %1780 = vmatprep.subr.bf16.mxu0 %v2687_v31  ;;  %v2759_v14 = vld [vmem:[%s3276_s5 + $0x398] ss:$12 sps:$4 sm:$0xff]   ;;  %v2760_v31 = vld [vmem:[%s3276_s5 + $0x440] ss:$12 sps:$4 sm:$0xff]  }
  0xd2   : > { %2472 = vmatprep.subr.bf16.mxu1 %v2688_v32  ;;  %v2761_v32 = vld [vmem:[%s3276_s5 + $0x380] ss:$12 sps:$4 sm:$0xff]  }
  0xd4   : > { %1781 = vmatpush1.bf16.msra.mxu0 %v2685_v9  ;;  %v2762_v9 = vld [vmem:[%s3276_s5 + $0x428] ss:$12 sps:$4 sm:$0xff]  }
  0xd5   : > { %2473 = vmatpush3.bf16.msra.mxu1 %v2689_v33  ;;  %1782 = vmatprep.subr.bf16.mxu0 %v2692_v34  ;;  %v2763_v33 = vld [vmem:[%s3276_s5 + $0x368] ss:$12 sps:$4 sm:$0xff]   ;;  %v2765_v34 = vld [vmem:[%s3276_s5 + $0x350] ss:$12 sps:$4 sm:$0xff]  }
  0xd6   : > { %2474 = vmatprep.subr.bf16.mxu1 %v2693_v35  ;;  %v2767_v35 = vld [vmem:[%s3276_s5 + $0x338] ss:$12 sps:$4 sm:$0xff]  }
  0xd8   : > { %1783 = vmatpush1.bf16.msra.mxu0 %v2690_v36  ;;  %v2768_v36 = vld [vmem:[%s3276_s5 + $0x3e0] ss:$12 sps:$4 sm:$0xff]  }
  0xd9   : > { %2475 = vmatpush3.bf16.msra.mxu1 %v2694_v37  ;;  %1784 = vmatprep.subr.bf16.mxu0 %v2697_v24  ;;  %v2769_v37 = vld [vmem:[%s3276_s5 + $0x320] ss:$12 sps:$4 sm:$0xff]   ;;  %v2770_v24 = vld [vmem:[%s3276_s5 + $0x3c8] ss:$12 sps:$4 sm:$0xff]  }
  0xda   : > { %2476 = vmatprep.subr.bf16.mxu1 %v2698_v38  ;;  %v2771_v38 = vld [vmem:[%s3276_s5 + $0x308] ss:$12 sps:$4 sm:$0xff]  }
  0xdc   : > { %1785 = vmatpush1.bf16.msra.mxu0 %v2695_v39  ;;  %v2815_v39 = vmov 0.0  }
  0xdd   : > { %2477 = vmatpush3.bf16.msra.mxu1 %v2699_v40  ;;  %1786 = vmatprep.subr.bf16.mxu0 %v2702_v41  ;;  %677 = vst [vmem:[%s3476_s10] sm:$0x3f] %v2815_v39 }
  0xde   : > { %2478 = vmatprep.subr.bf16.mxu1 %v2703_v42 }
  0xe0   : > { %1787 = vmatpush1.bf16.msra.mxu0 %v2700_v43 }
  0xe1   : > { %2479 = vmatpush3.bf16.msra.mxu1 %v2704_v44  ;;  %1788 = vmatprep.subr.bf16.mxu0 %v2707_v45 }
  0xe2   : > { %2480 = vmatprep.subr.bf16.mxu1 %v2708_v46 }
  0xe4   : > { %1789 = vmatpush1.bf16.msra.mxu0 %v2705_v47 }
  0xe5   : > { %2481 = vmatpush3.bf16.msra.mxu1 %v2709_v48  ;;  %1790 = vmatprep.subr.bf16.mxu0 %v2712_v49 }
  0xe6   : > { %2482 = vmatprep.subr.bf16.mxu1 %v2713_v50 }
  0xe8   : > { %1791 = vmatpush1.bf16.msra.mxu0 %v2710_v51 }
  0xe9   : > { %2483 = vmatpush3.bf16.msra.mxu1 %v2714_v52  ;;  %1792 = vmatprep.subr.bf16.mxu0 %v2717_v53 }
  0xea   : > { %2490 = vmatprep.subr.bf16.mxu1 %v2718_v54 }
  0xec   : > { %1850 = vmatmul.mubr.bf16.vlgmr.msra.gmra.mxu1 %v3367_v17  ;;  %1793 = vmatpush2.bf16.msra.mxu0 %v2715_v55  ;;  %v2748_v17 = vld [vmem:[%s3276_s5 + $0x260] ss:$12 sps:$4 sm:$0xff]  }
  0xed   : > { %2491 = vmatpush3.bf16.msra.mxu1 %v2719_v56  ;;  %1794 = vmatprep.subr.bf16.mxu0 %v2722_v57 }
  0xee   : > { %2492 = vmatprep.subr.bf16.mxu1 %v2723_v58  ;;  %1889 = vmatprep.mubr.bf16.mxu1 %v3312_v27  ;;  %v2738_v27 = vld [vmem:[%s3276_s5 + $0x290] ss:$12 sps:$4 sm:$0xff]  }
  0xf0   : > { %1795 = vmatpush2.bf16.msra.mxu0 %v2720_v59 }
  0xf1   : > { %2493 = vmatpush3.bf16.msra.mxu1 %v2724_v60  ;;  %1796 = vmatprep.subr.bf16.mxu0 %v2727_v61 }
  0xf2   : > { %2494 = vmatprep.subr.bf16.mxu1 %v2728_v62 }
  0xf4   : > { %1797 = vmatpush2.bf16.msra.mxu0 %v2725_v63 }
  0xf5   : > { %2495 = vmatpush3.bf16.msra.mxu1 %v2729_v0  ;;  %1798 = vmatprep.subr.bf16.mxu0 %v2732_v1  ;;  %v2816_v0 = vmov 1983009808  }
  0xf6   : > { %2496 = vmatprep.subr.bf16.mxu1 %v2733_v2  ;;  %v1942_v1 = vunpack.c.l.s4 %v2816_v0 }
  0xf8   : > { %1799 = vmatpush2.bf16.msra.mxu0 %v2730_v3  ;;  %v1943_v2 = vunpack.c.0.s8 %v1942_v1 }
  0xf9   : > { %2497 = vmatpush3.bf16.msra.mxu1 %v2734_v5  ;;  %1800 = vmatprep.subr.bf16.mxu0 %v2737_v6 }
  0xfa   : > { %2498 = vmatprep.subr.bf16.mxu1 %v2738_v27  ;;  %v1967_v27 = vsub.s32 0, %v3274_v4 }
  0xfc   : > { %1801 = vmatpush2.bf16.msra.mxu0 %v2735_v7  ;;  %v1971_v7 = vsub.s32 1, %v3274_v4 }
  0xfd   : > { %2499 = vmatpush3.bf16.msra.mxu1 %v2739_v8  ;;  %1802 = vmatprep.subr.bf16.mxu0 %v2742_v10  ;;  %v1963_v10 = vld [vmem:[%s660_s14] sm:$0x7] }
  0xfe   : > { %2500 = vmatprep.subr.bf16.mxu1 %v2743_v11  ;;  %v1946_v11 = vsub.s32 %v1943_v2, %v3274_v4 }
 0x100   : > { %1803 = vmatpush2.bf16.msra.mxu0 %v2740_v12 }
 0x101   : > { %2501 = vmatpush3.bf16.msra.mxu1 %v2744_v15  ;;  %1804 = vmatprep.subr.bf16.mxu0 %v2747_v16 }
 0x102   : > { %2502 = vmatprep.subr.bf16.mxu1 %v2748_v17 }
 0x104   : > { %1805 = vmatpush2.bf16.msra.mxu0 %v2745_v18  ;;  %v1968_v18 = vrot.slane %v1963_v10, %v1967_v27 }
 0x105   : > { %2503 = vmatpush3.bf16.msra.mxu1 %v2749_v20  ;;  %1806 = vmatprep.subr.bf16.mxu0 %v2752_v21  ;;  %v1972_v20 = vrot.slane %v1963_v10, %v1971_v7  ;;  %v1975_v21 = vsub.s32 2, %v3274_v4 }
 0x106   : > { %2504 = vmatprep.subr.bf16.mxu1 %v2753_v22 }
 0x108   : > { %1807 = vmatpush2.bf16.msra.mxu0 %v2750_v13 }
 0x109   : > { %2505 = vmatpush3.bf16.msra.mxu1 %v2754_v25  ;;  %2512 = vmatprep.subr.bf16.mxu0 %v2756_v26  ;;  %v678_v26 = vld [vmem:[%s3476_s10] sm:$0x3f] }
 0x10b   : > { %1809 = vmatmul.mubr.bf16.vlgmr.msra.gmra.mxu0 %v3299_v19 }
 0x10c   : > { %1890 = vmatmul.mubr.bf16.vlgmr.msra.gmra.mxu1 %v3376_v23  ;;  %2513 = vmatpush3.bf16.msra.mxu0 %v2757_v28  ;;  %v2764_v23 = vld [vmem:[%s3276_s5 + $0x410] ss:$12 sps:$4 sm:$0xff]  }
 0x10d   : > { %1929 = vmatprep.mubr.bf16.mxu0 %v3384_v30  ;;  %2514 = vmatprep.subr.bf16.mxu0 %v2758_v29  ;;  %v2766_v30 = vld [vmem:[%s3276_s5 + $0x3f8] ss:$12 sps:$4 sm:$0xff]   ;;  %v1976_v29 = vrot.slane %v1963_v10, %v1975_v21 }
 0x110   : > { %2515 = vmatpush3.bf16.msra.mxu0 %v2759_v14  ;;  %v1977_v14 = vcombine.low %v1968_v18, %v1972_v20 }
 0x111   : > { %2516 = vmatprep.subr.bf16.mxu0 %v2760_v31 }
 0x114   : > { %2517 = vmatpush3.bf16.msra.mxu0 %v2761_v32  ;;  %v1984_v32 = vrot.slane %v1977_v14, %v1946_v11 }
 0x115   : > { %2518 = vmatprep.subr.bf16.mxu0 %v2762_v9  ;;  %v1991_v9 = vrot.slane %v1976_v29, %v1946_v11 }
 0x118   : > { %2519 = vmatpush3.bf16.msra.mxu0 %v2763_v33  ;;  %v1992_v33 = vcombine.low %v1984_v32, %v1991_v9 }
 0x119   : > { %2520 = vmatprep.subr.bf16.mxu0 %v2764_v23 }
 0x11c   : > { %2521 = vmatpush3.bf16.msra.mxu0 %v2765_v34 }
 0x11d   : > { %2522 = vmatprep.subr.bf16.mxu0 %v2766_v30 }
 0x120   : > { %2523 = vmatpush3.bf16.msra.mxu0 %v2767_v35 }
 0x121   : > { %2524 = vmatprep.subr.bf16.mxu0 %v2768_v36 }
 0x124   : > { %2525 = vmatpush3.bf16.msra.mxu0 %v2769_v37 }
 0x125   : > { %2526 = vmatprep.subr.bf16.mxu0 %v2770_v24 }
 0x128   : > { %2527 = vmatpush3.bf16.msra.mxu0 %v2771_v38 }
 0x12b   : > { %1930 = vmatmul.mubr.bf16.vlgmr.msra.gmra.mxu0 %v3299_v19 }
 0x18b   : > { %v1728_v40 = vpop.f32.mrf.mxu0 }
 0x18c   : > { %v1769_v41 = vpop.f32.mrf.mxu1 }
 0x18d   : > { %v1770_v42 = vadd.f32 %v1769_v41, %v1728_v40  ;;  %v1730_v43 = vpop.f32.mrf.mxu0 }
 0x18e   : > { %v1771_v44 = vpop.f32.mrf.mxu1 }
 0x18f   : > { %v1772_v19 = vadd.f32 %v1771_v44, %v1730_v43  ;;  %v1732_v45 = vpop.f32.mrf.mxu0 }
 0x190   : > { %v1773_v46 = vpop.f32.mrf.mxu1 }
 0x191   : > { %v1733_v47 = vpop.f32.mrf.mxu0 }
 0x192   : > { %v1774_v48 = vpop.f32.mrf.mxu1 }
 0x1ac   : > { %v2484_v49 = vpop.f32.mrf.mxu1 }
 0x1ae   : > { %v2485_v50 = vpop.f32.mrf.mxu1 }
 0x1af   : > { %v2486_v6 = vadd.f32 %v2485_v50, %v2484_v49 }
 0x1b0   : > { %v2487_v51 = vpop.f32.mrf.mxu1 }
 0x1b2   : > { %v2488_v52 = vpop.f32.mrf.mxu1 }
 0x1cb   : > { %v1810_v53 = vpop.f32.mrf.mxu0 }
 0x1cc   : > { %v2506_v54 = vpop.f32.mrf.mxu1  ;;  %v1811_v57 = vadd.f32 %v1810_v53, %v1770_v42 }
 0x1cd   : > { %v1812_v55 = vpop.f32.mrf.mxu0 }
 0x1ce   : > { %v2507_v56 = vpop.f32.mrf.mxu1  ;;  %v1813_v58 = vadd.f32 %v1812_v55, %v1772_v19 }
 0x1cf   : > { %v1814_v59 = vpop.f32.mrf.mxu0  ;;  %v2508_v3 = vadd.f32 %v2507_v56, %v2506_v54 }
 0x1d0   : > { %v2509_v60 = vpop.f32.mrf.mxu1  ;;  %v1940_v61 = vcombine.low %v1811_v57, %v1813_v58 }
 0x1d1   : > { %v1815_v62 = vpop.f32.mrf.mxu0  ;;  %v1892_v12 = vadd.f32 %v2508_v3, %v2486_v6 }
 0x1d2   : > { %v2510_v63 = vpop.f32.mrf.mxu1  ;;  %v1947_v13 = vrot.slane %v1940_v61, %v1946_v11 }
 0x1eb   : > { %v2528_v5 = vpop.f32.mrf.mxu0 }
 0x1ed   : > { %v2529_v8 = vpop.f32.mrf.mxu0 }
 0x1ee   : > { %v2530_v15 = vadd.f32 %v2529_v8, %v2528_v5 }
 0x1ef   : > { %v2531_v16 = vpop.f32.mrf.mxu0 }
 0x1f0   : > { %v1932_v17 = vadd.f32 %v2530_v15, %v1892_v12 }
 0x1f1   : > { %v2532_v22 = vpop.f32.mrf.mxu0 }
 0x1f2   : > { %v1954_v25 = vrot.slane %v1932_v17, %v1946_v11 }
 0x1f4   : > { %v1955_v28 = vcombine.low %v1947_v13, %v1954_v25 }
 0x1f6   : > { %v1957_v31 = vadd.f32 %v1955_v28, %v678_v26 }
 0x1f8   : > { %1958 = vst [vmem:[%s3476_s10] sm:$0x3f] %v1957_v31 }
 0x1ff   : > { %v1962_v23 = vld [vmem:[%s3476_s10] sm:$0x3f] }
 0x200   : > { %v1994_v34 = vadd.f32 %v1992_v33, %v1962_v23 }
 0x202   : > { %2772 = vtanh.f32 %v1994_v34 }
 0x20f   : > { %v2773_v30 = vpop.eup %2772 }
 0x210   : > { %1996 = vst [vmem:[%s3476_s10] sm:$0x3f] %v2773_v30 }
 0x211 PF: > { %s13_s16 = sadd.s32 1, %s2812_s16   ;;  %s3510_s12 = smov %s2800_s13 }
 0x212   : > { %p10_p10 = scmp.ge.s32.totalorder %s13_s16, 4   ;;  %s3511_s13 = smov %s2872_s20 }
 0x213   : > { %s3512_s14 = smov %s2808_s15  ;;  %s3513_s15 = smov %s3515_s17 }
 0x214   :  { %12 = sbr.rel (!%p10_p10) target bundleno = 3 (0x3), region = 113 }

</bundles_post_ra>
